<compile_context>
chip_gen: v5e
topology: v5e:2x2
jax: 0.10.0
libtpu: 0.0.40
codegen_flags: <defaults>
</compile_context>

<pallas_src>
import functools

import jax
import jax.numpy as jnp
from jax.experimental import pallas as pl
from jax.experimental.pallas import tpu as pltpu


def _round_up(v, m):
    return ((v + m - 1) // m) * m


def _pick_tile_h(H):
    # Whole image as one tile for small H, else the largest nice divisor.
    if H <= 64:
        return H
    for th in (64, 32, 16, 8):
        if H % th == 0:
            return th
    return 32  # last resort: rows padded up to a multiple of 32


# ---------------------------------------------------------------------------
# Fused kernel: one (batch, row-tile) grid step computes
#   y  = SiLU(x @ w1 + b1)   on (TH+4) halo rows  (MXU or VPU, BN folded)
#   y2 = SiLU(dw5x5(y) + b2) via 25 ref-sliced taps, strip-tiled rows (VPU)
#   out[:, 0] = y_center, out[:, 1] = y2   (two plain stores, no concat)
# ---------------------------------------------------------------------------
def _ghost_fused_kernel(xp_ref, w1_ref, b1_ref, w2_ref, b2_ref, o_ref, y_ref,
                        *, TH, SR, H, W, Hpad, C_, tap_dtype):
    t = pl.program_id(1)
    HB = TH + 4                              # rows incl. 2-row halo each side
    Wp = y_ref.shape[1]                      # scratch width (>= W + 4)
    C1 = xp_ref.shape[3]

    h0 = t * TH                              # top halo row in padded coords
    if TH % 8 == 0:
        h0 = pl.multiple_of(h0, 8)

    # ---- cv1: 1x1 conv (BN scale folded into w1) + bias + SiLU --------------
    x_halo = xp_ref[0, pl.ds(h0, HB), :, :]                    # (HB, W, C1) bf16
    if C1 >= 32:
        # MXU path: (HB*W, C1) @ (C1, C_) in bf16, f32 accumulate.
        z = jnp.dot(x_halo.reshape(HB * W, C1), w1_ref[...],
                    preferred_element_type=jnp.float32).reshape(HB, W, C_)
    else:
        # Tiny contraction: C1 broadcast MACs on the VPU (MXU would idle).
        w1 = w1_ref[...].astype(jnp.float32)                   # (C1, C_)
        z = jnp.zeros((HB, W, C_), jnp.float32)
        for c in range(C1):
            z = z + x_halo[:, :, c:c + 1].astype(jnp.float32) * w1[c]
    z = z + b1_ref[...].reshape(1, 1, C_)
    y = z * pl.reciprocal(1.0 + jnp.exp(-z), approx=True)      # SiLU, f32

    # ---- stage y (zero-padded by 2 columns) into the VMEM scratch -----------
    zero_col = jnp.zeros((HB, 2, C_), tap_dtype)
    y_ref[:, 0:2, :] = zero_col                    # left pad columns
    y_ref[:, W + 2:W + 4, :] = zero_col            # right pad columns
    y_ref[:, 2:W + 2, :] = y.astype(tap_dtype)     # valid columns

    # Zero the few halo rows that fall outside the real image (== zero-pad of
    # y), only on the tiles that actually touch the boundary.
    @pl.when(t == 0)
    def _():
        y_ref[0:2, :, :] = jnp.zeros((2, Wp, C_), tap_dtype)

    nbot_last = Hpad - H + 2                       # invalid bottom rows, last tile
    @pl.when(t == pl.num_programs(1) - 1)
    def _():
        y_ref[HB - nbot_last:HB, :, :] = jnp.zeros((nbot_last, Wp, C_), tap_dtype)

    T_static = Hpad // TH
    nbot_prev = max(0, (T_static - 1) * TH + 2 - H) if T_static >= 2 else 0
    if nbot_prev > 0:                              # rare H % TH == 1 edge case
        @pl.when(t == pl.num_programs(1) - 2)
        def _():
            y_ref[HB - nbot_prev:HB, :, :] = jnp.zeros((nbot_prev, Wp, C_),
                                                       tap_dtype)

    # ---- y half of the output (center rows; padded rows sliced off later) ---
    o_ref[0, 0, :, :, :] = y[2:2 + TH, :, :].astype(o_ref.dtype)

    # ---- cv2: depthwise 5x5 + bias + SiLU, 25 ref-sliced taps per row strip -
    w2 = w2_ref[...].astype(tap_dtype)                          # (25, C_)
    b2 = b2_ref[...].reshape(1, 1, C_)
    for s in range(TH // SR):
        r0 = s * SR
        acc = jnp.zeros((SR, W, C_), jnp.float32)
        for i in range(5):
            for j in range(5):
                tap = y_ref[r0 + i:r0 + i + SR, j:j + W, :]     # shifted load
                acc = acc + (tap * w2[5 * i + j]).astype(jnp.float32)
        z2 = acc + b2
        y2 = z2 * pl.reciprocal(1.0 + jnp.exp(-z2), approx=True)
        o_ref[0, 1, r0:r0 + SR, :, :] = y2.astype(o_ref.dtype)


# ---------------------------------------------------------------------------
# GhostConv forward (NCHW in / NCHW out, like the PyTorch module)
# ---------------------------------------------------------------------------
def ghost_conv_forward(x_nchw, params):
    N, C1, H, W = x_nchw.shape
    C_ = params["w1"].shape[1]

    # Fold BN scales into the conv weights (host side, BEFORE the bf16 cast).
    w1 = (params["w1"] * params["scale1"]).astype(jnp.bfloat16)   # (C1, C_)
    b1 = params["bias1"].astype(jnp.float32)                      # (1, C_)
    w2 = (params["w2"] * params["scale2"]).astype(jnp.float32)    # (25, C_)
    b2 = params["bias2"].astype(jnp.float32)                      # (1, C_)

    TH = _pick_tile_h(H)
    T = -(-H // TH)
    Hpad = T * TH
    HB = TH + 4
    Wp = _round_up(W + 4, 8)
    SR = 8 if TH % 8 == 0 else TH

    # Depthwise taps in bf16 only where the VALU supports it (v6e / v7x).
    tap_dtype = jnp.float32
    try:
        kind = jax.devices()[0].device_kind.lower()
        if ("v6" in kind) or ("v7" in kind):
            tap_dtype = jnp.bfloat16
    except Exception:
        pass

    # NCHW -> NHWC; pad rows by the conv halo (+ row-tile remainder), bf16.
    # TODO(synk): in an NHWC pipeline both wrapper transposes disappear.
    x_nhwc = jnp.transpose(x_nchw, (0, 2, 3, 1))
    xp = jnp.pad(x_nhwc, ((0, 0), (2, 2 + Hpad - H), (0, 0), (0, 0))
                 ).astype(jnp.bfloat16)

    kernel = functools.partial(_ghost_fused_kernel, TH=TH, SR=SR, H=H, W=W,
                               Hpad=Hpad, C_=C_, tap_dtype=tap_dtype)

    tap_bytes = 2 if tap_dtype == jnp.bfloat16 else 4
    vmem_need = (2 * (Hpad + 4) * W * C1 * 2          # input block (dbl-buf)
                 + 2 * 2 * TH * W * C_ * 2            # output block (dbl-buf)
                 + HB * Wp * C_ * tap_bytes           # y scratch
                 + 4 * HB * W * C_ * 4)               # f32 intermediates
    vmem_limit = int(min(max(2 * vmem_need + (4 << 20), 16 << 20), 64 << 20))

    m = N * Hpad * W
    cost = pl.CostEstimate(
        flops=int(2 * N * T * HB * W * C1 * C_ + 2 * m * 25 * C_ + 12 * m * C_),
        transcendentals=int(2 * m * C_),
        bytes_accessed=int(N * (Hpad + 4) * W * C1 * 2 + m * 2 * C_ * 2
                           + C1 * C_ * 2 + 25 * C_ * 4 + 4 * C_ * 4))

    out = pl.pallas_call(
        kernel,
        out_shape=jax.ShapeDtypeStruct((N, 2, Hpad, W, C_), jnp.bfloat16),
        grid=(N, T),
        in_specs=[
            pl.BlockSpec((1, Hpad + 4, W, C1), lambda n, t: (n, 0, 0, 0)),
            pl.BlockSpec((C1, C_), lambda n, t: (0, 0)),
            pl.BlockSpec((1, C_), lambda n, t: (0, 0)),
            pl.BlockSpec((25, C_), lambda n, t: (0, 0)),
            pl.BlockSpec((1, C_), lambda n, t: (0, 0)),
        ],
        out_specs=pl.BlockSpec((1, 2, TH, W, C_),
                               lambda n, t: (n, 0, t, 0, 0)),
        scratch_shapes=[pltpu.VMEM((HB, Wp, C_), tap_dtype)],
        compiler_params=pltpu.CompilerParams(
            dimension_semantics=("parallel", "arbitrary"),
            vmem_limit_bytes=vmem_limit),
        cost_estimate=cost,
    )(xp, w1, b1, w2, b2)

    out = out[:, :, :H]                                  # (N, 2, H, W, C_)
    out = jnp.transpose(out, (0, 1, 4, 2, 3))            # (N, 2, C_, H, W)
    return out.reshape(N, 2 * C_, H, W).astype(jnp.float32)


# ---------------------------------------------------------------------------
# Deterministic parameter construction (BN folded into scale/bias, eval-style)
# ---------------------------------------------------------------------------
def make_params(key, c1, c2):
    c_ = c2 // 2
    eps = 1e-5
    ks = jax.random.split(key, 10)

    w1 = jax.random.normal(ks[0], (c1, c_), jnp.float32) * 0.1      # 1x1 conv
    w2 = jax.random.normal(ks[1], (25, c_), jnp.float32) * 0.1      # dw 5x5

    gamma1 = 1.0 + 0.1 * jax.random.normal(ks[2], (c_,), jnp.float32)
    beta1 = 0.1 * jax.random.normal(ks[3], (c_,), jnp.float32)
    mean1 = 0.05 * jax.random.normal(ks[4], (c_,), jnp.float32)
    var1 = 1.0 + 0.1 * jax.random.uniform(ks[5], (c_,), jnp.float32)

    gamma2 = 1.0 + 0.1 * jax.random.normal(ks[6], (c_,), jnp.float32)
    beta2 = 0.1 * jax.random.normal(ks[7], (c_,), jnp.float32)
    mean2 = 0.05 * jax.random.normal(ks[8], (c_,), jnp.float32)
    var2 = 1.0 + 0.1 * jax.random.uniform(ks[9], (c_,), jnp.float32)

    scale1 = gamma1 / jnp.sqrt(var1 + eps)
    bias1 = beta1 - mean1 * scale1
    scale2 = gamma2 / jnp.sqrt(var2 + eps)
    bias2 = beta2 - mean2 * scale2

    return {
        "w1": w1, "scale1": scale1[None, :], "bias1": bias1[None, :],
        "w2": w2, "scale2": scale2[None, :], "bias2": bias2[None, :],
    }


# ---------------------------------------------------------------------------
# Pure-JAX f32 reference (same math, no Pallas) for correctness check
# ---------------------------------------------------------------------------
def ghost_conv_reference(x_nchw, params):
    w1, s1, b1 = params["w1"], params["scale1"], params["bias1"]
    w2, s2, b2 = params["w2"], params["scale2"], params["bias2"]
    x = jnp.transpose(x_nchw, (0, 2, 3, 1)).astype(jnp.float32)

    z = jnp.einsum("nhwc,cd->nhwd", x, w1) * s1 + b1
    y = z * jax.nn.sigmoid(z)

    N, H, W, C = y.shape
    yp = jnp.pad(y, ((0, 0), (2, 2), (2, 2), (0, 0)))
    acc = jnp.zeros_like(y)
    for i in range(5):
        for j in range(5):
            acc = acc + yp[:, i:i + H, j:j + W, :] * w2[i * 5 + j]
    z2 = acc * s2 + b2
    y2 = z2 * jax.nn.sigmoid(z2)

    out = jnp.concatenate([y, y2], axis=-1)
    return jnp.transpose(out, (0, 3, 1, 2))


if __name__ == "__main__":
    import numpy as np

    # config 1: tiny channels (VPU pointwise path); config 2: MXU pointwise path
    configs = [
        dict(N=2, C1=4, H=16, W=16, C2=8),
        dict(N=2, C1=32, H=16, W=16, C2=64),
    ]

    key = jax.random.PRNGKey(0)
    for cfg in configs:
        key, kx, kp = jax.random.split(key, 3)
        x = jax.random.normal(kx, (cfg["N"], cfg["C1"], cfg["H"], cfg["W"]),
                              jnp.float32)
        params = make_params(kp, cfg["C1"], cfg["C2"])

        out = jax.block_until_ready(ghost_conv_forward(x, params))
        ref = jax.block_until_ready(ghost_conv_reference(x, params))

        assert out.shape == (cfg["N"], cfg["C2"], cfg["H"], cfg["W"]), out.shape
        # bf16 activations/weights (and bf16 output) -> bf16-level tolerance.
        np.testing.assert_allclose(np.asarray(out), np.asarray(ref),
                                   rtol=2e-2, atol=2e-2)

    print("KERNEL_OK")
</pallas_src>

<mosaic_0001>
module attributes {stable_mosaic.version = 11 : i64} {
  func.func @_ghost_fused_kernel(%arg0: i32, %arg1: i32, %arg2: memref<1x20x16x4xbf16, #tpu.memory_space<vmem>>, %arg3: memref<4x4xbf16, #tpu.memory_space<vmem>>, %arg4: memref<1x4xf32, #tpu.memory_space<vmem>>, %arg5: memref<25x4xf32, #tpu.memory_space<vmem>>, %arg6: memref<1x4xf32, #tpu.memory_space<vmem>>, %arg7: memref<1x2x16x16x4xbf16, #tpu.memory_space<vmem>>, %arg8: memref<20x24x4xf32, #tpu.memory_space<vmem>>) attributes {dimension_semantics = [#tpu.dimension_semantics<parallel>, #tpu.dimension_semantics<arbitrary>], iteration_bounds = array<i64: 2, 1>, scalar_prefetch = 0 : i64, scratch_operands = 1 : i64, tpu.core_type = #tpu.core_type<tc>, window_params = [{transform_indices = @transform_0, window_bounds = array<i64: 1, 20, 16, 4>}, {pipeline_mode = #tpu.pipeline_mode<synchronous>, transform_indices = @transform_1, window_bounds = array<i64: 4, 4>}, {pipeline_mode = #tpu.pipeline_mode<synchronous>, transform_indices = @transform_2, window_bounds = array<i64: 1, 4>}, {pipeline_mode = #tpu.pipeline_mode<synchronous>, transform_indices = @transform_3, window_bounds = array<i64: 25, 4>}, {pipeline_mode = #tpu.pipeline_mode<synchronous>, transform_indices = @transform_4, window_bounds = array<i64: 1, 4>}, {transform_indices = @transform_5, window_bounds = array<i64: 1, 2, 16, 16, 4>}]} {
    %c16_i32 = arith.constant 16 : i32
    %0 = arith.muli %arg1, %c16_i32 : i32
    %1 = tpu.assume_multiple %0, 8 : i32
    %c0 = arith.constant 0 : index
    %2 = arith.index_cast %1 : i32 to index
    %c0_0 = arith.constant 0 : index
    %c0_1 = arith.constant 0 : index
    %3 = vector.load %arg2[%c0, %2, %c0_0, %c0_1] : memref<1x20x16x4xbf16, #tpu.memory_space<vmem>>, vector<1x20x16x4xbf16>
    %4 = vector.shape_cast %3 : vector<1x20x16x4xbf16> to vector<20x16x4xbf16>
    %c0_2 = arith.constant 0 : index
    %c0_3 = arith.constant 0 : index
    %5 = vector.load %arg3[%c0_2, %c0_3] : memref<4x4xbf16, #tpu.memory_space<vmem>>, vector<4x4xbf16>
    %6 = arith.extf %5 : vector<4x4xbf16> to vector<4x4xf32>
    %cst = arith.constant 0.000000e+00 : f32
    %7 = vector.broadcast %cst : f32 to vector<20x16x4xf32>
    %8 = vector.extract_strided_slice %4 {offsets = [0, 0, 0], sizes = [20, 16, 1], strides = [1, 1, 1]} : vector<20x16x4xbf16> to vector<20x16x1xbf16>
    %9 = arith.extf %8 : vector<20x16x1xbf16> to vector<20x16x1xf32>
    %10 = vector.extract_strided_slice %6 {offsets = [0, 0], sizes = [1, 4], strides = [1, 1]} : vector<4x4xf32> to vector<1x4xf32>
    %11 = vector.shape_cast %10 : vector<1x4xf32> to vector<4xf32>
    %12 = vector.shape_cast %11 : vector<4xf32> to vector<1x1x4xf32>
    %13 = vector.broadcast %9 : vector<20x16x1xf32> to vector<20x16x4xf32>
    %14 = vector.broadcast %12 : vector<1x1x4xf32> to vector<20x16x4xf32>
    %15 = arith.mulf %13, %14 : vector<20x16x4xf32>
    %16 = arith.addf %7, %15 : vector<20x16x4xf32>
    %17 = vector.extract_strided_slice %4 {offsets = [0, 0, 1], sizes = [20, 16, 1], strides = [1, 1, 1]} : vector<20x16x4xbf16> to vector<20x16x1xbf16>
    %18 = arith.extf %17 : vector<20x16x1xbf16> to vector<20x16x1xf32>
    %19 = vector.extract_strided_slice %6 {offsets = [1, 0], sizes = [1, 4], strides = [1, 1]} : vector<4x4xf32> to vector<1x4xf32>
    %20 = vector.shape_cast %19 : vector<1x4xf32> to vector<4xf32>
    %21 = vector.shape_cast %20 : vector<4xf32> to vector<1x1x4xf32>
    %22 = vector.broadcast %18 : vector<20x16x1xf32> to vector<20x16x4xf32>
    %23 = vector.broadcast %21 : vector<1x1x4xf32> to vector<20x16x4xf32>
    %24 = arith.mulf %22, %23 : vector<20x16x4xf32>
    %25 = arith.addf %16, %24 : vector<20x16x4xf32>
    %26 = vector.extract_strided_slice %4 {offsets = [0, 0, 2], sizes = [20, 16, 1], strides = [1, 1, 1]} : vector<20x16x4xbf16> to vector<20x16x1xbf16>
    %27 = arith.extf %26 : vector<20x16x1xbf16> to vector<20x16x1xf32>
    %28 = vector.extract_strided_slice %6 {offsets = [2, 0], sizes = [1, 4], strides = [1, 1]} : vector<4x4xf32> to vector<1x4xf32>
    %29 = vector.shape_cast %28 : vector<1x4xf32> to vector<4xf32>
    %30 = vector.shape_cast %29 : vector<4xf32> to vector<1x1x4xf32>
    %31 = vector.broadcast %27 : vector<20x16x1xf32> to vector<20x16x4xf32>
    %32 = vector.broadcast %30 : vector<1x1x4xf32> to vector<20x16x4xf32>
    %33 = arith.mulf %31, %32 : vector<20x16x4xf32>
    %34 = arith.addf %25, %33 : vector<20x16x4xf32>
    %35 = vector.extract_strided_slice %4 {offsets = [0, 0, 3], sizes = [20, 16, 1], strides = [1, 1, 1]} : vector<20x16x4xbf16> to vector<20x16x1xbf16>
    %36 = arith.extf %35 : vector<20x16x1xbf16> to vector<20x16x1xf32>
    %37 = vector.extract_strided_slice %6 {offsets = [3, 0], sizes = [1, 4], strides = [1, 1]} : vector<4x4xf32> to vector<1x4xf32>
    %38 = vector.shape_cast %37 : vector<1x4xf32> to vector<4xf32>
    %39 = vector.shape_cast %38 : vector<4xf32> to vector<1x1x4xf32>
    %40 = vector.broadcast %36 : vector<20x16x1xf32> to vector<20x16x4xf32>
    %41 = vector.broadcast %39 : vector<1x1x4xf32> to vector<20x16x4xf32>
    %42 = arith.mulf %40, %41 : vector<20x16x4xf32>
    %43 = arith.addf %34, %42 : vector<20x16x4xf32>
    %c0_4 = arith.constant 0 : index
    %c0_5 = arith.constant 0 : index
    %44 = vector.load %arg4[%c0_4, %c0_5] : memref<1x4xf32, #tpu.memory_space<vmem>>, vector<1x4xf32>
    %45 = vector.shape_cast %44 : vector<1x4xf32> to vector<1x1x4xf32>
    %46 = vector.broadcast %45 : vector<1x1x4xf32> to vector<20x16x4xf32>
    %47 = arith.addf %43, %46 : vector<20x16x4xf32>
    %cst_6 = arith.constant 0.000000e+00 : f32
    %48 = vector.broadcast %cst_6 : f32 to vector<20x16x4xf32>
    %49 = arith.subf %48, %47 : vector<20x16x4xf32>
    %50 = math.exp %49 : vector<20x16x4xf32>
    %cst_7 = arith.constant 1.000000e+00 : f32
    %51 = vector.broadcast %cst_7 : f32 to vector<20x16x4xf32>
    %52 = arith.addf %51, %50 : vector<20x16x4xf32>
    %53 = tpu.reciprocal %52 {approx = true} : vector<20x16x4xf32> -> vector<20x16x4xf32>
    %54 = arith.mulf %47, %53 : vector<20x16x4xf32>
    %cst_8 = arith.constant 0.000000e+00 : f32
    %55 = vector.broadcast %cst_8 : f32 to vector<20x2x4xf32>
    %c0_9 = arith.constant 0 : index
    %c0_10 = arith.constant 0 : index
    %c0_11 = arith.constant 0 : index
    %56 = vector.load %arg8[%c0_9, %c0_10, %c0_11] : memref<20x24x4xf32, #tpu.memory_space<vmem>>, vector<20x2x4xf32>
    tpu.vector_store %arg8[%c0_9, %c0_10, %c0_11], %55 {strides = array<i32>} : memref<20x24x4xf32, #tpu.memory_space<vmem>>, vector<20x2x4xf32>,
    %c0_12 = arith.constant 0 : index
    %c18 = arith.constant 18 : index
    %c0_13 = arith.constant 0 : index
    %57 = vector.load %arg8[%c0_12, %c18, %c0_13] : memref<20x24x4xf32, #tpu.memory_space<vmem>>, vector<20x2x4xf32>
    tpu.vector_store %arg8[%c0_12, %c18, %c0_13], %55 {strides = array<i32>} : memref<20x24x4xf32, #tpu.memory_space<vmem>>, vector<20x2x4xf32>,
    %c0_14 = arith.constant 0 : index
    %c2 = arith.constant 2 : index
    %c0_15 = arith.constant 0 : index
    %58 = vector.load %arg8[%c0_14, %c2, %c0_15] : memref<20x24x4xf32, #tpu.memory_space<vmem>>, vector<20x16x4xf32>
    tpu.vector_store %arg8[%c0_14, %c2, %c0_15], %54 {strides = array<i32>} : memref<20x24x4xf32, #tpu.memory_space<vmem>>, vector<20x16x4xf32>,
    %c0_i32 = arith.constant 0 : i32
    %59 = arith.cmpi eq, %arg1, %c0_i32 : i32
    %60 = arith.extui %59 : i1 to i32
    %c0_i32_16 = arith.constant 0 : i32
    %61 = arith.cmpi ne, %60, %c0_i32_16 : i32
    scf.if %61 {
      %cst_186 = arith.constant 0.000000e+00 : f32
      %451 = vector.broadcast %cst_186 : f32 to vector<2x24x4xf32>
      %c0_187 = arith.constant 0 : index
      %c0_188 = arith.constant 0 : index
      %c0_189 = arith.constant 0 : index
      %452 = vector.load %arg8[%c0_187, %c0_188, %c0_189] : memref<20x24x4xf32, #tpu.memory_space<vmem>>, vector<2x24x4xf32>
      tpu.vector_store %arg8[%c0_187, %c0_188, %c0_189], %451 {strides = array<i32>} : memref<20x24x4xf32, #tpu.memory_space<vmem>>, vector<2x24x4xf32>,
    } else {
    }
    %c0_i32_17 = arith.constant 0 : i32
    %62 = arith.cmpi eq, %arg1, %c0_i32_17 : i32
    %63 = arith.extui %62 : i1 to i32
    %c0_i32_18 = arith.constant 0 : i32
    %64 = arith.cmpi ne, %63, %c0_i32_18 : i32
    scf.if %64 {
      %cst_186 = arith.constant 0.000000e+00 : f32
      %451 = vector.broadcast %cst_186 : f32 to vector<2x24x4xf32>
      %c18_187 = arith.constant 18 : index
      %c0_188 = arith.constant 0 : index
      %c0_189 = arith.constant 0 : index
      %452 = vector.load %arg8[%c18_187, %c0_188, %c0_189] : memref<20x24x4xf32, #tpu.memory_space<vmem>>, vector<2x24x4xf32>
      tpu.vector_store %arg8[%c18_187, %c0_188, %c0_189], %451 {strides = array<i32>} : memref<20x24x4xf32, #tpu.memory_space<vmem>>, vector<2x24x4xf32>,
    } else {
    }
    %65 = vector.extract_strided_slice %54 {offsets = [2, 0, 0], sizes = [16, 16, 4], strides = [1, 1, 1]} : vector<20x16x4xf32> to vector<16x16x4xf32>
    %66 = arith.truncf %65 : vector<16x16x4xf32> to vector<16x16x4xbf16>
    %c0_19 = arith.constant 0 : index
    %c0_20 = arith.constant 0 : index
    %c0_21 = arith.constant 0 : index
    %c0_22 = arith.constant 0 : index
    %c0_23 = arith.constant 0 : index
    %67 = vector.load %arg7[%c0_19, %c0_20, %c0_21, %c0_22, %c0_23] : memref<1x2x16x16x4xbf16, #tpu.memory_space<vmem>>, vector<1x1x16x16x4xbf16>
    %68 = vector.shape_cast %67 : vector<1x1x16x16x4xbf16> to vector<16x16x4xbf16>
    %69 = vector.shape_cast %66 : vector<16x16x4xbf16> to vector<1x1x16x16x4xbf16>
    tpu.vector_store %arg7[%c0_19, %c0_20, %c0_21, %c0_22, %c0_23], %69 {strides = array<i32>} : memref<1x2x16x16x4xbf16, #tpu.memory_space<vmem>>, vector<1x1x16x16x4xbf16>,
    %c0_24 = arith.constant 0 : index
    %c0_25 = arith.constant 0 : index
    %70 = vector.load %arg5[%c0_24, %c0_25] : memref<25x4xf32, #tpu.memory_space<vmem>>, vector<25x4xf32>
    %c0_26 = arith.constant 0 : index
    %c0_27 = arith.constant 0 : index
    %71 = vector.load %arg6[%c0_26, %c0_27] : memref<1x4xf32, #tpu.memory_space<vmem>>, vector<1x4xf32>
    %72 = vector.shape_cast %71 : vector<1x4xf32> to vector<1x1x4xf32>
    %cst_28 = arith.constant 0.000000e+00 : f32
    %73 = vector.broadcast %cst_28 : f32 to vector<8x16x4xf32>
    %c0_29 = arith.constant 0 : index
    %c0_30 = arith.constant 0 : index
    %c0_31 = arith.constant 0 : index
    %74 = vector.load %arg8[%c0_29, %c0_30, %c0_31] : memref<20x24x4xf32, #tpu.memory_space<vmem>>, vector<8x16x4xf32>
    %75 = vector.extract_strided_slice %70 {offsets = [0, 0], sizes = [1, 4], strides = [1, 1]} : vector<25x4xf32> to vector<1x4xf32>
    %76 = vector.shape_cast %75 : vector<1x4xf32> to vector<4xf32>
    %77 = vector.shape_cast %76 : vector<4xf32> to vector<1x1x4xf32>
    %78 = vector.broadcast %77 : vector<1x1x4xf32> to vector<8x16x4xf32>
    %79 = arith.mulf %74, %78 : vector<8x16x4xf32>
    %80 = arith.addf %73, %79 : vector<8x16x4xf32>
    %c0_32 = arith.constant 0 : index
    %c1 = arith.constant 1 : index
    %c0_33 = arith.constant 0 : index
    %81 = vector.load %arg8[%c0_32, %c1, %c0_33] : memref<20x24x4xf32, #tpu.memory_space<vmem>>, vector<8x16x4xf32>
    %82 = vector.extract_strided_slice %70 {offsets = [1, 0], sizes = [1, 4], strides = [1, 1]} : vector<25x4xf32> to vector<1x4xf32>
    %83 = vector.shape_cast %82 : vector<1x4xf32> to vector<4xf32>
    %84 = vector.shape_cast %83 : vector<4xf32> to vector<1x1x4xf32>
    %85 = vector.broadcast %84 : vector<1x1x4xf32> to vector<8x16x4xf32>
    %86 = arith.mulf %81, %85 : vector<8x16x4xf32>
    %87 = arith.addf %80, %86 : vector<8x16x4xf32>
    %c0_34 = arith.constant 0 : index
    %c2_35 = arith.constant 2 : index
    %c0_36 = arith.constant 0 : index
    %88 = vector.load %arg8[%c0_34, %c2_35, %c0_36] : memref<20x24x4xf32, #tpu.memory_space<vmem>>, vector<8x16x4xf32>
    %89 = vector.extract_strided_slice %70 {offsets = [2, 0], sizes = [1, 4], strides = [1, 1]} : vector<25x4xf32> to vector<1x4xf32>
    %90 = vector.shape_cast %89 : vector<1x4xf32> to vector<4xf32>
    %91 = vector.shape_cast %90 : vector<4xf32> to vector<1x1x4xf32>
    %92 = vector.broadcast %91 : vector<1x1x4xf32> to vector<8x16x4xf32>
    %93 = arith.mulf %88, %92 : vector<8x16x4xf32>
    %94 = arith.addf %87, %93 : vector<8x16x4xf32>
    %c0_37 = arith.constant 0 : index
    %c3 = arith.constant 3 : index
    %c0_38 = arith.constant 0 : index
    %95 = vector.load %arg8[%c0_37, %c3, %c0_38] : memref<20x24x4xf32, #tpu.memory_space<vmem>>, vector<8x16x4xf32>
    %96 = vector.extract_strided_slice %70 {offsets = [3, 0], sizes = [1, 4], strides = [1, 1]} : vector<25x4xf32> to vector<1x4xf32>
    %97 = vector.shape_cast %96 : vector<1x4xf32> to vector<4xf32>
    %98 = vector.shape_cast %97 : vector<4xf32> to vector<1x1x4xf32>
    %99 = vector.broadcast %98 : vector<1x1x4xf32> to vector<8x16x4xf32>
    %100 = arith.mulf %95, %99 : vector<8x16x4xf32>
    %101 = arith.addf %94, %100 : vector<8x16x4xf32>
    %c0_39 = arith.constant 0 : index
    %c4 = arith.constant 4 : index
    %c0_40 = arith.constant 0 : index
    %102 = vector.load %arg8[%c0_39, %c4, %c0_40] : memref<20x24x4xf32, #tpu.memory_space<vmem>>, vector<8x16x4xf32>
    %103 = vector.extract_strided_slice %70 {offsets = [4, 0], sizes = [1, 4], strides = [1, 1]} : vector<25x4xf32> to vector<1x4xf32>
    %104 = vector.shape_cast %103 : vector<1x4xf32> to vector<4xf32>
    %105 = vector.shape_cast %104 : vector<4xf32> to vector<1x1x4xf32>
    %106 = vector.broadcast %105 : vector<1x1x4xf32> to vector<8x16x4xf32>
    %107 = arith.mulf %102, %106 : vector<8x16x4xf32>
    %108 = arith.addf %101, %107 : vector<8x16x4xf32>
    %c1_41 = arith.constant 1 : index
    %c0_42 = arith.constant 0 : index
    %c0_43 = arith.constant 0 : index
    %109 = vector.load %arg8[%c1_41, %c0_42, %c0_43] : memref<20x24x4xf32, #tpu.memory_space<vmem>>, vector<8x16x4xf32>
    %110 = vector.extract_strided_slice %70 {offsets = [5, 0], sizes = [1, 4], strides = [1, 1]} : vector<25x4xf32> to vector<1x4xf32>
    %111 = vector.shape_cast %110 : vector<1x4xf32> to vector<4xf32>
    %112 = vector.shape_cast %111 : vector<4xf32> to vector<1x1x4xf32>
    %113 = vector.broadcast %112 : vector<1x1x4xf32> to vector<8x16x4xf32>
    %114 = arith.mulf %109, %113 : vector<8x16x4xf32>
    %115 = arith.addf %108, %114 : vector<8x16x4xf32>
    %c1_44 = arith.constant 1 : index
    %c1_45 = arith.constant 1 : index
    %c0_46 = arith.constant 0 : index
    %116 = vector.load %arg8[%c1_44, %c1_45, %c0_46] : memref<20x24x4xf32, #tpu.memory_space<vmem>>, vector<8x16x4xf32>
    %117 = vector.extract_strided_slice %70 {offsets = [6, 0], sizes = [1, 4], strides = [1, 1]} : vector<25x4xf32> to vector<1x4xf32>
    %118 = vector.shape_cast %117 : vector<1x4xf32> to vector<4xf32>
    %119 = vector.shape_cast %118 : vector<4xf32> to vector<1x1x4xf32>
    %120 = vector.broadcast %119 : vector<1x1x4xf32> to vector<8x16x4xf32>
    %121 = arith.mulf %116, %120 : vector<8x16x4xf32>
    %122 = arith.addf %115, %121 : vector<8x16x4xf32>
    %c1_47 = arith.constant 1 : index
    %c2_48 = arith.constant 2 : index
    %c0_49 = arith.constant 0 : index
    %123 = vector.load %arg8[%c1_47, %c2_48, %c0_49] : memref<20x24x4xf32, #tpu.memory_space<vmem>>, vector<8x16x4xf32>
    %124 = vector.extract_strided_slice %70 {offsets = [7, 0], sizes = [1, 4], strides = [1, 1]} : vector<25x4xf32> to vector<1x4xf32>
    %125 = vector.shape_cast %124 : vector<1x4xf32> to vector<4xf32>
    %126 = vector.shape_cast %125 : vector<4xf32> to vector<1x1x4xf32>
    %127 = vector.broadcast %126 : vector<1x1x4xf32> to vector<8x16x4xf32>
    %128 = arith.mulf %123, %127 : vector<8x16x4xf32>
    %129 = arith.addf %122, %128 : vector<8x16x4xf32>
    %c1_50 = arith.constant 1 : index
    %c3_51 = arith.constant 3 : index
    %c0_52 = arith.constant 0 : index
    %130 = vector.load %arg8[%c1_50, %c3_51, %c0_52] : memref<20x24x4xf32, #tpu.memory_space<vmem>>, vector<8x16x4xf32>
    %131 = vector.extract_strided_slice %70 {offsets = [8, 0], sizes = [1, 4], strides = [1, 1]} : vector<25x4xf32> to vector<1x4xf32>
    %132 = vector.shape_cast %131 : vector<1x4xf32> to vector<4xf32>
    %133 = vector.shape_cast %132 : vector<4xf32> to vector<1x1x4xf32>
    %134 = vector.broadcast %133 : vector<1x1x4xf32> to vector<8x16x4xf32>
    %135 = arith.mulf %130, %134 : vector<8x16x4xf32>
    %136 = arith.addf %129, %135 : vector<8x16x4xf32>
    %c1_53 = arith.constant 1 : index
    %c4_54 = arith.constant 4 : index
    %c0_55 = arith.constant 0 : index
    %137 = vector.load %arg8[%c1_53, %c4_54, %c0_55] : memref<20x24x4xf32, #tpu.memory_space<vmem>>, vector<8x16x4xf32>
    %138 = vector.extract_strided_slice %70 {offsets = [9, 0], sizes = [1, 4], strides = [1, 1]} : vector<25x4xf32> to vector<1x4xf32>
    %139 = vector.shape_cast %138 : vector<1x4xf32> to vector<4xf32>
    %140 = vector.shape_cast %139 : vector<4xf32> to vector<1x1x4xf32>
    %141 = vector.broadcast %140 : vector<1x1x4xf32> to vector<8x16x4xf32>
    %142 = arith.mulf %137, %141 : vector<8x16x4xf32>
    %143 = arith.addf %136, %142 : vector<8x16x4xf32>
    %c2_56 = arith.constant 2 : index
    %c0_57 = arith.constant 0 : index
    %c0_58 = arith.constant 0 : index
    %144 = vector.load %arg8[%c2_56, %c0_57, %c0_58] : memref<20x24x4xf32, #tpu.memory_space<vmem>>, vector<8x16x4xf32>
    %145 = vector.extract_strided_slice %70 {offsets = [10, 0], sizes = [1, 4], strides = [1, 1]} : vector<25x4xf32> to vector<1x4xf32>
    %146 = vector.shape_cast %145 : vector<1x4xf32> to vector<4xf32>
    %147 = vector.shape_cast %146 : vector<4xf32> to vector<1x1x4xf32>
    %148 = vector.broadcast %147 : vector<1x1x4xf32> to vector<8x16x4xf32>
    %149 = arith.mulf %144, %148 : vector<8x16x4xf32>
    %150 = arith.addf %143, %149 : vector<8x16x4xf32>
    %c2_59 = arith.constant 2 : index
    %c1_60 = arith.constant 1 : index
    %c0_61 = arith.constant 0 : index
    %151 = vector.load %arg8[%c2_59, %c1_60, %c0_61] : memref<20x24x4xf32, #tpu.memory_space<vmem>>, vector<8x16x4xf32>
    %152 = vector.extract_strided_slice %70 {offsets = [11, 0], sizes = [1, 4], strides = [1, 1]} : vector<25x4xf32> to vector<1x4xf32>
    %153 = vector.shape_cast %152 : vector<1x4xf32> to vector<4xf32>
    %154 = vector.shape_cast %153 : vector<4xf32> to vector<1x1x4xf32>
    %155 = vector.broadcast %154 : vector<1x1x4xf32> to vector<8x16x4xf32>
    %156 = arith.mulf %151, %155 : vector<8x16x4xf32>
    %157 = arith.addf %150, %156 : vector<8x16x4xf32>
    %c2_62 = arith.constant 2 : index
    %c2_63 = arith.constant 2 : index
    %c0_64 = arith.constant 0 : index
    %158 = vector.load %arg8[%c2_62, %c2_63, %c0_64] : memref<20x24x4xf32, #tpu.memory_space<vmem>>, vector<8x16x4xf32>
    %159 = vector.extract_strided_slice %70 {offsets = [12, 0], sizes = [1, 4], strides = [1, 1]} : vector<25x4xf32> to vector<1x4xf32>
    %160 = vector.shape_cast %159 : vector<1x4xf32> to vector<4xf32>
    %161 = vector.shape_cast %160 : vector<4xf32> to vector<1x1x4xf32>
    %162 = vector.broadcast %161 : vector<1x1x4xf32> to vector<8x16x4xf32>
    %163 = arith.mulf %158, %162 : vector<8x16x4xf32>
    %164 = arith.addf %157, %163 : vector<8x16x4xf32>
    %c2_65 = arith.constant 2 : index
    %c3_66 = arith.constant 3 : index
    %c0_67 = arith.constant 0 : index
    %165 = vector.load %arg8[%c2_65, %c3_66, %c0_67] : memref<20x24x4xf32, #tpu.memory_space<vmem>>, vector<8x16x4xf32>
    %166 = vector.extract_strided_slice %70 {offsets = [13, 0], sizes = [1, 4], strides = [1, 1]} : vector<25x4xf32> to vector<1x4xf32>
    %167 = vector.shape_cast %166 : vector<1x4xf32> to vector<4xf32>
    %168 = vector.shape_cast %167 : vector<4xf32> to vector<1x1x4xf32>
    %169 = vector.broadcast %168 : vector<1x1x4xf32> to vector<8x16x4xf32>
    %170 = arith.mulf %165, %169 : vector<8x16x4xf32>
    %171 = arith.addf %164, %170 : vector<8x16x4xf32>
    %c2_68 = arith.constant 2 : index
    %c4_69 = arith.constant 4 : index
    %c0_70 = arith.constant 0 : index
    %172 = vector.load %arg8[%c2_68, %c4_69, %c0_70] : memref<20x24x4xf32, #tpu.memory_space<vmem>>, vector<8x16x4xf32>
    %173 = vector.extract_strided_slice %70 {offsets = [14, 0], sizes = [1, 4], strides = [1, 1]} : vector<25x4xf32> to vector<1x4xf32>
    %174 = vector.shape_cast %173 : vector<1x4xf32> to vector<4xf32>
    %175 = vector.shape_cast %174 : vector<4xf32> to vector<1x1x4xf32>
    %176 = vector.broadcast %175 : vector<1x1x4xf32> to vector<8x16x4xf32>
    %177 = arith.mulf %172, %176 : vector<8x16x4xf32>
    %178 = arith.addf %171, %177 : vector<8x16x4xf32>
    %c3_71 = arith.constant 3 : index
    %c0_72 = arith.constant 0 : index
    %c0_73 = arith.constant 0 : index
    %179 = vector.load %arg8[%c3_71, %c0_72, %c0_73] : memref<20x24x4xf32, #tpu.memory_space<vmem>>, vector<8x16x4xf32>
    %180 = vector.extract_strided_slice %70 {offsets = [15, 0], sizes = [1, 4], strides = [1, 1]} : vector<25x4xf32> to vector<1x4xf32>
    %181 = vector.shape_cast %180 : vector<1x4xf32> to vector<4xf32>
    %182 = vector.shape_cast %181 : vector<4xf32> to vector<1x1x4xf32>
    %183 = vector.broadcast %182 : vector<1x1x4xf32> to vector<8x16x4xf32>
    %184 = arith.mulf %179, %183 : vector<8x16x4xf32>
    %185 = arith.addf %178, %184 : vector<8x16x4xf32>
    %c3_74 = arith.constant 3 : index
    %c1_75 = arith.constant 1 : index
    %c0_76 = arith.constant 0 : index
    %186 = vector.load %arg8[%c3_74, %c1_75, %c0_76] : memref<20x24x4xf32, #tpu.memory_space<vmem>>, vector<8x16x4xf32>
    %187 = vector.extract_strided_slice %70 {offsets = [16, 0], sizes = [1, 4], strides = [1, 1]} : vector<25x4xf32> to vector<1x4xf32>
    %188 = vector.shape_cast %187 : vector<1x4xf32> to vector<4xf32>
    %189 = vector.shape_cast %188 : vector<4xf32> to vector<1x1x4xf32>
    %190 = vector.broadcast %189 : vector<1x1x4xf32> to vector<8x16x4xf32>
    %191 = arith.mulf %186, %190 : vector<8x16x4xf32>
    %192 = arith.addf %185, %191 : vector<8x16x4xf32>
    %c3_77 = arith.constant 3 : index
    %c2_78 = arith.constant 2 : index
    %c0_79 = arith.constant 0 : index
    %193 = vector.load %arg8[%c3_77, %c2_78, %c0_79] : memref<20x24x4xf32, #tpu.memory_space<vmem>>, vector<8x16x4xf32>
    %194 = vector.extract_strided_slice %70 {offsets = [17, 0], sizes = [1, 4], strides = [1, 1]} : vector<25x4xf32> to vector<1x4xf32>
    %195 = vector.shape_cast %194 : vector<1x4xf32> to vector<4xf32>
    %196 = vector.shape_cast %195 : vector<4xf32> to vector<1x1x4xf32>
    %197 = vector.broadcast %196 : vector<1x1x4xf32> to vector<8x16x4xf32>
    %198 = arith.mulf %193, %197 : vector<8x16x4xf32>
    %199 = arith.addf %192, %198 : vector<8x16x4xf32>
    %c3_80 = arith.constant 3 : index
    %c3_81 = arith.constant 3 : index
    %c0_82 = arith.constant 0 : index
    %200 = vector.load %arg8[%c3_80, %c3_81, %c0_82] : memref<20x24x4xf32, #tpu.memory_space<vmem>>, vector<8x16x4xf32>
    %201 = vector.extract_strided_slice %70 {offsets = [18, 0], sizes = [1, 4], strides = [1, 1]} : vector<25x4xf32> to vector<1x4xf32>
    %202 = vector.shape_cast %201 : vector<1x4xf32> to vector<4xf32>
    %203 = vector.shape_cast %202 : vector<4xf32> to vector<1x1x4xf32>
    %204 = vector.broadcast %203 : vector<1x1x4xf32> to vector<8x16x4xf32>
    %205 = arith.mulf %200, %204 : vector<8x16x4xf32>
    %206 = arith.addf %199, %205 : vector<8x16x4xf32>
    %c3_83 = arith.constant 3 : index
    %c4_84 = arith.constant 4 : index
    %c0_85 = arith.constant 0 : index
    %207 = vector.load %arg8[%c3_83, %c4_84, %c0_85] : memref<20x24x4xf32, #tpu.memory_space<vmem>>, vector<8x16x4xf32>
    %208 = vector.extract_strided_slice %70 {offsets = [19, 0], sizes = [1, 4], strides = [1, 1]} : vector<25x4xf32> to vector<1x4xf32>
    %209 = vector.shape_cast %208 : vector<1x4xf32> to vector<4xf32>
    %210 = vector.shape_cast %209 : vector<4xf32> to vector<1x1x4xf32>
    %211 = vector.broadcast %210 : vector<1x1x4xf32> to vector<8x16x4xf32>
    %212 = arith.mulf %207, %211 : vector<8x16x4xf32>
    %213 = arith.addf %206, %212 : vector<8x16x4xf32>
    %c4_86 = arith.constant 4 : index
    %c0_87 = arith.constant 0 : index
    %c0_88 = arith.constant 0 : index
    %214 = vector.load %arg8[%c4_86, %c0_87, %c0_88] : memref<20x24x4xf32, #tpu.memory_space<vmem>>, vector<8x16x4xf32>
    %215 = vector.extract_strided_slice %70 {offsets = [20, 0], sizes = [1, 4], strides = [1, 1]} : vector<25x4xf32> to vector<1x4xf32>
    %216 = vector.shape_cast %215 : vector<1x4xf32> to vector<4xf32>
    %217 = vector.shape_cast %216 : vector<4xf32> to vector<1x1x4xf32>
    %218 = vector.broadcast %217 : vector<1x1x4xf32> to vector<8x16x4xf32>
    %219 = arith.mulf %214, %218 : vector<8x16x4xf32>
    %220 = arith.addf %213, %219 : vector<8x16x4xf32>
    %c4_89 = arith.constant 4 : index
    %c1_90 = arith.constant 1 : index
    %c0_91 = arith.constant 0 : index
    %221 = vector.load %arg8[%c4_89, %c1_90, %c0_91] : memref<20x24x4xf32, #tpu.memory_space<vmem>>, vector<8x16x4xf32>
    %222 = vector.extract_strided_slice %70 {offsets = [21, 0], sizes = [1, 4], strides = [1, 1]} : vector<25x4xf32> to vector<1x4xf32>
    %223 = vector.shape_cast %222 : vector<1x4xf32> to vector<4xf32>
    %224 = vector.shape_cast %223 : vector<4xf32> to vector<1x1x4xf32>
    %225 = vector.broadcast %224 : vector<1x1x4xf32> to vector<8x16x4xf32>
    %226 = arith.mulf %221, %225 : vector<8x16x4xf32>
    %227 = arith.addf %220, %226 : vector<8x16x4xf32>
    %c4_92 = arith.constant 4 : index
    %c2_93 = arith.constant 2 : index
    %c0_94 = arith.constant 0 : index
    %228 = vector.load %arg8[%c4_92, %c2_93, %c0_94] : memref<20x24x4xf32, #tpu.memory_space<vmem>>, vector<8x16x4xf32>
    %229 = vector.extract_strided_slice %70 {offsets = [22, 0], sizes = [1, 4], strides = [1, 1]} : vector<25x4xf32> to vector<1x4xf32>
    %230 = vector.shape_cast %229 : vector<1x4xf32> to vector<4xf32>
    %231 = vector.shape_cast %230 : vector<4xf32> to vector<1x1x4xf32>
    %232 = vector.broadcast %231 : vector<1x1x4xf32> to vector<8x16x4xf32>
    %233 = arith.mulf %228, %232 : vector<8x16x4xf32>
    %234 = arith.addf %227, %233 : vector<8x16x4xf32>
    %c4_95 = arith.constant 4 : index
    %c3_96 = arith.constant 3 : index
    %c0_97 = arith.constant 0 : index
    %235 = vector.load %arg8[%c4_95, %c3_96, %c0_97] : memref<20x24x4xf32, #tpu.memory_space<vmem>>, vector<8x16x4xf32>
    %236 = vector.extract_strided_slice %70 {offsets = [23, 0], sizes = [1, 4], strides = [1, 1]} : vector<25x4xf32> to vector<1x4xf32>
    %237 = vector.shape_cast %236 : vector<1x4xf32> to vector<4xf32>
    %238 = vector.shape_cast %237 : vector<4xf32> to vector<1x1x4xf32>
    %239 = vector.broadcast %238 : vector<1x1x4xf32> to vector<8x16x4xf32>
    %240 = arith.mulf %235, %239 : vector<8x16x4xf32>
    %241 = arith.addf %234, %240 : vector<8x16x4xf32>
    %c4_98 = arith.constant 4 : index
    %c4_99 = arith.constant 4 : index
    %c0_100 = arith.constant 0 : index
    %242 = vector.load %arg8[%c4_98, %c4_99, %c0_100] : memref<20x24x4xf32, #tpu.memory_space<vmem>>, vector<8x16x4xf32>
    %243 = vector.extract_strided_slice %70 {offsets = [24, 0], sizes = [1, 4], strides = [1, 1]} : vector<25x4xf32> to vector<1x4xf32>
    %244 = vector.shape_cast %243 : vector<1x4xf32> to vector<4xf32>
    %245 = vector.shape_cast %244 : vector<4xf32> to vector<1x1x4xf32>
    %246 = vector.broadcast %245 : vector<1x1x4xf32> to vector<8x16x4xf32>
    %247 = arith.mulf %242, %246 : vector<8x16x4xf32>
    %248 = arith.addf %241, %247 : vector<8x16x4xf32>
    %249 = vector.broadcast %72 : vector<1x1x4xf32> to vector<8x16x4xf32>
    %250 = arith.addf %248, %249 : vector<8x16x4xf32>
    %cst_101 = arith.constant 0.000000e+00 : f32
    %251 = vector.broadcast %cst_101 : f32 to vector<8x16x4xf32>
    %252 = arith.subf %251, %250 : vector<8x16x4xf32>
    %253 = math.exp %252 : vector<8x16x4xf32>
    %cst_102 = arith.constant 1.000000e+00 : f32
    %254 = vector.broadcast %cst_102 : f32 to vector<8x16x4xf32>
    %255 = arith.addf %254, %253 : vector<8x16x4xf32>
    %256 = tpu.reciprocal %255 {approx = true} : vector<8x16x4xf32> -> vector<8x16x4xf32>
    %257 = arith.mulf %250, %256 : vector<8x16x4xf32>
    %258 = arith.truncf %257 : vector<8x16x4xf32> to vector<8x16x4xbf16>
    %c0_103 = arith.constant 0 : index
    %c1_104 = arith.constant 1 : index
    %c0_105 = arith.constant 0 : index
    %c0_106 = arith.constant 0 : index
    %c0_107 = arith.constant 0 : index
    %259 = vector.load %arg7[%c0_103, %c1_104, %c0_105, %c0_106, %c0_107] : memref<1x2x16x16x4xbf16, #tpu.memory_space<vmem>>, vector<1x1x8x16x4xbf16>
    %260 = vector.shape_cast %259 : vector<1x1x8x16x4xbf16> to vector<8x16x4xbf16>
    %261 = vector.shape_cast %258 : vector<8x16x4xbf16> to vector<1x1x8x16x4xbf16>
    tpu.vector_store %arg7[%c0_103, %c1_104, %c0_105, %c0_106, %c0_107], %261 {strides = array<i32>} : memref<1x2x16x16x4xbf16, #tpu.memory_space<vmem>>, vector<1x1x8x16x4xbf16>,
    %cst_108 = arith.constant 0.000000e+00 : f32
    %262 = vector.broadcast %cst_108 : f32 to vector<8x16x4xf32>
    %c8 = arith.constant 8 : index
    %c0_109 = arith.constant 0 : index
    %c0_110 = arith.constant 0 : index
    %263 = vector.load %arg8[%c8, %c0_109, %c0_110] : memref<20x24x4xf32, #tpu.memory_space<vmem>>, vector<8x16x4xf32>
    %264 = vector.extract_strided_slice %70 {offsets = [0, 0], sizes = [1, 4], strides = [1, 1]} : vector<25x4xf32> to vector<1x4xf32>
    %265 = vector.shape_cast %264 : vector<1x4xf32> to vector<4xf32>
    %266 = vector.shape_cast %265 : vector<4xf32> to vector<1x1x4xf32>
    %267 = vector.broadcast %266 : vector<1x1x4xf32> to vector<8x16x4xf32>
    %268 = arith.mulf %263, %267 : vector<8x16x4xf32>
    %269 = arith.addf %262, %268 : vector<8x16x4xf32>
    %c8_111 = arith.constant 8 : index
    %c1_112 = arith.constant 1 : index
    %c0_113 = arith.constant 0 : index
    %270 = vector.load %arg8[%c8_111, %c1_112, %c0_113] : memref<20x24x4xf32, #tpu.memory_space<vmem>>, vector<8x16x4xf32>
    %271 = vector.extract_strided_slice %70 {offsets = [1, 0], sizes = [1, 4], strides = [1, 1]} : vector<25x4xf32> to vector<1x4xf32>
    %272 = vector.shape_cast %271 : vector<1x4xf32> to vector<4xf32>
    %273 = vector.shape_cast %272 : vector<4xf32> to vector<1x1x4xf32>
    %274 = vector.broadcast %273 : vector<1x1x4xf32> to vector<8x16x4xf32>
    %275 = arith.mulf %270, %274 : vector<8x16x4xf32>
    %276 = arith.addf %269, %275 : vector<8x16x4xf32>
    %c8_114 = arith.constant 8 : index
    %c2_115 = arith.constant 2 : index
    %c0_116 = arith.constant 0 : index
    %277 = vector.load %arg8[%c8_114, %c2_115, %c0_116] : memref<20x24x4xf32, #tpu.memory_space<vmem>>, vector<8x16x4xf32>
    %278 = vector.extract_strided_slice %70 {offsets = [2, 0], sizes = [1, 4], strides = [1, 1]} : vector<25x4xf32> to vector<1x4xf32>
    %279 = vector.shape_cast %278 : vector<1x4xf32> to vector<4xf32>
    %280 = vector.shape_cast %279 : vector<4xf32> to vector<1x1x4xf32>
    %281 = vector.broadcast %280 : vector<1x1x4xf32> to vector<8x16x4xf32>
    %282 = arith.mulf %277, %281 : vector<8x16x4xf32>
    %283 = arith.addf %276, %282 : vector<8x16x4xf32>
    %c8_117 = arith.constant 8 : index
    %c3_118 = arith.constant 3 : index
    %c0_119 = arith.constant 0 : index
    %284 = vector.load %arg8[%c8_117, %c3_118, %c0_119] : memref<20x24x4xf32, #tpu.memory_space<vmem>>, vector<8x16x4xf32>
    %285 = vector.extract_strided_slice %70 {offsets = [3, 0], sizes = [1, 4], strides = [1, 1]} : vector<25x4xf32> to vector<1x4xf32>
    %286 = vector.shape_cast %285 : vector<1x4xf32> to vector<4xf32>
    %287 = vector.shape_cast %286 : vector<4xf32> to vector<1x1x4xf32>
    %288 = vector.broadcast %287 : vector<1x1x4xf32> to vector<8x16x4xf32>
    %289 = arith.mulf %284, %288 : vector<8x16x4xf32>
    %290 = arith.addf %283, %289 : vector<8x16x4xf32>
    %c8_120 = arith.constant 8 : index
    %c4_121 = arith.constant 4 : index
    %c0_122 = arith.constant 0 : index
    %291 = vector.load %arg8[%c8_120, %c4_121, %c0_122] : memref<20x24x4xf32, #tpu.memory_space<vmem>>, vector<8x16x4xf32>
    %292 = vector.extract_strided_slice %70 {offsets = [4, 0], sizes = [1, 4], strides = [1, 1]} : vector<25x4xf32> to vector<1x4xf32>
    %293 = vector.shape_cast %292 : vector<1x4xf32> to vector<4xf32>
    %294 = vector.shape_cast %293 : vector<4xf32> to vector<1x1x4xf32>
    %295 = vector.broadcast %294 : vector<1x1x4xf32> to vector<8x16x4xf32>
    %296 = arith.mulf %291, %295 : vector<8x16x4xf32>
    %297 = arith.addf %290, %296 : vector<8x16x4xf32>
    %c9 = arith.constant 9 : index
    %c0_123 = arith.constant 0 : index
    %c0_124 = arith.constant 0 : index
    %298 = vector.load %arg8[%c9, %c0_123, %c0_124] : memref<20x24x4xf32, #tpu.memory_space<vmem>>, vector<8x16x4xf32>
    %299 = vector.extract_strided_slice %70 {offsets = [5, 0], sizes = [1, 4], strides = [1, 1]} : vector<25x4xf32> to vector<1x4xf32>
    %300 = vector.shape_cast %299 : vector<1x4xf32> to vector<4xf32>
    %301 = vector.shape_cast %300 : vector<4xf32> to vector<1x1x4xf32>
    %302 = vector.broadcast %301 : vector<1x1x4xf32> to vector<8x16x4xf32>
    %303 = arith.mulf %298, %302 : vector<8x16x4xf32>
    %304 = arith.addf %297, %303 : vector<8x16x4xf32>
    %c9_125 = arith.constant 9 : index
    %c1_126 = arith.constant 1 : index
    %c0_127 = arith.constant 0 : index
    %305 = vector.load %arg8[%c9_125, %c1_126, %c0_127] : memref<20x24x4xf32, #tpu.memory_space<vmem>>, vector<8x16x4xf32>
    %306 = vector.extract_strided_slice %70 {offsets = [6, 0], sizes = [1, 4], strides = [1, 1]} : vector<25x4xf32> to vector<1x4xf32>
    %307 = vector.shape_cast %306 : vector<1x4xf32> to vector<4xf32>
    %308 = vector.shape_cast %307 : vector<4xf32> to vector<1x1x4xf32>
    %309 = vector.broadcast %308 : vector<1x1x4xf32> to vector<8x16x4xf32>
    %310 = arith.mulf %305, %309 : vector<8x16x4xf32>
    %311 = arith.addf %304, %310 : vector<8x16x4xf32>
    %c9_128 = arith.constant 9 : index
    %c2_129 = arith.constant 2 : index
    %c0_130 = arith.constant 0 : index
    %312 = vector.load %arg8[%c9_128, %c2_129, %c0_130] : memref<20x24x4xf32, #tpu.memory_space<vmem>>, vector<8x16x4xf32>
    %313 = vector.extract_strided_slice %70 {offsets = [7, 0], sizes = [1, 4], strides = [1, 1]} : vector<25x4xf32> to vector<1x4xf32>
    %314 = vector.shape_cast %313 : vector<1x4xf32> to vector<4xf32>
    %315 = vector.shape_cast %314 : vector<4xf32> to vector<1x1x4xf32>
    %316 = vector.broadcast %315 : vector<1x1x4xf32> to vector<8x16x4xf32>
    %317 = arith.mulf %312, %316 : vector<8x16x4xf32>
    %318 = arith.addf %311, %317 : vector<8x16x4xf32>
    %c9_131 = arith.constant 9 : index
    %c3_132 = arith.constant 3 : index
    %c0_133 = arith.constant 0 : index
    %319 = vector.load %arg8[%c9_131, %c3_132, %c0_133] : memref<20x24x4xf32, #tpu.memory_space<vmem>>, vector<8x16x4xf32>
    %320 = vector.extract_strided_slice %70 {offsets = [8, 0], sizes = [1, 4], strides = [1, 1]} : vector<25x4xf32> to vector<1x4xf32>
    %321 = vector.shape_cast %320 : vector<1x4xf32> to vector<4xf32>
    %322 = vector.shape_cast %321 : vector<4xf32> to vector<1x1x4xf32>
    %323 = vector.broadcast %322 : vector<1x1x4xf32> to vector<8x16x4xf32>
    %324 = arith.mulf %319, %323 : vector<8x16x4xf32>
    %325 = arith.addf %318, %324 : vector<8x16x4xf32>
    %c9_134 = arith.constant 9 : index
    %c4_135 = arith.constant 4 : index
    %c0_136 = arith.constant 0 : index
    %326 = vector.load %arg8[%c9_134, %c4_135, %c0_136] : memref<20x24x4xf32, #tpu.memory_space<vmem>>, vector<8x16x4xf32>
    %327 = vector.extract_strided_slice %70 {offsets = [9, 0], sizes = [1, 4], strides = [1, 1]} : vector<25x4xf32> to vector<1x4xf32>
    %328 = vector.shape_cast %327 : vector<1x4xf32> to vector<4xf32>
    %329 = vector.shape_cast %328 : vector<4xf32> to vector<1x1x4xf32>
    %330 = vector.broadcast %329 : vector<1x1x4xf32> to vector<8x16x4xf32>
    %331 = arith.mulf %326, %330 : vector<8x16x4xf32>
    %332 = arith.addf %325, %331 : vector<8x16x4xf32>
    %c10 = arith.constant 10 : index
    %c0_137 = arith.constant 0 : index
    %c0_138 = arith.constant 0 : index
    %333 = vector.load %arg8[%c10, %c0_137, %c0_138] : memref<20x24x4xf32, #tpu.memory_space<vmem>>, vector<8x16x4xf32>
    %334 = vector.extract_strided_slice %70 {offsets = [10, 0], sizes = [1, 4], strides = [1, 1]} : vector<25x4xf32> to vector<1x4xf32>
    %335 = vector.shape_cast %334 : vector<1x4xf32> to vector<4xf32>
    %336 = vector.shape_cast %335 : vector<4xf32> to vector<1x1x4xf32>
    %337 = vector.broadcast %336 : vector<1x1x4xf32> to vector<8x16x4xf32>
    %338 = arith.mulf %333, %337 : vector<8x16x4xf32>
    %339 = arith.addf %332, %338 : vector<8x16x4xf32>
    %c10_139 = arith.constant 10 : index
    %c1_140 = arith.constant 1 : index
    %c0_141 = arith.constant 0 : index
    %340 = vector.load %arg8[%c10_139, %c1_140, %c0_141] : memref<20x24x4xf32, #tpu.memory_space<vmem>>, vector<8x16x4xf32>
    %341 = vector.extract_strided_slice %70 {offsets = [11, 0], sizes = [1, 4], strides = [1, 1]} : vector<25x4xf32> to vector<1x4xf32>
    %342 = vector.shape_cast %341 : vector<1x4xf32> to vector<4xf32>
    %343 = vector.shape_cast %342 : vector<4xf32> to vector<1x1x4xf32>
    %344 = vector.broadcast %343 : vector<1x1x4xf32> to vector<8x16x4xf32>
    %345 = arith.mulf %340, %344 : vector<8x16x4xf32>
    %346 = arith.addf %339, %345 : vector<8x16x4xf32>
    %c10_142 = arith.constant 10 : index
    %c2_143 = arith.constant 2 : index
    %c0_144 = arith.constant 0 : index
    %347 = vector.load %arg8[%c10_142, %c2_143, %c0_144] : memref<20x24x4xf32, #tpu.memory_space<vmem>>, vector<8x16x4xf32>
    %348 = vector.extract_strided_slice %70 {offsets = [12, 0], sizes = [1, 4], strides = [1, 1]} : vector<25x4xf32> to vector<1x4xf32>
    %349 = vector.shape_cast %348 : vector<1x4xf32> to vector<4xf32>
    %350 = vector.shape_cast %349 : vector<4xf32> to vector<1x1x4xf32>
    %351 = vector.broadcast %350 : vector<1x1x4xf32> to vector<8x16x4xf32>
    %352 = arith.mulf %347, %351 : vector<8x16x4xf32>
    %353 = arith.addf %346, %352 : vector<8x16x4xf32>
    %c10_145 = arith.constant 10 : index
    %c3_146 = arith.constant 3 : index
    %c0_147 = arith.constant 0 : index
    %354 = vector.load %arg8[%c10_145, %c3_146, %c0_147] : memref<20x24x4xf32, #tpu.memory_space<vmem>>, vector<8x16x4xf32>
    %355 = vector.extract_strided_slice %70 {offsets = [13, 0], sizes = [1, 4], strides = [1, 1]} : vector<25x4xf32> to vector<1x4xf32>
    %356 = vector.shape_cast %355 : vector<1x4xf32> to vector<4xf32>
    %357 = vector.shape_cast %356 : vector<4xf32> to vector<1x1x4xf32>
    %358 = vector.broadcast %357 : vector<1x1x4xf32> to vector<8x16x4xf32>
    %359 = arith.mulf %354, %358 : vector<8x16x4xf32>
    %360 = arith.addf %353, %359 : vector<8x16x4xf32>
    %c10_148 = arith.constant 10 : index
    %c4_149 = arith.constant 4 : index
    %c0_150 = arith.constant 0 : index
    %361 = vector.load %arg8[%c10_148, %c4_149, %c0_150] : memref<20x24x4xf32, #tpu.memory_space<vmem>>, vector<8x16x4xf32>
    %362 = vector.extract_strided_slice %70 {offsets = [14, 0], sizes = [1, 4], strides = [1, 1]} : vector<25x4xf32> to vector<1x4xf32>
    %363 = vector.shape_cast %362 : vector<1x4xf32> to vector<4xf32>
    %364 = vector.shape_cast %363 : vector<4xf32> to vector<1x1x4xf32>
    %365 = vector.broadcast %364 : vector<1x1x4xf32> to vector<8x16x4xf32>
    %366 = arith.mulf %361, %365 : vector<8x16x4xf32>
    %367 = arith.addf %360, %366 : vector<8x16x4xf32>
    %c11 = arith.constant 11 : index
    %c0_151 = arith.constant 0 : index
    %c0_152 = arith.constant 0 : index
    %368 = vector.load %arg8[%c11, %c0_151, %c0_152] : memref<20x24x4xf32, #tpu.memory_space<vmem>>, vector<8x16x4xf32>
    %369 = vector.extract_strided_slice %70 {offsets = [15, 0], sizes = [1, 4], strides = [1, 1]} : vector<25x4xf32> to vector<1x4xf32>
    %370 = vector.shape_cast %369 : vector<1x4xf32> to vector<4xf32>
    %371 = vector.shape_cast %370 : vector<4xf32> to vector<1x1x4xf32>
    %372 = vector.broadcast %371 : vector<1x1x4xf32> to vector<8x16x4xf32>
    %373 = arith.mulf %368, %372 : vector<8x16x4xf32>
    %374 = arith.addf %367, %373 : vector<8x16x4xf32>
    %c11_153 = arith.constant 11 : index
    %c1_154 = arith.constant 1 : index
    %c0_155 = arith.constant 0 : index
    %375 = vector.load %arg8[%c11_153, %c1_154, %c0_155] : memref<20x24x4xf32, #tpu.memory_space<vmem>>, vector<8x16x4xf32>
    %376 = vector.extract_strided_slice %70 {offsets = [16, 0], sizes = [1, 4], strides = [1, 1]} : vector<25x4xf32> to vector<1x4xf32>
    %377 = vector.shape_cast %376 : vector<1x4xf32> to vector<4xf32>
    %378 = vector.shape_cast %377 : vector<4xf32> to vector<1x1x4xf32>
    %379 = vector.broadcast %378 : vector<1x1x4xf32> to vector<8x16x4xf32>
    %380 = arith.mulf %375, %379 : vector<8x16x4xf32>
    %381 = arith.addf %374, %380 : vector<8x16x4xf32>
    %c11_156 = arith.constant 11 : index
    %c2_157 = arith.constant 2 : index
    %c0_158 = arith.constant 0 : index
    %382 = vector.load %arg8[%c11_156, %c2_157, %c0_158] : memref<20x24x4xf32, #tpu.memory_space<vmem>>, vector<8x16x4xf32>
    %383 = vector.extract_strided_slice %70 {offsets = [17, 0], sizes = [1, 4], strides = [1, 1]} : vector<25x4xf32> to vector<1x4xf32>
    %384 = vector.shape_cast %383 : vector<1x4xf32> to vector<4xf32>
    %385 = vector.shape_cast %384 : vector<4xf32> to vector<1x1x4xf32>
    %386 = vector.broadcast %385 : vector<1x1x4xf32> to vector<8x16x4xf32>
    %387 = arith.mulf %382, %386 : vector<8x16x4xf32>
    %388 = arith.addf %381, %387 : vector<8x16x4xf32>
    %c11_159 = arith.constant 11 : index
    %c3_160 = arith.constant 3 : index
    %c0_161 = arith.constant 0 : index
    %389 = vector.load %arg8[%c11_159, %c3_160, %c0_161] : memref<20x24x4xf32, #tpu.memory_space<vmem>>, vector<8x16x4xf32>
    %390 = vector.extract_strided_slice %70 {offsets = [18, 0], sizes = [1, 4], strides = [1, 1]} : vector<25x4xf32> to vector<1x4xf32>
    %391 = vector.shape_cast %390 : vector<1x4xf32> to vector<4xf32>
    %392 = vector.shape_cast %391 : vector<4xf32> to vector<1x1x4xf32>
    %393 = vector.broadcast %392 : vector<1x1x4xf32> to vector<8x16x4xf32>
    %394 = arith.mulf %389, %393 : vector<8x16x4xf32>
    %395 = arith.addf %388, %394 : vector<8x16x4xf32>
    %c11_162 = arith.constant 11 : index
    %c4_163 = arith.constant 4 : index
    %c0_164 = arith.constant 0 : index
    %396 = vector.load %arg8[%c11_162, %c4_163, %c0_164] : memref<20x24x4xf32, #tpu.memory_space<vmem>>, vector<8x16x4xf32>
    %397 = vector.extract_strided_slice %70 {offsets = [19, 0], sizes = [1, 4], strides = [1, 1]} : vector<25x4xf32> to vector<1x4xf32>
    %398 = vector.shape_cast %397 : vector<1x4xf32> to vector<4xf32>
    %399 = vector.shape_cast %398 : vector<4xf32> to vector<1x1x4xf32>
    %400 = vector.broadcast %399 : vector<1x1x4xf32> to vector<8x16x4xf32>
    %401 = arith.mulf %396, %400 : vector<8x16x4xf32>
    %402 = arith.addf %395, %401 : vector<8x16x4xf32>
    %c12 = arith.constant 12 : index
    %c0_165 = arith.constant 0 : index
    %c0_166 = arith.constant 0 : index
    %403 = vector.load %arg8[%c12, %c0_165, %c0_166] : memref<20x24x4xf32, #tpu.memory_space<vmem>>, vector<8x16x4xf32>
    %404 = vector.extract_strided_slice %70 {offsets = [20, 0], sizes = [1, 4], strides = [1, 1]} : vector<25x4xf32> to vector<1x4xf32>
    %405 = vector.shape_cast %404 : vector<1x4xf32> to vector<4xf32>
    %406 = vector.shape_cast %405 : vector<4xf32> to vector<1x1x4xf32>
    %407 = vector.broadcast %406 : vector<1x1x4xf32> to vector<8x16x4xf32>
    %408 = arith.mulf %403, %407 : vector<8x16x4xf32>
    %409 = arith.addf %402, %408 : vector<8x16x4xf32>
    %c12_167 = arith.constant 12 : index
    %c1_168 = arith.constant 1 : index
    %c0_169 = arith.constant 0 : index
    %410 = vector.load %arg8[%c12_167, %c1_168, %c0_169] : memref<20x24x4xf32, #tpu.memory_space<vmem>>, vector<8x16x4xf32>
    %411 = vector.extract_strided_slice %70 {offsets = [21, 0], sizes = [1, 4], strides = [1, 1]} : vector<25x4xf32> to vector<1x4xf32>
    %412 = vector.shape_cast %411 : vector<1x4xf32> to vector<4xf32>
    %413 = vector.shape_cast %412 : vector<4xf32> to vector<1x1x4xf32>
    %414 = vector.broadcast %413 : vector<1x1x4xf32> to vector<8x16x4xf32>
    %415 = arith.mulf %410, %414 : vector<8x16x4xf32>
    %416 = arith.addf %409, %415 : vector<8x16x4xf32>
    %c12_170 = arith.constant 12 : index
    %c2_171 = arith.constant 2 : index
    %c0_172 = arith.constant 0 : index
    %417 = vector.load %arg8[%c12_170, %c2_171, %c0_172] : memref<20x24x4xf32, #tpu.memory_space<vmem>>, vector<8x16x4xf32>
    %418 = vector.extract_strided_slice %70 {offsets = [22, 0], sizes = [1, 4], strides = [1, 1]} : vector<25x4xf32> to vector<1x4xf32>
    %419 = vector.shape_cast %418 : vector<1x4xf32> to vector<4xf32>
    %420 = vector.shape_cast %419 : vector<4xf32> to vector<1x1x4xf32>
    %421 = vector.broadcast %420 : vector<1x1x4xf32> to vector<8x16x4xf32>
    %422 = arith.mulf %417, %421 : vector<8x16x4xf32>
    %423 = arith.addf %416, %422 : vector<8x16x4xf32>
    %c12_173 = arith.constant 12 : index
    %c3_174 = arith.constant 3 : index
    %c0_175 = arith.constant 0 : index
    %424 = vector.load %arg8[%c12_173, %c3_174, %c0_175] : memref<20x24x4xf32, #tpu.memory_space<vmem>>, vector<8x16x4xf32>
    %425 = vector.extract_strided_slice %70 {offsets = [23, 0], sizes = [1, 4], strides = [1, 1]} : vector<25x4xf32> to vector<1x4xf32>
    %426 = vector.shape_cast %425 : vector<1x4xf32> to vector<4xf32>
    %427 = vector.shape_cast %426 : vector<4xf32> to vector<1x1x4xf32>
    %428 = vector.broadcast %427 : vector<1x1x4xf32> to vector<8x16x4xf32>
    %429 = arith.mulf %424, %428 : vector<8x16x4xf32>
    %430 = arith.addf %423, %429 : vector<8x16x4xf32>
    %c12_176 = arith.constant 12 : index
    %c4_177 = arith.constant 4 : index
    %c0_178 = arith.constant 0 : index
    %431 = vector.load %arg8[%c12_176, %c4_177, %c0_178] : memref<20x24x4xf32, #tpu.memory_space<vmem>>, vector<8x16x4xf32>
    %432 = vector.extract_strided_slice %70 {offsets = [24, 0], sizes = [1, 4], strides = [1, 1]} : vector<25x4xf32> to vector<1x4xf32>
    %433 = vector.shape_cast %432 : vector<1x4xf32> to vector<4xf32>
    %434 = vector.shape_cast %433 : vector<4xf32> to vector<1x1x4xf32>
    %435 = vector.broadcast %434 : vector<1x1x4xf32> to vector<8x16x4xf32>
    %436 = arith.mulf %431, %435 : vector<8x16x4xf32>
    %437 = arith.addf %430, %436 : vector<8x16x4xf32>
    %438 = vector.broadcast %72 : vector<1x1x4xf32> to vector<8x16x4xf32>
    %439 = arith.addf %437, %438 : vector<8x16x4xf32>
    %cst_179 = arith.constant 0.000000e+00 : f32
    %440 = vector.broadcast %cst_179 : f32 to vector<8x16x4xf32>
    %441 = arith.subf %440, %439 : vector<8x16x4xf32>
    %442 = math.exp %441 : vector<8x16x4xf32>
    %cst_180 = arith.constant 1.000000e+00 : f32
    %443 = vector.broadcast %cst_180 : f32 to vector<8x16x4xf32>
    %444 = arith.addf %443, %442 : vector<8x16x4xf32>
    %445 = tpu.reciprocal %444 {approx = true} : vector<8x16x4xf32> -> vector<8x16x4xf32>
    %446 = arith.mulf %439, %445 : vector<8x16x4xf32>
    %447 = arith.truncf %446 : vector<8x16x4xf32> to vector<8x16x4xbf16>
    %c0_181 = arith.constant 0 : index
    %c1_182 = arith.constant 1 : index
    %c8_183 = arith.constant 8 : index
    %c0_184 = arith.constant 0 : index
    %c0_185 = arith.constant 0 : index
    %448 = vector.load %arg7[%c0_181, %c1_182, %c8_183, %c0_184, %c0_185] : memref<1x2x16x16x4xbf16, #tpu.memory_space<vmem>>, vector<1x1x8x16x4xbf16>
    %449 = vector.shape_cast %448 : vector<1x1x8x16x4xbf16> to vector<8x16x4xbf16>
    %450 = vector.shape_cast %447 : vector<8x16x4xbf16> to vector<1x1x8x16x4xbf16>
    tpu.vector_store %arg7[%c0_181, %c1_182, %c8_183, %c0_184, %c0_185], %450 {strides = array<i32>} : memref<1x2x16x16x4xbf16, #tpu.memory_space<vmem>>, vector<1x1x8x16x4xbf16>,
    return
  }
  func.func @transform_0(%arg0: i32, %arg1: i32) -> (i32, i32, i32, i32) {
    %c0_i32 = arith.constant 0 : i32
    %c0_i32_0 = arith.constant 0 : i32
    %c0_i32_1 = arith.constant 0 : i32
    %c0_i32_2 = arith.constant 0 : i32
    return %arg0, %c0_i32, %c0_i32_0, %c0_i32_1 : i32, i32, i32, i32
  }
  func.func @transform_1(%arg0: i32, %arg1: i32) -> (i32, i32) {
    %c0_i32 = arith.constant 0 : i32
    %c0_i32_0 = arith.constant 0 : i32
    %c0_i32_1 = arith.constant 0 : i32
    return %c0_i32, %c0_i32_0 : i32, i32
  }
  func.func @transform_2(%arg0: i32, %arg1: i32) -> (i32, i32) {
    %c0_i32 = arith.constant 0 : i32
    %c0_i32_0 = arith.constant 0 : i32
    %c0_i32_1 = arith.constant 0 : i32
    return %c0_i32, %c0_i32_0 : i32, i32
  }
  func.func @transform_3(%arg0: i32, %arg1: i32) -> (i32, i32) {
    %c0_i32 = arith.constant 0 : i32
    %c0_i32_0 = arith.constant 0 : i32
    %c0_i32_1 = arith.constant 0 : i32
    return %c0_i32, %c0_i32_0 : i32, i32
  }
  func.func @transform_4(%arg0: i32, %arg1: i32) -> (i32, i32) {
    %c0_i32 = arith.constant 0 : i32
    %c0_i32_0 = arith.constant 0 : i32
    %c0_i32_1 = arith.constant 0 : i32
    return %c0_i32, %c0_i32_0 : i32, i32
  }
  func.func @transform_5(%arg0: i32, %arg1: i32) -> (i32, i32, i32, i32, i32) {
    %c0_i32 = arith.constant 0 : i32
    %c0_i32_0 = arith.constant 0 : i32
    %c0_i32_1 = arith.constant 0 : i32
    %c0_i32_2 = arith.constant 0 : i32
    return %arg0, %c0_i32, %arg1, %c0_i32_0, %c0_i32_1 : i32, i32, i32, i32, i32
  }
}

</mosaic_0001>

<bundles_post_ra>
// kernel: tpu_custom_call.1
= control target key start
LH: loop header
LB: loop body
LE: loop exit
PB: predicated region body
PF: predicated region fallthrough
CT: control target
= control target key end

     0   :  { %s5589_s18 = smov 0   ;;  %s5591_s19 = smov 0   ;;  %s10062_s0 = inlined_call_operand.vmem [shape: bf16[2,20,16,4], index: 0, kind: input, shape index: {}]   ;;  %s10063_s1 = inlined_call_operand.vmem [shape: bf16[4,4], index: 1, kind: input, shape index: {}]   ;;  %s10064_s2 = inlined_call_operand.vmem [shape: f32[1,4], index: 2, kind: input, shape index: {}]   ;;  %s10065_s3 = inlined_call_operand.vmem [shape: f32[25,4], index: 3, kind: input, shape index: {}]   ;;  %s10066_s4 = inlined_call_operand.vmem [shape: f32[1,4], index: 4, kind: input, shape index: {}]   ;;  %s10067_s5 = inlined_call_operand.vmem [shape: bf16[2,2,16,16,4], index: 5, kind: output, shape index: {}]  }
   0x1   :  { %s5593_s20 = smov 0  }
   0x2 LB: > { %s27_s21 = sadd.s32 1, %s5548_s19  ;;  %p4613_p0 = scmp.ge.s32.totalorder %s5552_s20, 1  ;;  %s5552_s20 = sphi %s5593_s20, %s15_s20   ;;  %s5548_s19 = sphi %s5591_s19, %s11199_s19   ;;  %s5544_s18 = sphi %s5589_s18, %s11198_s18  }
   0x3   : > { %p29_p1 = scmp.ge.s32.totalorder %s27_s21, 2  ;;  %p201_p2 = scmp.lt.s32.totalorder %s5552_s20, 3 }
   0x5   : > { %s11201_s21 = smov (%p29_p1, %s27_s21), 0  ;;  %p202_p3 = pnand %p4613_p0, %p201_p2 }
   0x7   : > { %205 = sbr.rel (%p202_p3) target bundleno = 1156 (0x484), region = 40 }
   0xc   : > { %p234_p4 = scmp.lt.s32.totalorder %s5544_s18, 1  ;;  %v5554_v0 = vmov 0   ;;  %vm1624_vm0 = vcmask 25600   ;;  %vm1665_vm1 = vcmask 31744   ;;  %vm1755_vm2 = vcmask 27648  }
   0xd   : > { %4803 = vset.pattern.permute.xlu2 %v5554_v0  ;;  %4792 = vset.pattern.permute.xlu1 %v5554_v0 }
   0xe   : > { %4781 = vset.pattern.permute.xlu0 %v5554_v0  ;;  %s11203_s18 = smov (!%p234_p4, %s5544_s18), 1 }
   0xf   : > { %s4751_s22 = smul.u32 160, %s11203_s18  ;;  %s4651_s30 = sshll.u32 %s11203_s18, 8 }
  0x10   : > { %s6299_s8 = scalar_lea.vmem %s10067_s5, %s4651_s30 }
  0x11   : > { %s5613_s25 = scalar_lea.vmem %s10062_s0, %s4751_s22 }
  0x12   : > { %v4735_v1 = vld [vmem:[%s5613_s25 + $0x20] sm:$0xff]   ;;  %v4733_v2 = vld [vmem:[%s5613_s25 + $0x10] sm:$0xff]   ;;  %v4736_v10 = vld [vmem:[%s5613_s25 + $0x28] sm:$0xff]  }
  0x13   : > { %v4653_v3 = vld [vmem:[%s5613_s25] sm:$0xff]   ;;  %v4670_v4 = vunpack.c.l.bf16 %v4735_v1  ;;  %v4671_v5 = vunpack.c.h.bf16 %v4735_v1  ;;  %v4662_v6 = vunpack.c.l.bf16 %v4733_v2  ;;  %v4663_v7 = vunpack.c.h.bf16 %v4733_v2  ;;  %v4734_v11 = vld [vmem:[%s5613_s25 + $0x18] sm:$0xff]   ;;  %v4732_v14 = vld [vmem:[%s5613_s25 + $0x8] sm:$0xff]  }
  0x14   : > { %v4654_v8 = vunpack.c.l.bf16 %v4653_v3  ;;  %v4655_v9 = vunpack.c.h.bf16 %v4653_v3  ;;  %v4674_v16 = vunpack.c.l.bf16 %v4736_v10  ;;  %v4675_v17 = vunpack.c.h.bf16 %v4736_v10  ;;  %v4739_v25 = vld [vmem:[%s5613_s25 + $0x40] sm:$0xff]   ;;  %v4738_v26 = vld [vmem:[%s5613_s25 + $0x38] sm:$0xff]   ;;  %v4737_v27 = vld [vmem:[%s5613_s25 + $0x30] sm:$0xff]  }
  0x15   : > { %v5620_v12 = vpack.i.bf16 %v4671_v5, %v4670_v4  ;;  %v5622_v13 = vpack.i.bf16 %v4663_v7, %v4662_v6  ;;  %v4666_v18 = vunpack.c.l.bf16 %v4734_v11  ;;  %v4667_v19 = vunpack.c.h.bf16 %v4734_v11  ;;  %v4742_v37 = vld [vmem:[%s5613_s25 + $0x58] sm:$0xff]   ;;  %v4741_v38 = vld [vmem:[%s5613_s25 + $0x50] sm:$0xff]   ;;  %v4740_v39 = vld [vmem:[%s5613_s25 + $0x48] sm:$0xff]  }
  0x16   : > { %v5625_v15 = vpack.i.bf16 %v4655_v9, %v4654_v8  ;;  %v4658_v20 = vunpack.c.l.bf16 %v4732_v14  ;;  %v4659_v21 = vunpack.c.h.bf16 %v4732_v14  ;;  %v5630_v22 = vpack.i.bf16 %v4675_v17, %v4674_v16  ;;  %v4745_v49 = vld [vmem:[%s5613_s25 + $0x70] sm:$0xff]   ;;  %v4744_v50 = vld [vmem:[%s5613_s25 + $0x68] sm:$0xff]   ;;  %v4743_v51 = vld [vmem:[%s5613_s25 + $0x60] sm:$0xff]  }
  0x17   : > { %4805 = vperm.xlu2 %4803, %v5620_v12   ;;  %4794 = vperm.xlu1 %4792, %v5622_v13   ;;  %v5632_v23 = vpack.i.bf16 %v4667_v19, %v4666_v18  ;;  %v4686_v28 = vunpack.c.l.bf16 %v4739_v25  ;;  %v4687_v29 = vunpack.c.h.bf16 %v4739_v25  ;;  %v4682_v30 = vunpack.c.l.bf16 %v4738_v26  ;;  %v4748_v61 = vld [vmem:[%s5613_s25 + $0x88] sm:$0xff]   ;;  %v4747_v62 = vld [vmem:[%s5613_s25 + $0x80] sm:$0xff]   ;;  %v4746_v63 = vld [vmem:[%s5613_s25 + $0x78] sm:$0xff]  }
  0x18   : > { %4783 = vperm.xlu0 %4781, %v5625_v15   ;;  %v5634_v24 = vpack.i.bf16 %v4659_v21, %v4658_v20  ;;  %v4683_v31 = vunpack.c.h.bf16 %v4738_v26  ;;  %v4678_v32 = vunpack.c.l.bf16 %v4737_v27  ;;  %v4679_v33 = vunpack.c.h.bf16 %v4737_v27  ;;  %v4750_v9 = vld [vmem:[%s5613_s25 + $0x98] sm:$0xff]   ;;  %v4749_v10 = vld [vmem:[%s5613_s25 + $0x90] sm:$0xff]  }
  0x19   : > { %v5642_v34 = vpack.i.bf16 %v4687_v29, %v4686_v28  ;;  %v4698_v40 = vunpack.c.l.bf16 %v4742_v37  ;;  %v4699_v41 = vunpack.c.h.bf16 %v4742_v37  ;;  %v4694_v42 = vunpack.c.l.bf16 %v4741_v38 }
  0x1a   : > { %v5644_v35 = vpack.i.bf16 %v4683_v31, %v4682_v30  ;;  %v5646_v36 = vpack.i.bf16 %v4679_v33, %v4678_v32  ;;  %v4695_v43 = vunpack.c.h.bf16 %v4741_v38  ;;  %v4690_v44 = vunpack.c.l.bf16 %v4740_v39 }
  0x1b   : > { %v4691_v45 = vunpack.c.h.bf16 %v4740_v39  ;;  %v5654_v46 = vpack.i.bf16 %v4699_v41, %v4698_v40  ;;  %v4710_v52 = vunpack.c.l.bf16 %v4745_v49  ;;  %v4711_v53 = vunpack.c.h.bf16 %v4745_v49  ;;  %v294_v40 = vld [vmem:[%s10063_s1] sm:$0x3] }
  0x1c   : > { %v5656_v47 = vpack.i.bf16 %v4695_v43, %v4694_v42  ;;  %v4706_v54 = vunpack.c.l.bf16 %v4744_v50  ;;  %v4707_v55 = vunpack.c.h.bf16 %v4744_v50  ;;  %v4702_v56 = vunpack.c.l.bf16 %v4743_v51 }
  0x1d   : > { %v5658_v48 = vpack.i.bf16 %v4691_v45, %v4690_v44  ;;  %v4703_v57 = vunpack.c.h.bf16 %v4743_v51  ;;  %v5666_v58 = vpack.i.bf16 %v4711_v53, %v4710_v52  ;;  %v4722_v0 = vunpack.c.l.bf16 %v4748_v61 }
  0x1e   : > { %v5668_v59 = vpack.i.bf16 %v4707_v55, %v4706_v54  ;;  %v4723_v1 = vunpack.c.h.bf16 %v4748_v61  ;;  %v4718_v2 = vunpack.c.l.bf16 %v4747_v62  ;;  %v4719_v3 = vunpack.c.h.bf16 %v4747_v62 }
  0x1f   : > { %4810 = vperm.xlu2 %4803, %v5630_v22   ;;  %4799 = vperm.xlu1 %4792, %v5632_v23   ;;  %v5670_v60 = vpack.i.bf16 %v4703_v57, %v4702_v56  ;;  %v4714_v4 = vunpack.c.l.bf16 %v4746_v63  ;;  %v4715_v5 = vunpack.c.h.bf16 %v4746_v63  ;;  %v4730_v11 = vunpack.c.l.bf16 %v4750_v9 }
  0x20   : > { %4788 = vperm.xlu0 %4781, %v5634_v24   ;;  %v5678_v6 = vpack.i.bf16 %v4723_v1, %v4722_v0  ;;  %v5680_v7 = vpack.i.bf16 %v4719_v3, %v4718_v2  ;;  %v4731_v14 = vunpack.c.h.bf16 %v4750_v9  ;;  %v4726_v16 = vunpack.c.l.bf16 %v4749_v10 }
  0x21   : > { %v5682_v8 = vpack.i.bf16 %v4715_v5, %v4714_v4  ;;  %v4727_v17 = vunpack.c.h.bf16 %v4749_v10  ;;  %v5555_v20 = vmov 1   ;;  %v5556_v26 = vmov 2  }
  0x22   : > { %v5689_v18 = vpack.i.bf16 %v4731_v14, %v4730_v11  ;;  %v5751_v41 = vunpack.c.l.bf16 %v294_v40  ;;  %v5557_v5 = vmov 3  }
  0x23   : > { %v5691_v19 = vpack.i.bf16 %v4727_v17, %v4726_v16 }
  0x24   : > { %v5757_v45 = vperm.slane %v5751_v41, 1  ;;  %v5764_v51 = vperm.slane %v5751_v41, 0 }
  0x27   : > { %4825 = vperm.xlu2 %4803, %v5642_v34   ;;  %4820 = vperm.xlu1 %4792, %v5644_v35  }
  0x28   : > { %4815 = vperm.xlu0 %4781, %v5646_v36  }
  0x2f   : > { %4840 = vperm.xlu2 %4803, %v5654_v46   ;;  %4835 = vperm.xlu1 %4792, %v5656_v47  }
  0x30   : > { %4830 = vperm.xlu0 %4781, %v5658_v48  }
  0x37   : > { %4855 = vperm.xlu2 %4803, %v5666_v58   ;;  %4850 = vperm.xlu1 %4792, %v5668_v59  }
  0x38   : > { %4845 = vperm.xlu0 %4781, %v5670_v60  }
  0x3f   : > { %4870 = vperm.xlu2 %4803, %v5678_v6   ;;  %4865 = vperm.xlu1 %4792, %v5680_v7  }
  0x40   : > { %4860 = vperm.xlu0 %4781, %v5682_v8  }
  0x47   : > { %4884 = vset.pattern.permute.xlu2 %v5555_v20  ;;  %4880 = vperm.xlu1 %4792, %v5689_v18  }
  0x48   : > { %4875 = vperm.xlu0 %4781, %v5691_v19   ;;  %4886 = vperm.xlu2 %4884, %v5625_v15  }
  0x4f   : > { %4896 = vset.pattern.permute.xlu1 %v5555_v20 }
  0x50   : > { %4890 = vset.pattern.permute.xlu0 %v5555_v20  ;;  %4898 = vperm.xlu1 %4896, %v5622_v13  }
  0x51   : > { %4903 = vperm.xlu2 %4884, %v5632_v23   ;;  %4892 = vperm.xlu0 %4890, %v5634_v24  }
  0x58   : > { %4908 = vperm.xlu1 %4896, %v5620_v12  }
  0x59   : > { %4913 = vperm.xlu2 %4884, %v5630_v22   ;;  %4918 = vperm.xlu0 %4890, %v5646_v36  }
  0x60   : > { %4923 = vperm.xlu1 %4896, %v5644_v35  }
  0x61   : > { %4928 = vperm.xlu2 %4884, %v5642_v34   ;;  %4933 = vperm.xlu0 %4890, %v5658_v48  }
  0x68   : > { %4938 = vperm.xlu1 %4896, %v5656_v47  }
  0x69   : > { %4943 = vperm.xlu2 %4884, %v5654_v46   ;;  %4948 = vperm.xlu0 %4890, %v5670_v60  }
  0x70   : > { %4953 = vperm.xlu1 %4896, %v5668_v59  }
  0x71   : > { %4958 = vperm.xlu2 %4884, %v5666_v58   ;;  %4963 = vperm.xlu0 %4890, %v5682_v8   ;;  %v5711_v21 = vpop.permute.xlu2 %4805 }
  0x78   : > { %4968 = vperm.xlu1 %4896, %v5680_v7  }
  0x79   : > { %4973 = vperm.xlu2 %4884, %v5678_v6   ;;  %4978 = vperm.xlu0 %4890, %v5691_v19   ;;  %v5716_v25 = vpop.permute.xlu2 %4810 }
  0x7a   : > { %v4813_v3 = vunpack.i.h.bf16 %v5716_v25  ;;  %v4812_v4 = vunpack.i.l.bf16 %v5716_v25 }
  0x7c   : > { %v548_v16 = vmul.f32 %v4813_v3, %v5764_v51  ;;  %v547_v17 = vmul.f32 %v4812_v4, %v5764_v51 }
  0x80   : > { %4983 = vperm.xlu1 %4896, %v5689_v18  }
  0x81   : > { %4987 = vset.pattern.permute.xlu2 %v5556_v26  ;;  %4993 = vset.pattern.permute.xlu0 %v5556_v26  ;;  %v5719_v27 = vpop.permute.xlu2 %4825 }
  0x82   : > { %4989 = vperm.xlu2 %4987, %v5625_v15   ;;  %4995 = vperm.xlu0 %4993, %v5634_v24   ;;  %v4828_v25 = vunpack.i.h.bf16 %v5719_v27 }
  0x88   : > { %4999 = vset.pattern.permute.xlu1 %v5556_v26 }
  0x89   : > { %v5723_v28 = vpop.permute.xlu2 %4840  ;;  %5001 = vperm.xlu1 %4999, %v5622_v13   ;;  %v5726_v29 = vpop.permute.xlu1 %4794 }
  0x8a   : > { %5006 = vperm.xlu2 %4987, %v5632_v23   ;;  %5021 = vperm.xlu0 %4993, %v5646_v36   ;;  %v4784_v30 = vpop.permute.xlu0 %4783  ;;  %v4796_v3 = vunpack.i.l.bf16 %v5726_v29 }
  0x8b   : > { %v4786_v42 = vunpack.i.h.bf16 %v4784_v30  ;;  %v4785_v43 = vunpack.i.l.bf16 %v4784_v30  ;;  %v4827_v30 = vunpack.i.l.bf16 %v5719_v27 }
  0x8d   : > { %v538_v54 = vmul.f32 %v4786_v42, %v5764_v51  ;;  %v537_v55 = vmul.f32 %v4785_v43, %v5764_v51  ;;  %v553_v27 = vmul.f32 %v4827_v30, %v5764_v51 }
  0x91   : > { %v5730_v31 = vpop.permute.xlu2 %4855  ;;  %5011 = vperm.xlu1 %4999, %v5620_v12   ;;  %v5733_v32 = vpop.permute.xlu1 %4799 }
  0x92   : > { %5016 = vperm.xlu2 %4987, %v5630_v22   ;;  %5036 = vperm.xlu0 %4993, %v5658_v48   ;;  %v5737_v33 = vpop.permute.xlu0 %4788 }
  0x93   : > { %v4791_v4 = vunpack.i.h.bf16 %v5737_v33 }
  0x95   : > { %v540_v30 = vmul.f32 %v4791_v4, %v5764_v51 }
  0x99   : > { %v5739_v37 = vpop.permute.xlu2 %4870  ;;  %5026 = vperm.xlu1 %4999, %v5644_v35   ;;  %v5742_v38 = vpop.permute.xlu1 %4820 }
  0x9a   : > { %5031 = vperm.xlu2 %4987, %v5642_v34   ;;  %5051 = vperm.xlu0 %4993, %v5670_v60   ;;  %v5746_v39 = vpop.permute.xlu0 %4815 }
  0xa1   : > { %5041 = vperm.xlu1 %4999, %v5656_v47   ;;  %v5754_v44 = vpop.permute.xlu1 %4835 }
  0xa2   : > { %5046 = vperm.xlu2 %4987, %v5654_v46   ;;  %5066 = vperm.xlu0 %4993, %v5682_v8   ;;  %v5761_v49 = vpop.permute.xlu0 %4830  ;;  %v4887_v50 = vpop.permute.xlu2 %4886 }
  0xa3   : > { %v4889_v52 = vunpack.i.h.bf16 %v4887_v50  ;;  %v4888_v53 = vunpack.i.l.bf16 %v4887_v50 }
  0xa5   : > { %v779_v56 = vmul.f32 %v4889_v52, %v5757_v45  ;;  %v778_v57 = vmul.f32 %v4888_v53, %v5757_v45  ;;  %v554_v52 = vmul.f32 %v4828_v25, %v5764_v51  ;;  %v4858_v25 = vunpack.i.h.bf16 %v5730_v31 }
  0xa7   : > { %v5770_v61 = vadd.f32 %v778_v57, %v537_v55  ;;  %v5772_v62 = vadd.f32 %v779_v56, %v538_v54  ;;  %v4843_v55 = vunpack.i.h.bf16 %v5723_v28  ;;  %v4842_v56 = vunpack.i.l.bf16 %v5723_v28 }
  0xa8   : > { %v4797_v57 = vunpack.i.h.bf16 %v5726_v29  ;;  %v4807_v28 = vunpack.i.l.bf16 %v5711_v21 }
  0xa9   : > { %5056 = vperm.xlu1 %4999, %v5668_v59   ;;  %v5775_v63 = vpop.permute.xlu1 %4850  ;;  %v559_v29 = vmul.f32 %v4842_v56, %v5764_v51 }
  0xaa   : > { %5061 = vperm.xlu2 %4987, %v5666_v58   ;;  %5081 = vperm.xlu0 %4993, %v5691_v19   ;;  %v5779_v0 = vpop.permute.xlu0 %4845 }
  0xab   : > { %v5781_v1 = vpop.permute.xlu2 %4903 }
  0xb1   : > { %5071 = vperm.xlu1 %4999, %v5680_v7   ;;  %v5784_v2 = vpop.permute.xlu1 %4865 }
  0xb2   : > { %5076 = vperm.xlu2 %4987, %v5678_v6   ;;  %5096 = vset.pattern.permute.xlu0 %v5557_v5  ;;  %v5789_v9 = vpop.permute.xlu0 %4860 }
  0xb3   : > { %v4914_v10 = vpop.permute.xlu2 %4913  ;;  %5098 = vperm.xlu0 %5096, %v5634_v24  }
  0xb4   : > { %v4916_v11 = vunpack.i.h.bf16 %v4914_v10  ;;  %v4915_v14 = vunpack.i.l.bf16 %v4914_v10  ;;  %v4790_v10 = vunpack.i.l.bf16 %v5737_v33  ;;  %v4857_v33 = vunpack.i.l.bf16 %v5730_v31 }
  0xb6   : > { %v789_v20 = vmul.f32 %v4916_v11, %v5757_v45  ;;  %v788_v26 = vmul.f32 %v4915_v14, %v5757_v45  ;;  %v4808_v11 = vunpack.i.h.bf16 %v5711_v21  ;;  %v539_v21 = vmul.f32 %v4790_v10, %v5764_v51 }
  0xb8   : > { %v5798_v40 = vadd.f32 %v789_v20, %v548_v16  ;;  %v5800_v42 = vadd.f32 %v788_v26, %v547_v17  ;;  %v560_v17 = vmul.f32 %v4843_v55, %v5764_v51  ;;  %v542_v20 = vmul.f32 %v4797_v57, %v5764_v51 }
  0xb9   : > { %5086 = vperm.xlu1 %4999, %v5689_v18   ;;  %v5803_v24 = vpop.permute.xlu1 %4880  ;;  %v541_v26 = vmul.f32 %v4796_v3, %v5764_v51  ;;  %v4817_v3 = vunpack.i.l.bf16 %v5746_v39 }
  0xba   : > { %5090 = vset.pattern.permute.xlu2 %v5557_v5  ;;  %v5805_v43 = vpop.permute.xlu0 %4875 }
  0xbb   : > { %5092 = vperm.xlu2 %5090, %v5625_v15   ;;  %v4929_v50 = vpop.permute.xlu2 %4928  ;;  %5124 = vperm.xlu0 %5096, %v5646_v36  }
  0xbc   : > { %v4931_v53 = vunpack.i.h.bf16 %v4929_v50  ;;  %v4930_v54 = vunpack.i.l.bf16 %v4929_v50 }
  0xbe   : > { %v795_v15 = vmul.f32 %v4931_v53, %v5757_v45  ;;  %v794_v36 = vmul.f32 %v4930_v54, %v5757_v45 }
  0xc0   : > { %v5820_v14 = vadd.f32 %v795_v15, %v554_v52  ;;  %v5822_v16 = vadd.f32 %v794_v36, %v553_v27  ;;  %v4818_v52 = vunpack.i.h.bf16 %v5746_v39 }
  0xc1   : > { %5102 = vset.pattern.permute.xlu1 %v5557_v5 }
  0xc2   : > { %5104 = vperm.xlu1 %5102, %v5622_v13   ;;  %v4899_v50 = vpop.permute.xlu1 %4898 }
  0xc3   : > { %v4901_v27 = vunpack.i.h.bf16 %v4899_v50  ;;  %v4900_v53 = vunpack.i.l.bf16 %v4899_v50  ;;  %5109 = vperm.xlu2 %5090, %v5632_v23   ;;  %v4944_v5 = vpop.permute.xlu2 %4943  ;;  %5139 = vperm.xlu0 %5096, %v5658_v48   ;;  %v4893_v54 = vpop.permute.xlu0 %4892 }
  0xc4   : > { %v4946_v55 = vunpack.i.h.bf16 %v4944_v5  ;;  %v4945_v56 = vunpack.i.l.bf16 %v4944_v5  ;;  %v4895_v31 = vunpack.i.h.bf16 %v4893_v54  ;;  %v4894_v57 = vunpack.i.l.bf16 %v4893_v54 }
  0xc5   : > { %v783_v13 = vmul.f32 %v4901_v27, %v5757_v45  ;;  %v782_v4 = vmul.f32 %v4900_v53, %v5757_v45  ;;  %v546_v53 = vmul.f32 %v4808_v11, %v5764_v51  ;;  %v549_v11 = vmul.f32 %v4817_v3, %v5764_v51 }
  0xc6   : > { %v801_v15 = vmul.f32 %v4946_v55, %v5757_v45  ;;  %v800_v36 = vmul.f32 %v4945_v56, %v5757_v45  ;;  %v781_v23 = vmul.f32 %v4895_v31, %v5757_v45  ;;  %v780_v10 = vmul.f32 %v4894_v57, %v5757_v45 }
  0xc7   : > { %v5844_v48 = vadd.f32 %v782_v4, %v541_v26  ;;  %v5846_v50 = vadd.f32 %v783_v13, %v542_v20  ;;  %v545_v55 = vmul.f32 %v4807_v28, %v5764_v51  ;;  %v566_v56 = vmul.f32 %v4858_v25, %v5764_v51 }
  0xc8   : > { %v5848_v5 = vadd.f32 %v801_v15, %v560_v17  ;;  %v5850_v54 = vadd.f32 %v800_v36, %v559_v29  ;;  %v5852_v39 = vadd.f32 %v780_v10, %v539_v21  ;;  %v5854_v27 = vadd.f32 %v781_v23, %v540_v30 }
  0xc9   : > { %v565_v31 = vmul.f32 %v4857_v33, %v5764_v51  ;;  %v4873_v26 = vunpack.i.h.bf16 %v5739_v37  ;;  %v4872_v20 = vunpack.i.l.bf16 %v5739_v37  ;;  %v4823_v17 = vunpack.i.h.bf16 %v5742_v38 }
  0xca   : > { %v4822_v29 = vunpack.i.l.bf16 %v5742_v38  ;;  %5114 = vperm.xlu1 %5102, %v5620_v12   ;;  %v4909_v30 = vpop.permute.xlu1 %4908  ;;  %v550_v21 = vmul.f32 %v4818_v52, %v5764_v51  ;;  %v4833_v38 = vunpack.i.h.bf16 %v5761_v49 }
  0xcb   : > { %v4911_v28 = vunpack.i.h.bf16 %v4909_v30  ;;  %v4910_v57 = vunpack.i.l.bf16 %v4909_v30  ;;  %5119 = vperm.xlu2 %5090, %v5630_v22   ;;  %v4959_v25 = vpop.permute.xlu2 %4958  ;;  %5154 = vperm.xlu0 %5096, %v5670_v60   ;;  %v4919_v33 = vpop.permute.xlu0 %4918 }
  0xcc   : > { %v4961_v37 = vunpack.i.h.bf16 %v4959_v25  ;;  %v4960_v13 = vunpack.i.l.bf16 %v4959_v25  ;;  %v4921_v4 = vunpack.i.h.bf16 %v4919_v33  ;;  %v4920_v15 = vunpack.i.l.bf16 %v4919_v33 }
  0xcd   : > { %v787_v12 = vmul.f32 %v4911_v28, %v5757_v45  ;;  %v786_v52 = vmul.f32 %v4910_v57, %v5757_v45  ;;  %v4832_v57 = vunpack.i.l.bf16 %v5761_v49 }
  0xce   : > { %v807_v3 = vmul.f32 %v4961_v37, %v5757_v45  ;;  %v806_v36 = vmul.f32 %v4960_v13, %v5757_v45  ;;  %v791_v22 = vmul.f32 %v4921_v4, %v5757_v45  ;;  %v790_v23 = vmul.f32 %v4920_v15, %v5757_v45 }
  0xcf   : > { %v5876_v60 = vadd.f32 %v787_v12, %v546_v53  ;;  %v5878_v10 = vadd.f32 %v786_v52, %v545_v55  ;;  %v572_v37 = vmul.f32 %v4873_v26, %v5764_v51  ;;  %v571_v13 = vmul.f32 %v4872_v20, %v5764_v51 }
  0xd0   : > { %v5880_v30 = vadd.f32 %v807_v3, %v566_v56  ;;  %v5882_v25 = vadd.f32 %v806_v36, %v565_v31  ;;  %v5884_v33 = vadd.f32 %v790_v23, %v549_v11  ;;  %v5886_v28 = vadd.f32 %v791_v22, %v550_v21 }
  0xd1   : > { %v552_v4 = vmul.f32 %v4823_v17, %v5764_v51  ;;  %v551_v53 = vmul.f32 %v4822_v29, %v5764_v51  ;;  %v4838_v56 = vunpack.i.h.bf16 %v5754_v44  ;;  %v556_v31 = vmul.f32 %v4833_v38, %v5764_v51 }
  0xd2   : > { %5129 = vperm.xlu1 %5102, %v5644_v35   ;;  %v4924_v55 = vpop.permute.xlu1 %4923  ;;  %v555_v29 = vmul.f32 %v4832_v57, %v5764_v51 }
  0xd3   : > { %v4926_v11 = vunpack.i.h.bf16 %v4924_v55  ;;  %v4925_v21 = vunpack.i.l.bf16 %v4924_v55  ;;  %5134 = vperm.xlu2 %5090, %v5642_v34   ;;  %v4974_v49 = vpop.permute.xlu2 %4973  ;;  %5169 = vperm.xlu0 %5096, %v5682_v8   ;;  %v4934_v26 = vpop.permute.xlu0 %4933 }
  0xd4   : > { %v4976_v20 = vunpack.i.h.bf16 %v4974_v49  ;;  %v4975_v15 = vunpack.i.l.bf16 %v4974_v49  ;;  %v4936_v17 = vunpack.i.h.bf16 %v4934_v26  ;;  %v4935_v12 = vunpack.i.l.bf16 %v4934_v26 }
  0xd5   : > { %v793_v35 = vmul.f32 %v4926_v11, %v5757_v45  ;;  %v792_v52 = vmul.f32 %v4925_v21, %v5757_v45  ;;  %v4837_v21 = vunpack.i.l.bf16 %v5754_v44  ;;  %v4848_v49 = vunpack.i.h.bf16 %v5779_v0 }
  0xd6   : > { %v813_v38 = vmul.f32 %v4976_v20, %v5757_v45  ;;  %v812_v3 = vmul.f32 %v4975_v15, %v5757_v45  ;;  %v797_v34 = vmul.f32 %v4936_v17, %v5757_v45  ;;  %v796_v36 = vmul.f32 %v4935_v12, %v5757_v45 }
  0xd7   : > { %v5905_v8 = vadd.f32 %v792_v52, %v551_v53  ;;  %v5907_v22 = vadd.f32 %v793_v35, %v552_v4  ;;  %v4847_v26 = vunpack.i.l.bf16 %v5779_v0  ;;  %v557_v44 = vmul.f32 %v4837_v21, %v5764_v51 }
  0xd8   : > { %v5909_v23 = vadd.f32 %v813_v38, %v572_v37  ;;  %v5911_v55 = vadd.f32 %v812_v3, %v571_v13  ;;  %v5913_v57 = vadd.f32 %v796_v36, %v555_v29  ;;  %v5915_v11 = vadd.f32 %v797_v34, %v556_v31 }
  0xd9   : > { %v558_v13 = vmul.f32 %v4838_v56, %v5764_v51  ;;  %v562_v0 = vmul.f32 %v4848_v49, %v5764_v51  ;;  %v561_v29 = vmul.f32 %v4847_v26, %v5764_v51  ;;  %v4853_v52 = vunpack.i.h.bf16 %v5775_v63 }
  0xda   : > { %5144 = vperm.xlu1 %5102, %v5656_v47   ;;  %v4939_v53 = vpop.permute.xlu1 %4938  ;;  %v4852_v34 = vunpack.i.l.bf16 %v5775_v63  ;;  %v4863_v36 = vunpack.i.h.bf16 %v5789_v9  ;;  %v4862_v21 = vunpack.i.l.bf16 %v5789_v9 }
  0xdb   : > { %v4941_v20 = vunpack.i.h.bf16 %v4939_v53  ;;  %v4940_v4 = vunpack.i.l.bf16 %v4939_v53  ;;  %5149 = vperm.xlu2 %5090, %v5654_v46   ;;  %5184 = vperm.xlu0 %5096, %v5691_v19   ;;  %v4949_v37 = vpop.permute.xlu0 %4948 }
  0xdc   : > { %v4951_v31 = vunpack.i.h.bf16 %v4949_v37  ;;  %v4950_v15 = vunpack.i.l.bf16 %v4949_v37  ;;  %v5924_v17 = vpop.permute.xlu2 %4989  ;;  %v563_v63 = vmul.f32 %v4852_v34, %v5764_v51  ;;  %v4878_v34 = vunpack.i.h.bf16 %v5805_v43 }
  0xdd   : > { %v799_v47 = vmul.f32 %v4941_v20, %v5757_v45  ;;  %v798_v12 = vmul.f32 %v4940_v4, %v5757_v45  ;;  %v564_v4 = vmul.f32 %v4853_v52, %v5764_v51  ;;  %v4867_v52 = vunpack.i.l.bf16 %v5784_v2 }
  0xde   : > { %v803_v46 = vmul.f32 %v4951_v31, %v5757_v45  ;;  %v802_v19 = vmul.f32 %v4950_v15, %v5757_v45  ;;  %v568_v15 = vmul.f32 %v4863_v36, %v5764_v51  ;;  %v4877_v36 = vunpack.i.l.bf16 %v5805_v43 }
  0xdf   : > { %v5933_v35 = vadd.f32 %v798_v12, %v557_v44  ;;  %v5935_v56 = vadd.f32 %v799_v47, %v558_v13  ;;  %v567_v44 = vmul.f32 %v4862_v21, %v5764_v51 }
  0xe0   : > { %v5938_v38 = vadd.f32 %v802_v19, %v561_v29  ;;  %v5940_v3 = vadd.f32 %v803_v46, %v562_v0  ;;  %v4868_v29 = vunpack.i.h.bf16 %v5784_v2  ;;  %v569_v2 = vmul.f32 %v4867_v52, %v5764_v51 }
  0xe2   : > { %5159 = vperm.xlu1 %5102, %v5668_v59   ;;  %v4954_v49 = vpop.permute.xlu1 %4953 }
  0xe3   : > { %v4956_v26 = vunpack.i.h.bf16 %v4954_v49  ;;  %v4955_v53 = vunpack.i.l.bf16 %v4954_v49  ;;  %5164 = vperm.xlu2 %5090, %v5666_v58   ;;  %v4964_v20 = vpop.permute.xlu0 %4963 }
  0xe4   : > { %v4966_v37 = vunpack.i.h.bf16 %v4964_v20  ;;  %v4965_v13 = vunpack.i.l.bf16 %v4964_v20  ;;  %v5948_v31 = vpop.permute.xlu2 %5006  ;;  %v570_v20 = vmul.f32 %v4868_v29, %v5764_v51 }
  0xe5   : > { %v805_v9 = vmul.f32 %v4956_v26, %v5757_v45  ;;  %v804_v59 = vmul.f32 %v4955_v53, %v5757_v45 }
  0xe6   : > { %v809_v0 = vmul.f32 %v4966_v37, %v5757_v45  ;;  %v808_v58 = vmul.f32 %v4965_v13, %v5757_v45 }
  0xe7   : > { %v5957_v47 = vadd.f32 %v804_v59, %v563_v63  ;;  %v5959_v12 = vadd.f32 %v805_v9, %v564_v4  ;;  %v574_v63 = vmul.f32 %v4878_v34, %v5764_v51 }
  0xe8   : > { %v5962_v46 = vadd.f32 %v808_v58, %v567_v44  ;;  %v5964_v19 = vadd.f32 %v809_v0, %v568_v15  ;;  %v573_v15 = vmul.f32 %v4877_v36, %v5764_v51  ;;  %v4883_v0 = vunpack.i.h.bf16 %v5803_v24 }
  0xe9   : > { %v4882_v58 = vunpack.i.l.bf16 %v5803_v24 }
  0xea   : > { %5174 = vperm.xlu1 %5102, %v5680_v7   ;;  %v4969_v21 = vpop.permute.xlu1 %4968 }
  0xeb   : > { %v4971_v49 = vunpack.i.h.bf16 %v4969_v21  ;;  %v4970_v26 = vunpack.i.l.bf16 %v4969_v21  ;;  %5179 = vperm.xlu2 %5090, %v5678_v6   ;;  %v4979_v53 = vpop.permute.xlu0 %4978 }
  0xec   : > { %v4981_v4 = vunpack.i.h.bf16 %v4979_v53  ;;  %v4980_v37 = vunpack.i.l.bf16 %v4979_v53  ;;  %v5972_v13 = vpop.permute.xlu2 %5016  ;;  %v5995_v53 = vperm.slane %v5751_v41, 2 }
  0xed   : > { %v811_v43 = vmul.f32 %v4971_v49, %v5757_v45  ;;  %v810_v7 = vmul.f32 %v4970_v26, %v5757_v45  ;;  %v576_v49 = vmul.f32 %v4883_v0, %v5764_v51  ;;  %v575_v26 = vmul.f32 %v4882_v58, %v5764_v51 }
  0xee   : > { %v815_v9 = vmul.f32 %v4981_v4, %v5757_v45  ;;  %v814_v6 = vmul.f32 %v4980_v37, %v5757_v45  ;;  %v10068_v0 = vmov 0.0  }
  0xef   : > { %v5981_v59 = vadd.f32 %v810_v7, %v569_v2  ;;  %v5983_v44 = vadd.f32 %v811_v43, %v570_v20  ;;  %1625 = vst.msk [vmem:[#allocation2] sm:$0x3] %vm1624_vm0, %v10068_v0 }
  0xf0   : > { %v5987_v29 = vadd.f32 %v814_v6, %v573_v15  ;;  %v5989_v52 = vadd.f32 %v815_v9, %v574_v63  ;;  %1645 = vst.msk [vmem:[#allocation2 + $0x12] sm:$0x3] %vm1624_vm0, %v10068_v0 }
  0xf1   : > { %1626 = vst.msk [vmem:[#allocation2 + $0x18] sm:$0x3] %vm1624_vm0, %v10068_v0 }
  0xf2   : > { %5189 = vperm.xlu1 %5102, %v5689_v18   ;;  %v4984_v34 = vpop.permute.xlu1 %4983  ;;  %1627 = vst.msk [vmem:[#allocation2 + $0x30] sm:$0x3] %vm1624_vm0, %v10068_v0 }
  0xf3   : > { %v4986_v36 = vunpack.i.h.bf16 %v4984_v34  ;;  %v4985_v21 = vunpack.i.l.bf16 %v4984_v34  ;;  %1628 = vst.msk [vmem:[#allocation2 + $0x48] sm:$0x3] %vm1624_vm0, %v10068_v0 }
  0xf4   : > { %v5032_v20 = vpop.permute.xlu2 %5031  ;;  %v5997_v4 = vpop.permute.xlu0 %4995  ;;  %1629 = vst.msk [vmem:[#allocation2 + $0x60] sm:$0x3] %vm1624_vm0, %v10068_v0 }
  0xf5   : > { %v817_v24 = vmul.f32 %v4986_v36, %v5757_v45  ;;  %v816_v37 = vmul.f32 %v4985_v21, %v5757_v45  ;;  %v5034_v2 = vunpack.i.h.bf16 %v5032_v20  ;;  %v5033_v63 = vunpack.i.l.bf16 %v5032_v20  ;;  %1630 = vst.msk [vmem:[#allocation2 + $0x78] sm:$0x3] %vm1624_vm0, %v10068_v0 }
  0xf6   : > { %1631 = vst.msk [vmem:[#allocation2 + $0x90] sm:$0x3] %vm1624_vm0, %v10068_v0 }
  0xf7   : > { %v6001_v18 = vadd.f32 %v816_v37, %v575_v26  ;;  %v6003_v43 = vadd.f32 %v817_v24, %v576_v49  ;;  %v1036_v7 = vmul.f32 %v5034_v2, %v5995_v53  ;;  %v1035_v15 = vmul.f32 %v5033_v63, %v5995_v53  ;;  %1632 = vst.msk [vmem:[#allocation2 + $0xa8] sm:$0x3] %vm1624_vm0, %v10068_v0 }
  0xf8   : > { %1633 = vst.msk [vmem:[#allocation2 + $0xc0] sm:$0x3] %vm1624_vm0, %v10068_v0 }
  0xf9   : > { %v6008_v9 = vadd.f32 %v1035_v15, %v5822_v16  ;;  %v6011_v6 = vadd.f32 %v1036_v7, %v5820_v14  ;;  %1634 = vst.msk [vmem:[#allocation2 + $0xd8] sm:$0x3] %vm1624_vm0, %v10068_v0 }
  0xfa   : > { %1635 = vst.msk [vmem:[#allocation2 + $0xf0] sm:$0x3] %vm1624_vm0, %v10068_v0 }
  0xfb   : > { %v6015_v58 = vpop.permute.xlu1 %5001  ;;  %1636 = vst.msk [vmem:[#allocation2 + $0x108] sm:$0x3] %vm1624_vm0, %v10068_v0 }
  0xfc   : > { %v5047_v34 = vpop.permute.xlu2 %5046  ;;  %v5022_v36 = vpop.permute.xlu0 %5021  ;;  %1637 = vst.msk [vmem:[#allocation2 + $0x120] sm:$0x3] %vm1624_vm0, %v10068_v0 }
  0xfd   : > { %v5049_v16 = vunpack.i.h.bf16 %v5047_v34  ;;  %v5048_v21 = vunpack.i.l.bf16 %v5047_v34  ;;  %v5024_v49 = vunpack.i.h.bf16 %v5022_v36  ;;  %v5023_v14 = vunpack.i.l.bf16 %v5022_v36  ;;  %1638 = vst.msk [vmem:[#allocation2 + $0x138] sm:$0x3] %vm1624_vm0, %v10068_v0 }
  0xfe   : > { %1639 = vst.msk [vmem:[#allocation2 + $0x150] sm:$0x3] %vm1624_vm0, %v10068_v0 }
  0xff   : > { %v1042_v26 = vmul.f32 %v5049_v16, %v5995_v53  ;;  %v1041_v20 = vmul.f32 %v5048_v21, %v5995_v53  ;;  %v1032_v24 = vmul.f32 %v5024_v49, %v5995_v53  ;;  %v1031_v37 = vmul.f32 %v5023_v14, %v5995_v53  ;;  %1640 = vst.msk [vmem:[#allocation2 + $0x168] sm:$0x3] %vm1624_vm0, %v10068_v0 }
 0x100   : > { %1641 = vst.msk [vmem:[#allocation2 + $0x180] sm:$0x3] %vm1624_vm0, %v10068_v0 }
 0x101   : > { %v6034_v2 = vadd.f32 %v1041_v20, %v5850_v54  ;;  %v6037_v63 = vadd.f32 %v1042_v26, %v5848_v5  ;;  %v6040_v7 = vadd.f32 %v1031_v37, %v5884_v33  ;;  %v6043_v15 = vadd.f32 %v1032_v24, %v5886_v28  ;;  %1642 = vst.msk [vmem:[#allocation2 + $0x198] sm:$0x3] %vm1624_vm0, %v10068_v0 }
 0x102   : > { %1643 = vst.msk [vmem:[#allocation2 + $0x1b0] sm:$0x3] %vm1624_vm0, %v10068_v0 }
 0x103   : > { %v5012_v34 = vpop.permute.xlu1 %5011  ;;  %1644 = vst.msk [vmem:[#allocation2 + $0x1c8] sm:$0x3] %vm1624_vm0, %v10068_v0 }
 0x104   : > { %v5014_v54 = vunpack.i.h.bf16 %v5012_v34  ;;  %v5013_v36 = vunpack.i.l.bf16 %v5012_v34  ;;  %v5062_v5 = vpop.permute.xlu2 %5061  ;;  %v5037_v16 = vpop.permute.xlu0 %5036  ;;  %1646 = vst.msk [vmem:[#allocation2 + $0x2a] sm:$0x3] %vm1624_vm0, %v10068_v0 }
 0x105   : > { %v5064_v33 = vunpack.i.h.bf16 %v5062_v5  ;;  %v5063_v28 = vunpack.i.l.bf16 %v5062_v5  ;;  %v5039_v21 = vunpack.i.h.bf16 %v5037_v16  ;;  %v5038_v49 = vunpack.i.l.bf16 %v5037_v16  ;;  %1647 = vst.msk [vmem:[#allocation2 + $0x42] sm:$0x3] %vm1624_vm0, %v10068_v0 }
 0x106   : > { %v1028_v14 = vmul.f32 %v5014_v54, %v5995_v53  ;;  %v1027_v26 = vmul.f32 %v5013_v36, %v5995_v53  ;;  %1648 = vst.msk [vmem:[#allocation2 + $0x5a] sm:$0x3] %vm1624_vm0, %v10068_v0 }
 0x107   : > { %v1048_v20 = vmul.f32 %v5064_v33, %v5995_v53  ;;  %v1047_v24 = vmul.f32 %v5063_v28, %v5995_v53  ;;  %v1038_v37 = vmul.f32 %v5039_v21, %v5995_v53  ;;  %v1037_v34 = vmul.f32 %v5038_v49, %v5995_v53  ;;  %1649 = vst.msk [vmem:[#allocation2 + $0x72] sm:$0x3] %vm1624_vm0, %v10068_v0 }
 0x108   : > { %v6066_v5 = vadd.f32 %v1027_v26, %v5878_v10  ;;  %v6069_v54 = vadd.f32 %v1028_v14, %v5876_v60  ;;  %v4992_v26 = vunpack.i.h.bf16 %v5924_v17  ;;  %1650 = vst.msk [vmem:[#allocation2 + $0x8a] sm:$0x3] %vm1624_vm0, %v10068_v0 }
 0x109   : > { %v6074_v36 = vadd.f32 %v1047_v24, %v5882_v25  ;;  %v6077_v16 = vadd.f32 %v1048_v20, %v5880_v30  ;;  %v6080_v33 = vadd.f32 %v1037_v34, %v5913_v57  ;;  %v6083_v28 = vadd.f32 %v1038_v37, %v5915_v11  ;;  %1651 = vst.msk [vmem:[#allocation2 + $0xa2] sm:$0x3] %vm1624_vm0, %v10068_v0 }
 0x10a   : > { %10227 = vst [vmem:[#allocation3_spill] sm:$0xff] %v6066_v5  ;;  %v4991_v20 = vunpack.i.l.bf16 %v5924_v17 }
 0x10b   : > { %10228 = vst [vmem:[#allocation4_spill] sm:$0xff] %v6069_v54  ;;  %v5027_v60 = vpop.permute.xlu1 %5026 }
 0x10c   : > { %10229 = vst [vmem:[#allocation5_spill] sm:$0xff] %v6074_v36  ;;  %v5029_v10 = vunpack.i.h.bf16 %v5027_v60  ;;  %v5028_v25 = vunpack.i.l.bf16 %v5027_v60  ;;  %v5077_v30 = vpop.permute.xlu2 %5076  ;;  %v5052_v21 = vpop.permute.xlu0 %5051 }
 0x10d   : > { %10230 = vst [vmem:[#allocation6_spill] sm:$0xff] %v6077_v16  ;;  %v5079_v57 = vunpack.i.h.bf16 %v5077_v30  ;;  %v5078_v11 = vunpack.i.l.bf16 %v5077_v30  ;;  %v5054_v49 = vunpack.i.h.bf16 %v5052_v21  ;;  %v5053_v14 = vunpack.i.l.bf16 %v5052_v21 }
 0x10e   : > { %v1034_v24 = vmul.f32 %v5029_v10, %v5995_v53  ;;  %v1033_v37 = vmul.f32 %v5028_v25, %v5995_v53  ;;  %1652 = vst.msk [vmem:[#allocation2 + $0xba] sm:$0x3] %vm1624_vm0, %v10068_v0 }
 0x10f   : > { %v1054_v34 = vmul.f32 %v5079_v57, %v5995_v53  ;;  %v1053_v60 = vmul.f32 %v5078_v11, %v5995_v53  ;;  %v1044_v30 = vmul.f32 %v5054_v49, %v5995_v53  ;;  %v1043_v21 = vmul.f32 %v5053_v14, %v5995_v53  ;;  %1653 = vst.msk [vmem:[#allocation2 + $0xd2] sm:$0x3] %vm1624_vm0, %v10068_v0 }
 0x110   : > { %v6108_v17 = vadd.f32 %v1033_v37, %v5905_v8  ;;  %v6111_v10 = vadd.f32 %v1034_v24, %v5907_v22  ;;  %v1020_v8 = vmul.f32 %v4992_v26, %v5995_v53  ;;  %v1019_v22 = vmul.f32 %v4991_v20, %v5995_v53  ;;  %1654 = vst.msk [vmem:[#allocation2 + $0xea] sm:$0x3] %vm1624_vm0, %v10068_v0 }
 0x111   : > { %v6116_v25 = vadd.f32 %v1053_v60, %v5911_v55  ;;  %v6119_v57 = vadd.f32 %v1054_v34, %v5909_v23  ;;  %v6122_v11 = vadd.f32 %v1043_v21, %v5938_v38  ;;  %v6125_v49 = vadd.f32 %v1044_v30, %v5940_v3  ;;  %1655 = vst.msk [vmem:[#allocation2 + $0x102] sm:$0x3] %vm1624_vm0, %v10068_v0 }
 0x112   : > { %10231 = vst [vmem:[#allocation7_spill] sm:$0xff] %v6108_v17  ;;  %v6136_v3 = vperm.slane %v5751_v41, 3  ;;  %v4906_v24 = vunpack.i.h.bf16 %v5781_v1  ;;  %v4905_v37 = vunpack.i.l.bf16 %v5781_v1 }
 0x113   : > { %10232 = vst [vmem:[#allocation8_spill] sm:$0xff] %v6111_v10  ;;  %v5042_v55 = vpop.permute.xlu1 %5041 }
 0x114   : > { %10233 = vst [vmem:[#allocation9_spill] sm:$0xff] %v6116_v25  ;;  %v5044_v23 = vunpack.i.h.bf16 %v5042_v55  ;;  %v5043_v38 = vunpack.i.l.bf16 %v5042_v55  ;;  %v5067_v14 = vpop.permute.xlu0 %5066  ;;  %v1059_v55 = vadd.f32 %v1019_v22, %v5770_v61 }
 0x115   : > { %10234 = vst [vmem:[#allocation10_spill] sm:$0xff] %v6119_v57  ;;  %v5069_v26 = vunpack.i.h.bf16 %v5067_v14  ;;  %v5068_v34 = vunpack.i.l.bf16 %v5067_v14  ;;  %v5093_v20 = vpop.permute.xlu2 %5092  ;;  %v1060_v57 = vadd.f32 %v1020_v8, %v5772_v62 }
 0x116   : > { %10235 = vst [vmem:[#allocation11_spill] sm:$0xff] %v6122_v11  ;;  %v1040_v60 = vmul.f32 %v5044_v23, %v5995_v53  ;;  %v1039_v30 = vmul.f32 %v5043_v38, %v5995_v53  ;;  %v5095_v21 = vunpack.i.h.bf16 %v5093_v20  ;;  %v5094_v41 = vunpack.i.l.bf16 %v5093_v20  ;;  %v6163_v20 = vld [vmem:[%s10064_s2] ss:$0 sm:$0xff] }
 0x117   : > { %10236 = vst [vmem:[#allocation12_spill] sm:$0xff] %v6125_v49  ;;  %v1050_v1 = vmul.f32 %v5069_v26, %v5995_v53  ;;  %v1049_v14 = vmul.f32 %v5068_v34, %v5995_v53  ;;  %v4801_v34 = vunpack.i.l.bf16 %v5733_v32 }
 0x118   : > { %10237 = vst [vmem:[#allocation13_spill] sm:$0xff] %v6136_v3  ;;  %v6155_v23 = vadd.f32 %v1039_v30, %v5933_v35  ;;  %v6158_v38 = vadd.f32 %v1040_v60, %v5935_v56  ;;  %v1261_v61 = vmul.f32 %v5095_v21, %v6136_v3  ;;  %v1260_v62 = vmul.f32 %v5094_v41, %v6136_v3 }
 0x119   : > { %v6170_v8 = vadd.f32 %v1049_v14, %v5962_v46  ;;  %v6173_v35 = vadd.f32 %v1050_v1, %v5964_v19  ;;  %1656 = vst.msk [vmem:[#allocation2 + $0x11a] sm:$0x3] %vm1624_vm0, %v10068_v0  ;;  %v4802_v56 = vunpack.i.h.bf16 %v5733_v32  ;;  %v785_v60 = vmul.f32 %v4906_v24, %v5757_v45 }
 0x11a   : > { %10238 = vst [vmem:[#allocation14_spill] sm:$0xff] %v6155_v23  ;;  %v1300_v22 = vadd.f32 %v1260_v62, %v1059_v55  ;;  %v1301_v26 = vadd.f32 %v1261_v61, %v1060_v57  ;;  %v784_v46 = vmul.f32 %v4905_v37, %v5757_v45  ;;  %v5009_v30 = vunpack.i.h.bf16 %v5948_v31 }
 0x11b   : > { %10239 = vst [vmem:[#allocation15_spill] sm:$0xff] %v6158_v38  ;;  %v5057_v19 = vpop.permute.xlu1 %5056  ;;  %v5008_v45 = vunpack.i.l.bf16 %v5948_v31  ;;  %v5019_v37 = vunpack.i.h.bf16 %v5972_v13  ;;  %v5018_v31 = vunpack.i.l.bf16 %v5972_v13  ;;  %v544_v13 = vmul.f32 %v4802_v56, %v5764_v51 }
 0x11c   : > { %10240 = vst [vmem:[#allocation16_spill] sm:$0xff] %v6170_v8  ;;  %v6187_v21 = vadd.f32 %v6163_v20, %v1300_v22  ;;  %v6190_v57 = vadd.f32 %v6163_v20, %v1301_v26  ;;  %v5059_v32 = vunpack.i.h.bf16 %v5057_v19  ;;  %v5058_v41 = vunpack.i.l.bf16 %v5057_v19  ;;  %v5082_v24 = vpop.permute.xlu0 %5081 }
 0x11d   : > { %10241 = vst [vmem:[#allocation17_spill] sm:$0xff] %v6173_v35  ;;  %v5084_v55 = vunpack.i.h.bf16 %v5082_v24  ;;  %v5083_v1 = vunpack.i.l.bf16 %v5082_v24  ;;  %v5110_v14 = vpop.permute.xlu2 %5109 }
 0x11e   : > { %1657 = vst.msk [vmem:[#allocation2 + $0x132] sm:$0x3] %vm1624_vm0, %v10068_v0  ;;  %v1384_v61 = vsub.f32 0.0, %v6187_v21  ;;  %v1385_v62 = vsub.f32 0.0, %v6190_v57  ;;  %v1046_v22 = vmul.f32 %v5059_v32, %v5995_v53  ;;  %v1045_v26 = vmul.f32 %v5058_v41, %v5995_v53 }
 0x11f   : > { %1658 = vst.msk [vmem:[#allocation2 + $0x14a] sm:$0x3] %vm1624_vm0, %v10068_v0  ;;  %v1056_v19 = vmul.f32 %v5084_v55, %v5995_v53  ;;  %v1055_v24 = vmul.f32 %v5083_v1, %v5995_v53  ;;  %v5112_v23 = vunpack.i.h.bf16 %v5110_v14  ;;  %v1026_v41 = vmul.f32 %v5009_v30, %v5995_v53 }
 0x120   : > { %1659 = vst.msk [vmem:[#allocation2 + $0x162] sm:$0x3] %vm1624_vm0, %v10068_v0  ;;  %v1424_v38 = vmul.f32 1.442695, %v1384_v61  ;;  %v1426_v8 = vmul.f32 1.442695, %v1385_v62  ;;  %v6212_v35 = vadd.f32 %v1045_v26, %v5957_v47  ;;  %v6215_v32 = vadd.f32 %v1046_v22, %v5959_v12 }
 0x121   : > { %1660 = vst.msk [vmem:[#allocation2 + $0x17a] sm:$0x3] %vm1624_vm0, %v10068_v0  ;;  %v6222_v55 = vadd.f32 %v1055_v24, %v5987_v29  ;;  %v6225_v1 = vadd.f32 %v1056_v19, %v5989_v52  ;;  %v543_v61 = vmul.f32 %v4801_v34, %v5764_v51  ;;  %v1025_v47 = vmul.f32 %v5008_v45, %v5995_v53 }
 0x122   : > { %1661 = vst.msk [vmem:[#allocation2 + $0x192] sm:$0x3] %vm1624_vm0, %v10068_v0  ;;  %5196 = vpow2.f32 %v1424_v38  ;;  %v825_v12 = vadd.f32 %v785_v60, %v544_v13  ;;  %v1267_v56 = vmul.f32 %v5112_v23, %v6136_v3  ;;  %v5111_v62 = vunpack.i.l.bf16 %v5110_v14 }
 0x123   : > { %1662 = vst.msk [vmem:[#allocation2 + $0x1aa] sm:$0x3] %vm1624_vm0, %v10068_v0  ;;  %5198 = vpow2.f32 %v1426_v8  ;;  %v824_v30 = vadd.f32 %v784_v46, %v543_v61  ;;  %v1030_v22 = vmul.f32 %v5019_v37, %v5995_v53  ;;  %v1029_v26 = vmul.f32 %v5018_v31, %v5995_v53  ;;  %v5072_v29 = vpop.permute.xlu1 %5071 }
 0x124   : > { %1663 = vst.msk [vmem:[#allocation2 + $0x1c2] sm:$0x3] %vm1624_vm0, %v10068_v0  ;;  %v1066_v24 = vadd.f32 %v1026_v41, %v825_v12  ;;  %v1266_v19 = vmul.f32 %v5111_v62, %v6136_v3  ;;  %v5074_v34 = vunpack.i.h.bf16 %v5072_v29  ;;  %v5073_v45 = vunpack.i.l.bf16 %v5072_v29 }
 0x125   : > { %10242 = vst [vmem:[#allocation18_spill] sm:$0xff] %v6212_v35  ;;  %v1065_v52 = vadd.f32 %v1025_v47, %v824_v30  ;;  %v1069_v8 = vadd.f32 %v1029_v26, %v5800_v42  ;;  %v1070_v23 = vadd.f32 %v1030_v22, %v5798_v40 }
 0x126   : > { %10243 = vst [vmem:[#allocation19_spill] sm:$0xff] %v6215_v32  ;;  %v1307_v51 = vadd.f32 %v1267_v56, %v1066_v24  ;;  %v1052_v41 = vmul.f32 %v5074_v34, %v5995_v53  ;;  %v1051_v47 = vmul.f32 %v5073_v45, %v5995_v53 }
 0x127   : > { %1664 = vst.msk [vmem:[#allocation2 + $0x1da] sm:$0x3] %vm1624_vm0, %v10068_v0  ;;  %v5120_v0 = vpop.permute.xlu2 %5119  ;;  %v1306_v13 = vadd.f32 %v1266_v19, %v1065_v52 }
 0x128   : > { %10244 = vst [vmem:[#allocation20_spill] sm:$0xff] %v6222_v55  ;;  %v5197_v38 = vpop.eup %5196  ;;  %v5122_v60 = vunpack.i.h.bf16 %v5120_v0  ;;  %v5121_v46 = vunpack.i.l.bf16 %v5120_v0  ;;  %v6236_v31 = vadd.f32 %v6163_v20, %v1307_v51  ;;  %v6247_v0 = vadd.f32 %v1052_v41, %v5983_v44 }
 0x129   : > { %10245 = vst [vmem:[#allocation21_spill] sm:$0xff] %v6225_v1  ;;  %v5199_v14 = vpop.eup %5198  ;;  %v1504_v37 = vadd.f32 1.0, %v5197_v38  ;;  %v6243_v40 = vadd.f32 %v6163_v20, %v1306_v13  ;;  %v6250_v62 = vadd.f32 %v1051_v47, %v5981_v59  ;;  %v5099_v59 = vpop.permute.xlu0 %5098  ;;  %v4998_v41 = vunpack.i.h.bf16 %v5997_v4 }
 0x12a   : > { %v1505_v61 = vadd.f32 1.0, %v5199_v14  ;;  %v1271_v12 = vmul.f32 %v5122_v60, %v6136_v3  ;;  %v1270_v56 = vmul.f32 %v5121_v46, %v6136_v3  ;;  %v1391_v42 = vsub.f32 0.0, %v6236_v31  ;;  %10246 = vst [vmem:[#allocation22_spill] sm:$0xff] %v6247_v0 }
 0x12b   : > { %5200 = vrcp.f32 %v1504_v37  ;;  %10247 = vst [vmem:[#allocation23_spill] sm:$0xff] %v6250_v62  ;;  %v1390_v26 = vsub.f32 0.0, %v6243_v40  ;;  %v5087_v19 = vpop.permute.xlu1 %5086  ;;  %v5100_v47 = vunpack.i.l.bf16 %v5099_v59 }
 0x12c   : > { %5202 = vrcp.f32 %v1505_v61  ;;  %v1310_v30 = vadd.f32 %v1270_v56, %v1069_v8  ;;  %v1311_v22 = vadd.f32 %v1271_v12, %v1070_v23  ;;  %v1438_v29 = vmul.f32 1.442695, %v1391_v42 }
 0x12d   : > { %v1436_v51 = vmul.f32 1.442695, %v1390_v26  ;;  %v5089_v45 = vunpack.i.h.bf16 %v5087_v19  ;;  %v5088_v38 = vunpack.i.l.bf16 %v5087_v19  ;;  %v4997_v23 = vunpack.i.l.bf16 %v5997_v4 }
 0x12e   : > { %v6254_v24 = vadd.f32 %v6163_v20, %v1310_v30  ;;  %v6257_v52 = vadd.f32 %v6163_v20, %v1311_v22  ;;  %5204 = vpow2.f32 %v1438_v29  ;;  %v5101_v30 = vunpack.i.h.bf16 %v5099_v59 }
 0x12f   : > { %5206 = vpow2.f32 %v1436_v51  ;;  %v1058_v13 = vmul.f32 %v5089_v45, %v5995_v53  ;;  %v1057_v12 = vmul.f32 %v5088_v38, %v5995_v53  ;;  %v10249_v22 = vmov 0.0  }
 0x130   : > { %v1394_v44 = vsub.f32 0.0, %v6254_v24  ;;  %v1395_v34 = vsub.f32 0.0, %v6257_v52  ;;  %v1022_v29 = vmul.f32 %v4998_v41, %v5995_v53 }
 0x131   : > { %v5201_v8 = vpop.eup %5200  ;;  %v6269_v56 = vadd.f32 %v1058_v13, %v6003_v43  ;;  %v1262_v43 = vmul.f32 %v5100_v47, %v6136_v3 }
 0x132   : > { %v5203_v60 = vpop.eup %5202  ;;  %v1584_v46 = vmul.f32 %v5201_v8, %v6187_v21  ;;  %v1444_v14 = vmul.f32 1.442695, %v1394_v44  ;;  %v1446_v37 = vmul.f32 1.442695, %v1395_v34  ;;  %v1021_v21 = vmul.f32 %v4997_v23, %v5995_v53 }
 0x133   : > { %v1585_v61 = vmul.f32 %v5203_v60, %v6190_v57  ;;  %10248 = vst [vmem:[#allocation24_spill] sm:$0xff] %v6269_v56  ;;  %v6276_v57 = vadd.f32 %v1057_v12, %v6001_v18  ;;  %v1263_v44 = vmul.f32 %v5101_v30, %v6136_v3  ;;  %v1062_v34 = vadd.f32 %v1022_v29, %v5854_v27  ;;  %v5135_v60 = vpop.permute.xlu2 %5134 }
 0x134   : > { %1666 = vst.msk [vmem:[#allocation2 + $0x2] sm:$0xff] %vm1665_vm1, %v1584_v46  ;;  %5208 = vpow2.f32 %v1444_v14  ;;  %v5205_v42 = vpop.eup %5204  ;;  %v1061_v51 = vadd.f32 %v1021_v21, %v5852_v39  ;;  %v5137_v13 = vunpack.i.h.bf16 %v5135_v60  ;;  %v5136_v12 = vunpack.i.l.bf16 %v5135_v60 }
 0x135   : > { %1667 = vst.msk [vmem:[#allocation2 + $0xa] sm:$0xff] %vm1665_vm1, %v1585_v61  ;;  %v1511_v4 = vadd.f32 1.0, %v5205_v42  ;;  %5210 = vpow2.f32 %v1446_v37  ;;  %v5207_v26 = vpop.eup %5206  ;;  %v1303_v23 = vadd.f32 %v1263_v44, %v1062_v34 }
 0x136   : > { %1710 = vst.msk [vmem:[#allocation2] sm:$0xff] %vm1665_vm1, %v10249_v22  ;;  %v1510_v19 = vadd.f32 1.0, %v5207_v26  ;;  %v1302_v45 = vadd.f32 %v1262_v43, %v1061_v51  ;;  %v1277_v30 = vmul.f32 %v5137_v13, %v6136_v3 }
 0x137   : > { %10250 = vst [vmem:[#allocation25_spill] sm:$0xff] %v6276_v57  ;;  %5212 = vrcp.f32 %v1511_v4  ;;  %v6294_v27 = vadd.f32 %v6163_v20, %v1303_v23  ;;  %v6309_v4 = vld [vmem:[%s10065_s3] sm:$0xff] }
 0x138   : > { %1711 = vst.msk [vmem:[#allocation2 + $0x8] sm:$0xff] %vm1665_vm1, %v10249_v22  ;;  %5214 = vrcp.f32 %v1510_v19  ;;  %v6290_v37 = vadd.f32 %v6163_v20, %v1302_v45  ;;  %v1276_v19 = vmul.f32 %v5136_v12, %v6136_v3  ;;  %v6322_v51 = vperm.slane %v6309_v4, 0 }
 0x139   : > { %1712 = vst.msk [vmem:[#allocation2 + $0x10] sm:$0xff] %vm1665_vm1, %v10249_v22  ;;  %v6325_v44 = vperm.slane %v6309_v4, 1  ;;  %v6333_v34 = vperm.slane %v6309_v4, 2 }
 0x13a   : > { %v5209_v18 = vpop.eup %5208  ;;  %v1386_v47 = vsub.f32 0.0, %v6290_v37  ;;  %10251 = vst [vmem:[#allocation26_spill] sm:$0xff] %v6322_v51  ;;  %v1316_v23 = vadd.f32 %v1276_v19, %v6008_v9 }
 0x13b   : > { %v1514_v59 = vadd.f32 1.0, %v5209_v18  ;;  %v5211_v38 = vpop.eup %5210  ;;  %10252 = vst [vmem:[#allocation27_spill] sm:$0xff] %v6325_v44  ;;  %v1317_v18 = vadd.f32 %v1277_v30, %v6011_v6  ;;  %v5150_v36 = vpop.permute.xlu2 %5149 }
 0x13c   : > { %v1515_v8 = vadd.f32 1.0, %v5211_v38  ;;  %10253 = vst [vmem:[#allocation28_spill] sm:$0xff] %v6333_v34 }
 0x13d   : > { %5216 = vrcp.f32 %v1514_v59  ;;  %v5213_v46 = vpop.eup %5212  ;;  %v6336_v59 = vperm.slane %v6309_v4, 3 }
 0x13e   : > { %v1591_v14 = vmul.f32 %v5213_v46, %v6236_v31  ;;  %v5215_v39 = vpop.eup %5214  ;;  %5218 = vrcp.f32 %v1515_v8 }
 0x13f   : > { %v1590_v31 = vmul.f32 %v5215_v39, %v6243_v40  ;;  %v1387_v40 = vsub.f32 0.0, %v6294_v27  ;;  %10254 = vst [vmem:[#allocation29_spill] sm:$0xff] %v6336_v59 }
 0x140   : > { %1673 = vst.msk [vmem:[#allocation2 + $0x52] sm:$0xff] %vm1665_vm1, %v1591_v14  ;;  %v1726_v41 = vpack.c.bf16 %v1591_v14, %v1591_v14 }
 0x141   : > { %1672 = vst.msk [vmem:[#allocation2 + $0x4a] sm:$0xff] %vm1665_vm1, %v1590_v31  ;;  %v1725_v42 = vpack.c.bf16 %v1590_v31, %v1590_v31  ;;  %v6358_v31 = vadd.f32 %v6163_v20, %v1317_v18 }
 0x142   : > { %1759 = vst.msk [vmem:[%s6299_s8 + $0xc] sm:$0xf] %vm1755_vm2, %v1726_v41 }
 0x143   : > { %v5217_v61 = vpop.eup %5216  ;;  %1758 = vst.msk [vmem:[%s6299_s8 + $0x8] sm:$0xf] %vm1755_vm2, %v1725_v42  ;;  %v1401_v18 = vsub.f32 0.0, %v6358_v31 }
 0x144   : > { %v1594_v21 = vmul.f32 %v5217_v61, %v6254_v24  ;;  %v5219_v26 = vpop.eup %5218  ;;  %v1428_v24 = vmul.f32 1.442695, %v1386_v47  ;;  %v6365_v61 = vperm.slane %v6309_v4, 4 }
 0x145   : > { %v6317_v43 = vmul.f32 %v5219_v26, %v6257_v52  ;;  %v1430_v52 = vmul.f32 1.442695, %v1387_v40  ;;  %v6376_v26 = vadd.f32 %v6163_v20, %v1316_v23  ;;  %v1458_v35 = vmul.f32 1.442695, %v1401_v18 }
 0x146   : > { %v1729_v29 = vpack.c.bf16 %v1594_v21, %v1594_v21  ;;  %1676 = vst.msk [vmem:[#allocation2 + $0x7a] sm:$0xff] %vm1665_vm1, %v1594_v21  ;;  %5220 = vpow2.f32 %v1428_v24 }
 0x147   : > { %1677 = vst.msk [vmem:[#allocation2 + $0x82] sm:$0xff] %vm1665_vm1, %v6317_v43  ;;  %v6355_v13 = vld [vmem:[#allocation2 + $0x52] sm:$0xff]  ;;  %5222 = vpow2.f32 %v1430_v52 }
 0x148   : > { %1762 = vst.msk [vmem:[%s6299_s8 + $0x18] sm:$0xf] %vm1755_vm2, %v1729_v29  ;;  %v6338_v45 = vld [vmem:[#allocation2 + $0x48] sm:$0xff]  ;;  %v6340_v38 = vld [vmem:[#allocation2 + $0x50] sm:$0xff]  ;;  %v1915_v30 = vmul.f32 %v6333_v34, %v6355_v13  ;;  %5224 = vpow2.f32 %v1458_v35 }
 0x149   : > { %v6342_v8 = vld [vmem:[#allocation2 + $0x49] sm:$0xff]  ;;  %v1816_v6 = vmul.f32 %v6322_v51, %v6338_v45  ;;  %v1817_v60 = vmul.f32 %v6322_v51, %v6340_v38  ;;  %v6349_v46 = vld [vmem:[#allocation2 + $0x51] sm:$0xff]  ;;  %10255 = vst [vmem:[#allocation30_spill] sm:$0xff] %v6365_v61 }
 0x14a   : > { %v1865_v14 = vmul.f32 %v6325_v44, %v6342_v8  ;;  %v6353_v39 = vld [vmem:[#allocation2 + $0x4a] sm:$0xff]  ;;  %v1866_v9 = vmul.f32 %v6325_v44, %v6349_v46  ;;  %v6369_v42 = vld [vmem:[#allocation2 + $0x53] sm:$0xff] }
 0x14b   : > { %v6362_v41 = vld [vmem:[#allocation2 + $0x4b] sm:$0xff]  ;;  %v1914_v12 = vmul.f32 %v6333_v34, %v6353_v39  ;;  %v6380_v19 = vld [vmem:[#allocation2 + $0x54] sm:$0xff] }
 0x14c   : > { %v1881_v47 = vadd.f32 %v1865_v14, %v1816_v6  ;;  %v1882_v21 = vadd.f32 %v1866_v9, %v1817_v60  ;;  %v6373_v40 = vld [vmem:[#allocation2 + $0x4c] sm:$0xff]  ;;  %v1963_v24 = vmul.f32 %v6336_v59, %v6362_v41  ;;  %v5221_v52 = vpop.eup %5220  ;;  %v1964_v60 = vmul.f32 %v6336_v59, %v6369_v42 }
 0x14d   : > { %v2012_v9 = vmul.f32 %v6365_v61, %v6373_v40  ;;  %v6387_v57 = vld [vmem:[#allocation2 + $0x78] sm:$0xff]  ;;  %v2013_v62 = vmul.f32 %v6365_v61, %v6380_v19  ;;  %v1506_v32 = vadd.f32 1.0, %v5221_v52 }
 0x14e   : > { %v1930_v29 = vadd.f32 %v1914_v12, %v1881_v47  ;;  %v1931_v6 = vadd.f32 %v1915_v30, %v1882_v21  ;;  %v6389_v23 = vld [vmem:[#allocation2 + $0x80] sm:$0xff]  ;;  %v5223_v12 = vpop.eup %5222  ;;  %v1400_v30 = vsub.f32 0.0, %v6376_v26 }
 0x14f   : > { %v6391_v47 = vld [vmem:[#allocation2 + $0x79] sm:$0xff]  ;;  %v6395_v21 = vld [vmem:[#allocation2 + $0x81] sm:$0xff]  ;;  %5226 = vrcp.f32 %v1506_v32 }
 0x150   : > { %v1979_v14 = vadd.f32 %v1963_v24, %v1930_v29  ;;  %v1980_v56 = vadd.f32 %v1964_v60, %v1931_v6  ;;  %v1730_v24 = vpack.c.bf16 %v6317_v43, %v6317_v43  ;;  %v6402_v0 = vld [vmem:[#allocation2 + $0x7a] sm:$0xff]  ;;  %v1820_v6 = vmul.f32 %v6322_v51, %v6387_v57 }
 0x151   : > { %v1821_v60 = vmul.f32 %v6322_v51, %v6389_v23  ;;  %v1869_v55 = vmul.f32 %v6325_v44, %v6391_v47  ;;  %v1870_v43 = vmul.f32 %v6325_v44, %v6395_v21  ;;  %v6418_v52 = vld [vmem:[#allocation2 + $0x7b] sm:$0xff]  ;;  %v1918_v18 = vmul.f32 %v6333_v34, %v6402_v0 }
 0x152   : > { %v6398_v29 = vadd.f32 %v2012_v9, %v1979_v14  ;;  %v6404_v1 = vadd.f32 %v2013_v62, %v1980_v56  ;;  %v6412_v14 = vld [vmem:[#allocation2 + $0x82] sm:$0xff]  ;;  %1763 = vst.msk [vmem:[%s6299_s8 + $0x1c] sm:$0xf] %vm1755_vm2, %v1730_v24  ;;  %v1507_v62 = vadd.f32 1.0, %v5223_v12  ;;  %v1456_v25 = vmul.f32 1.442695, %v1400_v30 }
 0x153   : > { %10258 = vst [vmem:[#allocation33_spill] sm:$0xff] %v6418_v52  ;;  %v1885_v56 = vadd.f32 %v1869_v55, %v1820_v6  ;;  %v6422_v9 = vld [vmem:[#allocation2 + $0x83] sm:$0xff]  ;;  %v1886_v10 = vadd.f32 %v1870_v43, %v1821_v60  ;;  %v1919_v17 = vmul.f32 %v6333_v34, %v6412_v14  ;;  %v1967_v49 = vmul.f32 %v6336_v59, %v6418_v52  ;;  %v5125_v43 = vpop.permute.xlu0 %5124 }
 0x154   : > { %10256 = vst [vmem:[#allocation31_spill] sm:$0xff] %v6398_v29  ;;  %v6426_v11 = vld [vmem:[#allocation2 + $0x7c] sm:$0xff]  ;;  %v1968_v12 = vmul.f32 %v6336_v59, %v6422_v9  ;;  %5228 = vrcp.f32 %v1507_v62  ;;  %v5127_v62 = vunpack.i.h.bf16 %v5125_v43 }
 0x155   : > { %10257 = vst [vmem:[#allocation32_spill] sm:$0xff] %v6404_v1  ;;  %v1934_v24 = vadd.f32 %v1918_v18, %v1885_v56  ;;  %v6430_v1 = vld [vmem:[#allocation2 + $0x84] sm:$0xff]  ;;  %v1935_v55 = vadd.f32 %v1919_v17, %v1886_v10  ;;  %v2016_v6 = vmul.f32 %v6365_v61, %v6426_v11  ;;  %5230 = vpow2.f32 %v1456_v25  ;;  %v5225_v18 = vpop.eup %5224 }
 0x156   : > { %10259 = vst [vmem:[#allocation34_spill] sm:$0xff] %v6422_v9  ;;  %v2017_v35 = vmul.f32 %v6365_v61, %v6430_v1  ;;  %v5227_v17 = vpop.eup %5226  ;;  %v5126_v10 = vunpack.i.l.bf16 %v5125_v43 }
 0x157   : > { %10260 = vst [vmem:[#allocation35_spill] sm:$0xff] %v6426_v11  ;;  %v1983_v30 = vadd.f32 %v1967_v49, %v1934_v24  ;;  %v1984_v60 = vadd.f32 %v1968_v12, %v1935_v55  ;;  %v1586_v49 = vmul.f32 %v5227_v17, %v6290_v37  ;;  %v1521_v12 = vadd.f32 1.0, %v5225_v18 }
 0x158   : > { %10261 = vst [vmem:[#allocation36_spill] sm:$0xff] %v6430_v1  ;;  %v1272_v24 = vmul.f32 %v5126_v10, %v6136_v3  ;;  %v5003_v10 = vunpack.i.l.bf16 %v6015_v58 }
 0x159   : > { %v6438_v56 = vadd.f32 %v2016_v6, %v1983_v30  ;;  %v6440_v29 = vadd.f32 %v2017_v35, %v1984_v60  ;;  %1668 = vst.msk [vmem:[#allocation2 + $0x1a] sm:$0xff] %vm1665_vm1, %v1586_v49  ;;  %v1273_v30 = vmul.f32 %v5127_v62, %v6136_v3 }
 0x15a   : > { %v5229_v32 = vpop.eup %5228  ;;  %1713 = vst.msk [vmem:[#allocation2 + $0x18] sm:$0xff] %vm1665_vm1, %v10249_v22  ;;  %v1312_v37 = vadd.f32 %v1272_v24, %v6040_v7  ;;  %v1023_v62 = vmul.f32 %v5003_v10, %v5995_v53 }
 0x15b   : > { %v5231_v16 = vpop.eup %5230  ;;  %v1587_v25 = vmul.f32 %v5229_v32, %v6294_v27 }
 0x15c   : > { %v1520_v55 = vadd.f32 1.0, %v5231_v16  ;;  %v1313_v16 = vadd.f32 %v1273_v30, %v6043_v15  ;;  %v6457_v27 = vadd.f32 %v6163_v20, %v1312_v37  ;;  %v5105_v15 = vpop.permute.xlu1 %5104  ;;  %v1063_v37 = vadd.f32 %v1023_v62, %v5844_v48 }
 0x15d   : > { %1669 = vst.msk [vmem:[#allocation2 + $0x22] sm:$0xff] %vm1665_vm1, %v1587_v25  ;;  %v5106_v49 = vunpack.i.l.bf16 %v5105_v15  ;;  %v5107_v24 = vunpack.i.h.bf16 %v5105_v15 }
 0x15e   : > { %5232 = vrcp.f32 %v1520_v55  ;;  %1714 = vst.msk [vmem:[#allocation2 + $0x20] sm:$0xff] %vm1665_vm1, %v10249_v22  ;;  %v6463_v18 = vadd.f32 %v6163_v20, %v1313_v16  ;;  %v1396_v17 = vsub.f32 0.0, %v6457_v27 }
 0x15f   : > { %5234 = vrcp.f32 %v1521_v12  ;;  %1715 = vst.msk [vmem:[#allocation2 + $0x28] sm:$0xff] %vm1665_vm1, %v10249_v22  ;;  %v1264_v30 = vmul.f32 %v5106_v49, %v6136_v3 }
 0x160   : > { %v1448_v32 = vmul.f32 1.442695, %v1396_v17 }
 0x162   : > { %5236 = vpow2.f32 %v1448_v32 }
 0x164   : > { %v5233_v6 = vpop.eup %5232 }
 0x165   : > { %v5235_v60 = vpop.eup %5234  ;;  %v1600_v35 = vmul.f32 %v5233_v6, %v6376_v26  ;;  %v5004_v26 = vunpack.i.h.bf16 %v6015_v58  ;;  %v1265_v58 = vmul.f32 %v5107_v24, %v6136_v3  ;;  %v1304_v6 = vadd.f32 %v1264_v30, %v1063_v37 }
 0x166   : > { %v1601_v43 = vmul.f32 %v5235_v60, %v6358_v31  ;;  %v1397_v31 = vsub.f32 0.0, %v6463_v18 }
 0x167   : > { %1682 = vst.msk [vmem:[#allocation2 + $0xc2] sm:$0xff] %vm1665_vm1, %v1600_v35  ;;  %v1735_v7 = vpack.c.bf16 %v1600_v35, %v1600_v35  ;;  %v1024_v55 = vmul.f32 %v5004_v26, %v5995_v53  ;;  %v6481_v15 = vadd.f32 %v6163_v20, %v1304_v6 }
 0x168   : > { %1683 = vst.msk [vmem:[#allocation2 + $0xca] sm:$0xff] %vm1665_vm1, %v1601_v43  ;;  %v1736_v25 = vpack.c.bf16 %v1601_v43, %v1601_v43  ;;  %v1450_v12 = vmul.f32 1.442695, %v1397_v31  ;;  %v5237_v60 = vpop.eup %5236 }
 0x169   : > { %1768 = vst.msk [vmem:[%s6299_s8 + $0x30] sm:$0xf] %vm1755_vm2, %v1735_v7  ;;  %v1064_v16 = vadd.f32 %v1024_v55, %v5846_v50  ;;  %v1516_v31 = vadd.f32 1.0, %v5237_v60  ;;  %v1388_v37 = vsub.f32 0.0, %v6481_v15 }
 0x16a   : > { %1769 = vst.msk [vmem:[%s6299_s8 + $0x34] sm:$0xf] %vm1755_vm2, %v1736_v25  ;;  %5238 = vpow2.f32 %v1450_v12 }
 0x16b   : > { %v1305_v35 = vadd.f32 %v1265_v58, %v1064_v16  ;;  %5240 = vrcp.f32 %v1516_v31 }
 0x16d   : > { %v6486_v50 = vadd.f32 %v6163_v20, %v1305_v35 }
 0x16e   : > { %v2053_v7 = vld [vmem:[#allocation2 + $0xc0] sm:$0xff] }
 0x16f   : > { %v2054_v43 = vld [vmem:[#allocation2 + $0xc8] sm:$0xff]  ;;  %v3187_v48 = vmul.f32 %v2053_v7, %v6322_v51 }
 0x170   : > { %v2102_v17 = vld [vmem:[#allocation2 + $0xc1] sm:$0xff]  ;;  %v2103_v53 = vld [vmem:[#allocation2 + $0xc9] sm:$0xff]  ;;  %v5239_v32 = vpop.eup %5238  ;;  %v3188_v49 = vmul.f32 %v2054_v43, %v6322_v51  ;;  %v1389_v43 = vsub.f32 0.0, %v6486_v50 }
 0x171   : > { %v2151_v10 = vld [vmem:[#allocation2 + $0xc2] sm:$0xff]  ;;  %v2152_v26 = vld [vmem:[#allocation2 + $0xca] sm:$0xff]  ;;  %v3235_v24 = vmul.f32 %v2102_v17, %v6325_v44  ;;  %v3236_v25 = vmul.f32 %v2103_v53, %v6325_v44  ;;  %v1517_v6 = vadd.f32 1.0, %v5239_v32 }
 0x172   : > { %v2200_v62 = vld [vmem:[#allocation2 + $0xc3] sm:$0xff]  ;;  %v2201_v55 = vld [vmem:[#allocation2 + $0xcb] sm:$0xff]  ;;  %v3283_v12 = vmul.f32 %v2151_v10, %v6333_v34  ;;  %v3284_v30 = vmul.f32 %v2152_v26, %v6333_v34  ;;  %v1432_v10 = vmul.f32 1.442695, %v1388_v37  ;;  %v1434_v31 = vmul.f32 1.442695, %v1389_v43 }
 0x173   : > { %v3251_v58 = vadd.f32 %v3235_v24, %v3187_v48  ;;  %v3252_v16 = vadd.f32 %v3236_v25, %v3188_v49  ;;  %v2249_v60 = vld [vmem:[#allocation2 + $0xc4] sm:$0xff]  ;;  %v2250_v7 = vld [vmem:[#allocation2 + $0xcc] sm:$0xff]  ;;  %v3331_v35 = vmul.f32 %v2200_v62, %v6336_v59  ;;  %v3332_v53 = vmul.f32 %v2201_v55, %v6336_v59  ;;  %v5241_v49 = vpop.eup %5240 }
 0x174   : > { %5242 = vrcp.f32 %v1517_v6  ;;  %v3379_v48 = vmul.f32 %v2249_v60, %v6365_v61  ;;  %v3380_v32 = vmul.f32 %v2250_v7, %v6365_v61  ;;  %v5152_v25 = vunpack.i.h.bf16 %v5150_v36  ;;  %v1793_v7 = vld [vmem:[#allocation2] sm:$0xff] }
 0x175   : > { %v3299_v17 = vadd.f32 %v3283_v12, %v3251_v58  ;;  %v3300_v22 = vadd.f32 %v3284_v30, %v3252_v16  ;;  %v5151_v12 = vunpack.i.l.bf16 %v5150_v36  ;;  %v1596_v55 = vmul.f32 %v5241_v49, %v6457_v27  ;;  %v6513_v27 = vld [vmem:[%s10065_s3 + $0x8] sm:$0xff] }
 0x176   : > { %5244 = vpow2.f32 %v1432_v10  ;;  %v1283_v58 = vmul.f32 %v5152_v25, %v6136_v3  ;;  %v6523_v43 = vperm.slane %v6309_v4, 6  ;;  %v1810_v49 = vmul.f32 %v6322_v51, %v1793_v7 }
 0x177   : > { %v3347_v26 = vadd.f32 %v3331_v35, %v3299_v17  ;;  %v3348_v54 = vadd.f32 %v3332_v53, %v3300_v22  ;;  %1678 = vst.msk [vmem:[#allocation2 + $0x92] sm:$0xff] %vm1665_vm1, %v1596_v55  ;;  %v1731_v37 = vpack.c.bf16 %v1596_v55, %v1596_v55  ;;  %5246 = vpow2.f32 %v1434_v31 }
 0x178   : > { %v1282_v16 = vmul.f32 %v5151_v12, %v6136_v3  ;;  %v1323_v6 = vadd.f32 %v1283_v58, %v6037_v63  ;;  %v6520_v35 = vperm.slane %v6309_v4, 5  ;;  %10265 = vst [vmem:[#allocation40_spill] sm:$0xff] %v6523_v43  ;;  %v6526_v17 = vperm.slane %v6309_v4, 7 }
 0x179   : > { %v6498_v24 = vadd.f32 %v3379_v48, %v3347_v26  ;;  %v6500_v62 = vadd.f32 %v3380_v32, %v3348_v54  ;;  %1764 = vst.msk [vmem:[%s6299_s8 + $0x20] sm:$0xf] %vm1755_vm2, %v1731_v37  ;;  %v6529_v53 = vperm.slane %v6513_v27, 0  ;;  %v6538_v48 = vperm.slane %v6513_v27, 1 }
 0x17a   : > { %v5243_v30 = vpop.eup %5242  ;;  %10264 = vst [vmem:[#allocation39_spill] sm:$0xff] %v6520_v35  ;;  %v6557_v37 = vadd.f32 %v6163_v20, %v1323_v6 }
 0x17b   : > { %10262 = vst [vmem:[#allocation37_spill] sm:$0xff] %v6498_v24  ;;  %v1597_v22 = vmul.f32 %v5243_v30, %v6463_v18  ;;  %v1322_v18 = vadd.f32 %v1282_v16, %v6034_v2 }
 0x17c   : > { %10263 = vst [vmem:[#allocation38_spill] sm:$0xff] %v6500_v62  ;;  %v5245_v36 = vpop.eup %5244 }
 0x17d   : > { %1679 = vst.msk [vmem:[#allocation2 + $0x9a] sm:$0xff] %vm1665_vm1, %v1597_v22  ;;  %v1732_v54 = vpack.c.bf16 %v1597_v22, %v1597_v22  ;;  %v5247_v60 = vpop.eup %5246  ;;  %v1508_v63 = vadd.f32 1.0, %v5245_v36  ;;  %v6554_v22 = vadd.f32 %v6163_v20, %v1322_v18 }
 0x17e   : > { %10266 = vst [vmem:[#allocation41_spill] sm:$0xff] %v6526_v17  ;;  %v6531_v10 = vld [vmem:[#allocation2 + $0x90] sm:$0xff]  ;;  %v1509_v30 = vadd.f32 1.0, %v5247_v60 }
 0x17f   : > { %1765 = vst.msk [vmem:[%s6299_s8 + $0x24] sm:$0xf] %vm1755_vm2, %v1732_v54  ;;  %v6533_v26 = vld [vmem:[#allocation2 + $0x91] sm:$0xff]  ;;  %v1822_v32 = vmul.f32 %v6322_v51, %v6531_v10  ;;  %v2066_v31 = vmul.f32 %v6520_v35, %v6531_v10  ;;  %5248 = vrcp.f32 %v1508_v63 }
 0x180   : > { %10267 = vst [vmem:[#allocation42_spill] sm:$0xff] %v6529_v53  ;;  %v6535_v2 = vld [vmem:[#allocation2 + $0x92] sm:$0xff]  ;;  %v1871_v4 = vmul.f32 %v6325_v44, %v6533_v26  ;;  %v2115_v6 = vmul.f32 %v6523_v43, %v6533_v26  ;;  %5250 = vrcp.f32 %v1509_v30 }
 0x181   : > { %10268 = vst [vmem:[#allocation43_spill] sm:$0xff] %v6531_v10  ;;  %v1920_v36 = vmul.f32 %v6333_v34, %v6535_v2  ;;  %v2082_v5 = vadd.f32 %v2066_v31, %v6438_v56  ;;  %v2164_v63 = vmul.f32 %v6526_v17, %v6535_v2  ;;  %v1843_v56 = vld [vmem:[#allocation2 + $0x9] sm:$0xff] }
 0x182   : > { %10269 = vst [vmem:[#allocation44_spill] sm:$0xff] %v6533_v26  ;;  %v1887_v54 = vadd.f32 %v1871_v4, %v1822_v32 }
 0x183   : > { %10270 = vst [vmem:[#allocation45_spill] sm:$0xff] %v6535_v2  ;;  %v2131_v9 = vadd.f32 %v2115_v6, %v2082_v5 }
 0x184   : > { %10271 = vst [vmem:[#allocation46_spill] sm:$0xff] %v6538_v48  ;;  %v6547_v25 = vld [vmem:[#allocation2 + $0x98] sm:$0xff]  ;;  %v1936_v4 = vadd.f32 %v1920_v36, %v1887_v54 }
 0x185   : > { %10272 = vst [vmem:[#allocation47_spill] sm:$0xff] %v6547_v25  ;;  %v6549_v12 = vld [vmem:[#allocation2 + $0x99] sm:$0xff]  ;;  %v1823_v58 = vmul.f32 %v6322_v51, %v6547_v25  ;;  %v2067_v20 = vmul.f32 %v6520_v35, %v6547_v25  ;;  %v2180_v2 = vadd.f32 %v2164_v63, %v2131_v9 }
 0x186   : > { %10273 = vst [vmem:[#allocation48_spill] sm:$0xff] %v6549_v12  ;;  %v6551_v55 = vld [vmem:[#allocation2 + $0x9a] sm:$0xff]  ;;  %v1872_v16 = vmul.f32 %v6325_v44, %v6549_v12  ;;  %v2116_v25 = vmul.f32 %v6523_v43, %v6549_v12 }
 0x187   : > { %10274 = vst [vmem:[#allocation49_spill] sm:$0xff] %v6551_v55  ;;  %v6565_v7 = vld [vmem:[#allocation2 + $0x93] sm:$0xff]  ;;  %v6567_v62 = vld [vmem:[#allocation2 + $0x9b] sm:$0xff]  ;;  %v1921_v18 = vmul.f32 %v6333_v34, %v6551_v55  ;;  %v2083_v11 = vadd.f32 %v2067_v20, %v6440_v29  ;;  %v2165_v29 = vmul.f32 %v6526_v17, %v6551_v55 }
 0x188   : > { %10275 = vst [vmem:[#allocation50_spill] sm:$0xff] %v6565_v7  ;;  %v6571_v60 = vld [vmem:[#allocation2 + $0x94] sm:$0xff]  ;;  %v1888_v32 = vadd.f32 %v1872_v16, %v1823_v58  ;;  %v1969_v10 = vmul.f32 %v6336_v59, %v6565_v7  ;;  %v6579_v24 = vld [vmem:[#allocation2 + $0x9c] sm:$0xff]  ;;  %v1970_v1 = vmul.f32 %v6336_v59, %v6567_v62  ;;  %v1794_v58 = vld [vmem:[#allocation2 + $0x8] sm:$0xff] }
 0x189   : > { %10276 = vst [vmem:[#allocation51_spill] sm:$0xff] %v6567_v62  ;;  %v1842_v16 = vld [vmem:[#allocation2 + $0x1] sm:$0xff]  ;;  %v2018_v26 = vmul.f32 %v6365_v61, %v6571_v60  ;;  %v2019_v31 = vmul.f32 %v6365_v61, %v6579_v24  ;;  %v2132_v52 = vadd.f32 %v2116_v25, %v2083_v11  ;;  %v2214_v11 = vmul.f32 %v6529_v53, %v6567_v62 }
 0x18a   : > { %10277 = vst [vmem:[#allocation52_spill] sm:$0xff] %v6571_v60  ;;  %v1937_v54 = vadd.f32 %v1921_v18, %v1888_v32  ;;  %v1985_v36 = vadd.f32 %v1969_v10, %v1936_v4  ;;  %v2213_v10 = vmul.f32 %v6529_v53, %v6565_v7  ;;  %v5249_v18 = vpop.eup %5248  ;;  %v1811_v32 = vmul.f32 %v6322_v51, %v1794_v58  ;;  %v1891_v4 = vld [vmem:[#allocation2 + $0x2] sm:$0xff] }
 0x18b   : > { %10278 = vst [vmem:[#allocation53_spill] sm:$0xff] %v6579_v24  ;;  %v1859_v5 = vmul.f32 %v6325_v44, %v1842_v16  ;;  %v2181_v6 = vadd.f32 %v2165_v29, %v2132_v52  ;;  %v1860_v25 = vmul.f32 %v6325_v44, %v1843_v56  ;;  %v2262_v9 = vmul.f32 %v6538_v48, %v6571_v60 }
 0x18c   : > { %v1986_v20 = vadd.f32 %v1970_v1, %v1937_v54  ;;  %v6595_v12 = vadd.f32 %v2018_v26, %v1985_v36  ;;  %v2229_v1 = vadd.f32 %v2213_v10, %v2180_v2  ;;  %v1892_v26 = vld [vmem:[#allocation2 + $0xa] sm:$0xff]  ;;  %v2263_v58 = vmul.f32 %v6538_v48, %v6579_v24  ;;  %v5251_v36 = vpop.eup %5250 }
 0x18d   : > { %v2230_v63 = vadd.f32 %v2214_v11, %v2181_v6  ;;  %v1406_v16 = vsub.f32 0.0, %v6554_v22  ;;  %v1407_v54 = vsub.f32 0.0, %v6557_v37  ;;  %v1875_v56 = vadd.f32 %v1859_v5, %v1810_v49  ;;  %v1940_v10 = vld [vmem:[#allocation2 + $0x3] sm:$0xff]  ;;  %v1941_v6 = vld [vmem:[#allocation2 + $0xb] sm:$0xff] }
 0x18e   : > { %10279 = vst [vmem:[#allocation54_spill] sm:$0xff] %v6595_v12  ;;  %v6604_v30 = vadd.f32 %v2019_v31, %v1986_v20  ;;  %v6611_v52 = vadd.f32 %v2262_v9, %v2229_v1  ;;  %v1908_v31 = vmul.f32 %v6333_v34, %v1891_v4  ;;  %v1876_v2 = vadd.f32 %v1860_v25, %v1811_v32  ;;  %v1989_v32 = vld [vmem:[#allocation2 + $0x4] sm:$0xff]  ;;  %v1990_v25 = vld [vmem:[#allocation2 + $0xc] sm:$0xff] }
 0x18f   : > { %v6615_v29 = vadd.f32 %v2263_v58, %v2230_v63  ;;  %v1909_v20 = vmul.f32 %v6333_v34, %v1892_v26  ;;  %v1468_v11 = vmul.f32 1.442695, %v1406_v16  ;;  %v1957_v24 = vmul.f32 %v6336_v59, %v1940_v10 }
 0x190   : > { %10280 = vst [vmem:[#allocation55_spill] sm:$0xff] %v6604_v30  ;;  %v1470_v30 = vmul.f32 1.442695, %v1407_v54  ;;  %v1924_v12 = vadd.f32 %v1908_v31, %v1875_v56  ;;  %v1588_v1 = vmul.f32 %v5249_v18, %v6481_v15  ;;  %v1589_v9 = vmul.f32 %v5251_v36, %v6486_v50  ;;  %v1790_v15 = vld [vmem:[%s10065_s3 + $0x10] sm:$0xff] }
 0x191   : > { %10281 = vst [vmem:[#allocation56_spill] sm:$0xff] %v6611_v52  ;;  %v6621_v52 = vpop.permute.xlu0 %5139  ;;  %v1925_v49 = vadd.f32 %v1909_v20, %v1876_v2  ;;  %v1958_v5 = vmul.f32 %v6336_v59, %v1941_v6  ;;  %5252 = vpow2.f32 %v1468_v11  ;;  %v2006_v63 = vmul.f32 %v6365_v61, %v1989_v32 }
 0x192   : > { %10282 = vst [vmem:[#allocation57_spill] sm:$0xff] %v6615_v29  ;;  %v1723_v4 = vpack.c.bf16 %v1588_v1, %v1588_v1  ;;  %v1724_v26 = vpack.c.bf16 %v1589_v9, %v1589_v9  ;;  %5254 = vpow2.f32 %v1470_v30  ;;  %v5141_v50 = vunpack.i.l.bf16 %v6621_v52 }
 0x193   : > { %1670 = vst.msk [vmem:[#allocation2 + $0x32] sm:$0xff] %vm1665_vm1, %v1588_v1  ;;  %v1973_v18 = vadd.f32 %v1957_v24, %v1924_v12  ;;  %v6632_v58 = vperm.slane %v6513_v27, 2  ;;  %v6635_v16 = vperm.slane %v6513_v27, 3  ;;  %v1974_v54 = vadd.f32 %v1958_v5, %v1925_v49 }
 0x194   : > { %1671 = vst.msk [vmem:[#allocation2 + $0x3a] sm:$0xff] %vm1665_vm1, %v1589_v9  ;;  %v2007_v36 = vmul.f32 %v6365_v61, %v1990_v25  ;;  %v6641_v56 = vperm.slane %v6513_v27, 4  ;;  %v6644_v30 = vperm.slane %v6513_v27, 5  ;;  %v6649_v24 = vperm.slane %v6513_v27, 6 }
 0x195   : > { %10283 = vst [vmem:[#allocation58_spill] sm:$0xff] %v6632_v58  ;;  %v6652_v12 = vperm.slane %v6513_v27, 7  ;;  %v6654_v31 = vperm.slane %v1790_v15, 0  ;;  %v6656_v2 = vperm.slane %v1790_v15, 1  ;;  %v6658_v20 = vperm.slane %v1790_v15, 2 }
 0x196   : > { %10284 = vst [vmem:[#allocation59_spill] sm:$0xff] %v6635_v16  ;;  %v6660_v10 = vperm.slane %v1790_v15, 3  ;;  %v6662_v6 = vperm.slane %v1790_v15, 4  ;;  %v1278_v11 = vmul.f32 %v5141_v50, %v6136_v3  ;;  %v6665_v9 = vadd.f32 %v2006_v63, %v1973_v18 }
 0x197   : > { %1756 = vst.msk [vmem:[%s6299_s8] sm:$0xf] %vm1755_vm2, %v1723_v4  ;;  %v5253_v1 = vpop.eup %5252  ;;  %v6667_v49 = vperm.slane %v1790_v15, 5  ;;  %v6669_v5 = vperm.slane %v1790_v15, 6  ;;  %v6671_v27 = vperm.slane %v1790_v15, 7  ;;  %v6673_v25 = vadd.f32 %v2007_v36, %v1974_v54 }
 0x198   : > { %10285 = vst [vmem:[#allocation60_spill] sm:$0xff] %v6641_v56  ;;  %v5255_v32 = vpop.eup %5254  ;;  %v6677_v4 = vmul.f32 %v6526_v17, %v6355_v13  ;;  %v6685_v50 = vmul.f32 %v6538_v48, %v6380_v19  ;;  %v6689_v18 = vmul.f32 %v6641_v56, %v6355_v13  ;;  %v6693_v15 = vmul.f32 %v6644_v30, %v6369_v42 }
 0x199   : > { %10286 = vst [vmem:[#allocation61_spill] sm:$0xff] %v6644_v30  ;;  %v6697_v63 = vmul.f32 %v6649_v24, %v6380_v19  ;;  %v6701_v54 = vmul.f32 %v6656_v2, %v6355_v13  ;;  %v6705_v36 = vmul.f32 %v6658_v20, %v6369_v42  ;;  %v6709_v29 = vmul.f32 %v6660_v10, %v6380_v19 }
 0x19a   : > { %1757 = vst.msk [vmem:[%s6299_s8 + $0x4] sm:$0xf] %vm1755_vm2, %v1724_v26  ;;  %v6681_v26 = vmul.f32 %v6529_v53, %v6369_v42  ;;  %v1318_v60 = vadd.f32 %v1278_v11, %v6080_v33  ;;  %v1527_v13 = vadd.f32 1.0, %v5255_v32  ;;  %v5142_v62 = vunpack.i.h.bf16 %v6621_v52 }
 0x19b   : > { %10287 = vst [vmem:[#allocation62_spill] sm:$0xff] %v6652_v12  ;;  %v6723_v42 = vmul.f32 %v6523_v43, %v6342_v8  ;;  %v6727_v19 = vmul.f32 %v6523_v43, %v6349_v46  ;;  %v6731_v33 = vmul.f32 %v6526_v17, %v6353_v39  ;;  %v6735_v11 = vmul.f32 %v6529_v53, %v6362_v41 }
 0x19c   : > { %10288 = vst [vmem:[#allocation63_spill] sm:$0xff] %v6654_v31  ;;  %v6743_v52 = vmul.f32 %v6632_v58, %v6338_v45  ;;  %v6747_v32 = vmul.f32 %v6632_v58, %v6340_v38  ;;  %v6759_v7 = vmul.f32 %v6641_v56, %v6353_v39 }
 0x19d   : > { %10289 = vst [vmem:[#allocation64_spill] sm:$0xff] %v6658_v20 }
 0x19e   : > { %10290 = vst [vmem:[#allocation65_spill] sm:$0xff] %v6660_v10 }
 0x19f   : > { %10291 = vst [vmem:[#allocation66_spill] sm:$0xff] %v6662_v6 }
 0x1a0   : > { %10292 = vst [vmem:[#allocation67_spill] sm:$0xff] %v6667_v49 }
 0x1a1   : > { %10293 = vst [vmem:[#allocation68_spill] sm:$0xff] %v6669_v5 }
 0x1a2   : > { %10294 = vst [vmem:[#allocation69_spill] sm:$0xff] %v6671_v27 }
 0x1a3   : > { %10295 = vst [vmem:[#allocation70_spill] sm:$0xff] %v6677_v4  ;;  %v6788_v4 = vmul.f32 %v6654_v31, %v6342_v8 }
 0x1a4   : > { %10296 = vst [vmem:[#allocation71_spill] sm:$0xff] %v6681_v26  ;;  %v6775_v26 = vmul.f32 %v6649_v24, %v6373_v40 }
 0x1a5   : > { %10297 = vst [vmem:[#allocation72_spill] sm:$0xff] %v6685_v50  ;;  %v1526_v50 = vadd.f32 1.0, %v5253_v1  ;;  %v6739_v1 = vmul.f32 %v6538_v48, %v6373_v40 }
 0x1a6   : > { %10298 = vst [vmem:[#allocation73_spill] sm:$0xff] %v6689_v18  ;;  %v6771_v18 = vmul.f32 %v6644_v30, %v6362_v41 }
 0x1a7   : > { %10299 = vst [vmem:[#allocation74_spill] sm:$0xff] %v6693_v15  ;;  %v6714_v15 = vmul.f32 %v6520_v35, %v6338_v45  ;;  %5256 = vrcp.f32 %v1526_v50  ;;  %v1279_v50 = vmul.f32 %v5142_v62, %v6136_v3  ;;  %v1844_v62 = vld [vmem:[#allocation2 + $0x19] sm:$0xff] }
 0x1a8   : > { %10300 = vst [vmem:[#allocation75_spill] sm:$0xff] %v6697_v63  ;;  %v6718_v63 = vmul.f32 %v6520_v35, %v6340_v38  ;;  %5258 = vrcp.f32 %v1527_v13  ;;  %v6796_v13 = vmul.f32 %v6656_v2, %v6353_v39  ;;  %v6816_v39 = vmul.f32 %v6523_v43, %v6391_v47 }
 0x1a9   : > { %10301 = vst [vmem:[#allocation76_spill] sm:$0xff] %v6701_v54 }
 0x1aa   : > { %10302 = vst [vmem:[#allocation77_spill] sm:$0xff] %v6705_v36  ;;  %v6755_v36 = vmul.f32 %v6635_v16, %v6349_v46 }
 0x1ab   : > { %10303 = vst [vmem:[#allocation78_spill] sm:$0xff] %v6709_v29  ;;  %v6751_v29 = vmul.f32 %v6635_v16, %v6342_v8  ;;  %v6808_v8 = vmul.f32 %v6520_v35, %v6387_v57 }
 0x1ac   : > { %10304 = vst [vmem:[#allocation79_spill] sm:$0xff] %v6714_v15 }
 0x1ad   : > { %10305 = vst [vmem:[#allocation80_spill] sm:$0xff] %v6718_v63 }
 0x1ae   : > { %10306 = vst [vmem:[#allocation81_spill] sm:$0xff] %v6723_v42  ;;  %v1894_v42 = vld [vmem:[#allocation2 + $0x22] sm:$0xff] }
 0x1af   : > { %10307 = vst [vmem:[#allocation82_spill] sm:$0xff] %v6727_v19  ;;  %v10336_v19 = vld [vmem:[#allocation35_spill] sm:$0xff] }
 0x1b0   : > { %10308 = vst [vmem:[#allocation83_spill] sm:$0xff] %v6731_v33  ;;  %v10332_v33 = vld [vmem:[#allocation33_spill] sm:$0xff] }
 0x1b1   : > { %10309 = vst [vmem:[#allocation84_spill] sm:$0xff] %v6735_v11  ;;  %v1795_v11 = vld [vmem:[#allocation2 + $0x18] sm:$0xff] }
 0x1b2   : > { %10310 = vst [vmem:[#allocation85_spill] sm:$0xff] %v6739_v1  ;;  %v6764_v1 = vld [vmem:[%s10064_s2] ss:$0 sm:$0xff] }
 0x1b3   : > { %10311 = vst [vmem:[#allocation86_spill] sm:$0xff] %v6743_v52  ;;  %v6767_v54 = vadd.f32 %v6764_v1, %v1318_v60  ;;  %v6784_v60 = vmul.f32 %v6652_v12, %v6340_v38  ;;  %v6804_v38 = vmul.f32 %v6660_v10, %v6373_v40  ;;  %v6858_v52 = vmul.f32 %v6632_v58, %v6387_v57 }
 0x1b4   : > { %10312 = vst [vmem:[#allocation87_spill] sm:$0xff] %v6747_v32 }
 0x1b5   : > { %10313 = vst [vmem:[#allocation88_spill] sm:$0xff] %v6751_v29  ;;  %v1402_v40 = vsub.f32 0.0, %v6767_v54  ;;  %v1861_v29 = vmul.f32 %v6325_v44, %v1844_v62 }
 0x1b6   : > { %10314 = vst [vmem:[#allocation89_spill] sm:$0xff] %v6755_v36 }
 0x1b7   : > { %10315 = vst [vmem:[#allocation90_spill] sm:$0xff] %v6759_v7  ;;  %v6780_v7 = vmul.f32 %v6652_v12, %v6338_v45  ;;  %v6800_v45 = vmul.f32 %v6658_v20, %v6362_v41  ;;  %v1845_v41 = vld [vmem:[#allocation2 + $0x21] sm:$0xff]  ;;  %v1460_v32 = vmul.f32 1.442695, %v1402_v40 }
 0x1b8   : > { %10316 = vst [vmem:[#allocation91_spill] sm:$0xff] %v6767_v54  ;;  %v1943_v54 = vld [vmem:[#allocation2 + $0x23] sm:$0xff] }
 0x1b9   : > { %10317 = vst [vmem:[#allocation92_spill] sm:$0xff] %v6771_v18  ;;  %v6792_v18 = vmul.f32 %v6654_v31, %v6349_v46  ;;  %v6812_v46 = vmul.f32 %v6520_v35, %v6389_v23  ;;  %5260 = vpow2.f32 %v1460_v32 }
 0x1ba   : > { %10318 = vst [vmem:[#allocation93_spill] sm:$0xff] %v6775_v26  ;;  %v1796_v26 = vld [vmem:[#allocation2 + $0x20] sm:$0xff] }
 0x1bb   : > { %10319 = vst [vmem:[#allocation94_spill] sm:$0xff] %v6780_v7  ;;  %v2105_v7 = vmul.f32 %v6523_v43, %v1844_v62 }
 0x1bc   : > { %10320 = vst [vmem:[#allocation95_spill] sm:$0xff] %v6784_v60  ;;  %v10338_v60 = vld [vmem:[#allocation36_spill] sm:$0xff] }
 0x1bd   : > { %10321 = vst [vmem:[#allocation96_spill] sm:$0xff] %v6788_v4  ;;  %v10334_v4 = vld [vmem:[#allocation34_spill] sm:$0xff] }
 0x1be   : > { %10322 = vst [vmem:[#allocation97_spill] sm:$0xff] %v6792_v18  ;;  %v6835_v18 = vmul.f32 %v6529_v53, %v10332_v33  ;;  %v6839_v36 = vmul.f32 %v6529_v53, %v10334_v4  ;;  %v6899_v32 = vmul.f32 %v6644_v30, %v10334_v4 }
 0x1bf   : > { %10323 = vst [vmem:[#allocation98_spill] sm:$0xff] %v6796_v13  ;;  %v5257_v13 = vpop.eup %5256 }
 0x1c0   : > { %10324 = vst [vmem:[#allocation99_spill] sm:$0xff] %v6800_v45  ;;  %v2056_v45 = vmul.f32 %v6520_v35, %v1795_v11  ;;  %v5259_v55 = vpop.eup %5258 }
 0x1c1   : > { %10325 = vst [vmem:[#allocation100_spill] sm:$0xff] %v6804_v38  ;;  %v6822_v38 = vmul.f32 %v6523_v43, %v6395_v21 }
 0x1c2   : > { %10326 = vst [vmem:[#allocation101_spill] sm:$0xff] %v6808_v8  ;;  %v6826_v8 = vmul.f32 %v6526_v17, %v6402_v0 }
 0x1c3   : > { %10327 = vst [vmem:[#allocation102_spill] sm:$0xff] %v6812_v46  ;;  %v6830_v46 = vmul.f32 %v6526_v17, %v6412_v14 }
 0x1c4   : > { %10328 = vst [vmem:[#allocation103_spill] sm:$0xff] %v6816_v39  ;;  %v1319_v39 = vadd.f32 %v1279_v50, %v6083_v28  ;;  %v1813_v28 = vmul.f32 %v6322_v51, %v1796_v26  ;;  %v1862_v50 = vmul.f32 %v6325_v44, %v1845_v41 }
 0x1c5   : > { %10329 = vst [vmem:[#allocation104_spill] sm:$0xff] %v6822_v38  ;;  %v1812_v38 = vmul.f32 %v6322_v51, %v1795_v11  ;;  %v2072_v11 = vadd.f32 %v2056_v45, %v6665_v9  ;;  %v1606_v9 = vmul.f32 %v5257_v13, %v6554_v22  ;;  %v1607_v45 = vmul.f32 %v5259_v55, %v6557_v37 }
 0x1c6   : > { %10330 = vst [vmem:[#allocation105_spill] sm:$0xff] %v6826_v8  ;;  %v1893_v8 = vld [vmem:[#allocation2 + $0x1a] sm:$0xff]  ;;  %v1878_v62 = vadd.f32 %v1862_v50, %v1813_v28  ;;  %v6877_v22 = vmul.f32 %v6635_v16, %v6391_v47  ;;  %v6881_v55 = vmul.f32 %v6635_v16, %v6395_v21  ;;  %v6885_v37 = vmul.f32 %v6641_v56, %v6402_v0  ;;  %v1992_v28 = vld [vmem:[#allocation2 + $0x24] sm:$0xff] }
 0x1c7   : > { %10331 = vst [vmem:[#allocation106_spill] sm:$0xff] %v6830_v46  ;;  %v6845_v46 = vmul.f32 %v6538_v48, %v10336_v19  ;;  %v1910_v63 = vmul.f32 %v6333_v34, %v1893_v8  ;;  %v1877_v15 = vadd.f32 %v1861_v29, %v1812_v38  ;;  %v2154_v27 = vmul.f32 %v6526_v17, %v1893_v8 }
 0x1c8   : > { %10333 = vst [vmem:[#allocation33_spill] sm:$0xff] %v6835_v18  ;;  %v2057_v18 = vmul.f32 %v6520_v35, %v1796_v26  ;;  %v6866_v26 = vadd.f32 %v6764_v1, %v1319_v39  ;;  %v2121_v5 = vadd.f32 %v2105_v7, %v2072_v11  ;;  %v1741_v29 = vpack.c.bf16 %v1606_v9, %v1606_v9 }
 0x1c9   : > { %10335 = vst [vmem:[#allocation34_spill] sm:$0xff] %v6839_v36  ;;  %v6852_v36 = vmul.f32 %v6538_v48, %v10338_v60  ;;  %v1742_v38 = vpack.c.bf16 %v1607_v45, %v1607_v45  ;;  %v6903_v13 = vmul.f32 %v6649_v24, %v10336_v19  ;;  %v1960_v39 = vmul.f32 %v6336_v59, %v1943_v54 }
 0x1ca   : > { %10337 = vst [vmem:[#allocation35_spill] sm:$0xff] %v6845_v46  ;;  %v6862_v46 = vmul.f32 %v6632_v58, %v6389_v23  ;;  %v2073_v40 = vadd.f32 %v2057_v18, %v6673_v25  ;;  %v1403_v7 = vsub.f32 0.0, %v6866_v26  ;;  %v6891_v25 = vmul.f32 %v6641_v56, %v6412_v14 }
 0x1cb   : > { %10339 = vst [vmem:[#allocation36_spill] sm:$0xff] %v6852_v36  ;;  %v1911_v36 = vmul.f32 %v6333_v34, %v1894_v42  ;;  %v6895_v18 = vmul.f32 %v6644_v30, %v10332_v33  ;;  %v2155_v11 = vmul.f32 %v6526_v17, %v1894_v42 }
 0x1cc   : > { %10340 = vst [vmem:[#allocation107_spill] sm:$0xff] %v6858_v52  ;;  %v2106_v52 = vmul.f32 %v6523_v43, %v1845_v41  ;;  %v1991_v41 = vld [vmem:[#allocation2 + $0x1c] sm:$0xff]  ;;  %v1462_v42 = vmul.f32 1.442695, %v1403_v7 }
 0x1cd   : > { %10341 = vst [vmem:[#allocation108_spill] sm:$0xff] %v6862_v46  ;;  %v1942_v46 = vld [vmem:[#allocation2 + $0x1b] sm:$0xff]  ;;  %v2252_v7 = vmul.f32 %v6538_v48, %v1991_v41 }
 0x1ce   : > { %1688 = vst.msk [vmem:[#allocation2 + $0x10a] sm:$0xff] %vm1665_vm1, %v1606_v9  ;;  %v1959_v8 = vmul.f32 %v6336_v59, %v1942_v46  ;;  %v2122_v50 = vadd.f32 %v2106_v52, %v2073_v40  ;;  %v1926_v9 = vadd.f32 %v1910_v63, %v1877_v15  ;;  %v6923_v52 = vmul.f32 %v6652_v12, %v6389_v23  ;;  %v5261_v40 = vpop.eup %5260 }
 0x1cf   : > { %1689 = vst.msk [vmem:[#allocation2 + $0x112] sm:$0xff] %vm1665_vm1, %v1607_v45  ;;  %v1927_v45 = vadd.f32 %v1911_v36, %v1878_v62  ;;  %v2008_v15 = vmul.f32 %v6365_v61, %v1991_v41  ;;  %v2009_v63 = vmul.f32 %v6365_v61, %v1992_v28  ;;  %5262 = vpow2.f32 %v1462_v42 }
 0x1d0   : > { %10342 = vst [vmem:[#allocation109_spill] sm:$0xff] %v6891_v25  ;;  %v5115_v25 = vpop.permute.xlu1 %5114  ;;  %v2171_v36 = vadd.f32 %v2155_v11, %v2122_v50  ;;  %v2253_v41 = vmul.f32 %v6538_v48, %v1992_v28  ;;  %v1798_v50 = vld [vmem:[#allocation2 + $0x38] sm:$0xff]  ;;  %v6966_v42 = vmul.f32 %v6662_v6, %v6387_v57 }
 0x1d1   : > { %10343 = vst [vmem:[#allocation110_spill] sm:$0xff] %v6895_v18  ;;  %v2203_v18 = vmul.f32 %v6529_v53, %v1942_v46  ;;  %v2204_v46 = vmul.f32 %v6529_v53, %v1943_v54  ;;  %v5117_v62 = vunpack.i.h.bf16 %v5115_v25  ;;  %v6947_v54 = vmul.f32 %v6658_v20, %v10332_v33  ;;  %v1847_v11 = vld [vmem:[#allocation2 + $0x39] sm:$0xff] }
 0x1d2   : > { %10344 = vst [vmem:[#allocation111_spill] sm:$0xff] %v6899_v32  ;;  %v2170_v32 = vadd.f32 %v2154_v27, %v2121_v5  ;;  %v6927_v5 = vmul.f32 %v6654_v31, %v6391_v47  ;;  %v6931_v27 = vmul.f32 %v6654_v31, %v6395_v21  ;;  %v1522_v31 = vadd.f32 1.0, %v5261_v40 }
 0x1d3   : > { %10345 = vst [vmem:[#allocation112_spill] sm:$0xff] %v6903_v13  ;;  %v6919_v13 = vmul.f32 %v6652_v12, %v6387_v57 }
 0x1d4   : > { %1774 = vst.msk [vmem:[%s6299_s8 + $0x48] sm:$0xf] %vm1755_vm2, %v1741_v29  ;;  %v6915_v29 = vmul.f32 %v6649_v24, %v10338_v60  ;;  %5264 = vrcp.f32 %v1522_v31  ;;  %v6980_v31 = vmul.f32 %v6662_v6, %v6389_v23 }
 0x1d5   : > { %1775 = vst.msk [vmem:[%s6299_s8 + $0x4c] sm:$0xf] %vm1755_vm2, %v1742_v38  ;;  %v5116_v38 = vunpack.i.l.bf16 %v5115_v25  ;;  %v6951_v25 = vmul.f32 %v6658_v20, %v10334_v4 }
 0x1d6   : > { %10346 = vst [vmem:[#allocation113_spill] sm:$0xff] %v6915_v29  ;;  %v1975_v29 = vadd.f32 %v1959_v8, %v1926_v9  ;;  %v1797_v8 = vld [vmem:[#allocation2 + $0x30] sm:$0xff]  ;;  %v2220_v9 = vadd.f32 %v2204_v46, %v2171_v36  ;;  %v1815_v36 = vmul.f32 %v6322_v51, %v1798_v50  ;;  %v1864_v46 = vmul.f32 %v6325_v44, %v1847_v11 }
 0x1d7   : > { %10347 = vst [vmem:[#allocation114_spill] sm:$0xff] %v6919_v13  ;;  %v2219_v13 = vadd.f32 %v2203_v18, %v2170_v32  ;;  %v6955_v18 = vmul.f32 %v6660_v10, %v10336_v19  ;;  %v6959_v32 = vmul.f32 %v6660_v10, %v10338_v60  ;;  %v1268_v4 = vmul.f32 %v5116_v38, %v6136_v3 }
 0x1d8   : > { %10348 = vst [vmem:[#allocation115_spill] sm:$0xff] %v6923_v52  ;;  %v1976_v52 = vadd.f32 %v1960_v39, %v1927_v45  ;;  %v1846_v39 = vld [vmem:[#allocation2 + $0x31] sm:$0xff]  ;;  %v1269_v45 = vmul.f32 %v5117_v62, %v6136_v3  ;;  %v2024_v19 = vadd.f32 %v2008_v15, %v1975_v29  ;;  %v1814_v60 = vmul.f32 %v6322_v51, %v1797_v8 }
 0x1d9   : > { %10349 = vst [vmem:[#allocation116_spill] sm:$0xff] %v6927_v5  ;;  %v6939_v5 = vmul.f32 %v6656_v2, %v6402_v0  ;;  %v2058_v28 = vmul.f32 %v6520_v35, %v1797_v8  ;;  %v1895_v62 = vld [vmem:[#allocation2 + $0x32] sm:$0xff]  ;;  %v2059_v38 = vmul.f32 %v6520_v35, %v1798_v50  ;;  %v2302_v57 = vmul.f32 %v6632_v58, %v1797_v8  ;;  %v10363_v8 = vld [vmem:[#allocation68_spill] sm:$0xff] }
 0x1da   : > { %10350 = vst [vmem:[#allocation117_spill] sm:$0xff] %v6931_v27  ;;  %v6943_v27 = vmul.f32 %v6656_v2, %v6412_v14  ;;  %v2025_v40 = vadd.f32 %v2009_v63, %v1976_v52  ;;  %v2269_v29 = vadd.f32 %v2253_v41, %v2220_v9  ;;  %v10358_v52 = vld [vmem:[#allocation3_spill] sm:$0xff]  ;;  %v10359_v63 = vld [vmem:[#allocation4_spill] sm:$0xff]  ;;  %v6992_v41 = vmul.f32 %v10363_v8, %v6402_v0 }
 0x1db   : > { %10351 = vst [vmem:[#allocation118_spill] sm:$0xff] %v6939_v5  ;;  %v1308_v15 = vadd.f32 %v1268_v4, %v10358_v52  ;;  %v1912_v23 = vmul.f32 %v6333_v34, %v1895_v62  ;;  %v1944_v4 = vld [vmem:[#allocation2 + $0x33] sm:$0xff]  ;;  %v2074_v52 = vadd.f32 %v2058_v28, %v2024_v19  ;;  %v2108_v19 = vmul.f32 %v6523_v43, %v1847_v11 }
 0x1dc   : > { %10352 = vst [vmem:[#allocation119_spill] sm:$0xff] %v6943_v27  ;;  %v2156_v28 = vmul.f32 %v6526_v17, %v1895_v62  ;;  %v10402_v27 = vld [vmem:[#allocation38_spill] sm:$0xff] }
 0x1dd   : > { %10353 = vst [vmem:[#allocation120_spill] sm:$0xff] %v6947_v54  ;;  %v6988_v54 = vmul.f32 %v6667_v49, %v6395_v21  ;;  %v7001_v0 = vadd.f32 %v6764_v1, %v1308_v15 }
 0x1de   : > { %10354 = vst [vmem:[#allocation121_spill] sm:$0xff] %v6951_v25  ;;  %v6984_v25 = vmul.f32 %v6667_v49, %v6391_v47  ;;  %v1880_v47 = vadd.f32 %v1864_v46, %v1815_v36  ;;  %v2352_v36 = vmul.f32 %v6635_v16, %v1847_v11  ;;  %v5165_v46 = vpop.permute.xlu2 %5164 }
 0x1df   : > { %10355 = vst [vmem:[#allocation122_spill] sm:$0xff] %v6955_v18  ;;  %v2268_v18 = vadd.f32 %v2252_v7, %v2219_v13  ;;  %v2303_v13 = vmul.f32 %v6632_v58, %v1798_v50  ;;  %v1309_v7 = vadd.f32 %v1269_v45, %v10359_v63  ;;  %v6996_v50 = vmul.f32 %v10363_v8, %v6412_v14  ;;  %v1896_v45 = vld [vmem:[#allocation2 + $0x3a] sm:$0xff] }
 0x1e0   : > { %10356 = vst [vmem:[#allocation123_spill] sm:$0xff] %v6959_v32  ;;  %v1863_v32 = vmul.f32 %v6325_v44, %v1846_v39  ;;  %v2075_v63 = vadd.f32 %v2059_v38, %v2025_v40  ;;  %v2351_v40 = vmul.f32 %v6635_v16, %v1846_v39 }
 0x1e1   : > { %10357 = vst [vmem:[#allocation124_spill] sm:$0xff] %v6966_v42  ;;  %v5263_v42 = vpop.eup %5262  ;;  %v2319_v10 = vadd.f32 %v2303_v13, %v2269_v29  ;;  %v7004_v14 = vadd.f32 %v6764_v1, %v1309_v7  ;;  %v10366_v29 = vld [vmem:[#allocation91_spill] sm:$0xff] }
 0x1e2   : > { %10360 = vst [vmem:[#allocation3_spill] sm:$0xff] %v6980_v31  ;;  %v1879_v9 = vadd.f32 %v1863_v32, %v1814_v60  ;;  %v1523_v31 = vadd.f32 1.0, %v5263_v42  ;;  %v5265_v21 = vpop.eup %5264  ;;  %v1913_v32 = vmul.f32 %v6333_v34, %v1896_v45  ;;  %v1961_v60 = vmul.f32 %v6336_v59, %v1944_v4  ;;  %v1945_v7 = vld [vmem:[#allocation2 + $0x3b] sm:$0xff] }
 0x1e3   : > { %10361 = vst [vmem:[#allocation4_spill] sm:$0xff] %v6984_v25  ;;  %v2318_v25 = vadd.f32 %v2302_v57, %v2268_v18  ;;  %v2124_v38 = vadd.f32 %v2108_v19, %v2075_v63  ;;  %v1602_v13 = vmul.f32 %v5265_v21, %v10366_v29  ;;  %v2205_v21 = vmul.f32 %v6529_v53, %v1944_v4  ;;  %v1993_v19 = vld [vmem:[#allocation2 + $0x34] sm:$0xff] }
 0x1e4   : > { %10362 = vst [vmem:[#allocation125_spill] sm:$0xff] %v6988_v54  ;;  %v2107_v54 = vmul.f32 %v6523_v43, %v1846_v39  ;;  %v1928_v18 = vadd.f32 %v1912_v23, %v1879_v9  ;;  %5266 = vrcp.f32 %v1523_v31  ;;  %v1929_v15 = vadd.f32 %v1913_v32, %v1880_v47 }
 0x1e5   : > { %10364 = vst [vmem:[#allocation126_spill] sm:$0xff] %v6992_v41  ;;  %v2367_v57 = vadd.f32 %v2351_v40, %v2318_v25  ;;  %v1392_v41 = vsub.f32 0.0, %v7001_v0  ;;  %v1393_v39 = vsub.f32 0.0, %v7004_v14  ;;  %v2400_v9 = vmul.f32 %v6641_v56, %v1895_v62  ;;  %v1994_v40 = vld [vmem:[#allocation2 + $0x3c] sm:$0xff] }
 0x1e6   : > { %10365 = vst [vmem:[#allocation127_spill] sm:$0xff] %v6996_v50  ;;  %v2123_v42 = vadd.f32 %v2107_v54, %v2074_v52  ;;  %v2368_v50 = vadd.f32 %v2352_v36, %v2319_v10  ;;  %v2157_v54 = vmul.f32 %v6526_v17, %v1896_v45  ;;  %v1737_v11 = vpack.c.bf16 %v1602_v13, %v1602_v13 }
 0x1e7   : > { %1684 = vst.msk [vmem:[#allocation2 + $0xda] sm:$0xff] %vm1665_vm1, %v1602_v13  ;;  %v5166_v23 = vunpack.i.l.bf16 %v5165_v46  ;;  %v2401_v31 = vmul.f32 %v6641_v56, %v1896_v45  ;;  %v1440_v52 = vmul.f32 1.442695, %v1392_v41  ;;  %v1442_v47 = vmul.f32 1.442695, %v1393_v39 }
 0x1e8   : > { %v2172_v25 = vadd.f32 %v2156_v28, %v2123_v42  ;;  %v1962_v10 = vmul.f32 %v6336_v59, %v1945_v7  ;;  %v2173_v63 = vadd.f32 %v2157_v54, %v2124_v38  ;;  %v2416_v32 = vadd.f32 %v2400_v9, %v2367_v57  ;;  %1770 = vst.msk [vmem:[%s6299_s8 + $0x38] sm:$0xf] %vm1755_vm2, %v1737_v11 }
 0x1e9   : > { %v2206_v62 = vmul.f32 %v6529_v53, %v1945_v7  ;;  %v2417_v36 = vadd.f32 %v2401_v31, %v2368_v50  ;;  %5268 = vpow2.f32 %v1440_v52  ;;  %v5167_v29 = vunpack.i.h.bf16 %v5165_v46  ;;  %v10369_v52 = vld [vmem:[#allocation5_spill] sm:$0xff] }
 0x1ea   : > { %v5267_v42 = vpop.eup %5266  ;;  %v1977_v28 = vadd.f32 %v1961_v60, %v1928_v18  ;;  %v2449_v41 = vmul.f32 %v6644_v30, %v1944_v4  ;;  %5270 = vpow2.f32 %v1442_v47  ;;  %v1288_v45 = vmul.f32 %v5166_v23, %v6136_v3 }
 0x1eb   : > { %v1978_v38 = vadd.f32 %v1962_v10, %v1929_v15  ;;  %v2221_v13 = vadd.f32 %v2205_v21, %v2172_v25  ;;  %v2450_v57 = vmul.f32 %v6644_v30, %v1945_v7  ;;  %v1603_v39 = vmul.f32 %v5267_v42, %v6866_v26  ;;  %v10367_v7 = vld [vmem:[#allocation69_spill] sm:$0xff] }
 0x1ec   : > { %v2010_v54 = vmul.f32 %v6365_v61, %v1993_v19  ;;  %v2011_v9 = vmul.f32 %v6365_v61, %v1994_v40  ;;  %v2222_v50 = vadd.f32 %v2206_v62, %v2173_v63  ;;  %v2465_v11 = vadd.f32 %v2449_v41, %v2416_v32 }
 0x1ed   : > { %v2254_v46 = vmul.f32 %v6538_v48, %v1993_v19  ;;  %v2466_v60 = vadd.f32 %v2450_v57, %v2417_v36  ;;  %1685 = vst.msk [vmem:[#allocation2 + $0xe2] sm:$0xff] %vm1665_vm1, %v1603_v39  ;;  %v1738_v4 = vpack.c.bf16 %v1603_v39, %v1603_v39  ;;  %v1289_v23 = vmul.f32 %v5167_v29, %v6136_v3 }
 0x1ee   : > { %v2299_v18 = vld [vmem:[#allocation2 + $0xd8] sm:$0xff]  ;;  %v7035_v26 = vmul.f32 %v10367_v7, %v10332_v33  ;;  %v2255_v25 = vmul.f32 %v6538_v48, %v1994_v40  ;;  %v2498_v31 = vmul.f32 %v6649_v24, %v1993_v19  ;;  %v1328_v47 = vadd.f32 %v1288_v45, %v10369_v52  ;;  %v10375_v52 = vld [vmem:[#allocation37_spill] sm:$0xff] }
 0x1ef   : > { %v2348_v15 = vld [vmem:[#allocation2 + $0xd9] sm:$0xff]  ;;  %v5269_v10 = vpop.eup %5268  ;;  %v2026_v63 = vadd.f32 %v2010_v54, %v1977_v28  ;;  %v2027_v21 = vadd.f32 %v2011_v9, %v1978_v38  ;;  %v2270_v32 = vadd.f32 %v2254_v46, %v2221_v13  ;;  %v2499_v62 = vmul.f32 %v6649_v24, %v1994_v40  ;;  %1771 = vst.msk [vmem:[%s6299_s8 + $0x3c] sm:$0xf] %vm1755_vm2, %v1738_v4  ;;  %v7046_v33 = vld [vmem:[%s10065_s3 + $0x18] ss:$0 sm:$0xff]  ;;  %v5485_v4 = vld [vmem:[#allocation2 + $0x83] sm:$0xff] }
 0x1f0   : > { %10368 = vst [vmem:[#allocation91_spill] sm:$0xff] %v7035_v26  ;;  %v2397_v36 = vld [vmem:[#allocation2 + $0xda] sm:$0xff]  ;;  %v5271_v29 = vpop.eup %5270  ;;  %v2271_v42 = vadd.f32 %v2255_v25, %v2222_v50  ;;  %v2514_v41 = vadd.f32 %v2498_v31, %v2465_v11  ;;  %v3189_v19 = vmul.f32 %v2299_v18, %v6322_v51  ;;  %v3237_v45 = vmul.f32 %v2348_v15, %v6325_v44  ;;  %v10374_v31 = vld [vmem:[#allocation80_spill] sm:$0xff] }
 0x1f1   : > { %v2515_v28 = vadd.f32 %v2499_v62, %v2466_v60  ;;  %v3428_v38 = vmul.f32 %v2299_v18, %v6520_v35  ;;  %v1512_v13 = vadd.f32 1.0, %v5269_v10  ;;  %v10370_v40 = vld [vmem:[#allocation6_spill] sm:$0xff]  ;;  %v3285_v54 = vmul.f32 %v2397_v36, %v6333_v34  ;;  %v10373_v11 = vld [vmem:[#allocation79_spill] sm:$0xff] }
 0x1f2   : > { %v1329_v57 = vadd.f32 %v1289_v23, %v10370_v40  ;;  %v3253_v39 = vadd.f32 %v3237_v45, %v3189_v19  ;;  %v1513_v9 = vadd.f32 1.0, %v5271_v29  ;;  %v7054_v46 = vadd.f32 %v6764_v1, %v1328_v47  ;;  %v5486_v10 = vld [vmem:[#allocation2 + $0x7c] sm:$0xff] }
 0x1f3   : > { %v7057_v50 = vmul.f32 %v5485_v4, %v10367_v7  ;;  %v2076_v25 = vadd.f32 %v10373_v11, %v2026_v63  ;;  %v2077_v60 = vadd.f32 %v10374_v31, %v2027_v21  ;;  %v3444_v18 = vadd.f32 %v3428_v38, %v10375_v52  ;;  %v10377_v62 = vld [vmem:[#allocation86_spill] sm:$0xff]  ;;  %v10378_v29 = vld [vmem:[#allocation87_spill] sm:$0xff] }
 0x1f4   : > { %10371 = vst [vmem:[#allocation69_spill] sm:$0xff] %v7054_v46  ;;  %v7063_v23 = vmul.f32 %v5486_v10, %v7046_v33  ;;  %v2320_v19 = vadd.f32 %v10377_v62, %v2270_v32  ;;  %v2321_v45 = vadd.f32 %v10378_v29, %v2271_v42  ;;  %v3301_v47 = vadd.f32 %v3285_v54, %v3253_v39  ;;  %v10379_v40 = vld [vmem:[#allocation94_spill] sm:$0xff]  ;;  %v10380_v26 = vld [vmem:[#allocation95_spill] sm:$0xff]  ;;  %v10386_v42 = vld [vmem:[#allocation44_spill] sm:$0xff] }
 0x1f5   : > { %10372 = vst [vmem:[#allocation5_spill] sm:$0xff] %v7057_v50  ;;  %v2564_v3 = vadd.f32 %v10379_v40, %v2514_v41  ;;  %v2565_v4 = vadd.f32 %v10380_v26, %v2515_v28  ;;  %5272 = vrcp.f32 %v1512_v13  ;;  %v7070_v63 = vadd.f32 %v6764_v1, %v1329_v57  ;;  %v10382_v21 = vld [vmem:[#allocation43_spill] sm:$0xff]  ;;  %v10388_v26 = vld [vmem:[#allocation48_spill] sm:$0xff]  ;;  %v10390_v1 = vld [vmem:[#allocation81_spill] sm:$0xff] }
 0x1f6   : > { %10376 = vst [vmem:[#allocation6_spill] sm:$0xff] %v7063_v23  ;;  %v7074_v38 = vmul.f32 %v6662_v6, %v10382_v21  ;;  %v10384_v11 = vld [vmem:[#allocation47_spill] sm:$0xff]  ;;  %5274 = vrcp.f32 %v1513_v9  ;;  %v1412_v32 = vsub.f32 0.0, %v7054_v46  ;;  %v7083_v41 = vmul.f32 %v6667_v49, %v10386_v42  ;;  %v10391_v57 = vld [vmem:[#allocation82_spill] sm:$0xff]  ;;  %v10392_v10 = vld [vmem:[#allocation45_spill] sm:$0xff] }
 0x1f7   : > { %10381 = vst [vmem:[#allocation79_spill] sm:$0xff] %v7070_v63  ;;  %v7078_v31 = vmul.f32 %v6662_v6, %v10384_v11  ;;  %v7087_v28 = vmul.f32 %v6667_v49, %v10388_v26  ;;  %v2125_v13 = vadd.f32 %v10390_v1, %v2076_v25  ;;  %v2126_v39 = vadd.f32 %v10391_v57, %v2077_v60  ;;  %v2300_v54 = vld [vmem:[#allocation2 + $0xe0] sm:$0xff]  ;;  %v10394_v9 = vld [vmem:[#allocation49_spill] sm:$0xff]  ;;  %v10396_v40 = vld [vmem:[#allocation88_spill] sm:$0xff] }
 0x1f8   : > { %10383 = vst [vmem:[#allocation80_spill] sm:$0xff] %v7074_v38  ;;  %v2349_v52 = vld [vmem:[#allocation2 + $0xe1] sm:$0xff]  ;;  %v7093_v62 = vmul.f32 %v10363_v8, %v10392_v10  ;;  %v7097_v29 = vmul.f32 %v10363_v8, %v10394_v9  ;;  %v2369_v21 = vadd.f32 %v10396_v40, %v2320_v19  ;;  %v10397_v11 = vld [vmem:[#allocation89_spill] sm:$0xff]  ;;  %v3476_v50 = vmul.f32 %v2348_v15, %v6523_v43 }
 0x1f9   : > { %10385 = vst [vmem:[#allocation37_spill] sm:$0xff] %v7078_v31  ;;  %v2370_v42 = vadd.f32 %v10397_v11, %v2321_v45  ;;  %v2398_v26 = vld [vmem:[#allocation2 + $0xe2] sm:$0xff]  ;;  %v10399_v1 = vld [vmem:[#allocation97_spill] sm:$0xff]  ;;  %v1413_v10 = vsub.f32 0.0, %v7070_v63  ;;  %v3190_v9 = vmul.f32 %v2300_v54, %v6322_v51  ;;  %v3524_v19 = vmul.f32 %v2397_v36, %v6526_v17 }
 0x1fa   : > { %10387 = vst [vmem:[#allocation86_spill] sm:$0xff] %v7083_v41  ;;  %v2446_v46 = vld [vmem:[#allocation2 + $0xdb] sm:$0xff]  ;;  %v10398_v23 = vld [vmem:[#allocation96_spill] sm:$0xff]  ;;  %v2614_v60 = vadd.f32 %v10399_v1, %v2565_v4  ;;  %v1480_v45 = vmul.f32 1.442695, %v1412_v32  ;;  %v3286_v11 = vmul.f32 %v2398_v26, %v6333_v34  ;;  %v3429_v38 = vmul.f32 %v2300_v54, %v6520_v35 }
 0x1fb   : > { %10389 = vst [vmem:[#allocation87_spill] sm:$0xff] %v7087_v28  ;;  %v2613_v25 = vadd.f32 %v10398_v23, %v2564_v3  ;;  %v2447_v57 = vld [vmem:[#allocation2 + $0xe3] sm:$0xff]  ;;  %v5273_v40 = vpop.eup %5272  ;;  %v3333_v3 = vmul.f32 %v2446_v46, %v6336_v59  ;;  %v10401_v1 = vld [vmem:[#allocation70_spill] sm:$0xff]  ;;  %v3492_v8 = vadd.f32 %v3476_v50, %v3444_v18  ;;  %v3477_v6 = vmul.f32 %v2349_v52, %v6523_v43 }
 0x1fc   : > { %10393 = vst [vmem:[#allocation94_spill] sm:$0xff] %v7093_v62  ;;  %v2495_v62 = vld [vmem:[#allocation2 + $0xdc] sm:$0xff]  ;;  %v2496_v28 = vld [vmem:[#allocation2 + $0xe4] sm:$0xff]  ;;  %v2175_v15 = vadd.f32 %v10401_v1, %v2126_v39  ;;  %v5275_v41 = vpop.eup %5274  ;;  %v3334_v31 = vmul.f32 %v2447_v57, %v6336_v59  ;;  %v3445_v5 = vadd.f32 %v3429_v38, %v10402_v27  ;;  %v3572_v39 = vmul.f32 %v2446_v46, %v6529_v53 }
 0x1fd   : > { %10395 = vst [vmem:[#allocation95_spill] sm:$0xff] %v7097_v29  ;;  %v3238_v29 = vmul.f32 %v2349_v52, %v6325_v44  ;;  %v10400_v23 = vld [vmem:[#allocation83_spill] sm:$0xff]  ;;  %v3349_v49 = vadd.f32 %v3333_v3, %v3301_v47  ;;  %v3381_v36 = vmul.f32 %v2495_v62, %v6365_v61  ;;  %v3382_v32 = vmul.f32 %v2496_v28, %v6365_v61  ;;  %v10412_v3 = vld [vmem:[#allocation76_spill] sm:$0xff] }
 0x1fe   : > { %v2174_v4 = vadd.f32 %v10400_v23, %v2125_v13  ;;  %v3540_v13 = vadd.f32 %v3524_v19, %v3492_v8  ;;  %v1592_v54 = vmul.f32 %v5273_v40, %v7001_v0  ;;  %v1593_v50 = vmul.f32 %v5275_v41, %v7004_v14  ;;  %v10404_v8 = vld [vmem:[#allocation90_spill] sm:$0xff] }
 0x1ff   : > { %v3254_v63 = vadd.f32 %v3238_v29, %v3190_v9  ;;  %v7119_v23 = vadd.f32 %v3381_v36, %v3349_v49  ;;  %v3525_v29 = vmul.f32 %v2398_v26, %v6526_v17  ;;  %v3493_v47 = vadd.f32 %v3477_v6, %v3445_v5  ;;  %v10408_v5 = vld [vmem:[#allocation71_spill] sm:$0xff]  ;;  %v10411_v19 = vld [vmem:[#allocation98_spill] sm:$0xff] }
 0x200   : > { %v3588_v9 = vadd.f32 %v3572_v39, %v3540_v13  ;;  %v3620_v52 = vmul.f32 %v2495_v62, %v6538_v48  ;;  %1674 = vst.msk [vmem:[#allocation2 + $0x62] sm:$0xff] %vm1665_vm1, %v1592_v54  ;;  %v1727_v27 = vpack.c.bf16 %v1592_v54, %v1592_v54  ;;  %v1728_v49 = vpack.c.bf16 %v1593_v50, %v1593_v50  ;;  %v10410_v62 = vld [vmem:[#allocation92_spill] sm:$0xff]  ;;  %v10414_v13 = vld [vmem:[#allocation51_spill] sm:$0xff] }
 0x201   : > { %v3302_v20 = vadd.f32 %v3286_v11, %v3254_v63  ;;  %10403 = vst [vmem:[#allocation43_spill] sm:$0xff] %v7119_v23  ;;  %v3573_v63 = vmul.f32 %v2447_v57, %v6529_v53  ;;  %v2418_v46 = vadd.f32 %v10404_v8, %v2369_v21  ;;  %v3541_v0 = vadd.f32 %v3525_v29, %v3493_v47  ;;  %v10416_v29 = vld [vmem:[#allocation99_spill] sm:$0xff]  ;;  %v10417_v54 = vld [vmem:[#allocation52_spill] sm:$0xff] }
 0x202   : > { %v7130_v26 = vadd.f32 %v3620_v52, %v3588_v9  ;;  %1675 = vst.msk [vmem:[#allocation2 + $0x6a] sm:$0xff] %vm1665_vm1, %v1593_v50  ;;  %v2224_v14 = vadd.f32 %v10408_v5, %v2175_v15  ;;  %v2662_v40 = vadd.f32 %v10411_v19, %v2613_v25  ;;  %v3621_v11 = vmul.f32 %v2496_v28, %v6538_v48  ;;  %v10418_v50 = vld [vmem:[#allocation53_spill] sm:$0xff]  ;;  %v10424_v5 = vld [vmem:[#allocation75_spill] sm:$0xff]  ;;  %v10426_v19 = vld [vmem:[#allocation78_spill] sm:$0xff] }
 0x203   : > { %v3350_v18 = vadd.f32 %v3334_v31, %v3302_v20  ;;  %v10407_v20 = vld [vmem:[#allocation84_spill] sm:$0xff]  ;;  %1760 = vst.msk [vmem:[%s6299_s8 + $0x10] sm:$0xf] %vm1755_vm2, %v1727_v27  ;;  %v10409_v31 = vld [vmem:[#allocation73_spill] sm:$0xff]  ;;  %v2467_v57 = vadd.f32 %v10410_v62, %v2418_v46  ;;  %v3589_v21 = vadd.f32 %v3573_v63, %v3541_v0  ;;  %v2663_v1 = vadd.f32 %v10412_v3, %v2614_v60 }
 0x204   : > { %10406 = vst [vmem:[#allocation44_spill] sm:$0xff] %v7130_v26  ;;  %v2223_v6 = vadd.f32 %v10407_v20, %v2174_v4  ;;  %v2419_v41 = vadd.f32 %v10409_v31, %v2370_v42  ;;  %v1482_v36 = vmul.f32 1.442695, %v1413_v10  ;;  %v7150_v15 = vmul.f32 %v10367_v7, %v10414_v13  ;;  %v10415_v42 = vld [vmem:[#allocation74_spill] sm:$0xff]  ;;  %v10421_v9 = vld [vmem:[#allocation85_spill] sm:$0xff]  ;;  %v10422_v63 = vld [vmem:[#allocation72_spill] sm:$0xff] }
 0x205   : > { %v7128_v38 = vadd.f32 %v3382_v32, %v3350_v18  ;;  %1761 = vst.msk [vmem:[%s6299_s8 + $0x14] sm:$0xf] %vm1755_vm2, %v1728_v49  ;;  %v10413_v32 = vld [vmem:[#allocation50_spill] sm:$0xff]  ;;  %v2711_v25 = vadd.f32 %v10416_v29, %v2662_v40  ;;  %v7156_v28 = vmul.f32 %v7046_v33, %v10417_v54  ;;  %v7160_v60 = vmul.f32 %v7046_v33, %v10418_v50  ;;  %v10420_v18 = vld [vmem:[#allocation77_spill] sm:$0xff] }
 0x206   : > { %v7146_v4 = vmul.f32 %v10367_v7, %v10413_v32  ;;  %v2468_v39 = vadd.f32 %v10415_v42, %v2419_v41  ;;  %v7162_v10 = vadd.f32 %v3621_v11, %v3589_v21  ;;  %v2712_v47 = vadd.f32 %v10420_v18, %v2663_v1  ;;  %v10423_v49 = vld [vmem:[#allocation93_spill] sm:$0xff]  ;;  %v10425_v41 = vld [vmem:[#allocation100_spill] sm:$0xff] }
 0x207   : > { %10405 = vst [vmem:[#allocation47_spill] sm:$0xff] %v7128_v38  ;;  %v2272_v52 = vadd.f32 %v10421_v9, %v2223_v6  ;;  %v2273_v27 = vadd.f32 %v10422_v63, %v2224_v14  ;;  %v7168_v8 = vadd.f32 %v10423_v49, %v2467_v57  ;;  %5276 = vpow2.f32 %v1480_v45  ;;  %v7170_v46 = vld [vmem:[#allocation2 + $0x60] sm:$0xff] }
 0x208   : > { %10419 = vst [vmem:[#allocation48_spill] sm:$0xff] %v7162_v10  ;;  %v7172_v0 = vld [vmem:[#allocation2 + $0x61] sm:$0xff]  ;;  %v7177_v31 = vadd.f32 %v10424_v5, %v2468_v39  ;;  %v7180_v62 = vadd.f32 %v10425_v41, %v2711_v25  ;;  %v7183_v6 = vadd.f32 %v10426_v19, %v2712_v47  ;;  %5278 = vpow2.f32 %v1482_v36 }
 0x209   : > { %v7174_v20 = vld [vmem:[#allocation2 + $0x62] sm:$0xff]  ;;  %v1818_v45 = vmul.f32 %v6322_v51, %v7170_v46  ;;  %v1867_v40 = vmul.f32 %v6325_v44, %v7172_v0  ;;  %v7193_v21 = vld [vmem:[#allocation2 + $0x6a] sm:$0xff]  ;;  %v2062_v3 = vmul.f32 %v6520_v35, %v7170_v46  ;;  %v2111_v10 = vmul.f32 %v6523_v43, %v7172_v0 }
 0x20a   : > { %v7185_v14 = vld [vmem:[#allocation2 + $0x68] sm:$0xff]  ;;  %v1916_v11 = vmul.f32 %v6333_v34, %v7174_v20  ;;  %v1917_v32 = vmul.f32 %v6333_v34, %v7193_v21  ;;  %v10427_v49 = vld [vmem:[#allocation31_spill] sm:$0xff]  ;;  %v2160_v38 = vmul.f32 %v6526_v17, %v7174_v20 }
 0x20b   : > { %v7189_v57 = vld [vmem:[#allocation2 + $0x69] sm:$0xff]  ;;  %v1819_v1 = vmul.f32 %v6322_v51, %v7185_v14  ;;  %v2063_v29 = vmul.f32 %v6520_v35, %v7185_v14  ;;  %v1883_v25 = vadd.f32 %v1867_v40, %v1818_v45  ;;  %v2078_v5 = vadd.f32 %v2062_v3, %v10427_v49 }
 0x20c   : > { %v1868_v36 = vmul.f32 %v6325_v44, %v7189_v57  ;;  %v7205_v13 = vld [vmem:[#allocation2 + $0x63] sm:$0xff]  ;;  %v7207_v42 = vld [vmem:[#allocation2 + $0x6b] sm:$0xff]  ;;  %v2112_v26 = vmul.f32 %v6523_v43, %v7189_v57  ;;  %v2161_v3 = vmul.f32 %v6526_v17, %v7193_v21 }
 0x20d   : > { %v7209_v39 = vld [vmem:[#allocation2 + $0x64] sm:$0xff]  ;;  %v1965_v54 = vmul.f32 %v6336_v59, %v7205_v13  ;;  %v1966_v50 = vmul.f32 %v6336_v59, %v7207_v42  ;;  %v7217_v18 = vld [vmem:[#allocation2 + $0x6c] sm:$0xff]  ;;  %v7225_v45 = vpop.eup %5276  ;;  %v1932_v40 = vadd.f32 %v1916_v11, %v1883_v25  ;;  %v2210_v11 = vmul.f32 %v6529_v53, %v7207_v42 }
 0x20e   : > { %v2014_v47 = vmul.f32 %v6365_v61, %v7209_v39  ;;  %v1884_v9 = vadd.f32 %v1868_v36, %v1819_v1  ;;  %v2015_v63 = vmul.f32 %v6365_v61, %v7217_v18  ;;  %v10428_v41 = vld [vmem:[#allocation32_spill] sm:$0xff]  ;;  %v7233_v1 = vpop.eup %5278  ;;  %v2127_v49 = vadd.f32 %v2111_v10, %v2078_v5 }
 0x20f   : > { %v2079_v19 = vadd.f32 %v2063_v29, %v10428_v41  ;;  %v2209_v29 = vmul.f32 %v6529_v53, %v7205_v13  ;;  %v1981_v25 = vadd.f32 %v1965_v54, %v1932_v40  ;;  %v2258_v23 = vmul.f32 %v6538_v48, %v7209_v39 }
 0x210   : > { %v1933_v36 = vadd.f32 %v1917_v32, %v1884_v9  ;;  %v2259_v59 = vmul.f32 %v6538_v48, %v7217_v18  ;;  %v2306_v32 = vmul.f32 %v6632_v58, %v7170_v46  ;;  %v2307_v9 = vmul.f32 %v6632_v58, %v7185_v14  ;;  %v10430_v58 = vld [vmem:[#allocation102_spill] sm:$0xff] }
 0x211   : > { %v2128_v41 = vadd.f32 %v2112_v26, %v2079_v19  ;;  %v2030_v34 = vadd.f32 %v2014_v47, %v1981_v25  ;;  %v2176_v44 = vadd.f32 %v2160_v38, %v2127_v49  ;;  %v2355_v10 = vmul.f32 %v6635_v16, %v7172_v0  ;;  %v10429_v19 = vld [vmem:[#allocation101_spill] sm:$0xff] }
 0x212   : > { %v1982_v61 = vadd.f32 %v1966_v50, %v1933_v36  ;;  %v2322_v54 = vadd.f32 %v2306_v32, %v2272_v52  ;;  %v2323_v5 = vadd.f32 %v2307_v9, %v2273_v27  ;;  %v2356_v50 = vmul.f32 %v6635_v16, %v7189_v57  ;;  %v10434_v32 = vld [vmem:[#allocation107_spill] sm:$0xff] }
 0x213   : > { %v2177_v51 = vadd.f32 %v2161_v3, %v2128_v41  ;;  %v2080_v40 = vadd.f32 %v10429_v19, %v2030_v34  ;;  %v2225_v36 = vadd.f32 %v2209_v29, %v2176_v44  ;;  %v2404_v53 = vmul.f32 %v6641_v56, %v7174_v20  ;;  %v10432_v34 = vld [vmem:[#allocation104_spill] sm:$0xff] }
 0x214   : > { %v2031_v26 = vadd.f32 %v2015_v63, %v1982_v61  ;;  %v2371_v38 = vadd.f32 %v2355_v10, %v2322_v54  ;;  %v2372_v3 = vadd.f32 %v2356_v50, %v2323_v5  ;;  %v2405_v25 = vmul.f32 %v6641_v56, %v7193_v21  ;;  %v10431_v61 = vld [vmem:[#allocation103_spill] sm:$0xff]  ;;  %v10435_v10 = vld [vmem:[#allocation108_spill] sm:$0xff]  ;;  %v10437_v50 = vld [vmem:[#allocation33_spill] sm:$0xff] }
 0x215   : > { %v2226_v48 = vadd.f32 %v2210_v11, %v2177_v51  ;;  %v2129_v52 = vadd.f32 %v10431_v61, %v2080_v40  ;;  %v2274_v27 = vadd.f32 %v2258_v23, %v2225_v36  ;;  %v2453_v49 = vmul.f32 %v6644_v30, %v7205_v13 }
 0x216   : > { %v2081_v47 = vadd.f32 %v10430_v58, %v2031_v26  ;;  %v2420_v51 = vadd.f32 %v2404_v53, %v2371_v38  ;;  %v2421_v29 = vadd.f32 %v2405_v25, %v2372_v3  ;;  %v2454_v11 = vmul.f32 %v6644_v30, %v7207_v42  ;;  %v10433_v58 = vld [vmem:[#allocation105_spill] sm:$0xff]  ;;  %v10438_v38 = vld [vmem:[#allocation34_spill] sm:$0xff] }
 0x217   : > { %v2275_v63 = vadd.f32 %v2259_v59, %v2226_v48  ;;  %v2178_v41 = vadd.f32 %v10433_v58, %v2129_v52  ;;  %v2324_v9 = vadd.f32 %v10434_v32, %v2274_v27  ;;  %v2502_v23 = vmul.f32 %v6649_v24, %v7209_v39  ;;  %v10436_v59 = vld [vmem:[#allocation106_spill] sm:$0xff]  ;;  %v10439_v27 = vld [vmem:[#allocation35_spill] sm:$0xff] }
 0x218   : > { %v2130_v44 = vadd.f32 %v10432_v34, %v2081_v47  ;;  %v2469_v54 = vadd.f32 %v2453_v49, %v2420_v51  ;;  %v2470_v5 = vadd.f32 %v2454_v11, %v2421_v29  ;;  %v2503_v53 = vmul.f32 %v6649_v24, %v7217_v18  ;;  %v10440_v34 = vld [vmem:[#allocation109_spill] sm:$0xff]  ;;  %v10442_v11 = vld [vmem:[#allocation114_spill] sm:$0xff] }
 0x219   : > { %v2325_v26 = vadd.f32 %v10435_v10, %v2275_v63  ;;  %v2227_v19 = vadd.f32 %v10437_v50, %v2178_v41  ;;  %v2373_v40 = vadd.f32 %v6877_v22, %v2324_v9  ;;  %v2550_v47 = vmul.f32 %v6652_v12, %v7170_v46  ;;  %v10443_v41 = vld [vmem:[#allocation115_spill] sm:$0xff]  ;;  %v10444_v9 = vld [vmem:[#allocation110_spill] sm:$0xff] }
 0x21a   : > { %v2179_v48 = vadd.f32 %v10436_v59, %v2130_v44  ;;  %v2518_v25 = vadd.f32 %v2502_v23, %v2469_v54  ;;  %v2519_v61 = vadd.f32 %v2503_v53, %v2470_v5  ;;  %v2551_v52 = vmul.f32 %v6652_v12, %v7185_v14  ;;  %v10446_v59 = vld [vmem:[#allocation63_spill] sm:$0xff]  ;;  %v10448_v5 = vld [vmem:[#allocation117_spill] sm:$0xff] }
 0x21b   : > { %v2374_v36 = vadd.f32 %v6881_v55, %v2325_v26  ;;  %v7282_v63 = vadd.f32 %v10439_v27, %v2227_v19  ;;  %v2422_v49 = vadd.f32 %v6885_v37, %v2373_v40  ;;  %v2566_v22 = vadd.f32 %v2550_v47, %v7168_v8  ;;  %v10441_v55 = vld [vmem:[#allocation36_spill] sm:$0xff]  ;;  %v10445_v26 = vld [vmem:[#allocation111_spill] sm:$0xff] }
 0x21c   : > { %v2228_v3 = vadd.f32 %v10438_v38, %v2179_v48  ;;  %v2567_v29 = vadd.f32 %v2551_v52, %v7177_v31  ;;  %v2568_v58 = vadd.f32 %v10442_v11, %v2518_v25  ;;  %v2569_v32 = vadd.f32 %v10443_v41, %v2519_v61  ;;  %v10447_v8 = vld [vmem:[#allocation116_spill] sm:$0xff]  ;;  %v10451_v25 = vld [vmem:[#allocation118_spill] sm:$0xff]  ;;  %v10452_v52 = vld [vmem:[#allocation119_spill] sm:$0xff] }
 0x21d   : > { %v2423_v44 = vadd.f32 %v10440_v34, %v2374_v36  ;;  %v2471_v10 = vadd.f32 %v10444_v9, %v2422_v49  ;;  %v2599_v37 = vmul.f32 %v10446_v59, %v7172_v0  ;;  %v2600_v48 = vmul.f32 %v10446_v59, %v7189_v57  ;;  %v10449_v19 = vld [vmem:[#allocation112_spill] sm:$0xff]  ;;  %v10450_v36 = vld [vmem:[#allocation113_spill] sm:$0xff] }
 0x21e   : > { %v7288_v51 = vadd.f32 %v10441_v55, %v2228_v3  ;;  %v2617_v54 = vadd.f32 %v10447_v8, %v2568_v58  ;;  %v2618_v53 = vadd.f32 %v10448_v5, %v2569_v32  ;;  %v2648_v31 = vmul.f32 %v6656_v2, %v7174_v20  ;;  %v10453_v49 = vld [vmem:[#allocation64_spill] sm:$0xff]  ;;  %v10454_v58 = vld [vmem:[#allocation65_spill] sm:$0xff] }
 0x21f   : > { %v2472_v23 = vadd.f32 %v10445_v26, %v2423_v44  ;;  %v2649_v50 = vmul.f32 %v6656_v2, %v7193_v21  ;;  %v7306_v40 = vadd.f32 %v10449_v19, %v2471_v10  ;;  %v2615_v38 = vadd.f32 %v2599_v37, %v2566_v22  ;;  %v10455_v22 = vld [vmem:[#allocation120_spill] sm:$0xff]  ;;  %v10456_v9 = vld [vmem:[#allocation121_spill] sm:$0xff]  ;;  %v10457_v26 = vld [vmem:[#allocation66_spill] sm:$0xff] }
 0x220   : > { %v2616_v3 = vadd.f32 %v2600_v48, %v2567_v29  ;;  %v2666_v61 = vadd.f32 %v10451_v25, %v2617_v54  ;;  %v2667_v27 = vadd.f32 %v10452_v52, %v2618_v53  ;;  %v2697_v34 = vmul.f32 %v10453_v49, %v7205_v13  ;;  %v10458_v54 = vld [vmem:[#allocation67_spill] sm:$0xff] }
 0x221   : > { %v7309_v47 = vadd.f32 %v10450_v36, %v2472_v23  ;;  %v2698_v44 = vmul.f32 %v10453_v49, %v7207_v42  ;;  %v2664_v55 = vadd.f32 %v2648_v31, %v2615_v38  ;;  %v2746_v41 = vmul.f32 %v10454_v58, %v7209_v39  ;;  %v10459_v31 = vld [vmem:[#allocation122_spill] sm:$0xff]  ;;  %v10460_v19 = vld [vmem:[#allocation123_spill] sm:$0xff] }
 0x222   : > { %v2665_v11 = vadd.f32 %v2649_v50, %v2616_v3  ;;  %v2747_v32 = vmul.f32 %v10454_v58, %v7217_v18  ;;  %v2715_v29 = vadd.f32 %v10455_v22, %v2666_v61  ;;  %v2716_v10 = vadd.f32 %v10456_v9, %v2667_v27  ;;  %v10467_v9 = vld [vmem:[#allocation87_spill] sm:$0xff] }
 0x223   : > { %v2794_v23 = vmul.f32 %v10457_v26, %v7170_v46  ;;  %v2795_v37 = vmul.f32 %v10457_v26, %v7185_v14  ;;  %v2713_v48 = vadd.f32 %v2697_v34, %v2664_v55  ;;  %v2843_v5 = vmul.f32 %v10458_v54, %v7172_v0  ;;  %v10461_v14 = vld [vmem:[#allocation68_spill] sm:$0xff]  ;;  %v10463_v34 = vld [vmem:[#allocation37_spill] sm:$0xff] }
 0x224   : > { %v2714_v8 = vadd.f32 %v2698_v44, %v2665_v11  ;;  %v2844_v53 = vmul.f32 %v10458_v54, %v7189_v57  ;;  %v2764_v50 = vadd.f32 %v10459_v31, %v2715_v29  ;;  %v2765_v36 = vadd.f32 %v10460_v19, %v2716_v10  ;;  %v10462_v0 = vld [vmem:[#allocation80_spill] sm:$0xff]  ;;  %v10465_v29 = vld [vmem:[#allocation3_spill] sm:$0xff] }
 0x225   : > { %v2810_v38 = vadd.f32 %v2794_v23, %v7180_v62  ;;  %v2811_v3 = vadd.f32 %v2795_v37, %v7183_v6  ;;  %v2762_v46 = vadd.f32 %v2746_v41, %v2713_v48  ;;  %v2892_v61 = vmul.f32 %v10461_v14, %v7174_v20  ;;  %v10464_v11 = vld [vmem:[#allocation124_spill] sm:$0xff]  ;;  %v10466_v20 = vld [vmem:[#allocation86_spill] sm:$0xff]  ;;  %v10471_v19 = vld [vmem:[#allocation95_spill] sm:$0xff] }
 0x226   : > { %v2763_v25 = vadd.f32 %v2747_v32, %v2714_v8  ;;  %v2893_v52 = vmul.f32 %v10461_v14, %v7193_v21  ;;  %v2814_v27 = vadd.f32 %v10462_v0, %v2764_v50  ;;  %v2815_v57 = vadd.f32 %v10463_v34, %v2765_v36  ;;  %v10468_v37 = vld [vmem:[#allocation4_spill] sm:$0xff]  ;;  %v10469_v8 = vld [vmem:[#allocation125_spill] sm:$0xff] }
 0x227   : > { %v2859_v44 = vadd.f32 %v2843_v5, %v2810_v38  ;;  %v2860_v55 = vadd.f32 %v2844_v53, %v2811_v3  ;;  %v2812_v22 = vadd.f32 %v10464_v11, %v2762_v46  ;;  %v2941_v6 = vmul.f32 %v10367_v7, %v7205_v13  ;;  %v5195_v13 = vld [vmem:[%s10066_s4] ss:$0 sm:$0xff]  ;;  %v10472_v46 = vld [vmem:[#allocation126_spill] sm:$0xff] }
 0x228   : > { %v2813_v62 = vadd.f32 %v10465_v29, %v2763_v25  ;;  %v2942_v41 = vmul.f32 %v10367_v7, %v7207_v42  ;;  %v2863_v32 = vadd.f32 %v10466_v20, %v2814_v27  ;;  %v2864_v21 = vadd.f32 %v10467_v9, %v2815_v57  ;;  %v10470_v42 = vld [vmem:[#allocation94_spill] sm:$0xff] }
 0x229   : > { %v2908_v10 = vadd.f32 %v2892_v61, %v2859_v44  ;;  %v2909_v23 = vadd.f32 %v2893_v52, %v2860_v55  ;;  %v2861_v48 = vadd.f32 %v10468_v37, %v2812_v22  ;;  %v2990_v53 = vmul.f32 %v7046_v33, %v7209_v39  ;;  %v10473_v61 = vld [vmem:[#allocation127_spill] sm:$0xff]  ;;  %v7366_v44 = vpop.permute.xlu0 %5154 }
 0x22a   : > { %v2862_v5 = vadd.f32 %v10469_v8, %v2813_v62  ;;  %v2991_v31 = vmul.f32 %v7046_v33, %v7217_v18  ;;  %v2912_v50 = vadd.f32 %v10470_v42, %v2863_v32  ;;  %v2913_v36 = vadd.f32 %v10471_v19, %v2864_v21  ;;  %v5487_v55 = vld [vmem:[#allocation2 + $0x84] sm:$0xff]  ;;  %v10475_v62 = vld [vmem:[#allocation5_spill] sm:$0xff] }
 0x22b   : > { %v2957_v38 = vadd.f32 %v2941_v6, %v2908_v10  ;;  %v2958_v3 = vadd.f32 %v2942_v41, %v2909_v23  ;;  %v2910_v25 = vadd.f32 %v10472_v46, %v2861_v48  ;;  %v1532_v0 = vadd.f32 1.0, %v7225_v45  ;;  %v10474_v22 = vld [vmem:[#allocation91_spill] sm:$0xff] }
 0x22c   : > { %v2911_v52 = vadd.f32 %v10473_v61, %v2862_v5  ;;  %v1533_v39 = vadd.f32 1.0, %v7233_v1  ;;  %v2961_v18 = vadd.f32 %v7146_v4, %v2912_v50  ;;  %v2962_v27 = vadd.f32 %v7150_v15, %v2913_v36  ;;  %v10476_v15 = vld [vmem:[#allocation6_spill] sm:$0xff]  ;;  %v10477_v36 = vld [vmem:[#allocation69_spill] sm:$0xff] }
 0x22d   : > { %v3006_v34 = vadd.f32 %v2990_v53, %v2957_v38  ;;  %v3007_v57 = vadd.f32 %v2991_v31, %v2958_v3  ;;  %v2993_v11 = vmul.f32 %v5487_v55, %v7046_v33  ;;  %v2959_v29 = vadd.f32 %v10474_v22, %v2910_v25  ;;  %v10478_v3 = vld [vmem:[#allocation13_spill] sm:$0xff] }
 0x22e   : > { %v2960_v6 = vadd.f32 %v10475_v62, %v2911_v52  ;;  %5280 = vrcp.f32 %v1532_v0  ;;  %v3010_v45 = vadd.f32 %v7156_v28, %v2961_v18  ;;  %v3011_v1 = vadd.f32 %v7160_v60, %v2962_v27  ;;  %v10479_v0 = vld [vmem:[#allocation79_spill] sm:$0xff] }
 0x22f   : > { %v7373_v41 = vadd.f32 %v5195_v13, %v3006_v34  ;;  %v7375_v4 = vadd.f32 %v5195_v13, %v3007_v57  ;;  %v3008_v20 = vadd.f32 %v10476_v15, %v2959_v29  ;;  %5282 = vrcp.f32 %v1533_v39  ;;  %v10480_v34 = vld [vmem:[#allocation12_spill] sm:$0xff]  ;;  %v7404_v29 = vld [vmem:[#allocation2 + $0xc0] sm:$0xff] }
 0x230   : > { %v3009_v32 = vadd.f32 %v2993_v11, %v2960_v6  ;;  %v5157_v9 = vunpack.i.h.bf16 %v7366_v44  ;;  %v7379_v21 = vadd.f32 %v5195_v13, %v3010_v45  ;;  %v7381_v10 = vadd.f32 %v5195_v13, %v3011_v1  ;;  %v7410_v6 = vld [vmem:[#allocation2 + $0xc8] sm:$0xff] }
 0x231   : > { %v3041_v23 = vsub.f32 0.0, %v7373_v41  ;;  %v3042_v28 = vsub.f32 0.0, %v7375_v4  ;;  %v7385_v37 = vadd.f32 %v5195_v13, %v3008_v20  ;;  %v5156_v55 = vunpack.i.l.bf16 %v7366_v44  ;;  %v7416_v1 = vld [vmem:[#allocation2 + $0xc1] sm:$0xff] }
 0x232   : > { %v7387_v60 = vadd.f32 %v5195_v13, %v3009_v32  ;;  %v3045_v48 = vsub.f32 0.0, %v7379_v21  ;;  %v3046_v8 = vsub.f32 0.0, %v7381_v10  ;;  %v1285_v46 = vmul.f32 %v5157_v9, %v10478_v3  ;;  %v7422_v32 = vld [vmem:[#allocation2 + $0xc9] sm:$0xff] }
 0x233   : > { %v3057_v5 = vmul.f32 1.442695, %v3041_v23  ;;  %v3059_v53 = vmul.f32 1.442695, %v3042_v28  ;;  %v3043_v42 = vsub.f32 0.0, %v7385_v37  ;;  %v7408_v62 = vmul.f32 %v7404_v29, %v6520_v35  ;;  %v7428_v23 = vld [vmem:[#allocation2 + $0xc2] sm:$0xff] }
 0x234   : > { %v5281_v31 = vpop.eup %5280  ;;  %v3044_v50 = vsub.f32 0.0, %v7387_v60  ;;  %v3065_v19 = vmul.f32 1.442695, %v3045_v48  ;;  %v3067_v52 = vmul.f32 1.442695, %v3046_v8  ;;  %v1325_v57 = vadd.f32 %v1285_v46, %v10480_v34  ;;  %v10488_v46 = vld [vmem:[#allocation42_spill] sm:$0xff] }
 0x235   : > { %5284 = vpow2.f32 %v3057_v5  ;;  %v1612_v38 = vmul.f32 %v5281_v31, %v10477_v36  ;;  %v5283_v13 = vpop.eup %5282  ;;  %v3061_v25 = vmul.f32 1.442695, %v3043_v42  ;;  %10481 = vst [vmem:[#allocation81_spill] sm:$0xff] %v7408_v62  ;;  %v7414_v45 = vmul.f32 %v7410_v6, %v6520_v35  ;;  %v7437_v8 = vld [vmem:[%s10064_s2] ss:$0 sm:$0xff]  ;;  %v7442_v31 = vld [vmem:[#allocation2 + $0xca] sm:$0xff] }
 0x236   : > { %5286 = vpow2.f32 %v3059_v53  ;;  %v3063_v61 = vmul.f32 1.442695, %v3044_v50  ;;  %v1613_v39 = vmul.f32 %v5283_v13, %v10479_v0  ;;  %v7420_v44 = vmul.f32 %v7416_v1, %v6523_v43  ;;  %10486 = vst [vmem:[#allocation89_spill] sm:$0xff] %v7437_v8  ;;  %v10493_v34 = vld [vmem:[#allocation58_spill] sm:$0xff] }
 0x237   : > { %5288 = vpow2.f32 %v3065_v19  ;;  %1694 = vst.msk [vmem:[#allocation2 + $0x152] sm:$0xff] %vm1665_vm1, %v1612_v38  ;;  %v1747_v18 = vpack.c.bf16 %v1612_v38, %v1612_v38  ;;  %v7426_v9 = vmul.f32 %v7422_v32, %v6523_v43  ;;  %v7432_v28 = vmul.f32 %v7428_v23, %v6526_v17  ;;  %v7449_v38 = vld [vmem:[#allocation2 + $0xc3] sm:$0xff] }
 0x238   : > { %5290 = vpow2.f32 %v3061_v25  ;;  %1695 = vst.msk [vmem:[#allocation2 + $0x15a] sm:$0xff] %vm1665_vm1, %v1613_v39  ;;  %v1748_v27 = vpack.c.bf16 %v1613_v39, %v1613_v39  ;;  %v7440_v5 = vadd.f32 %v7437_v8, %v1325_v57  ;;  %v7446_v42 = vmul.f32 %v7442_v31, %v6526_v17  ;;  %v7455_v25 = vld [vmem:[#allocation2 + $0xcb] sm:$0xff] }
 0x239   : > { %5292 = vpow2.f32 %v3063_v61  ;;  %1780 = vst.msk [vmem:[%s6299_s8 + $0x60] sm:$0xf] %vm1755_vm2, %v1747_v18  ;;  %v1284_v19 = vmul.f32 %v5156_v55, %v10478_v3  ;;  %v7453_v13 = vmul.f32 %v7449_v38, %v10488_v46  ;;  %v7459_v61 = vmul.f32 %v7455_v25, %v10488_v46  ;;  %v7461_v39 = vld [vmem:[#allocation2 + $0xc4] sm:$0xff]  ;;  %v10491_v18 = vld [vmem:[#allocation46_spill] sm:$0xff] }
 0x23a   : > { %5294 = vpow2.f32 %v3067_v52  ;;  %1781 = vst.msk [vmem:[%s6299_s8 + $0x64] sm:$0xf] %vm1755_vm2, %v1748_v27  ;;  %v7465_v27 = vmul.f32 %v7461_v39, %v10491_v18  ;;  %v7469_v57 = vmul.f32 %v7404_v29, %v10493_v34 }
 0x23b   : > { %v5285_v11 = vpop.eup %5284  ;;  %10482 = vst [vmem:[#allocation82_spill] sm:$0xff] %v7414_v45 }
 0x23c   : > { %v5287_v22 = vpop.eup %5286  ;;  %10483 = vst [vmem:[#allocation45_spill] sm:$0xff] %v7420_v44  ;;  %v3089_v15 = vadd.f32 1.0, %v5285_v11  ;;  %v7471_v11 = vld [vmem:[#allocation2 + $0xcc] sm:$0xff] }
 0x23d   : > { %v5289_v20 = vpop.eup %5288  ;;  %10484 = vst [vmem:[#allocation49_spill] sm:$0xff] %v7426_v9  ;;  %v3090_v48 = vadd.f32 1.0, %v5287_v22  ;;  %v7475_v22 = vmul.f32 %v7471_v11, %v10491_v18 }
 0x23e   : > { %10485 = vst [vmem:[#allocation88_spill] sm:$0xff] %v7432_v28  ;;  %v5291_v53 = vpop.eup %5290  ;;  %v3093_v50 = vadd.f32 1.0, %v5289_v20  ;;  %5296 = vrcp.f32 %v3089_v15  ;;  %v1409_v20 = vsub.f32 0.0, %v7440_v5  ;;  %v10534_v28 = vld [vmem:[#allocation27_spill] sm:$0xff] }
 0x23f   : > { %10487 = vst [vmem:[#allocation96_spill] sm:$0xff] %v7446_v42  ;;  %v5293_v36 = vpop.eup %5292  ;;  %v3091_v52 = vadd.f32 1.0, %v5291_v53  ;;  %5298 = vrcp.f32 %v3090_v48  ;;  %v7480_v48 = vmul.f32 %v7410_v6, %v10493_v34  ;;  %v7484_v53 = vmul.f32 %v7416_v1, %v6635_v16 }
 0x240   : > { %10489 = vst [vmem:[#allocation97_spill] sm:$0xff] %v7453_v13  ;;  %v5295_v0 = vpop.eup %5294  ;;  %v3092_v55 = vadd.f32 1.0, %v5293_v36  ;;  %5300 = vrcp.f32 %v3093_v50  ;;  %v10498_v50 = vld [vmem:[#allocation11_spill] sm:$0xff] }
 0x241   : > { %10490 = vst [vmem:[#allocation83_spill] sm:$0xff] %v7459_v61  ;;  %v3094_v15 = vadd.f32 1.0, %v5295_v0  ;;  %5302 = vrcp.f32 %v3091_v52  ;;  %v1324_v36 = vadd.f32 %v1284_v19, %v10498_v50  ;;  %v7493_v52 = vmul.f32 %v7428_v23, %v6641_v56 }
 0x242   : > { %10492 = vst [vmem:[#allocation70_spill] sm:$0xff] %v7465_v27  ;;  %5304 = vrcp.f32 %v3092_v55  ;;  %v7489_v27 = vmul.f32 %v7422_v32, %v6635_v16  ;;  %v7497_v0 = vmul.f32 %v7442_v31, %v6641_v56  ;;  %v7501_v61 = vmul.f32 %v7449_v38, %v6644_v30 }
 0x243   : > { %10494 = vst [vmem:[#allocation38_spill] sm:$0xff] %v7469_v57  ;;  %5306 = vrcp.f32 %v3094_v15  ;;  %v7505_v19 = vmul.f32 %v7455_v25, %v6644_v30  ;;  %v7509_v55 = vmul.f32 %v7461_v39, %v6649_v24  ;;  %v7513_v50 = vmul.f32 %v7471_v11, %v6649_v24 }
 0x244   : > { %10495 = vst [vmem:[#allocation90_spill] sm:$0xff] %v7475_v22  ;;  %v5297_v22 = vpop.eup %5296  ;;  %v7517_v15 = vmul.f32 %v7404_v29, %v6652_v12 }
 0x245   : > { %10496 = vst [vmem:[#allocation84_spill] sm:$0xff] %v7480_v48  ;;  %v10533_v48 = vld [vmem:[#allocation26_spill] sm:$0xff] }
 0x246   : > { %10497 = vst [vmem:[#allocation71_spill] sm:$0xff] %v7484_v53 }
 0x247   : > { %10499 = vst [vmem:[#allocation73_spill] sm:$0xff] %v7489_v27 }
 0x248   : > { %10500 = vst [vmem:[#allocation92_spill] sm:$0xff] %v7493_v52  ;;  %v5299_v52 = vpop.eup %5298 }
 0x249   : > { %10501 = vst [vmem:[#allocation98_spill] sm:$0xff] %v7497_v0  ;;  %v3121_v0 = vmul.f32 %v5297_v22, %v7373_v41  ;;  %v5301_v27 = vpop.eup %5300  ;;  %v3122_v53 = vmul.f32 %v5299_v52, %v7375_v4  ;;  %v7538_v41 = vmul.f32 %v7428_v23, %v6656_v2  ;;  %v7542_v22 = vmul.f32 %v7442_v31, %v6656_v2 }
 0x24a   : > { %10502 = vst [vmem:[#allocation76_spill] sm:$0xff] %v7501_v61  ;;  %v7521_v61 = vmul.f32 %v7410_v6, %v6652_v12  ;;  %v5303_v13 = vpop.eup %5302  ;;  %v7547_v4 = vmul.f32 %v7449_v38, %v10453_v49 }
 0x24b   : > { %10503 = vst [vmem:[#allocation50_spill] sm:$0xff] %v7505_v19  ;;  %v1474_v19 = vmul.f32 1.442695, %v1409_v20  ;;  %v3125_v20 = vmul.f32 %v5301_v27, %v7379_v21  ;;  %v3123_v52 = vmul.f32 %v5303_v13, %v7385_v37  ;;  %v7556_v21 = vmul.f32 %v7461_v39, %v10454_v58 }
 0x24c   : > { %10504 = vst [vmem:[#allocation51_spill] sm:$0xff] %v7509_v55  ;;  %v7526_v55 = vmul.f32 %v7416_v1, %v10446_v59 }
 0x24d   : > { %10505 = vst [vmem:[#allocation74_spill] sm:$0xff] %v7513_v50  ;;  %v7530_v50 = vmul.f32 %v7422_v32, %v10446_v59  ;;  %5308 = vpow2.f32 %v1474_v19  ;;  %v3139_v13 = vpack.c.bf16 %v3123_v52, %v3123_v52 }
 0x24e   : > { %10506 = vst [vmem:[#allocation99_spill] sm:$0xff] %v7517_v15  ;;  %v7534_v15 = vadd.f32 %v7437_v8, %v1324_v36  ;;  %v7551_v36 = vmul.f32 %v7455_v25, %v10453_v49 }
 0x24f   : > { %10507 = vst [vmem:[#allocation52_spill] sm:$0xff] %v7521_v61  ;;  %v5130_v61 = vpop.permute.xlu1 %5129 }
 0x250   : > { %10508 = vst [vmem:[#allocation53_spill] sm:$0xff] %v7526_v55  ;;  %v3137_v55 = vpack.c.bf16 %v3121_v0, %v3121_v0  ;;  %v3141_v0 = vpack.c.bf16 %v3125_v20, %v3125_v20  ;;  %v5132_v19 = vunpack.i.h.bf16 %v5130_v61  ;;  %v7577_v20 = vmul.f32 %v7410_v6, %v10457_v26 }
 0x251   : > { %10509 = vst [vmem:[#allocation77_spill] sm:$0xff] %v7530_v50  ;;  %v5305_v50 = vpop.eup %5304  ;;  %v7599_v6 = vmul.f32 %v7449_v38, %v10367_v7 }
 0x252   : > { %10510 = vst [vmem:[#allocation85_spill] sm:$0xff] %v7538_v41  ;;  %v3138_v41 = vpack.c.bf16 %v3122_v53, %v3122_v53  ;;  %v5307_v42 = vpop.eup %5306  ;;  %v3124_v27 = vmul.f32 %v5305_v50, %v7387_v60  ;;  %v1408_v53 = vsub.f32 0.0, %v7534_v15  ;;  %v7571_v60 = vmul.f32 %v7404_v29, %v10457_v26 }
 0x253   : > { %10511 = vst [vmem:[#allocation72_spill] sm:$0xff] %v7542_v22  ;;  %v3126_v37 = vmul.f32 %v5307_v42, %v7381_v10  ;;  %v7581_v10 = vmul.f32 %v7416_v1, %v10458_v54  ;;  %v7585_v42 = vmul.f32 %v7422_v32, %v10458_v54  ;;  %v7603_v1 = vmul.f32 %v7455_v25, %v10367_v7  ;;  %v5500_v25 = vld [vmem:[#allocation2 + $0x98] sm:$0xff] }
 0x254   : > { %10512 = vst [vmem:[#allocation93_spill] sm:$0xff] %v7547_v4  ;;  %v3140_v50 = vpack.c.bf16 %v3124_v27, %v3124_v27  ;;  %v7609_v32 = vmul.f32 %v7461_v39, %v7046_v33  ;;  %v1472_v38 = vmul.f32 1.442695, %v1408_v53  ;;  %v5309_v27 = vpop.eup %5308  ;;  %v7656_v4 = vld [vmem:[#allocation2 + $0x110] sm:$0xff]  ;;  %v7665_v45 = vmul.f32 %v5500_v25, %v6652_v12 }
 0x255   : > { %10513 = vst [vmem:[#allocation75_spill] sm:$0xff] %v7551_v36  ;;  %v7563_v36 = vmul.f32 %v7471_v11, %v10454_v58  ;;  %v3142_v29 = vpack.c.bf16 %v3126_v37, %v3126_v37  ;;  %v5501_v37 = vld [vmem:[#allocation2 + $0x91] sm:$0xff]  ;;  %v1529_v44 = vadd.f32 1.0, %v5309_v27 }
 0x256   : > { %10514 = vst [vmem:[#allocation100_spill] sm:$0xff] %v7556_v21  ;;  %v7624_v39 = vmul.f32 %v5501_v37, %v6635_v16  ;;  %v7658_v22 = vld [vmem:[#allocation2 + $0x111] sm:$0xff]  ;;  %5310 = vpow2.f32 %v1472_v38  ;;  %v7668_v62 = vmul.f32 %v5501_v37, %v10446_v59 }
 0x257   : > { %4617 = vst.msk [vmem:[%s6299_s8 + $0x80] sm:$0xf] %vm1755_vm2, %v3137_v55  ;;  %v5131_v55 = vunpack.i.l.bf16 %v5130_v61  ;;  %v7595_v61 = vmul.f32 %v7442_v31, %v10461_v14  ;;  %v5499_v31 = vld [vmem:[#allocation2 + $0x90] sm:$0xff]  ;;  %v3242_v38 = vmul.f32 %v7658_v22, %v10534_v28  ;;  %5312 = vrcp.f32 %v1529_v44 }
 0x258   : > { %10515 = vst [vmem:[#allocation78_spill] sm:$0xff] %v7563_v36  ;;  %v7616_v52 = vmul.f32 %v5499_v31, %v10493_v34  ;;  %v7654_v21 = vmul.f32 %v5499_v31, %v6652_v12  ;;  %v10536_v31 = vld [vmem:[#allocation7_spill] sm:$0xff]  ;;  %v7701_v44 = vld [vmem:[#allocation2 + $0x10b] sm:$0xff] }
 0x259   : > { %4618 = vst.msk [vmem:[%s6299_s8 + $0x84] sm:$0xf] %vm1755_vm2, %v3138_v41  ;;  %v7591_v41 = vmul.f32 %v7428_v23, %v10461_v14  ;;  %v7613_v23 = vmul.f32 %v7471_v11, %v7046_v33  ;;  %v7628_v11 = vld [vmem:[#allocation2 + $0x109] sm:$0xff] }
 0x25a   : > { %10516 = vst [vmem:[#allocation31_spill] sm:$0xff] %v7571_v60  ;;  %v5508_v60 = vld [vmem:[#allocation2 + $0x9c] sm:$0xff]  ;;  %v3241_v9 = vmul.f32 %v7628_v11, %v10534_v28 }
 0x25b   : > { %4621 = vst.msk [vmem:[%s6299_s8 + $0x90] sm:$0xf] %vm1755_vm2, %v3141_v0  ;;  %v7621_v0 = vmul.f32 %v5500_v25, %v10493_v34  ;;  %v7651_v36 = vmul.f32 %v5508_v60, %v6649_v24  ;;  %v7697_v37 = vmul.f32 %v5508_v60, %v10454_v58 }
 0x25c   : > { %10517 = vst [vmem:[#allocation32_spill] sm:$0xff] %v7577_v20 }
 0x25d   : > { %10518 = vst [vmem:[#allocation101_spill] sm:$0xff] %v7581_v10  ;;  %v5506_v10 = vld [vmem:[#allocation2 + $0x9b] sm:$0xff] }
 0x25e   : > { %10519 = vst [vmem:[#allocation102_spill] sm:$0xff] %v7585_v42 }
 0x25f   : > { %4619 = vst.msk [vmem:[%s6299_s8 + $0x88] sm:$0xf] %vm1755_vm2, %v3139_v13  ;;  %v7626_v13 = vld [vmem:[#allocation2 + $0x108] sm:$0xff] }
 0x260   : > { %10520 = vst [vmem:[#allocation103_spill] sm:$0xff] %v7591_v41  ;;  %v5505_v41 = vld [vmem:[#allocation2 + $0x93] sm:$0xff]  ;;  %v3193_v57 = vmul.f32 %v7626_v13, %v10533_v48 }
 0x261   : > { %10521 = vst [vmem:[#allocation104_spill] sm:$0xff] %v7595_v61  ;;  %v7642_v42 = vmul.f32 %v5505_v41, %v6644_v30 }
 0x262   : > { %10522 = vst [vmem:[#allocation105_spill] sm:$0xff] %v7599_v6  ;;  %v5504_v6 = vld [vmem:[#allocation2 + $0x9a] sm:$0xff] }
 0x263   : > { %10523 = vst [vmem:[#allocation107_spill] sm:$0xff] %v7603_v1  ;;  %v7639_v61 = vmul.f32 %v5504_v6, %v6641_v56  ;;  %v7685_v25 = vmul.f32 %v5504_v6, %v6656_v2  ;;  %v3257_v6 = vadd.f32 %v3241_v9, %v3193_v57  ;;  %v5311_v9 = vpop.eup %5310  ;;  %v7727_v57 = vmul.f32 %v10457_v26, %v7656_v4 }
 0x264   : > { %4620 = vst.msk [vmem:[%s6299_s8 + $0x8c] sm:$0xf] %vm1755_vm2, %v3140_v50  ;;  %v1275_v50 = vmul.f32 %v5132_v19, %v10478_v3  ;;  %v7645_v19 = vmul.f32 %v5506_v10, %v6644_v30 }
 0x265   : > { %10524 = vst [vmem:[#allocation108_spill] sm:$0xff] %v7609_v32  ;;  %v5502_v32 = vld [vmem:[#allocation2 + $0x99] sm:$0xff] }
 0x266   : > { %10525 = vst [vmem:[#allocation106_spill] sm:$0xff] %v7613_v23  ;;  %v1274_v23 = vmul.f32 %v5131_v55, %v10478_v3  ;;  %v7633_v53 = vmul.f32 %v5502_v32, %v6635_v16  ;;  %v5507_v55 = vld [vmem:[#allocation2 + $0x94] sm:$0xff] }
 0x267   : > { %4622 = vst.msk [vmem:[%s6299_s8 + $0x94] sm:$0xf] %vm1755_vm2, %v3142_v29  ;;  %v5503_v29 = vld [vmem:[#allocation2 + $0x92] sm:$0xff]  ;;  %v7648_v20 = vmul.f32 %v5507_v55, %v6649_v24 }
 0x268   : > { %10526 = vst [vmem:[#allocation33_spill] sm:$0xff] %v7633_v53  ;;  %v7636_v1 = vmul.f32 %v5503_v29, %v6641_v56  ;;  %v7682_v27 = vmul.f32 %v5503_v29, %v6656_v2  ;;  %v7703_v29 = vld [vmem:[#allocation2 + $0x113] sm:$0xff] }
 0x269   : > { %10528 = vst [vmem:[#allocation35_spill] sm:$0xff] %v7639_v61  ;;  %v7675_v61 = vld [vmem:[#allocation2 + $0x10a] sm:$0xff] }
 0x26a   : > { %10527 = vst [vmem:[#allocation34_spill] sm:$0xff] %v7636_v1  ;;  %v3194_v1 = vmul.f32 %v7656_v4, %v10533_v48  ;;  %v7718_v60 = vmul.f32 %v10461_v14, %v7675_v61 }
 0x26b   : > { %10529 = vst [vmem:[#allocation109_spill] sm:$0xff] %v7642_v42  ;;  %v7673_v42 = vmul.f32 %v5502_v32, %v10446_v59  ;;  %v7691_v32 = vmul.f32 %v5506_v10, %v10453_v49  ;;  %v7710_v10 = vmul.f32 %v10457_v26, %v7626_v13 }
 0x26c   : > { %10530 = vst [vmem:[#allocation36_spill] sm:$0xff] %v7645_v19 }
 0x26d   : > { %10531 = vst [vmem:[#allocation114_spill] sm:$0xff] %v7648_v20  ;;  %v10537_v20 = vld [vmem:[#allocation8_spill] sm:$0xff] }
 0x26e   : > { %10532 = vst [vmem:[#allocation115_spill] sm:$0xff] %v7651_v36  ;;  %v1314_v36 = vadd.f32 %v1274_v23, %v10536_v31  ;;  %v1315_v19 = vadd.f32 %v1275_v50, %v10537_v20  ;;  %v7688_v20 = vmul.f32 %v5505_v41, %v10453_v49  ;;  %v7694_v23 = vmul.f32 %v5507_v55, %v10454_v58  ;;  %v7699_v50 = vld [vmem:[#allocation2 + $0x112] sm:$0xff] }
 0x26f   : > { %10535 = vst [vmem:[#allocation110_spill] sm:$0xff] %v7668_v62  ;;  %v7714_v41 = vmul.f32 %v10458_v54, %v7628_v11  ;;  %v7720_v55 = vld [vmem:[#allocation2 + $0x10c] sm:$0xff] }
 0x270   : > { %10538 = vst [vmem:[#allocation111_spill] sm:$0xff] %v7673_v42  ;;  %v7706_v31 = vadd.f32 %v7437_v8, %v1314_v36  ;;  %v7731_v36 = vmul.f32 %v10458_v54, %v7658_v22  ;;  %v10556_v42 = vld [vmem:[#allocation29_spill] sm:$0xff] }
 0x271   : > { %10539 = vst [vmem:[#allocation116_spill] sm:$0xff] %v7682_v27  ;;  %v3338_v62 = vmul.f32 %v7703_v29, %v10556_v42 }
 0x272   : > { %10540 = vst [vmem:[#allocation117_spill] sm:$0xff] %v7685_v25 }
 0x273   : > { %10541 = vst [vmem:[#allocation112_spill] sm:$0xff] %v7688_v20  ;;  %v1528_v20 = vadd.f32 1.0, %v5311_v9 }
 0x274   : > { %10542 = vst [vmem:[#allocation113_spill] sm:$0xff] %v7691_v32  ;;  %v7739_v32 = vmul.f32 %v10461_v14, %v7699_v50 }
 0x275   : > { %10543 = vst [vmem:[#allocation118_spill] sm:$0xff] %v7694_v23  ;;  %v10550_v23 = vld [vmem:[#allocation28_spill] sm:$0xff]  ;;  %5314 = vrcp.f32 %v1528_v20  ;;  %v7772_v20 = vmul.f32 %v7626_v13, %v6520_v35 }
 0x276   : > { %10544 = vst [vmem:[#allocation119_spill] sm:$0xff] %v7697_v37  ;;  %v7723_v37 = vadd.f32 %v7437_v8, %v1315_v19  ;;  %v7743_v19 = vmul.f32 %v10367_v7, %v7701_v44 }
 0x277   : > { %10545 = vst [vmem:[#allocation64_spill] sm:$0xff] %v7710_v10  ;;  %v7733_v10 = vld [vmem:[#allocation2 + $0x114] sm:$0xff] }
 0x278   : > { %10546 = vst [vmem:[#allocation65_spill] sm:$0xff] %v7714_v41  ;;  %v3258_v41 = vadd.f32 %v3242_v38, %v3194_v1  ;;  %v7751_v1 = vmul.f32 %v7046_v33, %v7720_v55  ;;  %v3290_v38 = vmul.f32 %v7699_v50, %v10550_v23  ;;  %v7758_v27 = vmul.f32 %v7046_v33, %v7733_v10 }
 0x279   : > { %10547 = vst [vmem:[#allocation120_spill] sm:$0xff] %v7718_v60  ;;  %v3289_v60 = vmul.f32 %v7675_v61, %v10550_v23  ;;  %v1399_v9 = vsub.f32 0.0, %v7723_v37 }
 0x27a   : > { %10548 = vst [vmem:[#allocation121_spill] sm:$0xff] %v7727_v57  ;;  %v7747_v57 = vmul.f32 %v10367_v7, %v7703_v29 }
 0x27b   : > { %10549 = vst [vmem:[#allocation122_spill] sm:$0xff] %v7731_v36  ;;  %v5313_v36 = vpop.eup %5312  ;;  %v3305_v25 = vadd.f32 %v3289_v60, %v3257_v6  ;;  %v10557_v6 = vld [vmem:[#allocation30_spill] sm:$0xff] }
 0x27c   : > { %10551 = vst [vmem:[#allocation123_spill] sm:$0xff] %v7739_v32  ;;  %v1398_v32 = vsub.f32 0.0, %v7706_v31  ;;  %v3385_v60 = vmul.f32 %v7720_v55, %v10557_v6  ;;  %v3386_v33 = vmul.f32 %v7733_v10, %v10557_v6 }
 0x27d   : > { %10552 = vst [vmem:[#allocation68_spill] sm:$0xff] %v7743_v19  ;;  %v1609_v19 = vmul.f32 %v5313_v36, %v7440_v5  ;;  %v7776_v5 = vmul.f32 %v7656_v4, %v6520_v35 }
 0x27e   : > { %10553 = vst [vmem:[#allocation80_spill] sm:$0xff] %v7747_v57  ;;  %v3306_v57 = vadd.f32 %v3290_v38, %v3258_v41  ;;  %v7781_v38 = vmul.f32 %v7628_v11, %v6523_v43  ;;  %v1452_v53 = vmul.f32 1.442695, %v1398_v32  ;;  %v7805_v32 = vmul.f32 %v7703_v29, %v10488_v46 }
 0x27f   : > { %10554 = vst [vmem:[#allocation37_spill] sm:$0xff] %v7751_v1  ;;  %v3337_v1 = vmul.f32 %v7701_v44, %v10556_v42  ;;  %v1744_v41 = vpack.c.bf16 %v1609_v19, %v1609_v19 }
 0x280   : > { %10555 = vst [vmem:[#allocation124_spill] sm:$0xff] %v7758_v27  ;;  %v7785_v27 = vmul.f32 %v7658_v22, %v6523_v43  ;;  %5316 = vpow2.f32 %v1452_v53  ;;  %v7855_v53 = vmul.f32 %v7720_v55, %v6649_v24 }
 0x281   : > { %10558 = vst [vmem:[#allocation3_spill] sm:$0xff] %v7772_v20  ;;  %v3353_v36 = vadd.f32 %v3337_v1, %v3305_v25  ;;  %v7789_v20 = vmul.f32 %v7675_v61, %v6526_v17  ;;  %v7797_v25 = vmul.f32 %v7701_v44, %v10488_v46  ;;  %v7801_v1 = vpop.permute.xlu2 %5179 }
 0x282   : > { %10559 = vst [vmem:[#allocation86_spill] sm:$0xff] %v7776_v5  ;;  %v7793_v5 = vmul.f32 %v7699_v50, %v6526_v17 }
 0x283   : > { %1691 = vst.msk [vmem:[#allocation2 + $0x12a] sm:$0xff] %vm1665_vm1, %v1609_v19  ;;  %v1454_v19 = vmul.f32 1.442695, %v1399_v9  ;;  %v7829_v9 = vmul.f32 %v7658_v22, %v6635_v16 }
 0x284   : > { %10560 = vst [vmem:[#allocation87_spill] sm:$0xff] %v7781_v38  ;;  %v3354_v38 = vadd.f32 %v3338_v62, %v3306_v57  ;;  %v7821_v62 = vmul.f32 %v7656_v4, %v10493_v34  ;;  %v7825_v57 = vmul.f32 %v7628_v11, %v6635_v16 }
 0x285   : > { %10561 = vst [vmem:[#allocation4_spill] sm:$0xff] %v7785_v27  ;;  %v5315_v27 = vpop.eup %5314  ;;  %5318 = vpow2.f32 %v1454_v19  ;;  %v7864_v19 = vmul.f32 %v7626_v13, %v6652_v12 }
 0x286   : > { %10562 = vst [vmem:[#allocation125_spill] sm:$0xff] %v7789_v20  ;;  %v7809_v20 = vmul.f32 %v7720_v55, %v10491_v18 }
 0x287   : > { %10563 = vst [vmem:[#allocation94_spill] sm:$0xff] %v7793_v5  ;;  %v7813_v5 = vmul.f32 %v7733_v10, %v10491_v18 }
 0x288   : > { %10564 = vst [vmem:[#allocation95_spill] sm:$0xff] %v7797_v25  ;;  %v7837_v25 = vmul.f32 %v7675_v61, %v6641_v56 }
 0x289   : > { %1777 = vst.msk [vmem:[%s6299_s8 + $0x54] sm:$0xf] %vm1755_vm2, %v1744_v41  ;;  %v7817_v41 = vmul.f32 %v7626_v13, %v10493_v34  ;;  %v7884_v13 = vmul.f32 %v7675_v61, %v6656_v2  ;;  %v7903_v61 = vmul.f32 %v7720_v55, %v10454_v58  ;;  %v7919_v55 = vld [vmem:[#allocation2 + $0x159] sm:$0xff] }
 0x28a   : > { %10565 = vst [vmem:[#allocation126_spill] sm:$0xff] %v7805_v32  ;;  %v5181_v32 = vunpack.i.l.bf16 %v7801_v1 }
 0x28b   : > { %10566 = vst [vmem:[#allocation127_spill] sm:$0xff] %v7809_v20  ;;  %v7831_v20 = vadd.f32 %v3385_v60, %v3353_v36  ;;  %v7847_v60 = vadd.f32 %v3386_v33, %v3354_v38  ;;  %v7860_v36 = vmul.f32 %v7733_v10, %v6649_v24  ;;  %v7868_v33 = vmul.f32 %v7656_v4, %v6652_v12 }
 0x28c   : > { %10567 = vst [vmem:[#allocation91_spill] sm:$0xff] %v7813_v5  ;;  %v1608_v5 = vmul.f32 %v5315_v27, %v7534_v15  ;;  %v7851_v15 = vmul.f32 %v7703_v29, %v6644_v30  ;;  %v7872_v38 = vmul.f32 %v7628_v11, %v10446_v59  ;;  %v7888_v4 = vmul.f32 %v7699_v50, %v6656_v2 }
 0x28d   : > { %10568 = vst [vmem:[#allocation5_spill] sm:$0xff] %v7817_v41  ;;  %v1294_v11 = vmul.f32 %v5181_v32, %v10478_v3 }
 0x28e   : > { %10569 = vst [vmem:[#allocation6_spill] sm:$0xff] %v7821_v62  ;;  %v7841_v62 = vmul.f32 %v7699_v50, %v6641_v56  ;;  %v1743_v27 = vpack.c.bf16 %v1608_v5, %v1608_v5  ;;  %v7907_v50 = vmul.f32 %v7733_v10, %v10454_v58 }
 0x28f   : > { %10570 = vst [vmem:[#allocation69_spill] sm:$0xff] %v7825_v57  ;;  %v7845_v57 = vmul.f32 %v7701_v44, %v6644_v30 }
 0x290   : > { %10571 = vst [vmem:[#allocation79_spill] sm:$0xff] %v7829_v9 }
 0x291   : > { %10572 = vst [vmem:[#allocation12_spill] sm:$0xff] %v7831_v20 }
 0x292   : > { %10573 = vst [vmem:[#allocation11_spill] sm:$0xff] %v7837_v25  ;;  %v10601_v25 = vld [vmem:[#allocation9_spill] sm:$0xff] }
 0x293   : > { %10574 = vst [vmem:[#allocation7_spill] sm:$0xff] %v7841_v62  ;;  %v1334_v9 = vadd.f32 %v1294_v11, %v10601_v25 }
 0x294   : > { %10575 = vst [vmem:[#allocation8_spill] sm:$0xff] %v7845_v57 }
 0x295   : > { %10576 = vst [vmem:[#allocation128_spill] sm:$0xff] %v7847_v60  ;;  %v5515_v60 = vld [vmem:[#allocation2 + $0xdb] sm:$0xff] }
 0x296   : > { %10577 = vst [vmem:[#allocation129_spill] sm:$0xff] %v7851_v15  ;;  %v7876_v15 = vld [vmem:[#allocation2 + $0x151] sm:$0xff]  ;;  %v7962_v20 = vmul.f32 %v5515_v60, %v6644_v30 }
 0x297   : > { %10578 = vst [vmem:[#allocation130_spill] sm:$0xff] %v7855_v53  ;;  %v7874_v53 = vld [vmem:[#allocation2 + $0x150] sm:$0xff]  ;;  %v3247_v10 = vmul.f32 %v7876_v15, %v10534_v28 }
 0x298   : > { %1690 = vst.msk [vmem:[#allocation2 + $0x122] sm:$0xff] %vm1665_vm1, %v1608_v5  ;;  %v7880_v5 = vmul.f32 %v7658_v22, %v10446_v59  ;;  %v7899_v22 = vmul.f32 %v7703_v29, %v10453_v49  ;;  %v3199_v29 = vmul.f32 %v7874_v53, %v10533_v48 }
 0x299   : > { %10579 = vst [vmem:[#allocation131_spill] sm:$0xff] %v7860_v36 }
 0x29a   : > { %10580 = vst [vmem:[#allocation132_spill] sm:$0xff] %v7864_v19  ;;  %v5182_v19 = vunpack.i.h.bf16 %v7801_v1  ;;  %v3248_v1 = vmul.f32 %v7919_v55, %v10534_v28  ;;  %v3263_v25 = vadd.f32 %v3247_v10, %v3199_v29  ;;  %v7974_v29 = vld [vmem:[#allocation2 + $0x15a] sm:$0xff] }
 0x29b   : > { %10581 = vst [vmem:[#allocation133_spill] sm:$0xff] %v7868_v33 }
 0x29c   : > { %10582 = vst [vmem:[#allocation134_spill] sm:$0xff] %v7872_v38  ;;  %v7895_v38 = vmul.f32 %v7701_v44, %v10453_v49 }
 0x29d   : > { %10583 = vst [vmem:[#allocation135_spill] sm:$0xff] %v7874_v53 }
 0x29e   : > { %10584 = vst [vmem:[#allocation136_spill] sm:$0xff] %v7876_v15 }
 0x29f   : > { %10585 = vst [vmem:[#allocation137_spill] sm:$0xff] %v7880_v5 }
 0x2a0   : > { %10586 = vst [vmem:[#allocation138_spill] sm:$0xff] %v7884_v13  ;;  %v5510_v13 = vld [vmem:[#allocation2 + $0xd9] sm:$0xff] }
 0x2a1   : > { %10587 = vst [vmem:[#allocation139_spill] sm:$0xff] %v7888_v4  ;;  %v5317_v4 = vpop.eup %5316  ;;  %v7913_v44 = vmul.f32 %v5510_v13, %v6635_v16  ;;  %v7930_v33 = vmul.f32 %v5510_v13, %v10446_v59  ;;  %v7940_v62 = vmul.f32 %v5510_v13, %v10458_v54  ;;  %v5513_v13 = vld [vmem:[#allocation2 + $0xe1] sm:$0xff] }
 0x2a2   : > { %1776 = vst.msk [vmem:[%s6299_s8 + $0x50] sm:$0xf] %vm1755_vm2, %v1743_v27  ;;  %v5509_v27 = vld [vmem:[#allocation2 + $0xd8] sm:$0xff] }
 0x2a3   : > { %10588 = vst [vmem:[#allocation140_spill] sm:$0xff] %v7895_v38  ;;  %v7910_v32 = vmul.f32 %v5509_v27, %v10493_v34  ;;  %v7915_v38 = vld [vmem:[#allocation2 + $0x158] sm:$0xff]  ;;  %v7927_v5 = vmul.f32 %v5509_v27, %v6652_v12  ;;  %v7937_v57 = vmul.f32 %v5509_v27, %v10457_v26 }
 0x2a4   : > { %10589 = vst [vmem:[#allocation141_spill] sm:$0xff] %v7899_v22 }
 0x2a5   : > { %10590 = vst [vmem:[#allocation142_spill] sm:$0xff] %v7903_v61  ;;  %v5511_v61 = vld [vmem:[#allocation2 + $0xda] sm:$0xff] }
 0x2a6   : > { %10591 = vst [vmem:[#allocation143_spill] sm:$0xff] %v7907_v50  ;;  %v5319_v50 = vpop.eup %5318  ;;  %v7924_v22 = vmul.f32 %v5511_v61, %v6641_v56  ;;  %v7934_v36 = vmul.f32 %v5511_v61, %v6656_v2  ;;  %v7944_v41 = vmul.f32 %v5511_v61, %v10461_v14  ;;  %v5514_v61 = vld [vmem:[#allocation2 + $0xe2] sm:$0xff] }
 0x2a7   : > { %10592 = vst [vmem:[#allocation144_spill] sm:$0xff] %v7910_v32  ;;  %v1519_v11 = vadd.f32 1.0, %v5319_v50  ;;  %v7959_v32 = vmul.f32 %v5514_v61, %v6641_v56 }
 0x2a8   : > { %10593 = vst [vmem:[#allocation145_spill] sm:$0xff] %v7913_v44  ;;  %v7956_v44 = vmul.f32 %v5513_v13, %v6635_v16 }
 0x2a9   : > { %10594 = vst [vmem:[#allocation146_spill] sm:$0xff] %v7915_v38 }
 0x2aa   : > { %10595 = vst [vmem:[#allocation147_spill] sm:$0xff] %v7924_v22  ;;  %v5512_v22 = vld [vmem:[#allocation2 + $0xe0] sm:$0xff] }
 0x2ab   : > { %10596 = vst [vmem:[#allocation148_spill] sm:$0xff] %v7927_v5  ;;  %v3200_v5 = vmul.f32 %v7915_v38, %v10533_v48  ;;  %v7953_v27 = vmul.f32 %v5512_v22, %v10493_v34 }
 0x2ac   : > { %10597 = vst [vmem:[#allocation149_spill] sm:$0xff] %v7930_v33  ;;  %v7950_v33 = vld [vmem:[#allocation2 + $0x152] sm:$0xff] }
 0x2ad   : > { %10598 = vst [vmem:[#allocation150_spill] sm:$0xff] %v7934_v36  ;;  %v1518_v36 = vadd.f32 1.0, %v5317_v4  ;;  %v7965_v4 = vmul.f32 %v5512_v22, %v6652_v12  ;;  %v3295_v10 = vmul.f32 %v7950_v33, %v10550_v23  ;;  %v7993_v12 = vmul.f32 %v5515_v60, %v10453_v49 }
 0x2ae   : > { %10599 = vst [vmem:[#allocation151_spill] sm:$0xff] %v7937_v57  ;;  %v7987_v57 = vld [vmem:[#allocation2 + $0x153] sm:$0xff] }
 0x2af   : > { %10600 = vst [vmem:[#allocation152_spill] sm:$0xff] %v7940_v62  ;;  %5320 = vrcp.f32 %v1518_v36 }
 0x2b0   : > { %10602 = vst [vmem:[#allocation9_spill] sm:$0xff] %v7944_v41  ;;  %v1295_v41 = vmul.f32 %v5182_v19, %v10478_v3  ;;  %v7985_v19 = vmul.f32 %v5513_v13, %v10446_v59  ;;  %5322 = vrcp.f32 %v1519_v11  ;;  %v8014_v11 = vld [vmem:[#allocation2 + $0x154] sm:$0xff] }
 0x2b1   : > { %10603 = vst [vmem:[#allocation153_spill] sm:$0xff] %v7953_v27  ;;  %v5516_v27 = vld [vmem:[#allocation2 + $0xe3] sm:$0xff] }
 0x2b2   : > { %10604 = vst [vmem:[#allocation154_spill] sm:$0xff] %v7956_v44  ;;  %v7969_v62 = vmul.f32 %v5516_v27, %v6644_v30  ;;  %v5517_v44 = vld [vmem:[#allocation2 + $0xdc] sm:$0xff]  ;;  %v3311_v30 = vadd.f32 %v3295_v10, %v3263_v25  ;;  %v3343_v25 = vmul.f32 %v7987_v57, %v10556_v42 }
 0x2b3   : > { %10605 = vst [vmem:[#allocation155_spill] sm:$0xff] %v7959_v32  ;;  %v7972_v50 = vmul.f32 %v5517_v44, %v6649_v24  ;;  %v5518_v32 = vld [vmem:[#allocation2 + $0xe4] sm:$0xff] }
 0x2b4   : > { %10606 = vst [vmem:[#allocation156_spill] sm:$0xff] %v7962_v20  ;;  %v7979_v20 = vadd.f32 %v7437_v8, %v1334_v9  ;;  %v7996_v9 = vmul.f32 %v5516_v27, %v10453_v49  ;;  %v8005_v36 = vmul.f32 %v5518_v32, %v10454_v58 }
 0x2b5   : > { %10607 = vst [vmem:[#allocation157_spill] sm:$0xff] %v7965_v4  ;;  %v7982_v4 = vmul.f32 %v5518_v32, %v6649_v24 }
 0x2b6   : > { %10608 = vst [vmem:[#allocation158_spill] sm:$0xff] %v7969_v62  ;;  %v3264_v62 = vadd.f32 %v3248_v1, %v3200_v5  ;;  %v3296_v5 = vmul.f32 %v7974_v29, %v10550_v23  ;;  %v10619_v1 = vld [vmem:[#allocation10_spill] sm:$0xff]  ;;  %v1418_v10 = vsub.f32 0.0, %v7979_v20 }
 0x2b7   : > { %10609 = vst [vmem:[#allocation159_spill] sm:$0xff] %v7972_v50  ;;  %v7990_v50 = vmul.f32 %v5514_v61, %v6656_v2 }
 0x2b8   : > { %10610 = vst [vmem:[#allocation160_spill] sm:$0xff] %v7974_v29 }
 0x2b9   : > { %10611 = vst [vmem:[#allocation161_spill] sm:$0xff] %v7979_v20  ;;  %v3359_v20 = vadd.f32 %v3343_v25, %v3311_v30  ;;  %v8057_v30 = vmul.f32 %v7915_v38, %v6520_v35  ;;  %v8061_v25 = vmul.f32 %v7876_v15, %v6523_v43 }
 0x2ba   : > { %10612 = vst [vmem:[#allocation162_spill] sm:$0xff] %v7982_v4  ;;  %v7999_v4 = vmul.f32 %v5517_v44, %v10454_v58 }
 0x2bb   : > { %10613 = vst [vmem:[#allocation163_spill] sm:$0xff] %v7985_v19  ;;  %v1335_v19 = vadd.f32 %v1295_v41, %v10619_v1  ;;  %v8021_v41 = vmul.f32 %v5514_v61, %v10461_v14  ;;  %v8024_v1 = vmul.f32 %v5515_v60, %v10367_v7  ;;  %v5321_v60 = vpop.eup %5320 }
 0x2bc   : > { %10614 = vst [vmem:[#allocation164_spill] sm:$0xff] %v7987_v57 }
 0x2bd   : > { %10615 = vst [vmem:[#allocation165_spill] sm:$0xff] %v7990_v50  ;;  %v8008_v50 = vmul.f32 %v5512_v22, %v10457_v26  ;;  %v3312_v22 = vadd.f32 %v3296_v5, %v3264_v62  ;;  %v8048_v5 = vmul.f32 %v7874_v53, %v6520_v35 }
 0x2be   : > { %10616 = vst [vmem:[#allocation166_spill] sm:$0xff] %v7993_v12  ;;  %v8010_v12 = vld [vmem:[#allocation2 + $0x15b] sm:$0xff] }
 0x2bf   : > { %10617 = vst [vmem:[#allocation167_spill] sm:$0xff] %v7996_v9  ;;  %v8029_v9 = vmul.f32 %v5516_v27, %v10367_v7  ;;  %v3344_v62 = vmul.f32 %v8010_v12, %v10556_v42  ;;  %v3391_v27 = vmul.f32 %v8014_v11, %v10557_v6 }
 0x2c0   : > { %10618 = vst [vmem:[#allocation168_spill] sm:$0xff] %v7999_v4  ;;  %v8018_v4 = vmul.f32 %v5513_v13, %v10458_v54 }
 0x2c1   : > { %10620 = vst [vmem:[#allocation10_spill] sm:$0xff] %v8005_v36  ;;  %v8026_v36 = vld [vmem:[#allocation2 + $0x15c] sm:$0xff] }
 0x2c2   : > { %10621 = vst [vmem:[#allocation169_spill] sm:$0xff] %v8008_v50  ;;  %v8034_v50 = vld [vmem:[%s10065_s3 + $0x18] ss:$0 sm:$0xff] }
 0x2c3   : > { %10622 = vst [vmem:[#allocation170_spill] sm:$0xff] %v8010_v12  ;;  %v8037_v13 = vmul.f32 %v8034_v50, %v5517_v44  ;;  %v8040_v61 = vmul.f32 %v8034_v50, %v5518_v32  ;;  %v5323_v44 = vpop.eup %5322  ;;  %v3392_v32 = vmul.f32 %v8026_v36, %v10557_v6 }
 0x2c4   : > { %10623 = vst [vmem:[#allocation171_spill] sm:$0xff] %v8014_v11 }
 0x2c5   : > { %10624 = vst [vmem:[#allocation172_spill] sm:$0xff] %v8024_v1  ;;  %v8075_v1 = vadd.f32 %v3391_v27, %v3359_v20  ;;  %v2326_v20 = vadd.f32 %v7616_v52, %v7282_v63 }
 0x2c6   : > { %10625 = vst [vmem:[#allocation173_spill] sm:$0xff] %v8026_v36 }
 0x2c7   : > { %10626 = vst [vmem:[#allocation174_spill] sm:$0xff] %v8029_v9  ;;  %v8051_v9 = vadd.f32 %v7437_v8, %v1335_v19  ;;  %v8069_v19 = vmul.f32 %v7950_v33, %v6526_v17  ;;  %v8073_v8 = vmul.f32 %v7974_v29, %v6526_v17  ;;  %v2375_v52 = vadd.f32 %v7624_v39, %v2326_v20 }
 0x2c8   : > { %10627 = vst [vmem:[#allocation175_spill] sm:$0xff] %v8037_v13  ;;  %v3360_v13 = vadd.f32 %v3344_v62, %v3312_v22  ;;  %v8087_v22 = vmul.f32 %v8014_v11, %v10491_v18  ;;  %v1598_v62 = vmul.f32 %v5321_v60, %v7706_v31  ;;  %v5170_v31 = vpop.permute.xlu0 %5169  ;;  %v10641_v60 = vld [vmem:[#allocation110_spill] sm:$0xff] }
 0x2c9   : > { %10628 = vst [vmem:[#allocation176_spill] sm:$0xff] %v8040_v61  ;;  %v1492_v61 = vmul.f32 1.442695, %v1418_v10  ;;  %v8083_v10 = vmul.f32 %v8010_v12, %v10488_v46  ;;  %v1419_v27 = vsub.f32 0.0, %v8051_v9  ;;  %v5171_v39 = vunpack.i.l.bf16 %v5170_v31 }
 0x2ca   : > { %10629 = vst [vmem:[#allocation177_spill] sm:$0xff] %v8048_v5  ;;  %v8065_v5 = vmul.f32 %v7919_v55, %v6523_v43 }
 0x2cb   : > { %10630 = vst [vmem:[#allocation178_spill] sm:$0xff] %v8057_v30  ;;  %v8079_v30 = vmul.f32 %v7987_v57, %v10488_v46  ;;  %5324 = vpow2.f32 %v1492_v61 }
 0x2cc   : > { %10631 = vst [vmem:[#allocation179_spill] sm:$0xff] %v8061_v25 }
 0x2cd   : > { %10632 = vst [vmem:[#allocation180_spill] sm:$0xff] %v8065_v5  ;;  %v1599_v5 = vmul.f32 %v5323_v44, %v7723_v37  ;;  %v1733_v37 = vpack.c.bf16 %v1598_v62, %v1598_v62 }
 0x2ce   : > { %10633 = vst [vmem:[#allocation181_spill] sm:$0xff] %v8069_v19 }
 0x2cf   : > { %10634 = vst [vmem:[#allocation182_spill] sm:$0xff] %v8073_v8  ;;  %v2327_v8 = vadd.f32 %v7621_v0, %v7288_v51  ;;  %v1734_v63 = vpack.c.bf16 %v1599_v5, %v1599_v5  ;;  %v10640_v51 = vld [vmem:[#allocation33_spill] sm:$0xff] }
 0x2d0   : > { %10635 = vst [vmem:[#allocation183_spill] sm:$0xff] %v8075_v1 }
 0x2d1   : > { %10636 = vst [vmem:[#allocation184_spill] sm:$0xff] %v8079_v30  ;;  %v2571_v30 = vadd.f32 %v7665_v45, %v7309_v47  ;;  %v2376_v0 = vadd.f32 %v10640_v51, %v2327_v8  ;;  %v5172_v47 = vunpack.i.h.bf16 %v5170_v31  ;;  %v8110_v45 = vmul.f32 %v8026_v36, %v10491_v18  ;;  %v10646_v8 = vld [vmem:[#allocation116_spill] sm:$0xff]  ;;  %v5325_v31 = vpop.eup %5324 }
 0x2d2   : > { %10637 = vst [vmem:[#allocation185_spill] sm:$0xff] %v8083_v10  ;;  %v2570_v10 = vadd.f32 %v7654_v21, %v7306_v40  ;;  %v10642_v21 = vld [vmem:[#allocation111_spill] sm:$0xff] }
 0x2d3   : > { %10638 = vst [vmem:[#allocation186_spill] sm:$0xff] %v8087_v22  ;;  %v8100_v22 = vadd.f32 %v3392_v32, %v3360_v13  ;;  %v2620_v44 = vadd.f32 %v10642_v21, %v2571_v30  ;;  %v10644_v13 = vld [vmem:[#allocation34_spill] sm:$0xff]  ;;  %v1494_v32 = vmul.f32 1.442695, %v1419_v27  ;;  %v1291_v30 = vmul.f32 %v5172_v47, %v10478_v3  ;;  %v10650_v27 = vld [vmem:[#allocation109_spill] sm:$0xff] }
 0x2d4   : > { %1680 = vst.msk [vmem:[#allocation2 + $0xaa] sm:$0xff] %vm1665_vm1, %v1598_v62  ;;  %v2619_v40 = vadd.f32 %v10641_v60, %v2570_v10  ;;  %v2424_v61 = vadd.f32 %v10644_v13, %v2375_v52  ;;  %v10647_v10 = vld [vmem:[#allocation117_spill] sm:$0xff]  ;;  %v8123_v60 = vmul.f32 %v7874_v53, %v10493_v34  ;;  %v10662_v53 = vld [vmem:[#allocation55_spill] sm:$0xff] }
 0x2d5   : > { %10639 = vst [vmem:[#allocation187_spill] sm:$0xff] %v8100_v22  ;;  %v2669_v51 = vadd.f32 %v10647_v10, %v2620_v44  ;;  %v10653_v44 = vld [vmem:[#allocation112_spill] sm:$0xff]  ;;  %v10654_v13 = vld [vmem:[#allocation113_spill] sm:$0xff]  ;;  %5326 = vpow2.f32 %v1494_v32 }
 0x2d6   : > { %1681 = vst.msk [vmem:[#allocation2 + $0xb2] sm:$0xff] %vm1665_vm1, %v1599_v5  ;;  %v10645_v5 = vld [vmem:[#allocation35_spill] sm:$0xff]  ;;  %v2668_v20 = vadd.f32 %v10646_v8, %v2619_v40  ;;  %v2473_v52 = vadd.f32 %v10650_v27, %v2424_v61  ;;  %v10652_v40 = vld [vmem:[#allocation36_spill] sm:$0xff]  ;;  %v10655_v8 = vld [vmem:[#allocation114_spill] sm:$0xff] }
 0x2d7   : > { %10643 = vst [vmem:[#allocation33_spill] sm:$0xff] %v8110_v45  ;;  %v2425_v62 = vadd.f32 %v10645_v5, %v2376_v0  ;;  %v8133_v0 = vmul.f32 %v7876_v15, %v6635_v16  ;;  %v2718_v5 = vadd.f32 %v10654_v13, %v2669_v51  ;;  %v8141_v45 = vadd.f32 1.0, %v5325_v31  ;;  %v10656_v61 = vld [vmem:[#allocation17_spill] sm:$0xff]  ;;  %v10660_v32 = vld [vmem:[#allocation16_spill] sm:$0xff]  ;;  %v10661_v15 = vld [vmem:[#allocation54_spill] sm:$0xff] }
 0x2d8   : > { %1766 = vst.msk [vmem:[%s6299_s8 + $0x28] sm:$0xf] %vm1755_vm2, %v1733_v37  ;;  %v8127_v37 = vmul.f32 %v7915_v38, %v10493_v34  ;;  %v2717_v47 = vadd.f32 %v10653_v44, %v2668_v20  ;;  %v8139_v10 = vadd.f32 %v10655_v8, %v2473_v52  ;;  %v8144_v27 = vadd.f32 %v1291_v30, %v10656_v61  ;;  %v10658_v20 = vld [vmem:[#allocation118_spill] sm:$0xff]  ;;  %v10659_v52 = vld [vmem:[#allocation119_spill] sm:$0xff] }
 0x2d9   : > { %1767 = vst.msk [vmem:[%s6299_s8 + $0x2c] sm:$0xf] %vm1755_vm2, %v1734_v63  ;;  %v1290_v63 = vmul.f32 %v5171_v39, %v10478_v3  ;;  %v2474_v21 = vadd.f32 %v10652_v40, %v2425_v62  ;;  %v10657_v62 = vld [vmem:[#allocation115_spill] sm:$0xff]  ;;  %v8159_v44 = vadd.f32 %v10659_v52, %v2718_v5  ;;  %5328 = vrcp.f32 %v8141_v45 }
 0x2da   : > { %10648 = vst [vmem:[#allocation110_spill] sm:$0xff] %v8123_v60  ;;  %v8156_v51 = vadd.f32 %v10658_v20, %v2717_v47  ;;  %v8353_v45 = vld [vmem:[%s10066_s4] ss:$0 sm:$0xff] }
 0x2db   : > { %10649 = vst [vmem:[#allocation111_spill] sm:$0xff] %v8127_v37  ;;  %v8146_v39 = vld [vmem:[#allocation2 + $0xa8] sm:$0xff]  ;;  %v8153_v40 = vadd.f32 %v10657_v62, %v2474_v21  ;;  %v8162_v31 = vadd.f32 %v1290_v63, %v10660_v32 }
 0x2dc   : > { %10651 = vst [vmem:[#allocation34_spill] sm:$0xff] %v8133_v0  ;;  %v8148_v37 = vld [vmem:[#allocation2 + $0xa9] sm:$0xff]  ;;  %v1824_v13 = vmul.f32 %v10533_v48, %v8146_v39  ;;  %v2068_v5 = vmul.f32 %v6520_v35, %v8146_v39 }
 0x2dd   : > { %v8150_v0 = vld [vmem:[#allocation2 + $0xaa] sm:$0xff]  ;;  %v1873_v21 = vmul.f32 %v10534_v28, %v8148_v37  ;;  %v8172_v61 = vld [vmem:[#allocation2 + $0xb2] sm:$0xff]  ;;  %v2117_v36 = vmul.f32 %v6523_v43, %v8148_v37  ;;  %10716 = vst [vmem:[#allocation117_spill] sm:$0xff] %v8353_v45 }
 0x2de   : > { %v8164_v30 = vld [vmem:[#allocation2 + $0xb0] sm:$0xff]  ;;  %v1922_v47 = vmul.f32 %v10550_v23, %v8150_v0  ;;  %v1923_v20 = vmul.f32 %v10550_v23, %v8172_v61  ;;  %v2084_v38 = vadd.f32 %v2068_v5, %v10661_v15  ;;  %v2166_v11 = vmul.f32 %v6526_v17, %v8150_v0 }
 0x2df   : > { %v8168_v8 = vld [vmem:[#allocation2 + $0xb1] sm:$0xff]  ;;  %v1825_v63 = vmul.f32 %v10533_v48, %v8164_v30  ;;  %v2069_v60 = vmul.f32 %v6520_v35, %v8164_v30  ;;  %v1889_v25 = vadd.f32 %v1873_v21, %v1824_v13  ;;  %v8204_v13 = vpop.eup %5326 }
 0x2e0   : > { %v1874_v62 = vmul.f32 %v10534_v28, %v8168_v8  ;;  %v8184_v52 = vld [vmem:[#allocation2 + $0xab] sm:$0xff]  ;;  %v8186_v32 = vld [vmem:[#allocation2 + $0xb3] sm:$0xff] }
 0x2e1   : > { %v8188_v19 = vld [vmem:[#allocation2 + $0xac] sm:$0xff]  ;;  %v1971_v22 = vmul.f32 %v10556_v42, %v8184_v52  ;;  %v1972_v1 = vmul.f32 %v10556_v42, %v8186_v32  ;;  %v8196_v28 = vld [vmem:[#allocation2 + $0xb4] sm:$0xff]  ;;  %v2085_v35 = vadd.f32 %v2069_v60, %v10662_v53  ;;  %v1938_v21 = vadd.f32 %v1922_v47, %v1889_v25 }
 0x2e2   : > { %v2020_v23 = vmul.f32 %v10557_v6, %v8188_v19  ;;  %v1890_v48 = vadd.f32 %v1874_v62, %v1825_v63  ;;  %v2021_v3 = vmul.f32 %v10557_v6, %v8196_v28  ;;  %v2118_v42 = vmul.f32 %v6523_v43, %v8168_v8 }
 0x2e3   : > { %v2167_v62 = vmul.f32 %v6526_v17, %v8172_v61  ;;  %v2215_v15 = vmul.f32 %v10488_v46, %v8184_v52  ;;  %v2216_v53 = vmul.f32 %v10488_v46, %v8186_v32  ;;  %v1987_v25 = vadd.f32 %v1971_v22, %v1938_v21  ;;  %v10664_v22 = vld [vmem:[#allocation57_spill] sm:$0xff] }
 0x2e4   : > { %v1939_v63 = vadd.f32 %v1923_v20, %v1890_v48  ;;  %v2133_v60 = vadd.f32 %v2117_v36, %v2084_v38  ;;  %v2134_v47 = vadd.f32 %v2118_v42, %v2085_v35  ;;  %v2264_v5 = vmul.f32 %v10491_v18, %v8188_v19  ;;  %v10663_v42 = vld [vmem:[#allocation56_spill] sm:$0xff] }
 0x2e5   : > { %v2265_v6 = vmul.f32 %v10491_v18, %v8196_v28  ;;  %v2312_v48 = vmul.f32 %v10493_v34, %v8146_v39  ;;  %v2313_v20 = vmul.f32 %v10493_v34, %v8164_v30  ;;  %v2036_v17 = vadd.f32 %v2020_v23, %v1987_v25 }
 0x2e6   : > { %v1988_v43 = vadd.f32 %v1972_v1, %v1939_v63  ;;  %v2182_v12 = vadd.f32 %v2166_v11, %v2133_v60  ;;  %v2183_v57 = vadd.f32 %v2167_v62, %v2134_v47  ;;  %v2361_v38 = vmul.f32 %v6635_v16, %v8148_v37  ;;  %v10665_v63 = vld [vmem:[#allocation81_spill] sm:$0xff]  ;;  %v10666_v11 = vld [vmem:[#allocation82_spill] sm:$0xff] }
 0x2e7   : > { %v2328_v36 = vadd.f32 %v2312_v48, %v10663_v42  ;;  %v2329_v1 = vadd.f32 %v2313_v20, %v10664_v22  ;;  %v2362_v21 = vmul.f32 %v6635_v16, %v8168_v8  ;;  %v2086_v18 = vadd.f32 %v10665_v63, %v2036_v17  ;;  %v10668_v42 = vld [vmem:[#allocation61_spill] sm:$0xff] }
 0x2e8   : > { %v2037_v35 = vadd.f32 %v2021_v3, %v1988_v43  ;;  %v2231_v46 = vadd.f32 %v2215_v15, %v2182_v12  ;;  %v2232_v29 = vadd.f32 %v2216_v53, %v2183_v57  ;;  %v2410_v23 = vmul.f32 %v6641_v56, %v8150_v0  ;;  %v10667_v3 = vld [vmem:[#allocation45_spill] sm:$0xff] }
 0x2e9   : > { %v2377_v25 = vadd.f32 %v2361_v38, %v2328_v36  ;;  %v2378_v60 = vadd.f32 %v2362_v21, %v2329_v1  ;;  %v2411_v43 = vmul.f32 %v6641_v56, %v8172_v61  ;;  %v2135_v47 = vadd.f32 %v10667_v3, %v2086_v18  ;;  %v10669_v17 = vld [vmem:[#allocation49_spill] sm:$0xff]  ;;  %v10671_v36 = vld [vmem:[#allocation38_spill] sm:$0xff]  ;;  %v10672_v21 = vld [vmem:[#allocation84_spill] sm:$0xff] }
 0x2ea   : > { %v2087_v62 = vadd.f32 %v10666_v11, %v2037_v35  ;;  %v2280_v48 = vadd.f32 %v2264_v5, %v2231_v46  ;;  %v2281_v20 = vadd.f32 %v2265_v6, %v2232_v29  ;;  %v2459_v22 = vmul.f32 %v10668_v42, %v8184_v52  ;;  %v10670_v35 = vld [vmem:[#allocation88_spill] sm:$0xff]  ;;  %v10674_v11 = vld [vmem:[#allocation97_spill] sm:$0xff] }
 0x2eb   : > { %v2426_v57 = vadd.f32 %v2410_v23, %v2377_v25  ;;  %v2427_v15 = vadd.f32 %v2411_v43, %v2378_v60  ;;  %v2460_v53 = vmul.f32 %v10668_v42, %v8186_v32  ;;  %v2184_v38 = vadd.f32 %v10670_v35, %v2135_v47  ;;  %v10673_v18 = vld [vmem:[#allocation96_spill] sm:$0xff]  ;;  %v10675_v25 = vld [vmem:[#allocation71_spill] sm:$0xff]  ;;  %v10676_v43 = vld [vmem:[#allocation73_spill] sm:$0xff] }
 0x2ec   : > { %v2136_v12 = vadd.f32 %v10669_v17, %v2087_v62  ;;  %v2330_v1 = vadd.f32 %v10671_v36, %v2280_v48  ;;  %v2331_v63 = vadd.f32 %v10672_v21, %v2281_v20  ;;  %v2508_v46 = vmul.f32 %v6649_v24, %v8188_v19  ;;  %v10677_v47 = vld [vmem:[#allocation62_spill] sm:$0xff]  ;;  %v10678_v20 = vld [vmem:[#allocation83_spill] sm:$0xff] }
 0x2ed   : > { %v2475_v29 = vadd.f32 %v2459_v22, %v2426_v57  ;;  %v2476_v5 = vadd.f32 %v2460_v53, %v2427_v15  ;;  %v2509_v23 = vmul.f32 %v6649_v24, %v8196_v28  ;;  %v2233_v62 = vadd.f32 %v10674_v11, %v2184_v38  ;;  %v10680_v15 = vld [vmem:[#allocation92_spill] sm:$0xff]  ;;  %v10681_v38 = vld [vmem:[#allocation98_spill] sm:$0xff] }
 0x2ee   : > { %v2185_v6 = vadd.f32 %v10673_v18, %v2136_v12  ;;  %v2379_v60 = vadd.f32 %v10675_v25, %v2330_v1  ;;  %v2380_v3 = vadd.f32 %v10676_v43, %v2331_v63  ;;  %v2556_v48 = vmul.f32 %v10677_v47, %v8146_v39  ;;  %v10679_v12 = vld [vmem:[#allocation70_spill] sm:$0xff] }
 0x2ef   : > { %v2524_v35 = vadd.f32 %v2508_v46, %v2475_v29  ;;  %v2525_v36 = vadd.f32 %v2509_v23, %v2476_v5  ;;  %v2557_v22 = vmul.f32 %v10677_v47, %v8164_v30  ;;  %v8261_v57 = vadd.f32 %v10679_v12, %v2233_v62  ;;  %v10682_v63 = vld [vmem:[#allocation90_spill] sm:$0xff]  ;;  %v10684_v29 = vld [vmem:[#allocation52_spill] sm:$0xff] }
 0x2f0   : > { %v2234_v17 = vadd.f32 %v10678_v20, %v2185_v6  ;;  %v2428_v53 = vadd.f32 %v10680_v15, %v2379_v60  ;;  %v2429_v21 = vadd.f32 %v10681_v38, %v2380_v3  ;;  %v2572_v1 = vadd.f32 %v2556_v48, %v8139_v10  ;;  %v10683_v6 = vld [vmem:[#allocation99_spill] sm:$0xff]  ;;  %v10685_v23 = vld [vmem:[#allocation76_spill] sm:$0xff]  ;;  %v10686_v43 = vld [vmem:[#allocation50_spill] sm:$0xff] }
 0x2f1   : > { %v2573_v11 = vadd.f32 %v2557_v22, %v8153_v40  ;;  %v2574_v46 = vadd.f32 %v10683_v6, %v2524_v35  ;;  %v2575_v5 = vadd.f32 %v10684_v29, %v2525_v36  ;;  %v2605_v60 = vmul.f32 %v10446_v59, %v8148_v37  ;;  %v10687_v10 = vld [vmem:[#allocation53_spill] sm:$0xff]  ;;  %v10689_v36 = vld [vmem:[#allocation51_spill] sm:$0xff]  ;;  %v10691_v12 = vld [vmem:[#allocation74_spill] sm:$0xff] }
 0x2f2   : > { %v8267_v18 = vadd.f32 %v10682_v63, %v2234_v17  ;;  %v2477_v25 = vadd.f32 %v10685_v23, %v2428_v53  ;;  %v2478_v62 = vadd.f32 %v10686_v43, %v2429_v21  ;;  %v2606_v3 = vmul.f32 %v10446_v59, %v8168_v8  ;;  %v10688_v20 = vld [vmem:[#allocation77_spill] sm:$0xff]  ;;  %v10694_v6 = vld [vmem:[#allocation72_spill] sm:$0xff] }
 0x2f3   : > { %v2623_v48 = vadd.f32 %v10687_v10, %v2574_v46  ;;  %v2624_v17 = vadd.f32 %v10688_v20, %v2575_v5  ;;  %v2654_v40 = vmul.f32 %v6656_v2, %v8150_v0  ;;  %v2655_v35 = vmul.f32 %v6656_v2, %v8172_v61  ;;  %v10693_v21 = vld [vmem:[#allocation85_spill] sm:$0xff] }
 0x2f4   : > { %v8285_v22 = vadd.f32 %v10689_v36, %v2477_v25  ;;  %v8288_v15 = vadd.f32 %v10691_v12, %v2478_v62  ;;  %v2621_v53 = vadd.f32 %v2605_v60, %v2572_v1  ;;  %v2622_v38 = vadd.f32 %v2606_v3, %v2573_v11  ;;  %v10695_v1 = vld [vmem:[#allocation93_spill] sm:$0xff]  ;;  %v10696_v60 = vld [vmem:[#allocation75_spill] sm:$0xff]  ;;  %v10697_v36 = vld [vmem:[#allocation100_spill] sm:$0xff] }
 0x2f5   : > { %v2672_v63 = vadd.f32 %v10693_v21, %v2623_v48  ;;  %v2673_v46 = vadd.f32 %v10694_v6, %v2624_v17  ;;  %v2703_v29 = vmul.f32 %v10453_v49, %v8184_v52  ;;  %v2704_v5 = vmul.f32 %v10453_v49, %v8186_v32 }
 0x2f6   : > { %10690 = vst [vmem:[#allocation35_spill] sm:$0xff] %v8285_v22  ;;  %v2670_v23 = vadd.f32 %v2654_v40, %v2621_v53  ;;  %v2671_v43 = vadd.f32 %v2655_v35, %v2622_v38  ;;  %v2752_v25 = vmul.f32 %v10454_v58, %v8188_v19  ;;  %v2753_v62 = vmul.f32 %v10454_v58, %v8196_v28  ;;  %v10698_v53 = vld [vmem:[#allocation78_spill] sm:$0xff] }
 0x2f7   : > { %10692 = vst [vmem:[#allocation116_spill] sm:$0xff] %v8288_v15  ;;  %v2721_v11 = vadd.f32 %v10695_v1, %v2672_v63  ;;  %v2722_v3 = vadd.f32 %v10696_v60, %v2673_v46  ;;  %v2800_v10 = vmul.f32 %v10457_v26, %v8146_v39  ;;  %v2801_v48 = vmul.f32 %v10457_v26, %v8164_v30  ;;  %v10701_v1 = vld [vmem:[#allocation31_spill] sm:$0xff]  ;;  %v10702_v60 = vld [vmem:[#allocation32_spill] sm:$0xff] }
 0x2f8   : > { %v2719_v20 = vadd.f32 %v2703_v29, %v2670_v23  ;;  %v2720_v17 = vadd.f32 %v2704_v5, %v2671_v43  ;;  %v2849_v40 = vmul.f32 %v10458_v54, %v8148_v37  ;;  %v2850_v35 = vmul.f32 %v10458_v54, %v8168_v8  ;;  %v10699_v37 = vld [vmem:[#allocation151_spill] sm:$0xff]  ;;  %v10700_v5 = vld [vmem:[#allocation169_spill] sm:$0xff] }
 0x2f9   : > { %v2770_v12 = vadd.f32 %v10697_v36, %v2721_v11  ;;  %v2771_v38 = vadd.f32 %v10698_v53, %v2722_v3  ;;  %v2816_v21 = vadd.f32 %v2800_v10, %v8156_v51  ;;  %v2817_v63 = vadd.f32 %v2801_v48, %v8159_v44  ;;  %v10704_v48 = vld [vmem:[#allocation101_spill] sm:$0xff] }
 0x2fa   : > { %v2768_v39 = vadd.f32 %v2752_v25, %v2719_v20  ;;  %v2769_v6 = vadd.f32 %v2753_v62, %v2720_v17  ;;  %v2898_v30 = vmul.f32 %v10461_v14, %v8150_v0  ;;  %v2899_v46 = vmul.f32 %v10461_v14, %v8172_v61  ;;  %v10703_v0 = vld [vmem:[#allocation152_spill] sm:$0xff]  ;;  %v10705_v17 = vld [vmem:[#allocation102_spill] sm:$0xff] }
 0x2fb   : > { %v2820_v29 = vadd.f32 %v10699_v37, %v2770_v12  ;;  %v2821_v8 = vadd.f32 %v10700_v5, %v2771_v38  ;;  %v2865_v23 = vadd.f32 %v2849_v40, %v2816_v21  ;;  %v2866_v43 = vadd.f32 %v2850_v35, %v2817_v63  ;;  %v10707_v21 = vld [vmem:[#allocation103_spill] sm:$0xff]  ;;  %v10708_v63 = vld [vmem:[#allocation104_spill] sm:$0xff]  ;;  %v10711_v5 = vld [vmem:[#allocation105_spill] sm:$0xff] }
 0x2fc   : > { %v2818_v11 = vadd.f32 %v10701_v1, %v2768_v39  ;;  %v2819_v51 = vadd.f32 %v10702_v60, %v2769_v6  ;;  %v2947_v44 = vmul.f32 %v10367_v7, %v8184_v52  ;;  %v2948_v25 = vmul.f32 %v10367_v7, %v8186_v32  ;;  %v10706_v52 = vld [vmem:[#allocation9_spill] sm:$0xff] }
 0x2fd   : > { %v2869_v62 = vadd.f32 %v10703_v0, %v2820_v29  ;;  %v2870_v61 = vadd.f32 %v8018_v4, %v2821_v8  ;;  %v2914_v3 = vadd.f32 %v2898_v30, %v2865_v23  ;;  %v2915_v10 = vadd.f32 %v2899_v46, %v2866_v43  ;;  %v10709_v30 = vld [vmem:[#allocation172_spill] sm:$0xff]  ;;  %v10712_v23 = vld [vmem:[#allocation107_spill] sm:$0xff]  ;;  %v10713_v43 = vld [vmem:[#allocation89_spill] sm:$0xff] }
 0x2fe   : > { %v2867_v20 = vadd.f32 %v10704_v48, %v2818_v11  ;;  %v2868_v40 = vadd.f32 %v10705_v17, %v2819_v51  ;;  %v2996_v35 = vmul.f32 %v8034_v50, %v8188_v19  ;;  %v2997_v36 = vmul.f32 %v8034_v50, %v8196_v28  ;;  %v10710_v19 = vld [vmem:[#allocation174_spill] sm:$0xff]  ;;  %v10714_v11 = vld [vmem:[#allocation175_spill] sm:$0xff]  ;;  %v10717_v0 = vld [vmem:[#allocation108_spill] sm:$0xff] }
 0x2ff   : > { %v2918_v12 = vadd.f32 %v10706_v52, %v2869_v62  ;;  %v2919_v32 = vadd.f32 %v8021_v41, %v2870_v61  ;;  %v2963_v53 = vadd.f32 %v2947_v44, %v2914_v3  ;;  %v2964_v38 = vadd.f32 %v2948_v25, %v2915_v10  ;;  %v10718_v61 = vld [vmem:[#allocation106_spill] sm:$0xff] }
 0x300   : > { %v2916_v4 = vadd.f32 %v10707_v21, %v2867_v20  ;;  %v2917_v39 = vadd.f32 %v10708_v63, %v2868_v40  ;;  %v1539_v6 = vadd.f32 1.0, %v8204_v13  ;;  %v8346_v1 = vadd.f32 %v10713_v43, %v8162_v31  ;;  %v10715_v13 = vld [vmem:[#allocation176_spill] sm:$0xff] }
 0x301   : > { %v2967_v46 = vadd.f32 %v10709_v30, %v2918_v12  ;;  %v2968_v37 = vadd.f32 %v10710_v19, %v2919_v32  ;;  %v3012_v29 = vadd.f32 %v2996_v35, %v2963_v53  ;;  %v3013_v28 = vadd.f32 %v2997_v36, %v2964_v38  ;;  %v5329_v35 = vpop.eup %5328 }
 0x302   : > { %v2965_v8 = vadd.f32 %v10711_v5, %v2916_v4  ;;  %v2966_v41 = vadd.f32 %v10712_v23, %v2917_v39  ;;  %5330 = vrcp.f32 %v1539_v6  ;;  %v8365_v3 = vadd.f32 %v10713_v43, %v8144_v27  ;;  %v10719_v6 = vld [vmem:[#allocation161_spill] sm:$0xff] }
 0x303   : > { %v3016_v60 = vadd.f32 %v10714_v11, %v2967_v46  ;;  %v3017_v51 = vadd.f32 %v10715_v13, %v2968_v37  ;;  %v8356_v44 = vadd.f32 %v8353_v45, %v3012_v29  ;;  %v8359_v25 = vadd.f32 %v8353_v45, %v3013_v28  ;;  %v10724_v11 = vld [vmem:[#allocation164_spill] sm:$0xff] }
 0x304   : > { %v3014_v62 = vadd.f32 %v10717_v0, %v2965_v8  ;;  %v3015_v31 = vadd.f32 %v10718_v61, %v2966_v41  ;;  %v1414_v10 = vsub.f32 0.0, %v8346_v1  ;;  %v1415_v27 = vsub.f32 0.0, %v8365_v3  ;;  %v10726_v0 = vld [vmem:[#allocation170_spill] sm:$0xff]  ;;  %v10728_v61 = vld [vmem:[#allocation171_spill] sm:$0xff] }
 0x305   : > { %v8369_v48 = vadd.f32 %v8353_v45, %v3016_v60  ;;  %v8372_v20 = vadd.f32 %v8353_v45, %v3017_v51  ;;  %v3047_v17 = vsub.f32 0.0, %v8356_v44  ;;  %v3048_v40 = vsub.f32 0.0, %v8359_v25  ;;  %v8409_v51 = vpop.permute.xlu1 %5144 }
 0x306   : > { %v8377_v36 = vadd.f32 %v8353_v45, %v3014_v62  ;;  %v8380_v52 = vadd.f32 %v8353_v45, %v3015_v31  ;;  %v1484_v12 = vmul.f32 1.442695, %v1414_v10  ;;  %v1618_v30 = vmul.f32 %v5329_v35, %v10719_v6  ;;  %v10730_v10 = vld [vmem:[#allocation173_spill] sm:$0xff]  ;;  %v10732_v35 = vld [vmem:[#allocation135_spill] sm:$0xff] }
 0x307   : > { %v3051_v32 = vsub.f32 0.0, %v8369_v48  ;;  %v3052_v53 = vsub.f32 0.0, %v8372_v20  ;;  %v3069_v38 = vmul.f32 1.442695, %v3047_v17  ;;  %v3071_v21 = vmul.f32 1.442695, %v3048_v40 }
 0x308   : > { %v5331_v4 = vpop.eup %5330  ;;  %v3049_v63 = vsub.f32 0.0, %v8377_v36  ;;  %v3050_v39 = vsub.f32 0.0, %v8380_v52  ;;  %5332 = vpow2.f32 %v1484_v12  ;;  %1700 = vst.msk [vmem:[#allocation2 + $0x19a] sm:$0xff] %vm1665_vm1, %v1618_v30  ;;  %v1753_v5 = vpack.c.bf16 %v1618_v30, %v1618_v30  ;;  %v10734_v12 = vld [vmem:[#allocation146_spill] sm:$0xff] }
 0x309   : > { %5334 = vpow2.f32 %v3069_v38  ;;  %v3077_v46 = vmul.f32 1.442695, %v3051_v32  ;;  %v3079_v19 = vmul.f32 1.442695, %v3052_v53  ;;  %v1619_v37 = vmul.f32 %v5331_v4, %v8051_v9  ;;  %v10722_v9 = vld [vmem:[#allocation160_spill] sm:$0xff] }
 0x30a   : > { %5336 = vpow2.f32 %v3071_v21  ;;  %v3073_v29 = vmul.f32 1.442695, %v3049_v63  ;;  %v3075_v28 = vmul.f32 1.442695, %v3050_v39  ;;  %v8392_v8 = vmul.f32 %v7919_v55, %v6635_v16  ;;  %1786 = vst.msk [vmem:[%s6299_s8 + $0x78] sm:$0xf] %vm1755_vm2, %v1753_v5 }
 0x30b   : > { %v8396_v23 = vmul.f32 %v7950_v33, %v6641_v56  ;;  %5338 = vpow2.f32 %v3077_v46  ;;  %1701 = vst.msk [vmem:[#allocation2 + $0x1a2] sm:$0xff] %vm1665_vm1, %v1619_v37  ;;  %v1754_v41 = vpack.c.bf16 %v1619_v37, %v1619_v37  ;;  %v8401_v43 = vmul.f32 %v10722_v9, %v6641_v56  ;;  %v10736_v53 = vld [vmem:[#allocation136_spill] sm:$0xff] }
 0x30c   : > { %10720 = vst [vmem:[#allocation109_spill] sm:$0xff] %v8392_v8  ;;  %v8405_v60 = vmul.f32 %v10724_v11, %v10668_v42  ;;  %5340 = vpow2.f32 %v3073_v29  ;;  %v1486_v13 = vmul.f32 1.442695, %v1415_v27  ;;  %v8413_v62 = vmul.f32 %v10726_v0, %v10668_v42 }
 0x30d   : > { %10721 = vst [vmem:[#allocation36_spill] sm:$0xff] %v8396_v23  ;;  %v8417_v31 = vmul.f32 %v10728_v61, %v6649_v24  ;;  %v8421_v17 = vmul.f32 %v10730_v10, %v6649_v24  ;;  %5342 = vpow2.f32 %v3075_v28  ;;  %v8427_v27 = vmul.f32 %v10732_v35, %v10677_v47 }
 0x30e   : > { %10723 = vst [vmem:[#allocation112_spill] sm:$0xff] %v8401_v43  ;;  %v5333_v40 = vpop.eup %5332  ;;  %v8431_v32 = vmul.f32 %v10734_v12, %v10677_v47  ;;  %v8435_v38 = vmul.f32 %v10736_v53, %v10446_v59  ;;  %5344 = vpow2.f32 %v3079_v19  ;;  %v8439_v4 = vmul.f32 %v7919_v55, %v10446_v59 }
 0x30f   : > { %10725 = vst [vmem:[#allocation113_spill] sm:$0xff] %v8405_v60  ;;  %v5335_v21 = vpop.eup %5334  ;;  %v8443_v63 = vmul.f32 %v7950_v33, %v6656_v2  ;;  %v1534_v39 = vadd.f32 1.0, %v5333_v40  ;;  %v5147_v6 = vunpack.i.h.bf16 %v8409_v51  ;;  %v8448_v46 = vmul.f32 %v10722_v9, %v6656_v2 }
 0x310   : > { %10727 = vst [vmem:[#allocation114_spill] sm:$0xff] %v8413_v62  ;;  %v5337_v30 = vpop.eup %5336  ;;  %v8452_v19 = vmul.f32 %v10724_v11, %v10453_v49  ;;  %v3095_v37 = vadd.f32 1.0, %v5335_v21  ;;  %5346 = vpow2.f32 %v1486_v13  ;;  %v8456_v28 = vmul.f32 %v10726_v0, %v10453_v49 }
 0x311   : > { %10729 = vst [vmem:[#allocation17_spill] sm:$0xff] %v8417_v31  ;;  %v5339_v29 = vpop.eup %5338  ;;  %v8460_v5 = vmul.f32 %v10728_v61, %v10454_v58  ;;  %5348 = vrcp.f32 %v1534_v39  ;;  %v8468_v21 = vmul.f32 %v10732_v35, %v10457_v26  ;;  %v8481_v35 = vmul.f32 %v7919_v55, %v10458_v54 }
 0x312   : > { %10731 = vst [vmem:[#allocation115_spill] sm:$0xff] %v8421_v17  ;;  %v5341_v40 = vpop.eup %5340  ;;  %v8464_v17 = vmul.f32 %v10730_v10, %v10454_v58  ;;  %v3099_v13 = vadd.f32 1.0, %v5339_v29  ;;  %5350 = vrcp.f32 %v3095_v37  ;;  %v8485_v37 = vmul.f32 %v7950_v33, %v10461_v14 }
 0x313   : > { %1787 = vst.msk [vmem:[%s6299_s8 + $0x7c] sm:$0xf] %vm1755_vm2, %v1754_v41  ;;  %v3096_v41 = vadd.f32 1.0, %v5337_v30  ;;  %v10747_v30 = vld [vmem:[#allocation13_spill] sm:$0xff]  ;;  %v8503_v33 = vmul.f32 %v10726_v0, %v10367_v7  ;;  %v5146_v0 = vunpack.i.l.bf16 %v8409_v51 }
 0x314   : > { %10733 = vst [vmem:[#allocation118_spill] sm:$0xff] %v8427_v27  ;;  %v1281_v39 = vmul.f32 %v5147_v6, %v10747_v30  ;;  %v8491_v6 = vld [vmem:[#allocation2 + $0x120] sm:$0xff]  ;;  %v10763_v27 = vld [vmem:[#allocation41_spill] sm:$0xff] }
 0x315   : > { %10735 = vst [vmem:[#allocation119_spill] sm:$0xff] %v8431_v32  ;;  %5352 = vrcp.f32 %v3096_v41  ;;  %v8493_v41 = vld [vmem:[#allocation2 + $0x121] sm:$0xff] }
 0x316   : > { %10737 = vst [vmem:[#allocation16_spill] sm:$0xff] %v8435_v38  ;;  %5354 = vrcp.f32 %v3099_v13  ;;  %v8509_v13 = vld [vmem:[#allocation2 + $0x128] sm:$0xff] }
 0x317   : > { %10738 = vst [vmem:[#allocation54_spill] sm:$0xff] %v8439_v4 }
 0x318   : > { %10739 = vst [vmem:[#allocation55_spill] sm:$0xff] %v8443_v63  ;;  %v8477_v63 = vmul.f32 %v10736_v53, %v10458_v54  ;;  %v8495_v53 = vld [vmem:[#allocation2 + $0x12a] sm:$0xff] }
 0x319   : > { %10740 = vst [vmem:[#allocation56_spill] sm:$0xff] %v8448_v46  ;;  %v3097_v46 = vadd.f32 1.0, %v5341_v40  ;;  %v8550_v31 = vmul.f32 %v8495_v53, %v10763_v27 }
 0x31a   : > { %10741 = vst [vmem:[#allocation57_spill] sm:$0xff] %v8452_v19  ;;  %v5343_v19 = vpop.eup %5342 }
 0x31b   : > { %10742 = vst [vmem:[#allocation81_spill] sm:$0xff] %v8456_v28  ;;  %v8472_v28 = vmul.f32 %v10734_v12, %v10457_v26  ;;  %v3098_v29 = vadd.f32 1.0, %v5343_v19  ;;  %v8489_v12 = vmul.f32 %v10722_v9, %v10461_v14  ;;  %5356 = vrcp.f32 %v3097_v46 }
 0x31c   : > { %10743 = vst [vmem:[#allocation82_spill] sm:$0xff] %v8460_v5  ;;  %v5345_v5 = vpop.eup %5344  ;;  %v8499_v19 = vmul.f32 %v10724_v11, %v10367_v7  ;;  %v8507_v9 = vmul.f32 %v8034_v50, %v10728_v61  ;;  %v8517_v11 = vmul.f32 %v8034_v50, %v10730_v10  ;;  %v10760_v10 = vld [vmem:[#allocation39_spill] sm:$0xff] }
 0x31d   : > { %10744 = vst [vmem:[#allocation45_spill] sm:$0xff] %v8464_v17  ;;  %v3100_v40 = vadd.f32 1.0, %v5345_v5  ;;  %v5347_v55 = vpop.eup %5346  ;;  %5358 = vrcp.f32 %v3098_v29  ;;  %v8519_v5 = vld [vmem:[#allocation2 + $0x129] sm:$0xff]  ;;  %v3435_v62 = vmul.f32 %v8509_v13, %v10760_v10 }
 0x31e   : > { %10745 = vst [vmem:[#allocation61_spill] sm:$0xff] %v8468_v21  ;;  %v5349_v46 = vpop.eup %5348  ;;  %v10759_v29 = vld [vmem:[#allocation28_spill] sm:$0xff] }
 0x31f   : > { %10746 = vst [vmem:[#allocation49_spill] sm:$0xff] %v8472_v28  ;;  %5360 = vrcp.f32 %v3100_v40  ;;  %v8529_v21 = vmul.f32 %v8495_v53, %v10759_v29  ;;  %v10761_v40 = vld [vmem:[#allocation29_spill] sm:$0xff] }
 0x320   : > { %10748 = vst [vmem:[#allocation88_spill] sm:$0xff] %v8477_v63  ;;  %v10758_v63 = vld [vmem:[#allocation27_spill] sm:$0xff] }
 0x321   : > { %10749 = vst [vmem:[#allocation38_spill] sm:$0xff] %v8481_v35  ;;  %v3243_v28 = vmul.f32 %v8493_v41, %v10758_v63  ;;  %v3244_v32 = vmul.f32 %v8519_v5, %v10758_v63 }
 0x322   : > { %10750 = vst [vmem:[#allocation84_spill] sm:$0xff] %v8485_v37  ;;  %v8513_v37 = vld [vmem:[#allocation2 + $0x12c] sm:$0xff] }
 0x323   : > { %10751 = vst [vmem:[#allocation96_spill] sm:$0xff] %v8489_v12  ;;  %v8511_v12 = vld [vmem:[#allocation2 + $0x12b] sm:$0xff] }
 0x324   : > { %10752 = vst [vmem:[#allocation97_spill] sm:$0xff] %v8499_v19  ;;  %v10757_v19 = vld [vmem:[#allocation26_spill] sm:$0xff]  ;;  %v8535_v51 = vmul.f32 %v8511_v12, %v10761_v40 }
 0x325   : > { %10753 = vst [vmem:[#allocation71_spill] sm:$0xff] %v8503_v33  ;;  %v10756_v33 = vld [vmem:[#allocation15_spill] sm:$0xff]  ;;  %v3195_v35 = vmul.f32 %v8491_v6, %v10757_v19  ;;  %v3196_v43 = vmul.f32 %v8509_v13, %v10757_v19  ;;  %v10765_v19 = vld [vmem:[#allocation12_spill] sm:$0xff] }
 0x326   : > { %10754 = vst [vmem:[#allocation73_spill] sm:$0xff] %v8507_v9  ;;  %v1321_v61 = vadd.f32 %v1281_v39, %v10756_v33  ;;  %v5351_v9 = vpop.eup %5350  ;;  %v10762_v39 = vld [vmem:[#allocation30_spill] sm:$0xff] }
 0x327   : > { %10755 = vst [vmem:[#allocation83_spill] sm:$0xff] %v8517_v11  ;;  %v3434_v11 = vmul.f32 %v8491_v6, %v10760_v10  ;;  %v5353_v17 = vpop.eup %5352  ;;  %v8539_v33 = vmul.f32 %v8513_v37, %v10762_v39  ;;  %v3127_v4 = vmul.f32 %v5351_v9, %v8356_v44  ;;  %v1280_v44 = vmul.f32 %v5146_v0, %v10747_v30  ;;  %v8558_v9 = vld [vmem:[%s10064_s2] ss:$0 sm:$0xff]  ;;  %v10767_v30 = vld [vmem:[#allocation40_spill] sm:$0xff] }
 0x328   : > { %v5355_v38 = vpop.eup %5354  ;;  %v3128_v8 = vmul.f32 %v5353_v17, %v8359_v25  ;;  %10764 = vst [vmem:[#allocation70_spill] sm:$0xff] %v8558_v9  ;;  %v8561_v15 = vadd.f32 %v8558_v9, %v1321_v61  ;;  %v3259_v63 = vadd.f32 %v3243_v28, %v3195_v35  ;;  %v3482_v22 = vmul.f32 %v8493_v41, %v10767_v30 }
 0x329   : > { %v5357_v60 = vpop.eup %5356  ;;  %v3131_v23 = vmul.f32 %v5355_v38, %v8369_v48  ;;  %v3143_v45 = vpack.c.bf16 %v3127_v4, %v3127_v4  ;;  %v3450_v25 = vadd.f32 %v3434_v11, %v10765_v19  ;;  %v10766_v4 = vld [vmem:[#allocation128_spill] sm:$0xff] }
 0x32a   : > { %v5359_v10 = vpop.eup %5358  ;;  %v3129_v17 = vmul.f32 %v5357_v60, %v8377_v36  ;;  %v3144_v48 = vpack.c.bf16 %v3128_v8, %v3128_v8  ;;  %v3451_v0 = vadd.f32 %v3435_v62, %v10766_v4  ;;  %v1535_v36 = vadd.f32 1.0, %v5347_v55  ;;  %v8575_v62 = vld [vmem:[#allocation2 + $0x122] sm:$0xff] }
 0x32b   : > { %v5361_v38 = vpop.eup %5360  ;;  %v3130_v54 = vmul.f32 %v5359_v10, %v8380_v52  ;;  %v3147_v26 = vpack.c.bf16 %v3131_v23, %v3131_v23  ;;  %4623 = vst.msk [vmem:[%s6299_s8 + $0x98] sm:$0xf] %vm1755_vm2, %v3143_v45  ;;  %v1614_v8 = vmul.f32 %v5349_v46, %v8346_v1  ;;  %v3260_v60 = vadd.f32 %v3244_v32, %v3196_v43  ;;  %v10768_v52 = vld [vmem:[#allocation14_spill] sm:$0xff] }
 0x32c   : > { %v3132_v28 = vmul.f32 %v5361_v38, %v8372_v20  ;;  %v3145_v35 = vpack.c.bf16 %v3129_v17, %v3129_v17  ;;  %4624 = vst.msk [vmem:[%s6299_s8 + $0x9c] sm:$0xf] %vm1755_vm2, %v3144_v48  ;;  %v1320_v11 = vadd.f32 %v1280_v44, %v10768_v52  ;;  %v1405_v45 = vsub.f32 0.0, %v8561_v15  ;;  %v10769_v43 = vld [vmem:[#allocation42_spill] sm:$0xff]  ;;  %v8609_v17 = vld [vmem:[#allocation2 + $0x124] sm:$0xff] }
 0x32d   : > { %v3146_v19 = vpack.c.bf16 %v3130_v54, %v3130_v54  ;;  %4627 = vst.msk [vmem:[%s6299_s8 + $0xa8] sm:$0xf] %vm1755_vm2, %v3147_v26  ;;  %v3483_v20 = vmul.f32 %v8519_v5, %v10767_v30  ;;  %5362 = vrcp.f32 %v1535_v36  ;;  %v1749_v1 = vpack.c.bf16 %v1614_v8, %v1614_v8  ;;  %v10770_v54 = vld [vmem:[#allocation46_spill] sm:$0xff] }
 0x32e   : > { %v3148_v23 = vpack.c.bf16 %v3132_v28, %v3132_v28  ;;  %4625 = vst.msk [vmem:[%s6299_s8 + $0xa0] sm:$0xf] %vm1755_vm2, %v3145_v35  ;;  %v3498_v55 = vadd.f32 %v3482_v22, %v3450_v25  ;;  %v3579_v32 = vmul.f32 %v8511_v12, %v10769_v43  ;;  %v3627_v26 = vmul.f32 %v8513_v37, %v10770_v54  ;;  %v8607_v25 = vld [vmem:[#allocation2 + $0x123] sm:$0xff] }
 0x32f   : > { %v8591_v46 = vmul.f32 %v8495_v53, %v6641_v56  ;;  %4626 = vst.msk [vmem:[%s6299_s8 + $0xa4] sm:$0xf] %vm1755_vm2, %v3146_v19  ;;  %v3291_v61 = vmul.f32 %v8575_v62, %v10759_v29  ;;  %v3499_v10 = vadd.f32 %v3483_v20, %v3451_v0  ;;  %v8599_v22 = vmul.f32 %v8511_v12, %v10668_v42 }
 0x330   : > { %v8603_v44 = vmul.f32 %v8513_v37, %v6649_v24  ;;  %4628 = vst.msk [vmem:[%s6299_s8 + $0xac] sm:$0xf] %vm1755_vm2, %v3148_v23  ;;  %v3530_v48 = vmul.f32 %v8575_v62, %v10763_v27  ;;  %v8615_v38 = vmul.f32 %v8495_v53, %v6656_v2  ;;  %v8619_v4 = vadd.f32 %v8558_v9, %v1320_v11 }
 0x331   : > { %10771 = vst [vmem:[#allocation92_spill] sm:$0xff] %v8591_v46  ;;  %v1466_v0 = vmul.f32 1.442695, %v1405_v45  ;;  %v3307_v28 = vadd.f32 %v3291_v61, %v3259_v63  ;;  %v3308_v35 = vadd.f32 %v8529_v21, %v3260_v60  ;;  %v8624_v36 = vmul.f32 %v8511_v12, %v10453_v49  ;;  %v10780_v61 = vld [vmem:[#allocation144_spill] sm:$0xff] }
 0x332   : > { %10772 = vst [vmem:[#allocation98_spill] sm:$0xff] %v8599_v22  ;;  %v8628_v19 = vmul.f32 %v8513_v37, %v10454_v58  ;;  %v3546_v52 = vadd.f32 %v3530_v48, %v3498_v55  ;;  %v8638_v63 = vmul.f32 %v8511_v12, %v10367_v7  ;;  %v8642_v21 = vmul.f32 %v8034_v50, %v8513_v37  ;;  %v10807_v22 = vld [vmem:[#allocation147_spill] sm:$0xff] }
 0x333   : > { %10773 = vst [vmem:[#allocation90_spill] sm:$0xff] %v8603_v44  ;;  %v5363_v60 = vpop.eup %5362  ;;  %v3339_v11 = vmul.f32 %v8607_v25, %v10761_v40  ;;  %v3387_v45 = vmul.f32 %v8609_v17, %v10762_v39  ;;  %v3547_v20 = vadd.f32 %v8550_v31, %v3499_v10  ;;  %v3626_v12 = vmul.f32 %v8609_v17, %v10770_v54  ;;  %v10781_v31 = vld [vmem:[#allocation153_spill] sm:$0xff]  ;;  %v3715_v44 = vld [vmem:[#allocation2 + $0x199] sm:$0xff] }
 0x334   : > { %10774 = vst [vmem:[#allocation99_spill] sm:$0xff] %v8615_v38  ;;  %v1615_v23 = vmul.f32 %v5363_v60, %v8365_v3  ;;  %v1404_v37 = vsub.f32 0.0, %v8619_v4  ;;  %5364 = vpow2.f32 %v1466_v0  ;;  %v3356_v55 = vadd.f32 %v8535_v51, %v3308_v35 }
 0x335   : > { %1696 = vst.msk [vmem:[#allocation2 + $0x16a] sm:$0xff] %vm1665_vm1, %v1614_v8  ;;  %v8634_v8 = vmul.f32 %v8495_v53, %v10461_v14  ;;  %v3578_v53 = vmul.f32 %v8607_v25, %v10769_v43  ;;  %v2332_v48 = vadd.f32 %v10780_v61, %v8261_v57  ;;  %v2333_v10 = vadd.f32 %v10781_v31, %v8267_v18  ;;  %v10785_v57 = vld [vmem:[#allocation145_spill] sm:$0xff]  ;;  %v10786_v18 = vld [vmem:[#allocation154_spill] sm:$0xff] }
 0x336   : > { %10775 = vst [vmem:[#allocation52_spill] sm:$0xff] %v8624_v36  ;;  %v8662_v36 = vmul.f32 %v8491_v6, %v10493_v34  ;;  %v8666_v3 = vmul.f32 %v8509_v13, %v10493_v34  ;;  %v1750_v0 = vpack.c.bf16 %v1615_v23, %v1615_v23  ;;  %v8671_v51 = vmul.f32 %v8493_v41, %v6635_v16 }
 0x337   : > { %10776 = vst [vmem:[#allocation76_spill] sm:$0xff] %v8628_v19  ;;  %v3594_v19 = vadd.f32 %v3578_v53, %v3546_v52  ;;  %v2381_v35 = vadd.f32 %v10785_v57, %v2332_v48  ;;  %v2382_v52 = vadd.f32 %v10786_v18, %v2333_v10  ;;  %v8677_v60 = vmul.f32 %v8519_v5, %v6635_v16  ;;  %v10802_v57 = vld [vmem:[#allocation66_spill] sm:$0xff] }
 0x338   : > { %1782 = vst.msk [vmem:[%s6299_s8 + $0x68] sm:$0xf] %vm1755_vm2, %v1749_v1  ;;  %v3355_v1 = vadd.f32 %v3339_v11, %v3307_v28  ;;  %v3595_v28 = vadd.f32 %v3579_v32, %v3547_v20  ;;  %v8681_v11 = vmul.f32 %v8575_v62, %v6641_v56  ;;  %v8685_v53 = vmul.f32 %v8607_v25, %v10668_v42 }
 0x339   : > { %10777 = vst [vmem:[#allocation50_spill] sm:$0xff] %v8634_v8  ;;  %v1464_v32 = vmul.f32 1.442695, %v1404_v37  ;;  %v8696_v61 = vmul.f32 %v8609_v17, %v6649_v24  ;;  %v8700_v48 = vmul.f32 %v8491_v6, %v10677_v47  ;;  %v8702_v10 = vadd.f32 %v3626_v12, %v3594_v19 }
 0x33a   : > { %10778 = vst [vmem:[#allocation53_spill] sm:$0xff] %v8638_v63  ;;  %v8689_v20 = vadd.f32 %v3387_v45, %v3355_v1  ;;  %v5365_v31 = vpop.eup %5364  ;;  %v8710_v45 = vmul.f32 %v8493_v41, %v10446_v59  ;;  %v8716_v37 = vadd.f32 %v3627_v26, %v3595_v28  ;;  %v8720_v1 = vmul.f32 %v8575_v62, %v6656_v2  ;;  %v10805_v28 = vld [vmem:[#allocation67_spill] sm:$0xff] }
 0x33b   : > { %10779 = vst [vmem:[#allocation77_spill] sm:$0xff] %v8642_v21  ;;  %v8724_v19 = vmul.f32 %v8607_v25, %v10453_v49  ;;  %v8728_v12 = vmul.f32 %v8609_v17, %v10454_v58  ;;  %v8732_v18 = vmul.f32 %v8491_v6, %v10802_v57  ;;  %v8736_v26 = vmul.f32 %v8509_v13, %v10802_v57  ;;  %v10808_v6 = vld [vmem:[#allocation155_spill] sm:$0xff]  ;;  %v10856_v21 = vld [vmem:[#allocation157_spill] sm:$0xff] }
 0x33c   : > { %10782 = vst [vmem:[#allocation51_spill] sm:$0xff] %v8662_v36  ;;  %v8740_v38 = vmul.f32 %v8493_v41, %v10805_v28  ;;  %5366 = vpow2.f32 %v1464_v32  ;;  %v5185_v41 = vpop.permute.xlu0 %5184  ;;  %v8758_v32 = vmul.f32 %v8575_v62, %v10461_v14  ;;  %v8843_v36 = vld [vmem:[#allocation2 + $0x16a] sm:$0xff] }
 0x33d   : > { %10783 = vst [vmem:[#allocation74_spill] sm:$0xff] %v8666_v3  ;;  %v10838_v3 = vld [vmem:[#allocation26_spill] sm:$0xff] }
 0x33e   : > { %1697 = vst.msk [vmem:[#allocation2 + $0x172] sm:$0xff] %vm1665_vm1, %v1615_v23  ;;  %v8692_v23 = vadd.f32 %v8539_v33, %v3356_v55  ;;  %v8714_v33 = vmul.f32 %v8519_v5, %v10446_v59  ;;  %v3667_v55 = vld [vmem:[#allocation2 + $0x198] sm:$0xff] }
 0x33f   : > { %10784 = vst [vmem:[#allocation85_spill] sm:$0xff] %v8671_v51  ;;  %v8810_v51 = vld [vmem:[#allocation2 + $0x168] sm:$0xff] }
 0x340   : > { %10787 = vst [vmem:[#allocation72_spill] sm:$0xff] %v8677_v60  ;;  %v8799_v60 = vmul.f32 %v3715_v44, %v10446_v59 }
 0x341   : > { %10788 = vst [vmem:[#allocation93_spill] sm:$0xff] %v8681_v11  ;;  %v8754_v11 = vmul.f32 %v8519_v5, %v10805_v28  ;;  %v8775_v5 = vmul.f32 %v3715_v44, %v6635_v16 }
 0x342   : > { %10789 = vst [vmem:[#allocation75_spill] sm:$0xff] %v8685_v53  ;;  %v8743_v53 = vadd.f32 %v10807_v22, %v2381_v35  ;;  %v8762_v22 = vmul.f32 %v8607_v25, %v10367_v7  ;;  %v8766_v35 = vmul.f32 %v8034_v50, %v8609_v17 }
 0x343   : > { %1783 = vst.msk [vmem:[%s6299_s8 + $0x6c] sm:$0xf] %vm1755_vm2, %v1750_v0  ;;  %v8706_v0 = vmul.f32 %v8509_v13, %v10677_v47  ;;  %v10809_v13 = vld [vmem:[#allocation35_spill] sm:$0xff] }
 0x344   : > { %10790 = vst [vmem:[#allocation100_spill] sm:$0xff] %v8689_v20 }
 0x345   : > { %10791 = vst [vmem:[#allocation78_spill] sm:$0xff] %v8692_v23  ;;  %v1525_v23 = vadd.f32 1.0, %v5365_v31  ;;  %v8769_v31 = vmul.f32 %v3667_v55, %v10493_v34 }
 0x346   : > { %10792 = vst [vmem:[#allocation151_spill] sm:$0xff] %v8696_v61  ;;  %v3763_v61 = vld [vmem:[#allocation2 + $0x19a] sm:$0xff] }
 0x347   : > { %10793 = vst [vmem:[#allocation169_spill] sm:$0xff] %v8700_v48  ;;  %v8781_v25 = vmul.f32 %v3763_v61, %v6641_v56  ;;  %5368 = vrcp.f32 %v1525_v23 }
 0x348   : > { %10794 = vst [vmem:[#allocation31_spill] sm:$0xff] %v8702_v10 }
 0x349   : > { %10795 = vst [vmem:[#allocation32_spill] sm:$0xff] %v8706_v0  ;;  %v10835_v0 = vld [vmem:[#allocation13_spill] sm:$0xff] }
 0x34a   : > { %10796 = vst [vmem:[#allocation152_spill] sm:$0xff] %v8710_v45  ;;  %v10810_v45 = vld [vmem:[#allocation148_spill] sm:$0xff] }
 0x34b   : > { %10797 = vst [vmem:[#allocation101_spill] sm:$0xff] %v8714_v33  ;;  %v8746_v33 = vadd.f32 %v10808_v6, %v2382_v52  ;;  %v8750_v46 = vadd.f32 %v10810_v45, %v10809_v13  ;;  %v3812_v52 = vld [vmem:[#allocation2 + $0x1a3] sm:$0xff] }
 0x34c   : > { %10798 = vst [vmem:[#allocation102_spill] sm:$0xff] %v8716_v37  ;;  %v3764_v37 = vld [vmem:[#allocation2 + $0x1a2] sm:$0xff]  ;;  %v8790_v10 = vmul.f32 %v3812_v52, %v10668_v42  ;;  %v8818_v23 = vmul.f32 %v3812_v52, %v10453_v49 }
 0x34d   : > { %10799 = vst [vmem:[#allocation9_spill] sm:$0xff] %v8720_v1  ;;  %v3668_v1 = vld [vmem:[#allocation2 + $0x1a0] sm:$0xff]  ;;  %v8784_v6 = vmul.f32 %v3764_v37, %v6641_v56 }
 0x34e   : > { %10800 = vst [vmem:[#allocation103_spill] sm:$0xff] %v8724_v19  ;;  %v3716_v19 = vld [vmem:[#allocation2 + $0x1a1] sm:$0xff]  ;;  %v8772_v45 = vmul.f32 %v3668_v1, %v10493_v34 }
 0x34f   : > { %10801 = vst [vmem:[#allocation104_spill] sm:$0xff] %v8728_v12  ;;  %v3811_v12 = vld [vmem:[#allocation2 + $0x19b] sm:$0xff]  ;;  %v8778_v62 = vmul.f32 %v3716_v19, %v6635_v16 }
 0x350   : > { %10803 = vst [vmem:[#allocation172_spill] sm:$0xff] %v8732_v18  ;;  %v8787_v17 = vmul.f32 %v3811_v12, %v10668_v42  ;;  %v3859_v13 = vld [vmem:[#allocation2 + $0x19c] sm:$0xff] }
 0x351   : > { %10804 = vst [vmem:[#allocation174_spill] sm:$0xff] %v8736_v26 }
 0x352   : > { %10806 = vst [vmem:[#allocation105_spill] sm:$0xff] %v8740_v38 }
 0x353   : > { %10811 = vst [vmem:[#allocation107_spill] sm:$0xff] %v8754_v11 }
 0x354   : > { %10812 = vst [vmem:[#allocation89_spill] sm:$0xff] %v8758_v32  ;;  %v10878_v32 = vld [vmem:[#allocation168_spill] sm:$0xff] }
 0x355   : > { %10813 = vst [vmem:[#allocation175_spill] sm:$0xff] %v8762_v22 }
 0x356   : > { %10814 = vst [vmem:[#allocation176_spill] sm:$0xff] %v8766_v35 }
 0x357   : > { %10815 = vst [vmem:[#allocation108_spill] sm:$0xff] %v8769_v31  ;;  %v5186_v31 = vunpack.i.l.bf16 %v5185_v41 }
 0x358   : > { %10816 = vst [vmem:[#allocation106_spill] sm:$0xff] %v8772_v45  ;;  %v3860_v45 = vld [vmem:[#allocation2 + $0x1a4] sm:$0xff] }
 0x359   : > { %10817 = vst [vmem:[#allocation161_spill] sm:$0xff] %v8775_v5  ;;  %v8793_v5 = vmul.f32 %v3667_v55, %v10677_v47  ;;  %v8824_v20 = vmul.f32 %v3860_v45, %v10454_v58  ;;  %v1296_v48 = vmul.f32 %v5186_v31, %v10835_v0  ;;  %v10842_v31 = vld [vmem:[#allocation39_spill] sm:$0xff] }
 0x35a   : > { %10818 = vst [vmem:[#allocation160_spill] sm:$0xff] %v8778_v62  ;;  %v8796_v62 = vmul.f32 %v3668_v1, %v10677_v47 }
 0x35b   : > { %10819 = vst [vmem:[#allocation164_spill] sm:$0xff] %v8781_v25  ;;  %v5367_v25 = vpop.eup %5366 }
 0x35c   : > { %10820 = vst [vmem:[#allocation170_spill] sm:$0xff] %v8784_v6  ;;  %v8802_v6 = vmul.f32 %v3716_v19, %v10446_v59 }
 0x35d   : > { %10821 = vst [vmem:[#allocation171_spill] sm:$0xff] %v8787_v17  ;;  %v8805_v17 = vmul.f32 %v3763_v61, %v6656_v2 }
 0x35e   : > { %10822 = vst [vmem:[#allocation173_spill] sm:$0xff] %v8790_v10  ;;  %v8808_v10 = vmul.f32 %v3764_v37, %v6656_v2 }
 0x35f   : > { %10823 = vst [vmem:[#allocation135_spill] sm:$0xff] %v8793_v5  ;;  %v8812_v5 = vld [vmem:[#allocation2 + $0x169] sm:$0xff] }
 0x360   : > { %10824 = vst [vmem:[#allocation146_spill] sm:$0xff] %v8796_v62  ;;  %v8815_v62 = vmul.f32 %v3811_v12, %v10453_v49 }
 0x361   : > { %10825 = vst [vmem:[#allocation136_spill] sm:$0xff] %v8799_v60  ;;  %v8821_v60 = vmul.f32 %v3859_v13, %v10454_v58 }
 0x362   : > { %10826 = vst [vmem:[#allocation15_spill] sm:$0xff] %v8802_v6  ;;  %v5187_v6 = vunpack.i.h.bf16 %v5185_v41  ;;  %v3201_v41 = vmul.f32 %v8810_v51, %v10838_v3 }
 0x363   : > { %10827 = vst [vmem:[#allocation29_spill] sm:$0xff] %v8805_v17  ;;  %v8827_v17 = vmul.f32 %v3667_v55, %v10802_v57  ;;  %v8846_v55 = vmul.f32 %v3763_v61, %v10461_v14 }
 0x364   : > { %10828 = vst [vmem:[#allocation30_spill] sm:$0xff] %v8808_v10  ;;  %v8830_v10 = vmul.f32 %v3668_v1, %v10802_v57  ;;  %v8849_v1 = vmul.f32 %v3764_v37, %v10461_v14  ;;  %v1297_v61 = vmul.f32 %v5187_v6, %v10835_v0  ;;  %v3297_v37 = vmul.f32 %v8843_v36, %v10759_v29 }
 0x365   : > { %10829 = vst [vmem:[#allocation12_spill] sm:$0xff] %v8815_v62  ;;  %v8834_v62 = vmul.f32 %v3715_v44, %v10805_v28  ;;  %v3440_v44 = vmul.f32 %v8810_v51, %v10842_v31 }
 0x366   : > { %10830 = vst [vmem:[#allocation128_spill] sm:$0xff] %v8818_v23  ;;  %v8837_v23 = vmul.f32 %v3716_v19, %v10805_v28  ;;  %v5369_v19 = vpop.eup %5368 }
 0x367   : > { %10831 = vst [vmem:[#allocation14_spill] sm:$0xff] %v8821_v60  ;;  %v10839_v60 = vld [vmem:[#allocation27_spill] sm:$0xff] }
 0x368   : > { %10832 = vst [vmem:[#allocation144_spill] sm:$0xff] %v8824_v20  ;;  %v3249_v20 = vmul.f32 %v8812_v5, %v10839_v60 }
 0x369   : > { %10833 = vst [vmem:[#allocation153_spill] sm:$0xff] %v8827_v17  ;;  %v8860_v17 = vmul.f32 %v8034_v50, %v3859_v13  ;;  %v8877_v13 = vmul.f32 %v8810_v51, %v10493_v34 }
 0x36a   : > { %10834 = vst [vmem:[#allocation145_spill] sm:$0xff] %v8830_v10  ;;  %v8857_v10 = vmul.f32 %v3812_v52, %v10367_v7  ;;  %v8873_v52 = vmul.f32 %v8843_v36, %v10763_v27 }
 0x36b   : > { %10836 = vst [vmem:[#allocation154_spill] sm:$0xff] %v8834_v62  ;;  %v1524_v62 = vadd.f32 1.0, %v5367_v25  ;;  %v3488_v25 = vmul.f32 %v8812_v5, %v10767_v30 }
 0x36c   : > { %10837 = vst [vmem:[#allocation147_spill] sm:$0xff] %v8837_v23  ;;  %v8854_v23 = vmul.f32 %v3811_v12, %v10367_v7 }
 0x36d   : > { %10840 = vst [vmem:[#allocation155_spill] sm:$0xff] %v8846_v55  ;;  %v8864_v55 = vmul.f32 %v8034_v50, %v3860_v45  ;;  %v8881_v50 = vmul.f32 %v8812_v5, %v6635_v16  ;;  %v10850_v45 = vld [vmem:[#allocation183_spill] sm:$0xff]  ;;  %5370 = vrcp.f32 %v1524_v62  ;;  %v10858_v62 = vld [vmem:[#allocation21_spill] sm:$0xff] }
 0x36e   : > { %10841 = vst [vmem:[#allocation35_spill] sm:$0xff] %v8849_v1  ;;  %v10847_v1 = vld [vmem:[#allocation20_spill] sm:$0xff]  ;;  %v3456_v6 = vadd.f32 %v3440_v44, %v10850_v45  ;;  %v1337_v45 = vadd.f32 %v1297_v61, %v10858_v62 }
 0x36f   : > { %10843 = vst [vmem:[#allocation148_spill] sm:$0xff] %v8854_v23  ;;  %v1336_v12 = vadd.f32 %v1296_v48, %v10847_v1  ;;  %v3265_v23 = vadd.f32 %v3249_v20, %v3201_v41  ;;  %v10851_v48 = vld [vmem:[#allocation156_spill] sm:$0xff]  ;;  %v8887_v41 = vld [vmem:[#allocation2 + $0x170] sm:$0xff] }
 0x370   : > { %10844 = vst [vmem:[#allocation188_spill] sm:$0xff] %v8857_v10  ;;  %v2479_v20 = vadd.f32 %v10851_v48, %v8743_v53  ;;  %v8889_v1 = vld [vmem:[#allocation2 + $0x171] sm:$0xff]  ;;  %v8915_v62 = vadd.f32 %v8558_v9, %v1337_v45  ;;  %v3504_v11 = vadd.f32 %v3488_v25, %v3456_v6  ;;  %v8981_v6 = vpop.permute.xlu1 %5159 }
 0x371   : > { %10845 = vst [vmem:[#allocation189_spill] sm:$0xff] %v8860_v17  ;;  %v10854_v17 = vld [vmem:[#allocation158_spill] sm:$0xff] }
 0x372   : > { %10846 = vst [vmem:[#allocation190_spill] sm:$0xff] %v8864_v55  ;;  %v1605_v55 = vmul.f32 %v5369_v19, %v8561_v15  ;;  %v2480_v10 = vadd.f32 %v10854_v17, %v8746_v33  ;;  %v8900_v15 = vmul.f32 %v8843_v36, %v6641_v56  ;;  %v10860_v19 = vld [vmem:[#allocation159_spill] sm:$0xff]  ;;  %v8907_v33 = vadd.f32 %v8558_v9, %v1336_v12 }
 0x373   : > { %10848 = vst [vmem:[#allocation20_spill] sm:$0xff] %v8877_v13  ;;  %v10855_v13 = vld [vmem:[#allocation116_spill] sm:$0xff]  ;;  %v8904_v48 = vadd.f32 %v10860_v19, %v2479_v20  ;;  %v8923_v12 = vmul.f32 %v8810_v51, %v10677_v47  ;;  %v3441_v20 = vmul.f32 %v8887_v41, %v10842_v31  ;;  %v10870_v19 = vld [vmem:[#allocation166_spill] sm:$0xff]  ;;  %v1421_v63 = vsub.f32 0.0, %v8915_v62 }
 0x374   : > { %10849 = vst [vmem:[#allocation191_spill] sm:$0xff] %v8881_v50  ;;  %v2577_v35 = vadd.f32 %v10856_v21, %v10855_v13  ;;  %v10857_v50 = vld [vmem:[#allocation149_spill] sm:$0xff]  ;;  %v1740_v53 = vpack.c.bf16 %v1605_v55, %v1605_v55  ;;  %v10862_v21 = vld [vmem:[#allocation162_spill] sm:$0xff]  ;;  %v10863_v13 = vld [vmem:[#allocation163_spill] sm:$0xff] }
 0x375   : > { %10852 = vst [vmem:[#allocation183_spill] sm:$0xff] %v8887_v41  ;;  %v2625_v44 = vadd.f32 %v10857_v50, %v8750_v46  ;;  %v8910_v17 = vadd.f32 %v10862_v21, %v2480_v10  ;;  %v10864_v50 = vld [vmem:[#allocation150_spill] sm:$0xff]  ;;  %v8927_v10 = vmul.f32 %v8812_v5, %v10446_v59 }
 0x376   : > { %10853 = vst [vmem:[#allocation156_spill] sm:$0xff] %v8889_v1  ;;  %v2626_v46 = vadd.f32 %v10863_v13, %v2577_v35  ;;  %v8931_v35 = vld [vmem:[#allocation2 + $0x16b] sm:$0xff]  ;;  %v1420_v13 = vsub.f32 0.0, %v8907_v33 }
 0x377   : > { %10859 = vst [vmem:[#allocation158_spill] sm:$0xff] %v8900_v15  ;;  %v2674_v61 = vadd.f32 %v10864_v50, %v2625_v44  ;;  %v3202_v15 = vmul.f32 %v8887_v41, %v10838_v3  ;;  %v10869_v44 = vld [vmem:[#allocation165_spill] sm:$0xff]  ;;  %v5371_v50 = vpop.eup %5370 }
 0x378   : > { %1687 = vst.msk [vmem:[#allocation2 + $0xfa] sm:$0xff] %vm1665_vm1, %v1605_v55  ;;  %v3250_v55 = vmul.f32 %v8889_v1, %v10839_v60  ;;  %v2675_v45 = vadd.f32 %v10869_v44, %v2626_v46  ;;  %v8951_v46 = vld [vmem:[#allocation2 + $0x172] sm:$0xff]  ;;  %v1604_v22 = vmul.f32 %v5371_v50, %v8619_v4 }
 0x379   : > { %10861 = vst [vmem:[#allocation116_spill] sm:$0xff] %v8907_v33  ;;  %v2723_v21 = vadd.f32 %v10870_v19, %v2674_v61  ;;  %v3313_v61 = vadd.f32 %v3297_v37, %v3265_v23  ;;  %v8953_v44 = vld [vmem:[#allocation2 + $0x173] sm:$0xff]  ;;  %v8966_v23 = vmul.f32 %v8843_v36, %v10461_v14  ;;  %v10881_v37 = vld [vmem:[#allocation187_spill] sm:$0xff] }
 0x37a   : > { %10865 = vst [vmem:[#allocation157_spill] sm:$0xff] %v8915_v62  ;;  %v8955_v19 = vld [vmem:[#allocation2 + $0x16c] sm:$0xff]  ;;  %v3457_v38 = vadd.f32 %v3441_v20, %v10881_v37  ;;  %v1739_v4 = vpack.c.bf16 %v1604_v22, %v1604_v22  ;;  %v9008_v37 = vmul.f32 %v8953_v44, %v10769_v43 }
 0x37b   : > { %10866 = vst [vmem:[#allocation149_spill] sm:$0xff] %v8923_v12  ;;  %v8940_v12 = vmul.f32 %v8843_v36, %v6656_v2  ;;  %v8979_v25 = vmul.f32 %v8955_v19, %v10762_v39  ;;  %v1498_v36 = vmul.f32 1.442695, %v1421_v63 }
 0x37c   : > { %10867 = vst [vmem:[#allocation21_spill] sm:$0xff] %v8927_v10  ;;  %v8944_v10 = vmul.f32 %v8810_v51, %v10802_v57  ;;  %v2772_v51 = vadd.f32 %v10878_v32, %v2723_v21  ;;  %v1496_v32 = vmul.f32 1.442695, %v1420_v13  ;;  %v8993_v21 = vmul.f32 %v8951_v46, %v10763_v27 }
 0x37d   : > { %1773 = vst.msk [vmem:[%s6299_s8 + $0x44] sm:$0xf] %vm1755_vm2, %v1740_v53  ;;  %v8948_v53 = vmul.f32 %v8812_v5, %v10805_v28  ;;  %v3345_v5 = vmul.f32 %v8931_v35, %v10761_v40 }
 0x37e   : > { %10868 = vst [vmem:[#allocation159_spill] sm:$0xff] %v8931_v35  ;;  %5372 = vpow2.f32 %v1496_v32 }
 0x37f   : > { %10871 = vst [vmem:[#allocation162_spill] sm:$0xff] %v8940_v12  ;;  %v10877_v12 = vld [vmem:[#allocation167_spill] sm:$0xff]  ;;  %v8983_v20 = vadd.f32 %v3345_v5, %v3313_v61  ;;  %v9000_v61 = vadd.f32 %v8873_v52, %v3504_v11  ;;  %v9004_v5 = vmul.f32 %v8931_v35, %v10769_v43  ;;  %5374 = vpow2.f32 %v1498_v36 }
 0x380   : > { %10872 = vst [vmem:[#allocation163_spill] sm:$0xff] %v8944_v10  ;;  %v2724_v8 = vadd.f32 %v10877_v12, %v2675_v45  ;;  %v3266_v10 = vadd.f32 %v3250_v55, %v3202_v15  ;;  %v10882_v12 = vld [vmem:[#allocation10_spill] sm:$0xff]  ;;  %v3298_v15 = vmul.f32 %v8951_v46, %v10759_v29  ;;  %v8975_v55 = vmul.f32 %v8953_v44, %v10761_v40 }
 0x381   : > { %10873 = vst [vmem:[#allocation150_spill] sm:$0xff] %v8948_v53  ;;  %v8962_v53 = vld [vmem:[#allocation2 + $0x174] sm:$0xff] }
 0x382   : > { %10874 = vst [vmem:[#allocation165_spill] sm:$0xff] %v8951_v46  ;;  %v2773_v45 = vadd.f32 %v10882_v12, %v2724_v8  ;;  %v8987_v8 = vmul.f32 %v8962_v53, %v10762_v39  ;;  %v2644_v13 = vld [vmem:[#allocation2 + $0xfa] sm:$0xff]  ;;  %v8997_v63 = vadd.f32 %v3298_v15, %v3266_v10  ;;  %v5162_v10 = vunpack.i.h.bf16 %v8981_v6 }
 0x383   : > { %10875 = vst [vmem:[#allocation166_spill] sm:$0xff] %v8953_v44  ;;  %v2693_v50 = vld [vmem:[#allocation2 + $0xfb] sm:$0xff]  ;;  %v2661_v11 = vmul.f32 %v6656_v2, %v2644_v13  ;;  %v5161_v15 = vunpack.i.l.bf16 %v8981_v6  ;;  %v9036_v6 = vmul.f32 %v2644_v13, %v10759_v29  ;;  %v9045_v46 = vmul.f32 %v2644_v13, %v10763_v27 }
 0x384   : > { %10876 = vst [vmem:[#allocation192_spill] sm:$0xff] %v8955_v19  ;;  %v2742_v12 = vld [vmem:[#allocation2 + $0xfc] sm:$0xff]  ;;  %v2710_v52 = vmul.f32 %v10453_v49, %v2693_v50 }
 0x385   : > { %10879 = vst [vmem:[#allocation167_spill] sm:$0xff] %v8962_v53  ;;  %v9042_v35 = vmul.f32 %v2742_v12, %v10762_v39 }
 0x386   : > { %10880 = vst [vmem:[#allocation168_spill] sm:$0xff] %v8966_v23 }
 0x387   : > { %1686 = vst.msk [vmem:[#allocation2 + $0xf2] sm:$0xff] %vm1665_vm1, %v1604_v22  ;;  %v3489_v22 = vmul.f32 %v8889_v1, %v10767_v30  ;;  %v9056_v1 = vmul.f32 %v2693_v50, %v10769_v43 }
 0x388   : > { %10883 = vst [vmem:[#allocation187_spill] sm:$0xff] %v8975_v55 }
 0x389   : > { %10884 = vst [vmem:[#allocation10_spill] sm:$0xff] %v8979_v25  ;;  %v9010_v23 = vadd.f32 %v3489_v22, %v3457_v38  ;;  %v2954_v38 = vmul.f32 %v10367_v7, %v2693_v50  ;;  %v9026_v22 = vld [vmem:[%s10065_s3 + $0x18] ss:$0 sm:$0xff] }
 0x38a   : > { %10885 = vst [vmem:[#allocation193_spill] sm:$0xff] %v8983_v20  ;;  %v3003_v32 = vmul.f32 %v9026_v22, %v2742_v12 }
 0x38b   : > { %10886 = vst [vmem:[#allocation194_spill] sm:$0xff] %v8987_v8  ;;  %v2759_v8 = vmul.f32 %v10454_v58, %v2742_v12 }
 0x38c   : > { %10887 = vst [vmem:[#allocation195_spill] sm:$0xff] %v8993_v21 }
 0x38d   : > { %1772 = vst.msk [vmem:[%s6299_s8 + $0x40] sm:$0xf] %vm1755_vm2, %v1739_v4  ;;  %v9014_v4 = vmul.f32 %v8955_v19, %v10770_v54 }
 0x38e   : > { %10888 = vst [vmem:[#allocation196_spill] sm:$0xff] %v8997_v63  ;;  %v9029_v19 = vld [vmem:[#allocation2 + $0xf0] sm:$0xff]  ;;  %v9031_v44 = vld [vmem:[#allocation2 + $0xf8] sm:$0xff] }
 0x38f   : > { %10889 = vst [vmem:[#allocation197_spill] sm:$0xff] %v9000_v61  ;;  %v9033_v36 = vld [vmem:[#allocation2 + $0xf1] sm:$0xff]  ;;  %v2562_v26 = vmul.f32 %v10677_v47, %v9029_v19  ;;  %v2563_v18 = vmul.f32 %v10677_v47, %v9031_v44  ;;  %v9051_v21 = vld [vmem:[#allocation2 + $0xf9] sm:$0xff]  ;;  %v2807_v41 = vmul.f32 %v10802_v57, %v9031_v44  ;;  %v9068_v47 = vmul.f32 %v2644_v13, %v6641_v56  ;;  %v5373_v61 = vpop.eup %5372 }
 0x390   : > { %10890 = vst [vmem:[#allocation198_spill] sm:$0xff] %v9004_v5  ;;  %v2611_v55 = vmul.f32 %v10446_v59, %v9033_v36  ;;  %v9060_v63 = vld [vmem:[#allocation2 + $0xf2] sm:$0xff]  ;;  %v9065_v5 = vmul.f32 %v2742_v12, %v10770_v54  ;;  %v2612_v53 = vmul.f32 %v10446_v59, %v9051_v21  ;;  %v9074_v20 = vpop.eup %5374  ;;  %v2855_v9 = vmul.f32 %v10805_v28, %v9033_v36 }
 0x391   : > { %10891 = vst [vmem:[#allocation199_spill] sm:$0xff] %v9008_v37  ;;  %v2905_v37 = vmul.f32 %v10461_v14, %v2644_v13  ;;  %v2578_v62 = vadd.f32 %v2562_v26, %v8904_v48  ;;  %v2579_v33 = vadd.f32 %v2563_v18, %v8910_v17  ;;  %v2856_v13 = vmul.f32 %v10805_v28, %v9051_v21  ;;  %v9087_v17 = vld [vmem:[#allocation2 + $0xf4] sm:$0xff] }
 0x392   : > { %10892 = vst [vmem:[#allocation200_spill] sm:$0xff] %v9010_v23  ;;  %v2806_v23 = vmul.f32 %v10802_v57, %v9029_v19  ;;  %v2823_v57 = vadd.f32 %v2807_v41, %v2773_v45  ;;  %v2660_v48 = vmul.f32 %v6656_v2, %v9060_v63  ;;  %v2904_v45 = vmul.f32 %v10461_v14, %v9060_v63 }
 0x393   : > { %10893 = vst [vmem:[#allocation201_spill] sm:$0xff] %v9014_v4  ;;  %v9039_v4 = vmul.f32 %v2693_v50, %v10761_v40  ;;  %v2627_v26 = vadd.f32 %v2611_v55, %v2578_v62  ;;  %v2628_v18 = vadd.f32 %v2612_v53, %v2579_v33  ;;  %v1286_v59 = vmul.f32 %v5161_v15, %v10835_v0 }
 0x394   : > { %10894 = vst [vmem:[#allocation202_spill] sm:$0xff] %v9026_v22  ;;  %v2822_v25 = vadd.f32 %v2806_v23, %v2772_v51  ;;  %v1287_v51 = vmul.f32 %v5162_v10, %v10835_v0  ;;  %v2872_v41 = vadd.f32 %v2856_v13, %v2823_v57  ;;  %v9096_v33 = vmul.f32 %v2742_v12, %v6649_v24 }
 0x395   : > { %10895 = vst [vmem:[#allocation203_spill] sm:$0xff] %v9042_v35  ;;  %v9076_v35 = vld [vmem:[#allocation2 + $0xf3] sm:$0xff]  ;;  %v2676_v28 = vadd.f32 %v2660_v48, %v2627_v26  ;;  %v2677_v56 = vadd.f32 %v2661_v11, %v2628_v18  ;;  %v2758_v53 = vmul.f32 %v10454_v58, %v9087_v17  ;;  %v3191_v10 = vmul.f32 %v9029_v19, %v10838_v3 }
 0x396   : > { %10896 = vst [vmem:[#allocation204_spill] sm:$0xff] %v9068_v47  ;;  %v9083_v47 = vmul.f32 %v2693_v50, %v10668_v42  ;;  %v2871_v23 = vadd.f32 %v2855_v9, %v2822_v25  ;;  %v2709_v62 = vmul.f32 %v10453_v49, %v9076_v35  ;;  %v2921_v50 = vadd.f32 %v2905_v37, %v2872_v41  ;;  %v10897_v41 = vld [vmem:[#allocation43_spill] sm:$0xff] }
 0x397   : > { %v2953_v9 = vmul.f32 %v10367_v7, %v9076_v35  ;;  %v2726_v25 = vadd.f32 %v2710_v52, %v2677_v56  ;;  %v3239_v11 = vmul.f32 %v9033_v36, %v10839_v60  ;;  %v3002_v12 = vmul.f32 %v9026_v22, %v9087_v17 }
 0x398   : > { %v2920_v55 = vadd.f32 %v2904_v45, %v2871_v23  ;;  %v2725_v57 = vadd.f32 %v2709_v62, %v2676_v28  ;;  %v2970_v13 = vadd.f32 %v2954_v38, %v2921_v50  ;;  %v3430_v26 = vmul.f32 %v9029_v19, %v10842_v31  ;;  %v10898_v45 = vld [vmem:[#allocation64_spill] sm:$0xff] }
 0x399   : > { %v2775_v18 = vadd.f32 %v2759_v8, %v2726_v25  ;;  %v3192_v28 = vmul.f32 %v9031_v44, %v10838_v3  ;;  %v9112_v56 = vadd.f32 1.0, %v5373_v61  ;;  %v3431_v23 = vmul.f32 %v9031_v44, %v10842_v31  ;;  %v10908_v3 = vld [vmem:[#allocation80_spill] sm:$0xff] }
 0x39a   : > { %v2969_v15 = vadd.f32 %v2953_v9, %v2920_v55  ;;  %v2774_v37 = vadd.f32 %v2758_v53, %v2725_v57  ;;  %v3019_v48 = vadd.f32 %v3003_v32, %v2970_v13  ;;  %v3446_v38 = vadd.f32 %v3430_v26, %v10897_v41  ;;  %v10899_v55 = vld [vmem:[#allocation121_spill] sm:$0xff]  ;;  %v10901_v32 = vld [vmem:[#allocation47_spill] sm:$0xff]  ;;  %v10903_v26 = vld [vmem:[#allocation122_spill] sm:$0xff] }
 0x39b   : > { %v2825_v50 = vadd.f32 %v10899_v55, %v2775_v18  ;;  %v3240_v53 = vmul.f32 %v9051_v21, %v10839_v60  ;;  %v3255_v8 = vadd.f32 %v3239_v11, %v3191_v10  ;;  %v10900_v9 = vld [vmem:[#allocation117_spill] sm:$0xff]  ;;  %v3447_v25 = vadd.f32 %v3431_v23, %v10901_v32  ;;  %v10904_v41 = vld [vmem:[#allocation18_spill] sm:$0xff]  ;;  %v10906_v32 = vld [vmem:[#allocation123_spill] sm:$0xff] }
 0x39c   : > { %v3018_v52 = vadd.f32 %v3002_v12, %v2969_v15  ;;  %v2824_v62 = vadd.f32 %v10898_v45, %v2774_v37  ;;  %v9125_v61 = vadd.f32 %v10900_v9, %v3019_v48  ;;  %v3478_v15 = vmul.f32 %v9033_v36, %v10767_v30  ;;  %v10902_v13 = vld [vmem:[#allocation65_spill] sm:$0xff]  ;;  %v10905_v45 = vld [vmem:[#allocation120_spill] sm:$0xff] }
 0x39d   : > { %v2874_v37 = vadd.f32 %v10903_v26, %v2825_v50  ;;  %v3287_v18 = vmul.f32 %v9060_v63, %v10759_v29  ;;  %v9135_v10 = vadd.f32 %v1286_v59, %v10904_v41  ;;  %v3479_v48 = vmul.f32 %v9051_v21, %v10767_v30  ;;  %v10907_v41 = vld [vmem:[#allocation68_spill] sm:$0xff] }
 0x39e   : > { %v9122_v57 = vadd.f32 %v10900_v9, %v3018_v52  ;;  %v2873_v12 = vadd.f32 %v10902_v13, %v2824_v62  ;;  %v3054_v52 = vsub.f32 0.0, %v9125_v61  ;;  %v3494_v23 = vadd.f32 %v3478_v15, %v3446_v38  ;;  %v10909_v38 = vld [vmem:[#allocation19_spill] sm:$0xff] }
 0x39f   : > { %v2923_v62 = vadd.f32 %v10906_v32, %v2874_v37  ;;  %v3256_v13 = vadd.f32 %v3240_v53, %v3192_v28  ;;  %v3303_v50 = vadd.f32 %v3287_v18, %v3255_v8  ;;  %v3495_v29 = vadd.f32 %v3479_v48, %v3447_v25  ;;  %v10910_v8 = vld [vmem:[#allocation37_spill] sm:$0xff]  ;;  %v10911_v37 = vld [vmem:[#allocation124_spill] sm:$0xff] }
 0x3a0   : > { %v3053_v11 = vsub.f32 0.0, %v9122_v57  ;;  %v2922_v55 = vadd.f32 %v10905_v45, %v2873_v12  ;;  %v3083_v31 = vmul.f32 1.442695, %v3054_v52  ;;  %v3526_v59 = vmul.f32 %v9060_v63, %v10763_v27 }
 0x3a1   : > { %v2972_v22 = vadd.f32 %v10908_v3, %v2923_v62  ;;  %v3335_v30 = vmul.f32 %v9076_v35, %v10761_v40  ;;  %v1327_v15 = vadd.f32 %v1287_v51, %v10909_v38  ;;  %v3543_v28 = vadd.f32 %v9045_v46, %v3495_v29 }
 0x3a2   : > { %v3081_v26 = vmul.f32 1.442695, %v3053_v11  ;;  %v2971_v60 = vadd.f32 %v10907_v41, %v2922_v55  ;;  %v3542_v12 = vadd.f32 %v3526_v59, %v3494_v23  ;;  %v3574_v53 = vmul.f32 %v9076_v35, %v10769_v43  ;;  %v10912_v55 = vld [vmem:[#allocation44_spill] sm:$0xff]  ;;  %v10915_v59 = vld [vmem:[#allocation6_spill] sm:$0xff] }
 0x3a3   : > { %v3021_v18 = vadd.f32 %v10911_v37, %v2972_v22  ;;  %v3304_v11 = vadd.f32 %v9036_v6, %v3256_v13  ;;  %v3351_v3 = vadd.f32 %v3335_v30, %v3303_v50  ;;  %v3591_v48 = vadd.f32 %v9056_v1, %v3543_v28  ;;  %v10914_v50 = vld [vmem:[#allocation5_spill] sm:$0xff]  ;;  %v10917_v37 = vld [vmem:[#allocation79_spill] sm:$0xff] }
 0x3a4   : > { %5376 = vpow2.f32 %v3081_v26  ;;  %v3020_v25 = vadd.f32 %v10910_v8, %v2971_v60  ;;  %v3590_v52 = vadd.f32 %v3574_v53, %v3542_v12  ;;  %v3622_v51 = vmul.f32 %v9087_v17, %v10770_v54  ;;  %v10916_v8 = vld [vmem:[#allocation69_spill] sm:$0xff] }
 0x3a5   : > { %5378 = vpow2.f32 %v3083_v31  ;;  %v9163_v29 = vadd.f32 %v10900_v9, %v3021_v18  ;;  %v3669_v60 = vmul.f32 %v9029_v19, %v10493_v34  ;;  %v1541_v31 = vadd.f32 1.0, %v9074_v20  ;;  %v10913_v20 = vld [vmem:[#allocation48_spill] sm:$0xff] }
 0x3a6   : > { %v9160_v23 = vadd.f32 %v10900_v9, %v3020_v25  ;;  %v3383_v30 = vmul.f32 %v9087_v17, %v10762_v39  ;;  %v3638_v46 = vadd.f32 %v3622_v51, %v3590_v52  ;;  %v3639_v1 = vadd.f32 %v9065_v5, %v3591_v48 }
 0x3a7   : > { %v3670_v22 = vmul.f32 %v9031_v44, %v10493_v34  ;;  %v3056_v45 = vsub.f32 0.0, %v9163_v29  ;;  %v3352_v9 = vadd.f32 %v9039_v4, %v3304_v11  ;;  %v3685_v32 = vadd.f32 %v3669_v60, %v10912_v55  ;;  %v10919_v60 = vld [vmem:[#allocation11_spill] sm:$0xff]  ;;  %v10923_v55 = vld [vmem:[#allocation8_spill] sm:$0xff] }
 0x3a8   : > { %v3055_v6 = vsub.f32 0.0, %v9160_v23  ;;  %v3399_v62 = vadd.f32 %v3383_v30, %v3351_v3  ;;  %v3687_v26 = vadd.f32 %v10914_v50, %v3638_v46  ;;  %v3688_v41 = vadd.f32 %v10915_v59, %v3639_v1  ;;  %v10918_v3 = vld [vmem:[#allocation60_spill] sm:$0xff]  ;;  %v10920_v30 = vld [vmem:[#allocation7_spill] sm:$0xff] }
 0x3a9   : > { %v3686_v13 = vadd.f32 %v3670_v22, %v10913_v20  ;;  %v3087_v12 = vmul.f32 1.442695, %v3056_v45  ;;  %v3717_v28 = vmul.f32 %v9033_v36, %v6635_v16  ;;  %v3718_v4 = vmul.f32 %v9051_v21, %v6635_v16  ;;  %v10921_v22 = vld [vmem:[#allocation70_spill] sm:$0xff]  ;;  %v10926_v59 = vld [vmem:[#allocation131_spill] sm:$0xff] }
 0x3aa   : > { %v5377_v19 = vpop.eup %5376  ;;  %v3085_v38 = vmul.f32 1.442695, %v3055_v6  ;;  %v3735_v25 = vadd.f32 %v10916_v8, %v3687_v26  ;;  %v3736_v18 = vadd.f32 %v10917_v37, %v3688_v41  ;;  %v3765_v52 = vmul.f32 %v9060_v63, %v10918_v3  ;;  %v10922_v63 = vld [vmem:[#allocation204_spill] sm:$0xff]  ;;  %v10925_v26 = vld [vmem:[#allocation130_spill] sm:$0xff] }
 0x3ab   : > { %v5379_v5 = vpop.eup %5378  ;;  %v3101_v44 = vadd.f32 1.0, %v5377_v19  ;;  %v3733_v11 = vadd.f32 %v3717_v28, %v3685_v32  ;;  %v3813_v48 = vmul.f32 %v9076_v35, %v10668_v42  ;;  %v3734_v51 = vadd.f32 %v3718_v4, %v3686_v13  ;;  %v10924_v32 = vld [vmem:[#allocation129_spill] sm:$0xff]  ;;  %v10929_v4 = vld [vmem:[#allocation10_spill] sm:$0xff] }
 0x3ac   : > { %v3102_v53 = vadd.f32 1.0, %v5379_v5  ;;  %5380 = vpow2.f32 %v3085_v38  ;;  %v3783_v36 = vadd.f32 %v10919_v60, %v3735_v25  ;;  %v3784_v46 = vadd.f32 %v10920_v30, %v3736_v18  ;;  %v10927_v38 = vld [vmem:[#allocation203_spill] sm:$0xff] }
 0x3ad   : > { %5382 = vpow2.f32 %v3087_v12  ;;  %v3781_v21 = vadd.f32 %v3765_v52, %v3733_v11  ;;  %v3861_v1 = vmul.f32 %v9087_v17, %v6649_v24  ;;  %v9196_v6 = vadd.f32 %v10921_v22, %v9135_v10  ;;  %v10932_v52 = vld [vmem:[#allocation132_spill] sm:$0xff] }
 0x3ae   : > { %5384 = vrcp.f32 %v3101_v44  ;;  %v3782_v45 = vadd.f32 %v10922_v63, %v3734_v51  ;;  %v3831_v35 = vadd.f32 %v10923_v55, %v3783_v36  ;;  %v3832_v19 = vadd.f32 %v10924_v32, %v3784_v46  ;;  %v10933_v36 = vld [vmem:[#allocation3_spill] sm:$0xff]  ;;  %v10934_v46 = vld [vmem:[#allocation133_spill] sm:$0xff]  ;;  %v10936_v55 = vld [vmem:[#allocation134_spill] sm:$0xff] }
 0x3af   : > { %5386 = vrcp.f32 %v3102_v53  ;;  %v3829_v20 = vadd.f32 %v3813_v48, %v3781_v21  ;;  %v9203_v13 = vadd.f32 %v10921_v22, %v1327_v15  ;;  %v1410_v50 = vsub.f32 0.0, %v9196_v6  ;;  %v10928_v53 = vld [vmem:[#allocation193_spill] sm:$0xff] }
 0x3b0   : > { %5388 = vrcp.f32 %v9112_v56  ;;  %v3830_v17 = vadd.f32 %v9083_v47, %v3782_v45  ;;  %v9208_v10 = vadd.f32 %v10925_v26, %v3831_v35  ;;  %v9211_v41 = vadd.f32 %v10926_v59, %v3832_v19  ;;  %v10931_v47 = vld [vmem:[#allocation167_spill] sm:$0xff]  ;;  %v10939_v59 = vld [vmem:[#allocation138_spill] sm:$0xff] }
 0x3b1   : > { %5390 = vrcp.f32 %v1541_v31  ;;  %v3400_v12 = vadd.f32 %v10927_v38, %v3352_v9  ;;  %v3877_v44 = vadd.f32 %v3861_v1, %v3829_v20  ;;  %v1411_v56 = vsub.f32 0.0, %v9203_v13  ;;  %v10937_v20 = vld [vmem:[#allocation137_spill] sm:$0xff] }
 0x3b2   : > { %v5381_v5 = vpop.eup %5380  ;;  %v1476_v28 = vmul.f32 1.442695, %v1410_v50  ;;  %v9217_v8 = vadd.f32 %v10929_v4, %v10928_v53  ;;  %v9221_v25 = vmul.f32 %v10931_v47, %v10770_v54  ;;  %v3878_v18 = vadd.f32 %v9096_v33, %v3830_v17  ;;  %v10935_v33 = vld [vmem:[#allocation86_spill] sm:$0xff]  ;;  %v10938_v17 = vld [vmem:[#allocation116_spill] sm:$0xff]  ;;  %v10940_v38 = vld [vmem:[#allocation157_spill] sm:$0xff] }
 0x3b3   : > { %v5383_v15 = vpop.eup %5382  ;;  %v3103_v37 = vadd.f32 1.0, %v5381_v5  ;;  %v3926_v9 = vadd.f32 %v10932_v52, %v3877_v44  ;;  %v1478_v48 = vmul.f32 1.442695, %v1411_v56  ;;  %v3448_v30 = vadd.f32 %v10933_v36, %v3399_v62  ;;  %v5175_v62 = vpop.permute.xlu1 %5174  ;;  %v10945_v4 = vld [vmem:[#allocation139_spill] sm:$0xff] }
 0x3b4   : > { %10930 = vst [vmem:[#allocation43_spill] sm:$0xff] %v9217_v8  ;;  %v5385_v31 = vpop.eup %5384  ;;  %v3104_v11 = vadd.f32 1.0, %v5383_v15  ;;  %5392 = vpow2.f32 %v1476_v28  ;;  %v3927_v21 = vadd.f32 %v10934_v46, %v3878_v18  ;;  %v3449_v45 = vadd.f32 %v10935_v33, %v3400_v12  ;;  %v10942_v28 = vld [vmem:[#allocation198_spill] sm:$0xff]  ;;  %v10943_v15 = vld [vmem:[#allocation183_spill] sm:$0xff]  ;;  %v10952_v33 = vld [vmem:[#allocation141_spill] sm:$0xff] }
 0x3b5   : > { %v5387_v51 = vpop.eup %5386  ;;  %5394 = vrcp.f32 %v3103_v37  ;;  %v3133_v60 = vmul.f32 %v5385_v31, %v9122_v57  ;;  %v3974_v35 = vadd.f32 %v10936_v55, %v3926_v9  ;;  %v5177_v56 = vunpack.i.h.bf16 %v5175_v62  ;;  %v10947_v52 = vld [vmem:[#allocation187_spill] sm:$0xff]  ;;  %v11011_v8 = vld [vmem:[#allocation74_spill] sm:$0xff] }
 0x3b6   : > { %v5389_v1 = vpop.eup %5388  ;;  %5396 = vrcp.f32 %v3104_v11  ;;  %v3134_v63 = vmul.f32 %v5387_v51, %v9125_v61  ;;  %v3975_v50 = vadd.f32 %v10937_v20, %v3927_v21  ;;  %v10941_v61 = vld [vmem:[#allocation197_spill] sm:$0xff]  ;;  %v9239_v53 = vmul.f32 %v10943_v15, %v10493_v34  ;;  %v10946_v11 = vld [vmem:[#allocation196_spill] sm:$0xff] }
 0x3b7   : > { %v5391_v32 = vpop.eup %5390  ;;  %v3149_v19 = vpack.c.bf16 %v3133_v60, %v3133_v60  ;;  %v1620_v57 = vmul.f32 %v5389_v1, %v10938_v17  ;;  %5398 = vpow2.f32 %v1478_v48  ;;  %v4022_v5 = vadd.f32 %v10939_v59, %v3974_v35  ;;  %v10948_v48 = vld [vmem:[#allocation156_spill] sm:$0xff]  ;;  %v10951_v1 = vld [vmem:[#allocation87_spill] sm:$0xff]  ;;  %v10955_v59 = vld [vmem:[#allocation22_spill] sm:$0xff] }
 0x3b8   : > { %v3150_v26 = vpack.c.bf16 %v3134_v63, %v3134_v63  ;;  %v1621_v44 = vmul.f32 %v5391_v32, %v10940_v38  ;;  %v3600_v12 = vadd.f32 %v10942_v28, %v10941_v61  ;;  %10944 = vst [vmem:[#allocation64_spill] sm:$0xff] %v9239_v53  ;;  %v4023_v37 = vadd.f32 %v10945_v4, %v3975_v50  ;;  %v10950_v60 = vld [vmem:[#allocation140_spill] sm:$0xff]  ;;  %v10958_v28 = vld [vmem:[#allocation23_spill] sm:$0xff] }
 0x3b9   : > { %4629 = vst.msk [vmem:[%s6299_s8 + $0xb0] sm:$0xf] %vm1755_vm2, %v3149_v19  ;;  %v5176_v18 = vunpack.i.l.bf16 %v5175_v62  ;;  %v3362_v9 = vadd.f32 %v10947_v52, %v10946_v11  ;;  %v9248_v51 = vmul.f32 %v10948_v48, %v6635_v16  ;;  %v4070_v36 = vadd.f32 %v10950_v60, %v4022_v5  ;;  %v10953_v50 = vld [vmem:[#allocation4_spill] sm:$0xff]  ;;  %v10954_v62 = vld [vmem:[#allocation142_spill] sm:$0xff] }
 0x3ba   : > { %v5393_v31 = vpop.eup %5392  ;;  %4630 = vst.msk [vmem:[%s6299_s8 + $0xb4] sm:$0xf] %vm1755_vm2, %v3150_v26  ;;  %v1293_v46 = vmul.f32 %v5177_v56, %v10835_v0  ;;  %v3496_v63 = vadd.f32 %v10951_v1, %v3448_v30  ;;  %v4071_v55 = vadd.f32 %v10952_v33, %v4023_v37  ;;  %v3497_v17 = vadd.f32 %v10953_v50, %v3449_v45  ;;  %v10956_v56 = vld [vmem:[#allocation143_spill] sm:$0xff]  ;;  %v10959_v4 = vld [vmem:[#allocation200_spill] sm:$0xff]  ;;  %v10963_v52 = vld [vmem:[#allocation174_spill] sm:$0xff] }
 0x3bb   : > { %10949 = vst [vmem:[#allocation121_spill] sm:$0xff] %v9248_v51  ;;  %v5395_v21 = vpop.eup %5394  ;;  %v1530_v35 = vadd.f32 1.0, %v5393_v31  ;;  %v1292_v32 = vmul.f32 %v5176_v18, %v10835_v0  ;;  %v4118_v26 = vadd.f32 %v10954_v62, %v4070_v36  ;;  %v10960_v45 = vld [vmem:[#allocation195_spill] sm:$0xff]  ;;  %v10961_v31 = vld [vmem:[#allocation172_spill] sm:$0xff]  ;;  %v10971_v50 = vld [vmem:[#allocation201_spill] sm:$0xff] }
 0x3bc   : > { %1702 = vst.msk [vmem:[#allocation2 + $0x1b2] sm:$0xff] %vm1665_vm1, %v1620_v57  ;;  %v5397_v19 = vpop.eup %5396  ;;  %v3135_v20 = vmul.f32 %v5395_v21, %v9160_v23  ;;  %v1333_v5 = vadd.f32 %v1293_v46, %v10955_v59  ;;  %v4119_v61 = vadd.f32 %v10956_v56, %v4071_v55  ;;  %v10957_v57 = vmov 0.0   ;;  %v10965_v21 = vld [vmem:[#allocation165_spill] sm:$0xff]  ;;  %v10967_v33 = vld [vmem:[#allocation159_spill] sm:$0xff]  ;;  %v10975_v59 = vld [vmem:[#allocation94_spill] sm:$0xff] }
 0x3bd   : > { %1703 = vst.msk [vmem:[#allocation2 + $0x1ba] sm:$0xff] %vm1665_vm1, %v1621_v44  ;;  %v5399_v38 = vpop.eup %5398  ;;  %v3136_v30 = vmul.f32 %v5397_v19, %v9163_v29  ;;  %5400 = vrcp.f32 %v1530_v35  ;;  %v1332_v23 = vadd.f32 %v1292_v32, %v10958_v28  ;;  %v3553_v37 = vadd.f32 %v10960_v45, %v10959_v4  ;;  %v10969_v35 = vld [vmem:[#allocation125_spill] sm:$0xff]  ;;  %v10977_v56 = vld [vmem:[#allocation192_spill] sm:$0xff]  ;;  %v10981_v45 = vld [vmem:[#allocation194_spill] sm:$0xff] }
 0x3be   : > { %1717 = vst.msk [vmem:[#allocation2 + $0x1b0] sm:$0xff] %vm1665_vm1, %v10957_v57  ;;  %v3151_v18 = vpack.c.bf16 %v3135_v20, %v3135_v20  ;;  %v4167_v44 = vadd.f32 %v10961_v31, %v4118_v26  ;;  %v9274_v29 = vadd.f32 %v10921_v22, %v1333_v5  ;;  %v4168_v60 = vadd.f32 %v10963_v52, %v4119_v61  ;;  %v10970_v19 = vld [vmem:[#allocation105_spill] sm:$0xff]  ;;  %v10983_v31 = vld [vmem:[#allocation50_spill] sm:$0xff]  ;;  %v11021_v0 = vld [vmem:[#allocation100_spill] sm:$0xff] }
 0x3bf   : > { %1718 = vst.msk [vmem:[#allocation2 + $0x1b8] sm:$0xff] %vm1665_vm1, %v10957_v57  ;;  %v3152_v11 = vpack.c.bf16 %v3136_v30, %v3136_v30  ;;  %v1531_v36 = vadd.f32 1.0, %v5399_v38  ;;  %v9280_v46 = vadd.f32 %v10921_v22, %v1332_v23  ;;  %v9284_v1 = vmul.f32 %v10965_v21, %v10918_v3  ;;  %v10973_v22 = vld [vmem:[#allocation166_spill] sm:$0xff]  ;;  %v10976_v38 = vld [vmem:[#allocation107_spill] sm:$0xff] }
 0x3c0   : > { %10962 = vst [vmem:[#allocation117_spill] sm:$0xff] %v9274_v29  ;;  %v9288_v55 = vmul.f32 %v10967_v33, %v10668_v42  ;;  %v3544_v32 = vadd.f32 %v10969_v35, %v3496_v63  ;;  %v4215_v20 = vadd.f32 %v10970_v19, %v4167_v44  ;;  %v9295_v62 = vadd.f32 %v10971_v50, %v3600_v12  ;;  %v10980_v12 = vld [vmem:[#allocation89_spill] sm:$0xff]  ;;  %v10986_v19 = vld [vmem:[#allocation175_spill] sm:$0xff] }
 0x3c1   : > { %1719 = vst.msk [vmem:[#allocation2 + $0x1c0] sm:$0xff] %vm1665_vm1, %v10957_v57  ;;  %v9299_v26 = vmul.f32 %v10973_v22, %v10668_v42  ;;  %v3545_v5 = vadd.f32 %v10975_v59, %v3497_v17  ;;  %v4216_v30 = vadd.f32 %v10976_v38, %v4168_v60  ;;  %v9307_v61 = vmul.f32 %v10977_v56, %v6649_v24  ;;  %v10985_v60 = vld [vmem:[#allocation95_spill] sm:$0xff] }
 0x3c2   : > { %10964 = vst [vmem:[#allocation47_spill] sm:$0xff] %v9280_v46  ;;  %v9311_v63 = vmul.f32 %v10931_v47, %v6649_v24  ;;  %v4263_v28 = vadd.f32 %v10980_v12, %v4215_v20  ;;  %v1417_v23 = vsub.f32 0.0, %v9274_v29  ;;  %5402 = vrcp.f32 %v1531_v36  ;;  %v10987_v20 = vld [vmem:[#allocation62_spill] sm:$0xff]  ;;  %v10989_v12 = vld [vmem:[#allocation63_spill] sm:$0xff]  ;;  %v11023_v29 = vld [vmem:[#allocation72_spill] sm:$0xff] }
 0x3c3   : > { %10966 = vst [vmem:[#allocation65_spill] sm:$0xff] %v9284_v1  ;;  %v5401_v4 = vpop.eup %5400  ;;  %v4264_v17 = vadd.f32 %v10983_v31, %v4216_v30  ;;  %v1416_v44 = vsub.f32 0.0, %v9280_v46  ;;  %v3592_v35 = vadd.f32 %v10985_v60, %v3544_v32  ;;  %v9326_v38 = vmul.f32 %v10943_v15, %v10987_v20  ;;  %v10991_v30 = vld [vmem:[#allocation126_spill] sm:$0xff]  ;;  %v9364_v57 = vld [vmem:[%s10066_s4] ss:$0 sm:$0xff] }
 0x3c4   : > { %10968 = vst [vmem:[#allocation122_spill] sm:$0xff] %v9288_v55  ;;  %v4311_v50 = vadd.f32 %v10986_v19, %v4263_v28  ;;  %v1610_v59 = vmul.f32 %v5401_v4, %v9196_v6  ;;  %v3593_v36 = vadd.f32 %v10991_v30, %v3545_v5  ;;  %v9340_v32 = vmul.f32 %v10967_v33, %v10453_v49  ;;  %v10995_v6 = vld [vmem:[#allocation176_spill] sm:$0xff] }
 0x3c5   : > { %4631 = vst.msk [vmem:[%s6299_s8 + $0xb8] sm:$0xf] %vm1755_vm2, %v3151_v18  ;;  %v9316_v18 = vadd.f32 %v10981_v45, %v3362_v9  ;;  %v9330_v9 = vmul.f32 %v10948_v48, %v10989_v12  ;;  %v10992_v45 = vld [vmem:[#allocation53_spill] sm:$0xff]  ;;  %v1490_v4 = vmul.f32 1.442695, %v1417_v23  ;;  %v9350_v5 = vmul.f32 %v10977_v56, %v10454_v58 }
 0x3c6   : > { %10972 = vst [vmem:[#allocation18_spill] sm:$0xff] %v9295_v62  ;;  %v4312_v31 = vadd.f32 %v10992_v45, %v4264_v17  ;;  %v4359_v28 = vadd.f32 %v10995_v6, %v4311_v50  ;;  %v10998_v17 = vld [vmem:[#allocation77_spill] sm:$0xff]  ;;  %v1488_v19 = vmul.f32 1.442695, %v1416_v44  ;;  %v11000_v45 = vld [vmem:[#allocation66_spill] sm:$0xff]  ;;  %v11001_v6 = vld [vmem:[#allocation127_spill] sm:$0xff] }
 0x3c7   : > { %10974 = vst [vmem:[#allocation120_spill] sm:$0xff] %v9299_v26  ;;  %v9358_v50 = vmul.f32 %v10943_v15, %v11000_v45  ;;  %v3640_v23 = vadd.f32 %v11001_v6, %v3592_v35  ;;  %v11004_v15 = vld [vmem:[#allocation91_spill] sm:$0xff]  ;;  %5404 = vpow2.f32 %v1490_v4  ;;  %v11007_v6 = vld [vmem:[#allocation202_spill] sm:$0xff]  ;;  %v11022_v26 = vld [vmem:[#allocation85_spill] sm:$0xff] }
 0x3c8   : > { %4632 = vst.msk [vmem:[%s6299_s8 + $0xbc] sm:$0xf] %vm1755_vm2, %v3152_v11  ;;  %v10984_v11 = vld [vmem:[#allocation199_spill] sm:$0xff]  ;;  %v4360_v60 = vadd.f32 %v10998_v17, %v4312_v31  ;;  %v9383_v17 = vmul.f32 %v10967_v33, %v10367_v7  ;;  %5406 = vpow2.f32 %v1488_v19  ;;  %v11013_v19 = vld [vmem:[#allocation32_spill] sm:$0xff] }
 0x3c9   : > { %10978 = vst [vmem:[#allocation123_spill] sm:$0xff] %v9307_v61  ;;  %v3601_v52 = vadd.f32 %v10984_v11, %v3553_v37  ;;  %v9336_v37 = vmul.f32 %v10965_v21, %v6656_v2  ;;  %v9346_v11 = vmul.f32 %v10973_v22, %v10453_v49  ;;  %v11003_v31 = vld [vmem:[#allocation67_spill] sm:$0xff] }
 0x3ca   : > { %10979 = vst [vmem:[#allocation68_spill] sm:$0xff] %v9311_v63  ;;  %v9371_v44 = vmul.f32 %v10948_v48, %v11003_v31  ;;  %v9379_v35 = vadd.f32 %v9364_v57, %v4360_v60 }
 0x3cb   : > { %10982 = vst [vmem:[#allocation80_spill] sm:$0xff] %v9316_v18  ;;  %v9354_v30 = vadd.f32 %v9221_v25, %v3601_v52  ;;  %v9375_v25 = vmul.f32 %v10965_v21, %v10461_v14  ;;  %v3641_v52 = vadd.f32 %v11004_v15, %v3593_v36  ;;  %v9392_v21 = vmul.f32 %v11007_v6, %v10977_v56 }
 0x3cc   : > { %10988 = vst [vmem:[#allocation19_spill] sm:$0xff] %v9326_v38  ;;  %v9396_v36 = vmul.f32 %v11007_v6, %v10931_v47  ;;  %v4392_v60 = vsub.f32 0.0, %v9379_v35 }
 0x3cd   : > { %10990 = vst [vmem:[#allocation37_spill] sm:$0xff] %v9330_v9  ;;  %v3690_v47 = vadd.f32 %v11011_v8, %v3641_v52  ;;  %v11017_v52 = vld [vmem:[#allocation39_spill] sm:$0xff] }
 0x3ce   : > { %10993 = vst [vmem:[#allocation124_spill] sm:$0xff] %v9336_v37  ;;  %v4409_v62 = vmul.f32 1.442695, %v4392_v60  ;;  %v11012_v37 = vld [vmem:[#allocation169_spill] sm:$0xff]  ;;  %v11016_v60 = vld [vmem:[#allocation28_spill] sm:$0xff] }
 0x3cf   : > { %10994 = vst [vmem:[#allocation44_spill] sm:$0xff] %v9340_v32  ;;  %v11010_v32 = vld [vmem:[#allocation51_spill] sm:$0xff]  ;;  %v3928_v63 = vadd.f32 %v11012_v37, %v9208_v10  ;;  %v11018_v37 = vld [vmem:[#allocation40_spill] sm:$0xff]  ;;  %v3738_v38 = vadd.f32 %v11023_v29, %v3690_v47 }
 0x3d0   : > { %1692 = vst.msk [vmem:[#allocation2 + $0x13a] sm:$0xff] %vm1665_vm1, %v1610_v59 }
 0x3d1   : > { %10996 = vst [vmem:[#allocation48_spill] sm:$0xff] %v9346_v11  ;;  %v9367_v11 = vadd.f32 %v9364_v57, %v4359_v28  ;;  %v9387_v28 = vmul.f32 %v10973_v22, %v10367_v7  ;;  %v1745_v22 = vpack.c.bf16 %v1610_v59, %v1610_v59  ;;  %v11014_v59 = vld [vmem:[#allocation26_spill] sm:$0xff] }
 0x3d2   : > { %10997 = vst [vmem:[#allocation5_spill] sm:$0xff] %v9350_v5  ;;  %v5403_v5 = vpop.eup %5402 }
 0x3d3   : > { %10999 = vst [vmem:[#allocation6_spill] sm:$0xff] %v9354_v30  ;;  %v4391_v48 = vsub.f32 0.0, %v9367_v11  ;;  %v1611_v15 = vmul.f32 %v5403_v5, %v9203_v13  ;;  %v3689_v30 = vadd.f32 %v11010_v32, %v3640_v23  ;;  %v11015_v5 = vld [vmem:[#allocation27_spill] sm:$0xff] }
 0x3d4   : > { %11002 = vst [vmem:[#allocation69_spill] sm:$0xff] %v9364_v57  ;;  %v11025_v57 = vld [vmem:[#allocation93_spill] sm:$0xff] }
 0x3d5   : > { %11005 = vst [vmem:[#allocation79_spill] sm:$0xff] %v9383_v17  ;;  %v4407_v33 = vmul.f32 1.442695, %v4391_v48  ;;  %v3929_v48 = vadd.f32 %v11013_v19, %v9211_v41  ;;  %v1746_v13 = vpack.c.bf16 %v1611_v15, %v1611_v15  ;;  %v3737_v55 = vadd.f32 %v11022_v26, %v3689_v30  ;;  %v11027_v30 = vld [vmem:[#allocation152_spill] sm:$0xff] }
 0x3d6   : > { %11006 = vst [vmem:[#allocation11_spill] sm:$0xff] %v9387_v28  ;;  %v9448_v29 = vadd.f32 %v11027_v30, %v3928_v63  ;;  %v11031_v28 = vld [vmem:[#allocation78_spill] sm:$0xff] }
 0x3d7   : > { %11008 = vst [vmem:[#allocation7_spill] sm:$0xff] %v9392_v21  ;;  %v3181_v4 = vld [vmem:[#allocation2 + $0x138] sm:$0xff]  ;;  %5408 = vpow2.f32 %v4407_v33  ;;  %v9421_v33 = vpop.eup %5404 }
 0x3d8   : > { %11009 = vst [vmem:[#allocation70_spill] sm:$0xff] %v9396_v36  ;;  %v9401_v18 = vld [vmem:[#allocation2 + $0x139] sm:$0xff]  ;;  %v3197_v32 = vmul.f32 %v3181_v4, %v11014_v59  ;;  %5410 = vpow2.f32 %v4409_v62  ;;  %v3436_v10 = vmul.f32 %v3181_v4, %v11017_v52  ;;  %v3675_v62 = vmul.f32 %v3181_v4, %v10493_v34  ;;  %v9430_v61 = vpop.eup %5406 }
 0x3d9   : > { %v9403_v56 = vld [vmem:[#allocation2 + $0x13a] sm:$0xff]  ;;  %1693 = vst.msk [vmem:[#allocation2 + $0x142] sm:$0xff] %vm1665_vm1, %v1611_v15  ;;  %v3245_v23 = vmul.f32 %v9401_v18, %v11015_v5  ;;  %v3484_v41 = vmul.f32 %v9401_v18, %v11018_v37  ;;  %v9439_v46 = vmul.f32 %v3181_v4, %v10987_v20  ;;  %v9443_v51 = vmul.f32 %v9401_v18, %v10989_v12 }
 0x3da   : > { %1778 = vst.msk [vmem:[%s6299_s8 + $0x58] sm:$0xf] %vm1755_vm2, %v1745_v22  ;;  %v3293_v8 = vmul.f32 %v9403_v56, %v11016_v60  ;;  %v3532_v19 = vmul.f32 %v9403_v56, %v10763_v27  ;;  %v3723_v22 = vmul.f32 %v9401_v18, %v6635_v16  ;;  %v3452_v9 = vadd.f32 %v3436_v10, %v11021_v0  ;;  %v11026_v10 = vld [vmem:[#allocation92_spill] sm:$0xff] }
 0x3db   : > { %11019 = vst [vmem:[#allocation204_spill] sm:$0xff] %v9421_v33  ;;  %v3261_v15 = vadd.f32 %v3245_v23, %v3197_v32  ;;  %v11024_v23 = vld [vmem:[#allocation31_spill] sm:$0xff]  ;;  %v3785_v0 = vadd.f32 %v11025_v57, %v3737_v55  ;;  %v3786_v26 = vadd.f32 %v11026_v10, %v3738_v38 }
 0x3dc   : > { %1779 = vst.msk [vmem:[%s6299_s8 + $0x5c] sm:$0xf] %vm1755_vm2, %v1746_v13  ;;  %v3771_v13 = vmul.f32 %v9403_v56, %v10918_v3  ;;  %v3691_v1 = vadd.f32 %v3675_v62, %v11024_v23  ;;  %v3500_v53 = vadd.f32 %v3484_v41, %v3452_v9  ;;  %v9455_v62 = vmul.f32 %v9403_v56, %v6656_v2 }
 0x3dd   : > { %11020 = vst [vmem:[#allocation8_spill] sm:$0xff] %v9430_v61  ;;  %v3309_v32 = vadd.f32 %v3293_v8, %v3261_v15  ;;  %v5409_v47 = vpop.eup %5408  ;;  %v11028_v8 = vld [vmem:[#allocation101_spill] sm:$0xff]  ;;  %v9458_v23 = vmul.f32 %v3181_v4, %v11000_v45 }
 0x3de   : > { %v3739_v36 = vadd.f32 %v3723_v22, %v3691_v1  ;;  %v9451_v15 = vadd.f32 %v11028_v8, %v3929_v48  ;;  %v5411_v9 = vpop.eup %5410  ;;  %v4439_v41 = vadd.f32 1.0, %v5409_v47  ;;  %v3548_v38 = vadd.f32 %v3532_v19, %v3500_v53  ;;  %v11029_v1 = vld [vmem:[#allocation75_spill] sm:$0xff]  ;;  %v11030_v48 = vld [vmem:[#allocation98_spill] sm:$0xff] }
 0x3df   : > { %v9467_v22 = vadd.f32 %v11029_v1, %v3785_v0  ;;  %v9470_v10 = vadd.f32 %v11030_v48, %v3786_v26  ;;  %v4440_v30 = vadd.f32 1.0, %v5411_v9 }
 0x3e0   : > { %v9460_v57 = vld [vmem:[#allocation2 + $0x140] sm:$0xff]  ;;  %5412 = vrcp.f32 %v4439_v41 }
 0x3e1   : > { %v9462_v55 = vld [vmem:[#allocation2 + $0x141] sm:$0xff]  ;;  %v3198_v4 = vmul.f32 %v9460_v57, %v11014_v59  ;;  %5414 = vrcp.f32 %v4440_v30  ;;  %v3437_v9 = vmul.f32 %v9460_v57, %v11017_v52 }
 0x3e2   : > { %v9464_v63 = vld [vmem:[#allocation2 + $0x142] sm:$0xff]  ;;  %v3246_v47 = vmul.f32 %v9462_v55, %v11015_v5  ;;  %v3485_v1 = vmul.f32 %v9462_v55, %v11018_v37 }
 0x3e3   : > { %v3294_v8 = vmul.f32 %v9464_v63, %v11016_v60  ;;  %v9478_v21 = vld [vmem:[#allocation2 + $0x13b] sm:$0xff]  ;;  %v9480_v33 = vld [vmem:[#allocation2 + $0x143] sm:$0xff]  ;;  %v3453_v30 = vadd.f32 %v3437_v9, %v11031_v28  ;;  %v3772_v28 = vmul.f32 %v9464_v63, %v10918_v3  ;;  %v11032_v9 = vld [vmem:[#allocation177_spill] sm:$0xff] }
 0x3e4   : > { %v9482_v53 = vld [vmem:[#allocation2 + $0x13c] sm:$0xff]  ;;  %v3341_v19 = vmul.f32 %v9478_v21, %v10761_v40  ;;  %v3342_v0 = vmul.f32 %v9480_v33, %v10761_v40  ;;  %v9488_v59 = vld [vmem:[#allocation2 + $0x144] sm:$0xff]  ;;  %v3262_v60 = vadd.f32 %v3246_v47, %v3198_v4  ;;  %v3533_v40 = vmul.f32 %v9464_v63, %v10763_v27 }
 0x3e5   : > { %v3389_v5 = vmul.f32 %v9482_v53, %v10762_v39  ;;  %v3390_v26 = vmul.f32 %v9488_v59, %v10762_v39  ;;  %v3580_v48 = vmul.f32 %v9478_v21, %v10769_v43  ;;  %v3581_v4 = vmul.f32 %v9480_v33, %v10769_v43 }
 0x3e6   : > { %v3357_v41 = vadd.f32 %v3341_v19, %v3309_v32  ;;  %v3310_v61 = vadd.f32 %v3294_v8, %v3262_v60  ;;  %v3628_v39 = vmul.f32 %v9482_v53, %v10770_v54  ;;  %v3629_v19 = vmul.f32 %v9488_v59, %v10770_v54  ;;  %v5413_v60 = vpop.eup %5412 }
 0x3e7   : > { %v3596_v32 = vadd.f32 %v3580_v48, %v3548_v38  ;;  %v3676_v27 = vmul.f32 %v9460_v57, %v10493_v34  ;;  %v3501_v52 = vadd.f32 %v3485_v1, %v3453_v30  ;;  %v3724_v8 = vmul.f32 %v9462_v55, %v6635_v16  ;;  %v5415_v48 = vpop.eup %5414  ;;  %v11034_v30 = vld [vmem:[#allocation179_spill] sm:$0xff]  ;;  %v11035_v16 = vld [vmem:[#allocation110_spill] sm:$0xff] }
 0x3e8   : > { %v3405_v47 = vadd.f32 %v3389_v5, %v3357_v41  ;;  %v3358_v37 = vadd.f32 %v3342_v0, %v3310_v61  ;;  %v11033_v5 = vld [vmem:[#allocation102_spill] sm:$0xff]  ;;  %v3787_v41 = vadd.f32 %v3771_v13, %v3739_v36  ;;  %v4471_v54 = vmul.f32 %v5413_v60, %v9367_v11 }
 0x3e9   : > { %v3644_v17 = vadd.f32 %v3628_v39, %v3596_v32  ;;  %v3692_v38 = vadd.f32 %v3676_v27, %v11033_v5  ;;  %v3549_v61 = vadd.f32 %v3533_v40, %v3501_v52  ;;  %v3819_v0 = vmul.f32 %v9478_v21, %v10668_v42  ;;  %v11036_v27 = vld [vmem:[#allocation178_spill] sm:$0xff]  ;;  %v11037_v52 = vld [vmem:[#allocation181_spill] sm:$0xff] }
 0x3ea   : > { %v3454_v43 = vadd.f32 %v11032_v9, %v3405_v47  ;;  %v3406_v34 = vadd.f32 %v3390_v26, %v3358_v37  ;;  %v4472_v1 = vmul.f32 %v5415_v48, %v9379_v35  ;;  %v4487_v32 = vpack.c.bf16 %v4471_v54, %v4471_v54  ;;  %v11038_v40 = vld [vmem:[#allocation34_spill] sm:$0xff] }
 0x3eb   : > { %v3693_v47 = vadd.f32 %v11035_v16, %v3644_v17  ;;  %v3740_v39 = vadd.f32 %v3724_v8, %v3692_v38  ;;  %v3597_v13 = vadd.f32 %v3581_v4, %v3549_v61  ;;  %v3820_v11 = vmul.f32 %v9480_v33, %v10668_v42  ;;  %v11041_v4 = vld [vmem:[#allocation36_spill] sm:$0xff]  ;;  %v11043_v61 = vld [vmem:[#allocation111_spill] sm:$0xff] }
 0x3ec   : > { %v3502_v3 = vadd.f32 %v11034_v30, %v3454_v43  ;;  %v3455_v36 = vadd.f32 %v11036_v27, %v3406_v34  ;;  %v4488_v37 = vpack.c.bf16 %v4472_v1, %v4472_v1  ;;  %4633 = vst.msk [vmem:[%s6299_s8 + $0xc0] sm:$0xf] %vm1755_vm2, %v4487_v32  ;;  %v11039_v43 = vld [vmem:[#allocation180_spill] sm:$0xff]  ;;  %v3835_v16 = vadd.f32 %v3819_v0, %v3787_v41  ;;  %v11045_v0 = vld [vmem:[#allocation90_spill] sm:$0xff]  ;;  %v11047_v32 = vld [vmem:[#allocation113_spill] sm:$0xff] }
 0x3ed   : > { %v3741_v60 = vadd.f32 %v11038_v40, %v3693_v47  ;;  %v3788_v9 = vadd.f32 %v3772_v28, %v3740_v39  ;;  %v3645_v5 = vadd.f32 %v3629_v19, %v3597_v13  ;;  %v3867_v54 = vmul.f32 %v9482_v53, %v6649_v24  ;;  %v11040_v34 = vld [vmem:[#allocation184_spill] sm:$0xff]  ;;  %v11042_v28 = vld [vmem:[#allocation182_spill] sm:$0xff]  ;;  %v11044_v19 = vld [vmem:[#allocation151_spill] sm:$0xff] }
 0x3ee   : > { %v3550_v26 = vadd.f32 %v11037_v52, %v3502_v3  ;;  %v3503_v35 = vadd.f32 %v11039_v43, %v3455_v36  ;;  %4634 = vst.msk [vmem:[%s6299_s8 + $0xc4] sm:$0xf] %vm1755_vm2, %v4488_v37  ;;  %v3868_v3 = vmul.f32 %v9488_v59, %v6649_v24  ;;  %v3881_v41 = vadd.f32 %v11044_v19, %v9467_v22  ;;  %v11046_v47 = vld [vmem:[#allocation186_spill] sm:$0xff]  ;;  %v11049_v52 = vld [vmem:[#allocation109_spill] sm:$0xff] }
 0x3ef   : > { %v3789_v8 = vadd.f32 %v11041_v4, %v3741_v60  ;;  %v3836_v38 = vadd.f32 %v3820_v11, %v3788_v9  ;;  %v3694_v1 = vadd.f32 %v11043_v61, %v3645_v5  ;;  %v3882_v30 = vadd.f32 %v11045_v0, %v9470_v10  ;;  %v11048_v11 = vld [vmem:[#allocation185_spill] sm:$0xff]  ;;  %v11051_v10 = vld [vmem:[#allocation118_spill] sm:$0xff] }
 0x3f0   : > { %v3598_v17 = vadd.f32 %v11040_v34, %v3550_v26  ;;  %v3551_v48 = vadd.f32 %v11042_v28, %v3503_v35  ;;  %v3883_v36 = vadd.f32 %v3867_v54, %v3835_v16  ;;  %v3915_v40 = vmul.f32 %v9460_v57, %v10987_v20  ;;  %v11050_v22 = vld [vmem:[#allocation17_spill] sm:$0xff]  ;;  %v11052_v35 = vld [vmem:[#allocation119_spill] sm:$0xff]  ;;  %v11056_v28 = vld [vmem:[#allocation54_spill] sm:$0xff] }
 0x3f1   : > { %v3837_v27 = vadd.f32 %v11047_v32, %v3789_v8  ;;  %v3884_v13 = vadd.f32 %v3868_v3, %v3836_v38  ;;  %v3742_v26 = vadd.f32 %v11049_v52, %v3694_v1  ;;  %v3930_v60 = vadd.f32 %v9439_v46, %v3881_v41  ;;  %v11053_v54 = vld [vmem:[#allocation33_spill] sm:$0xff]  ;;  %v11055_v3 = vld [vmem:[#allocation16_spill] sm:$0xff]  ;;  %v11058_v41 = vld [vmem:[#allocation114_spill] sm:$0xff] }
 0x3f2   : > { %v9546_v39 = vadd.f32 %v11046_v47, %v3598_v17  ;;  %v3599_v37 = vadd.f32 %v11048_v11, %v3551_v48  ;;  %v3932_v43 = vadd.f32 %v11051_v10, %v3883_v36  ;;  %v3963_v16 = vmul.f32 %v9462_v55, %v10989_v12  ;;  %v11054_v17 = vld [vmem:[#allocation112_spill] sm:$0xff]  ;;  %v11057_v1 = vld [vmem:[#allocation9_spill] sm:$0xff]  ;;  %v11059_v32 = vld [vmem:[#allocation99_spill] sm:$0xff] }
 0x3f3   : > { %v9555_v9 = vadd.f32 %v11050_v22, %v3837_v27  ;;  %v3933_v5 = vadd.f32 %v11052_v35, %v3884_v13  ;;  %v3790_v4 = vadd.f32 %v11054_v17, %v3742_v26  ;;  %v3931_v8 = vadd.f32 %v3915_v40, %v3882_v30  ;;  %v11060_v36 = vld [vmem:[#allocation55_spill] sm:$0xff]  ;;  %v11061_v13 = vld [vmem:[#allocation56_spill] sm:$0xff] }
 0x3f4   : > { %v9562_v34 = vadd.f32 %v11053_v54, %v3599_v37  ;;  %v3978_v38 = vadd.f32 %v9443_v51, %v3930_v60  ;;  %v3980_v46 = vadd.f32 %v11055_v3, %v3932_v43  ;;  %v4011_v61 = vmul.f32 %v9464_v63, %v6656_v2  ;;  %v11062_v26 = vld [vmem:[#allocation115_spill] sm:$0xff]  ;;  %v11064_v10 = vld [vmem:[#allocation52_spill] sm:$0xff] }
 0x3f5   : > { %v3981_v48 = vadd.f32 %v11056_v28, %v3933_v5  ;;  %v4024_v19 = vadd.f32 %v11057_v1, %v9448_v29  ;;  %v3838_v0 = vadd.f32 %v11058_v41, %v3790_v4  ;;  %v3979_v47 = vadd.f32 %v3963_v16, %v3931_v8  ;;  %v11063_v60 = vld [vmem:[#allocation103_spill] sm:$0xff]  ;;  %v11066_v5 = vld [vmem:[#allocation81_spill] sm:$0xff]  ;;  %v11067_v8 = vld [vmem:[#allocation104_spill] sm:$0xff] }
 0x3f6   : > { %v4025_v27 = vadd.f32 %v11059_v32, %v9451_v15  ;;  %v4026_v30 = vadd.f32 %v9455_v62, %v3978_v38  ;;  %v4028_v51 = vadd.f32 %v11060_v36, %v3980_v46  ;;  %v4058_v37 = vmul.f32 %v9478_v21, %v10453_v49  ;;  %v11065_v62 = vld [vmem:[#allocation57_spill] sm:$0xff]  ;;  %v11068_v3 = vld [vmem:[#allocation76_spill] sm:$0xff] }
 0x3f7   : > { %v4029_v11 = vadd.f32 %v11061_v13, %v3981_v48  ;;  %v4059_v52 = vmul.f32 %v9480_v33, %v10453_v49  ;;  %v9583_v29 = vadd.f32 %v11062_v26, %v3838_v0  ;;  %v4027_v40 = vadd.f32 %v4011_v61, %v3979_v47  ;;  %v11069_v48 = vld [vmem:[#allocation82_spill] sm:$0xff]  ;;  %v11070_v1 = vld [vmem:[#allocation45_spill] sm:$0xff]  ;;  %v11072_v13 = vld [vmem:[#allocation163_spill] sm:$0xff] }
 0x3f8   : > { %v4072_v22 = vadd.f32 %v11063_v60, %v4024_v19  ;;  %v4073_v15 = vadd.f32 %v11064_v10, %v4025_v27  ;;  %v4074_v43 = vadd.f32 %v4058_v37, %v4026_v30  ;;  %v4076_v35 = vadd.f32 %v11065_v62, %v4028_v51  ;;  %v11071_v36 = vld [vmem:[#allocation61_spill] sm:$0xff]  ;;  %v11074_v60 = vld [vmem:[#allocation88_spill] sm:$0xff] }
 0x3f9   : > { %v4077_v16 = vadd.f32 %v11066_v5, %v4029_v11  ;;  %v4106_v54 = vmul.f32 %v9482_v53, %v10454_v58  ;;  %v4075_v17 = vadd.f32 %v4059_v52, %v4027_v40  ;;  %v4107_v4 = vmul.f32 %v9488_v59, %v10454_v58  ;;  %v11073_v52 = vld [vmem:[#allocation49_spill] sm:$0xff] }
 0x3fa   : > { %v4120_v38 = vadd.f32 %v11067_v8, %v4072_v22  ;;  %v4121_v46 = vadd.f32 %v11068_v3, %v4073_v15  ;;  %v4124_v61 = vadd.f32 %v11069_v48, %v4076_v35  ;;  %v4154_v41 = vmul.f32 %v9460_v57, %v11000_v45  ;;  %v11079_v8 = vld [vmem:[#allocation96_spill] sm:$0xff] }
 0x3fb   : > { %v4122_v28 = vadd.f32 %v4106_v54, %v4074_v43  ;;  %v4125_v19 = vadd.f32 %v11070_v1, %v4077_v16  ;;  %v4123_v0 = vadd.f32 %v4107_v4, %v4075_v17  ;;  %v4201_v32 = vmul.f32 %v9401_v18, %v11003_v31  ;;  %v11076_v43 = vld [vmem:[#allocation38_spill] sm:$0xff]  ;;  %v11077_v16 = vld [vmem:[#allocation84_spill] sm:$0xff]  ;;  %v11082_v1 = vld [vmem:[#allocation11_spill] sm:$0xff] }
 0x3fc   : > { %v4169_v47 = vadd.f32 %v9458_v23, %v4120_v38  ;;  %v4202_v27 = vmul.f32 %v9462_v55, %v11003_v31  ;;  %v4170_v30 = vadd.f32 %v4154_v41, %v4121_v46  ;;  %v4173_v11 = vadd.f32 %v11072_v13, %v4124_v61  ;;  %v11075_v55 = vld [vmem:[#allocation150_spill] sm:$0xff]  ;;  %v11083_v41 = vld [vmem:[#allocation71_spill] sm:$0xff] }
 0x3fd   : > { %v4171_v51 = vadd.f32 %v11071_v36, %v4122_v28  ;;  %v4174_v37 = vadd.f32 %v9358_v50, %v4125_v19  ;;  %v4172_v26 = vadd.f32 %v11073_v52, %v4123_v0  ;;  %v4249_v57 = vmul.f32 %v9403_v56, %v10461_v14  ;;  %v11080_v28 = vld [vmem:[#allocation97_spill] sm:$0xff]  ;;  %v11087_v13 = vld [vmem:[#allocation7_spill] sm:$0xff] }
 0x3fe   : > { %v4217_v40 = vadd.f32 %v4201_v32, %v4169_v47  ;;  %v4250_v23 = vmul.f32 %v9464_v63, %v10461_v14  ;;  %v4218_v18 = vadd.f32 %v4202_v27, %v4170_v30  ;;  %v4221_v10 = vadd.f32 %v11075_v55, %v4173_v11  ;;  %v11078_v63 = vld [vmem:[#allocation168_spill] sm:$0xff] }
 0x3ff   : > { %v4219_v22 = vadd.f32 %v11074_v60, %v4171_v51  ;;  %v4222_v15 = vadd.f32 %v9371_v44, %v4174_v37  ;;  %v4220_v62 = vadd.f32 %v11076_v43, %v4172_v26  ;;  %v4297_v50 = vmul.f32 %v9478_v21, %v10367_v7  ;;  %v11085_v27 = vld [vmem:[#allocation204_spill] sm:$0xff]  ;;  %v11086_v51 = vld [vmem:[#allocation73_spill] sm:$0xff]  ;;  %v11089_v37 = vld [vmem:[#allocation83_spill] sm:$0xff] }
 0x400   : > { %v4265_v35 = vadd.f32 %v4249_v57, %v4217_v40  ;;  %v4298_v5 = vmul.f32 %v9480_v33, %v10367_v7  ;;  %v4266_v56 = vadd.f32 %v4250_v23, %v4218_v18  ;;  %v4269_v17 = vadd.f32 %v11078_v63, %v4221_v10  ;;  %v11081_v33 = vld [vmem:[#allocation79_spill] sm:$0xff]  ;;  %v11090_v26 = vld [vmem:[#allocation69_spill] sm:$0xff]  ;;  %v11091_v57 = vld [vmem:[#allocation20_spill] sm:$0xff] }
 0x401   : > { %v4267_v54 = vadd.f32 %v11077_v16, %v4219_v22  ;;  %v4270_v4 = vadd.f32 %v9375_v25, %v4222_v15  ;;  %v4268_v38 = vadd.f32 %v11079_v8, %v4220_v62  ;;  %v4345_v44 = vmul.f32 %v11007_v6, %v9482_v53  ;;  %v11084_v25 = vld [vmem:[#allocation8_spill] sm:$0xff]  ;;  %v11094_v63 = vld [vmem:[#allocation191_spill] sm:$0xff] }
 0x402   : > { %v4313_v3 = vadd.f32 %v4297_v50, %v4265_v35  ;;  %v4346_v46 = vmul.f32 %v11007_v6, %v9488_v59  ;;  %v4314_v21 = vadd.f32 %v4298_v5, %v4266_v56  ;;  %v4317_v61 = vadd.f32 %v11081_v33, %v4269_v17  ;;  %v11088_v6 = vld [vmem:[#allocation70_spill] sm:$0xff]  ;;  %v9665_v56 = vld [vmem:[#allocation2 + $0x1b0] sm:$0xff] }
 0x403   : > { %v4315_v48 = vadd.f32 %v11080_v28, %v4267_v54  ;;  %v4318_v19 = vadd.f32 %v11082_v1, %v4270_v4  ;;  %v4316_v0 = vadd.f32 %v11083_v41, %v4268_v38  ;;  %v1536_v32 = vadd.f32 1.0, %v11084_v25  ;;  %11093 = vst [vmem:[#allocation129_spill] sm:$0xff] %v9665_v56  ;;  %v11095_v4 = vld [vmem:[#allocation121_spill] sm:$0xff]  ;;  %v11097_v1 = vld [vmem:[#allocation158_spill] sm:$0xff] }
 0x404   : > { %v4361_v47 = vadd.f32 %v4345_v44, %v4313_v3  ;;  %v1537_v30 = vadd.f32 1.0, %v11085_v27  ;;  %v4362_v36 = vadd.f32 %v4346_v46, %v4314_v21  ;;  %v4365_v11 = vadd.f32 %v11087_v13, %v4317_v61  ;;  %v5524_v38 = vld [vmem:[#allocation2 + $0x174] sm:$0xff]  ;;  %v9673_v21 = vpop.permute.xlu1 %5189  ;;  %v11103_v13 = vld [vmem:[#allocation19_spill] sm:$0xff] }
 0x405   : > { %v4363_v53 = vadd.f32 %v11086_v51, %v4315_v48  ;;  %v4366_v59 = vadd.f32 %v11088_v6, %v4318_v19  ;;  %v4364_v52 = vadd.f32 %v11089_v37, %v4316_v0  ;;  %5416 = vrcp.f32 %v1536_v32  ;;  %v9675_v48 = vld [vmem:[#allocation2 + $0x1b8] sm:$0xff]  ;;  %v11099_v0 = vld [vmem:[#allocation47_spill] sm:$0xff]  ;;  %v11100_v25 = vld [vmem:[#allocation65_spill] sm:$0xff] }
 0x406   : > { %v9639_v40 = vadd.f32 %v11090_v26, %v4361_v47  ;;  %v3695_v23 = vadd.f32 %v11091_v57, %v9546_v39  ;;  %v9644_v18 = vadd.f32 %v11090_v26, %v4362_v36  ;;  %v9650_v22 = vadd.f32 %v11090_v26, %v4365_v11  ;;  %v11092_v39 = vld [vmem:[#allocation64_spill] sm:$0xff]  ;;  %11096 = vst [vmem:[#allocation130_spill] sm:$0xff] %v9675_v48  ;;  %v9678_v41 = vld [vmem:[#allocation2 + $0x1b1] sm:$0xff]  ;;  %v9684_v51 = vld [vmem:[#allocation2 + $0x1b9] sm:$0xff] }
 0x407   : > { %v9647_v60 = vadd.f32 %v11090_v26, %v4363_v53  ;;  %v9653_v55 = vadd.f32 %v11090_v26, %v4366_v59  ;;  %v9656_v10 = vadd.f32 %v11090_v26, %v4364_v52  ;;  %5418 = vrcp.f32 %v1537_v30  ;;  %11098 = vst [vmem:[#allocation131_spill] sm:$0xff] %v9678_v41  ;;  %v11101_v27 = vld [vmem:[#allocation149_spill] sm:$0xff]  ;;  %v9695_v37 = vld [vmem:[#allocation2 + $0x1ba] sm:$0xff] }
 0x408   : > { %v4393_v15 = vsub.f32 0.0, %v9639_v40  ;;  %v3696_v43 = vadd.f32 %v11092_v39, %v9562_v34  ;;  %v4394_v62 = vsub.f32 0.0, %v9644_v18  ;;  %v4397_v50 = vsub.f32 0.0, %v9650_v22  ;;  %11102 = vst [vmem:[#allocation203_spill] sm:$0xff] %v9684_v51  ;;  %v9693_v59 = vld [vmem:[#allocation2 + $0x1b2] sm:$0xff] }
 0x409   : > { %v4395_v35 = vsub.f32 0.0, %v9647_v60  ;;  %v4398_v5 = vsub.f32 0.0, %v9653_v55  ;;  %v4396_v16 = vsub.f32 0.0, %v9656_v10  ;;  %v3743_v17 = vadd.f32 %v11094_v63, %v3695_v23  ;;  %11104 = vst [vmem:[#allocation193_spill] sm:$0xff] %v9693_v59  ;;  %v11106_v52 = vld [vmem:[#allocation117_spill] sm:$0xff] }
 0x40a   : > { %v4411_v54 = vmul.f32 1.442695, %v4393_v15  ;;  %v3744_v8 = vadd.f32 %v11095_v4, %v3696_v43  ;;  %v9671_v34 = vmul.f32 %v5524_v38, %v10454_v58  ;;  %v4413_v3 = vmul.f32 1.442695, %v4394_v62  ;;  %11105 = vst [vmem:[#allocation10_spill] sm:$0xff] %v9695_v37  ;;  %v9703_v15 = vld [vmem:[#allocation2 + $0x1b3] sm:$0xff] }
 0x40b   : > { %v4415_v44 = vmul.f32 1.442695, %v4395_v35  ;;  %v4419_v46 = vmul.f32 1.442695, %v4397_v50  ;;  %v5417_v28 = vpop.eup %5416  ;;  %v4417_v33 = vmul.f32 1.442695, %v4396_v16  ;;  %v3791_v19 = vadd.f32 %v11097_v1, %v3743_v17 }
 0x40c   : > { %5420 = vpow2.f32 %v4411_v54  ;;  %v4421_v61 = vmul.f32 1.442695, %v4398_v5  ;;  %v1616_v47 = vmul.f32 %v5417_v28, %v11099_v0  ;;  %v3792_v32 = vadd.f32 %v11100_v25, %v3744_v8  ;;  %11107 = vst [vmem:[#allocation167_spill] sm:$0xff] %v9703_v15  ;;  %v9707_v39 = vld [vmem:[#allocation2 + $0x1b4] sm:$0xff]  ;;  %v11112_v50 = vld [vmem:[#allocation120_spill] sm:$0xff]  ;;  %v9715_v16 = vld [vmem:[#allocation2 + $0x1bc] sm:$0xff] }
 0x40d   : > { %5422 = vpow2.f32 %v4413_v3  ;;  %v3934_v30 = vadd.f32 %v11101_v27, %v9555_v9  ;;  %v5419_v36 = vpop.eup %5418  ;;  %v9688_v53 = vmul.f32 %v9665_v56, %v11000_v45  ;;  %v3935_v11 = vadd.f32 %v11103_v13, %v9583_v29  ;;  %v9705_v29 = vld [vmem:[#allocation2 + $0x1bb] sm:$0xff]  ;;  %11109 = vst [vmem:[#allocation3_spill] sm:$0xff] %v9707_v39  ;;  %v11115_v17 = vld [vmem:[#allocation21_spill] sm:$0xff]  ;;  %v9746_v0 = vld [vmem:[%s10065_s3 + $0x18] ss:$0 sm:$0xff] }
 0x40e   : > { %5424 = vpow2.f32 %v4415_v44  ;;  %v5192_v6 = vunpack.i.h.bf16 %v9673_v21  ;;  %v9699_v9 = vmul.f32 %v9675_v48, %v11000_v45  ;;  %v1617_v57 = vmul.f32 %v5419_v36, %v11106_v52  ;;  %1698 = vst.msk [vmem:[#allocation2 + $0x182] sm:$0xff] %vm1665_vm1, %v1616_v47  ;;  %v11111_v62 = vld [vmem:[#allocation122_spill] sm:$0xff]  ;;  %v11118_v44 = vld [vmem:[#allocation37_spill] sm:$0xff]  ;;  %v11125_v36 = vld [vmem:[#allocation123_spill] sm:$0xff] }
 0x40f   : > { %5426 = vpow2.f32 %v4417_v33  ;;  %v1751_v23 = vpack.c.bf16 %v1616_v47, %v1616_v47  ;;  %11108 = vst [vmem:[#allocation132_spill] sm:$0xff] %v9705_v29  ;;  %v9711_v43 = vmul.f32 %v9678_v41, %v11003_v31  ;;  %v3839_v35 = vadd.f32 %v11111_v62, %v3791_v19  ;;  %v11119_v28 = vld [vmem:[#allocation13_spill] sm:$0xff]  ;;  %v11136_v41 = vld [vmem:[#allocation42_spill] sm:$0xff] }
 0x410   : > { %5428 = vpow2.f32 %v4419_v46  ;;  %v3840_v5 = vadd.f32 %v11112_v50, %v3792_v32  ;;  %11113 = vst [vmem:[#allocation86_spill] sm:$0xff] %v9715_v16  ;;  %v9719_v54 = vmul.f32 %v9684_v51, %v11003_v31  ;;  %v1752_v63 = vpack.c.bf16 %v1617_v57, %v1617_v57 }
 0x411   : > { %11110 = vst [vmem:[#allocation133_spill] sm:$0xff] %v9711_v43  ;;  %5430 = vpow2.f32 %v4421_v61  ;;  %v3982_v4 = vadd.f32 %v11115_v17, %v3934_v30  ;;  %v9725_v38 = vmul.f32 %v9693_v59, %v10461_v14  ;;  %v9729_v3 = vmul.f32 %v9695_v37, %v10461_v14 }
 0x412   : > { %11114 = vst [vmem:[#allocation134_spill] sm:$0xff] %v9719_v54  ;;  %v5421_v8 = vpop.eup %5420  ;;  %v3983_v46 = vadd.f32 %v11118_v44, %v3935_v11  ;;  %v1299_v33 = vmul.f32 %v5192_v6, %v11119_v28  ;;  %v9737_v1 = vmul.f32 %v9703_v15, %v10367_v7  ;;  %v9741_v19 = vmul.f32 %v9705_v29, %v10367_v7  ;;  %v11126_v11 = vld [vmem:[#allocation68_spill] sm:$0xff]  ;;  %v11135_v29 = vld [vmem:[#allocation43_spill] sm:$0xff]  ;;  %v11141_v54 = vld [vmem:[#allocation6_spill] sm:$0xff] }
 0x413   : > { %1699 = vst.msk [vmem:[#allocation2 + $0x18a] sm:$0xff] %vm1665_vm1, %v1617_v57  ;;  %v5423_v61 = vpop.eup %5422  ;;  %v9750_v47 = vmul.f32 %v9746_v0, %v9707_v39  ;;  %v4441_v25 = vadd.f32 1.0, %v5421_v8  ;;  %v9756_v27 = vmul.f32 %v9746_v0, %v9715_v16  ;;  %v9759_v13 = vadd.f32 %v11125_v36, %v3839_v35  ;;  %v11129_v36 = vld [vmem:[#allocation24_spill] sm:$0xff] }
 0x414   : > { %11116 = vst [vmem:[#allocation137_spill] sm:$0xff] %v9725_v38  ;;  %v5425_v32 = vpop.eup %5424  ;;  %v4442_v30 = vadd.f32 1.0, %v5423_v61  ;;  %v9762_v6 = vadd.f32 %v11126_v11, %v3840_v5  ;;  %v11128_v61 = vld [vmem:[#allocation124_spill] sm:$0xff]  ;;  %v11131_v11 = vld [vmem:[#allocation39_spill] sm:$0xff] }
 0x415   : > { %11117 = vst [vmem:[#allocation116_spill] sm:$0xff] %v9729_v3  ;;  %v5427_v52 = vpop.eup %5426  ;;  %v4443_v57 = vadd.f32 1.0, %v5425_v32  ;;  %5432 = vrcp.f32 %v4441_v25  ;;  %v9768_v8 = vld [vmem:[#allocation2 + $0x180] sm:$0xff]  ;;  %v9775_v5 = vadd.f32 %v11128_v61, %v3983_v46  ;;  %v9778_v32 = vadd.f32 %v1299_v33, %v11129_v36  ;;  %v11133_v61 = vld [vmem:[#allocation41_spill] sm:$0xff]  ;;  %v11134_v36 = vld [vmem:[#allocation58_spill] sm:$0xff] }
 0x416   : > { %1784 = vst.msk [vmem:[%s6299_s8 + $0x70] sm:$0xf] %vm1755_vm2, %v1751_v23  ;;  %v11127_v23 = vld [vmem:[#allocation162_spill] sm:$0xff]  ;;  %v4444_v17 = vadd.f32 1.0, %v5427_v52  ;;  %5434 = vrcp.f32 %v4442_v30  ;;  %v9770_v44 = vld [vmem:[#allocation2 + $0x181] sm:$0xff] }
 0x417   : > { %11120 = vst [vmem:[#allocation138_spill] sm:$0xff] %v9737_v1  ;;  %v9765_v62 = vadd.f32 %v11127_v23, %v3982_v4  ;;  %v9772_v35 = vld [vmem:[#allocation2 + $0x182] sm:$0xff]  ;;  %5436 = vrcp.f32 %v4443_v57  ;;  %v3442_v23 = vmul.f32 %v9768_v8, %v11131_v11  ;;  %v3681_v57 = vmul.f32 %v9768_v8, %v11134_v36 }
 0x418   : > { %11121 = vst [vmem:[#allocation157_spill] sm:$0xff] %v9741_v19  ;;  %v11132_v52 = vld [vmem:[#allocation40_spill] sm:$0xff]  ;;  %5438 = vrcp.f32 %v4444_v17  ;;  %v3538_v33 = vmul.f32 %v9772_v35, %v11133_v61  ;;  %v11140_v1 = vld [vmem:[#allocation59_spill] sm:$0xff] }
 0x419   : > { %11122 = vst [vmem:[#allocation197_spill] sm:$0xff] %v9746_v0  ;;  %v3490_v30 = vmul.f32 %v9770_v44, %v11132_v52  ;;  %v3458_v15 = vadd.f32 %v3442_v23, %v11135_v29  ;;  %v3729_v3 = vmul.f32 %v9770_v44, %v11140_v1 }
 0x41a   : > { %11123 = vst [vmem:[#allocation198_spill] sm:$0xff] %v9750_v47  ;;  %v9784_v16 = vld [vmem:[#allocation2 + $0x188] sm:$0xff] }
 0x41b   : > { %1785 = vst.msk [vmem:[%s6299_s8 + $0x74] sm:$0xf] %vm1755_vm2, %v1752_v63  ;;  %v5429_v63 = vpop.eup %5428  ;;  %v9786_v39 = vld [vmem:[#allocation2 + $0x189] sm:$0xff]  ;;  %v3506_v56 = vadd.f32 %v3490_v30, %v3458_v15  ;;  %v3682_v19 = vmul.f32 %v9784_v16, %v11134_v36 }
 0x41c   : > { %11124 = vst [vmem:[#allocation183_spill] sm:$0xff] %v9756_v27  ;;  %v5431_v25 = vpop.eup %5430  ;;  %v4445_v4 = vadd.f32 1.0, %v5429_v63  ;;  %v9788_v46 = vld [vmem:[#allocation2 + $0x18a] sm:$0xff]  ;;  %v3443_v63 = vmul.f32 %v9784_v16, %v11131_v11  ;;  %v3491_v17 = vmul.f32 %v9786_v39, %v11132_v52  ;;  %v11138_v27 = vld [vmem:[#allocation46_spill] sm:$0xff] }
 0x41d   : > { %11130 = vst [vmem:[#allocation139_spill] sm:$0xff] %v9778_v32  ;;  %v4446_v50 = vadd.f32 1.0, %v5431_v25  ;;  %v9799_v25 = vld [vmem:[#allocation2 + $0x183] sm:$0xff]  ;;  %v9801_v37 = vld [vmem:[#allocation2 + $0x18b] sm:$0xff]  ;;  %v3539_v51 = vmul.f32 %v9788_v46, %v11133_v61  ;;  %v5433_v23 = vpop.eup %5432  ;;  %v11139_v32 = vld [vmem:[#allocation18_spill] sm:$0xff]  ;;  %v3698_v36 = vadd.f32 %v3682_v19, %v11141_v54 }
 0x41e   : > { %5440 = vrcp.f32 %v4445_v4  ;;  %v9803_v59 = vld [vmem:[#allocation2 + $0x184] sm:$0xff]  ;;  %v3586_v4 = vmul.f32 %v9799_v25, %v11136_v41  ;;  %v3587_v11 = vmul.f32 %v9801_v37, %v11136_v41  ;;  %v9811_v29 = vld [vmem:[#allocation2 + $0x18c] sm:$0xff]  ;;  %v5435_v47 = vpop.eup %5434  ;;  %v4473_v61 = vmul.f32 %v5433_v23, %v9639_v40 }
 0x41f   : > { %5442 = vrcp.f32 %v4446_v50  ;;  %v11137_v52 = vld [vmem:[#allocation80_spill] sm:$0xff]  ;;  %v3634_v26 = vmul.f32 %v9803_v59, %v11138_v27  ;;  %v3635_v50 = vmul.f32 %v9811_v29, %v11138_v27  ;;  %v3697_v41 = vadd.f32 %v3681_v57, %v11139_v32  ;;  %v5437_v38 = vpop.eup %5436 }
 0x420   : > { %v3459_v48 = vadd.f32 %v3443_v63, %v11137_v52  ;;  %v4474_v15 = vmul.f32 %v5435_v47, %v9644_v18  ;;  %v3554_v63 = vadd.f32 %v3538_v33, %v3506_v56  ;;  %v3730_v27 = vmul.f32 %v9786_v39, %v11140_v1  ;;  %v5439_v52 = vpop.eup %5438 }
 0x421   : > { %v4475_v40 = vmul.f32 %v5437_v38, %v9647_v60  ;;  %v4489_v23 = vpack.c.bf16 %v4473_v61, %v4473_v61  ;;  %v3745_v32 = vadd.f32 %v3729_v3, %v3697_v41  ;;  %v4476_v0 = vmul.f32 %v5439_v52, %v9656_v10  ;;  %v11142_v38 = vld [vmem:[#allocation60_spill] sm:$0xff] }
 0x422   : > { %v3507_v30 = vadd.f32 %v3491_v17, %v3459_v48  ;;  %v4490_v43 = vpack.c.bf16 %v4474_v15, %v4474_v15  ;;  %v3602_v48 = vadd.f32 %v3586_v4, %v3554_v63  ;;  %v3746_v60 = vadd.f32 %v3730_v27, %v3698_v36  ;;  %v11146_v52 = vld [vmem:[#allocation48_spill] sm:$0xff] }
 0x423   : > { %v4491_v1 = vpack.c.bf16 %v4475_v40, %v4475_v40  ;;  %4635 = vst.msk [vmem:[%s6299_s8 + $0xc8] sm:$0xf] %vm1755_vm2, %v4489_v23  ;;  %v3777_v33 = vmul.f32 %v9772_v35, %v11142_v38  ;;  %v4492_v3 = vpack.c.bf16 %v4476_v0, %v4476_v0  ;;  %v3825_v4 = vmul.f32 %v9799_v25, %v10668_v42  ;;  %v11143_v0 = vld [vmem:[#allocation108_spill] sm:$0xff]  ;;  %v11147_v23 = vld [vmem:[#allocation106_spill] sm:$0xff] }
 0x424   : > { %v5441_v57 = vpop.eup %5440  ;;  %v3555_v18 = vadd.f32 %v3539_v51, %v3507_v30  ;;  %4636 = vst.msk [vmem:[%s6299_s8 + $0xcc] sm:$0xf] %vm1755_vm2, %v4490_v43  ;;  %v3650_v51 = vadd.f32 %v3634_v26, %v3602_v48  ;;  %v11144_v26 = vunpack.i.l.bf16 %v9673_v21  ;;  %v3826_v15 = vmul.f32 %v9801_v37, %v10668_v42  ;;  %v11145_v21 = vld [vmem:[#allocation44_spill] sm:$0xff] }
 0x425   : > { %v5443_v47 = vpop.eup %5442  ;;  %v4477_v56 = vmul.f32 %v5441_v57, %v9650_v22  ;;  %4637 = vst.msk [vmem:[%s6299_s8 + $0xd0] sm:$0xf] %vm1755_vm2, %v4491_v1  ;;  %v3778_v22 = vmul.f32 %v9788_v46, %v11142_v38  ;;  %v3793_v17 = vadd.f32 %v3777_v33, %v3745_v32  ;;  %v3873_v63 = vmul.f32 %v9803_v59, %v6649_v24  ;;  %v11150_v33 = vld [vmem:[#allocation25_spill] sm:$0xff] }
 0x426   : > { %v4478_v54 = vmul.f32 %v5443_v47, %v9653_v55  ;;  %v3603_v10 = vadd.f32 %v3587_v11, %v3555_v18  ;;  %4638 = vst.msk [vmem:[%s6299_s8 + $0xd4] sm:$0xf] %vm1755_vm2, %v4492_v3  ;;  %v3699_v41 = vadd.f32 %v11143_v0, %v3650_v51  ;;  %v1298_v43 = vmul.f32 %v11144_v26, %v11119_v28  ;;  %v11151_v51 = vld [vmem:[#allocation160_spill] sm:$0xff] }
 0x427   : > { %v4493_v19 = vpack.c.bf16 %v4477_v56, %v4477_v56  ;;  %v3794_v11 = vadd.f32 %v3778_v22, %v3746_v60  ;;  %v3841_v30 = vadd.f32 %v3825_v4, %v3793_v17  ;;  %v3921_v27 = vmul.f32 %v9784_v16, %v10987_v20  ;;  %v11148_v56 = vld [vmem:[#allocation161_spill] sm:$0xff]  ;;  %v11149_v60 = vld [vmem:[#allocation135_spill] sm:$0xff]  ;;  %v11152_v22 = vld [vmem:[#allocation146_spill] sm:$0xff] }
 0x428   : > { %v4494_v61 = vpack.c.bf16 %v4478_v54, %v4478_v54  ;;  %v3651_v55 = vadd.f32 %v3635_v50, %v3603_v10  ;;  %v3920_v50 = vmul.f32 %v9768_v8, %v10987_v20  ;;  %v4078_v28 = vadd.f32 %v11145_v21, %v9765_v62  ;;  %v11153_v4 = vld [vmem:[#allocation136_spill] sm:$0xff] }
 0x429   : > { %4639 = vst.msk [vmem:[%s6299_s8 + $0xd8] sm:$0xf] %vm1755_vm2, %v4493_v19  ;;  %v4079_v40 = vadd.f32 %v11146_v52, %v9775_v5  ;;  %v3842_v36 = vadd.f32 %v3826_v15, %v3794_v11  ;;  %v3874_v32 = vmul.f32 %v9811_v29, %v6649_v24  ;;  %v3889_v57 = vadd.f32 %v3873_v63, %v3841_v30  ;;  %v11155_v15 = vld [vmem:[#allocation164_spill] sm:$0xff]  ;;  %v11156_v63 = vld [vmem:[#allocation15_spill] sm:$0xff] }
 0x42a   : > { %4640 = vst.msk [vmem:[%s6299_s8 + $0xdc] sm:$0xf] %vm1755_vm2, %v4494_v61  ;;  %v3700_v42 = vadd.f32 %v11147_v23, %v3651_v55  ;;  %v3936_v18 = vadd.f32 %v3920_v50, %v9759_v13  ;;  %v3937_v48 = vadd.f32 %v3921_v27, %v9762_v6  ;;  %v3968_v47 = vmul.f32 %v9770_v44, %v10989_v12  ;;  %v11154_v55 = vld [vmem:[#allocation5_spill] sm:$0xff] }
 0x42b   : > { %v3969_v62 = vmul.f32 %v9786_v39, %v10989_v12  ;;  %v3747_v1 = vadd.f32 %v11148_v56, %v3699_v41  ;;  %v3890_v5 = vadd.f32 %v3874_v32, %v3842_v36  ;;  %v3938_v38 = vadd.f32 %v11149_v60, %v3889_v57  ;;  %v11157_v27 = vld [vmem:[#allocation29_spill] sm:$0xff]  ;;  %v11158_v32 = vld [vmem:[#allocation30_spill] sm:$0xff]  ;;  %v11161_v60 = vld [vmem:[#allocation128_spill] sm:$0xff] }
 0x42c   : > { %v1338_v54 = vadd.f32 %v1298_v43, %v11150_v33  ;;  %v3984_v3 = vadd.f32 %v3968_v47, %v3936_v18  ;;  %v4016_v13 = vmul.f32 %v9772_v35, %v6656_v2  ;;  %v4017_v6 = vmul.f32 %v9788_v46, %v6656_v2  ;;  %v11159_v18 = vld [vmem:[#allocation12_spill] sm:$0xff]  ;;  %v11160_v56 = vld [vmem:[#allocation170_spill] sm:$0xff] }
 0x42d   : > { %v3985_v10 = vadd.f32 %v3969_v62, %v3937_v48  ;;  %v3748_v19 = vadd.f32 %v11151_v51, %v3700_v42  ;;  %v3939_v17 = vadd.f32 %v11152_v22, %v3890_v5  ;;  %v3986_v61 = vadd.f32 %v11153_v4, %v3938_v38  ;;  %v11162_v33 = vld [vmem:[#allocation14_spill] sm:$0xff] }
 0x42e   : > { %v4126_v0 = vadd.f32 %v11154_v55, %v4078_v28  ;;  %v4032_v41 = vadd.f32 %v4016_v13, %v3984_v3  ;;  %v4064_v43 = vmul.f32 %v9799_v25, %v10453_v49  ;;  %v4065_v11 = vmul.f32 %v9801_v37, %v10453_v49 }
 0x42f   : > { %v4033_v26 = vadd.f32 %v4017_v6, %v3985_v10  ;;  %v9891_v30 = vadd.f32 %v11155_v15, %v3747_v1  ;;  %v3987_v50 = vadd.f32 %v11156_v63, %v3939_v17  ;;  %v4034_v21 = vadd.f32 %v11157_v27, %v3986_v61  ;;  %v11163_v6 = vld [vmem:[#allocation153_spill] sm:$0xff]  ;;  %v11165_v17 = vld [vmem:[#allocation144_spill] sm:$0xff] }
 0x430   : > { %v4127_v52 = vadd.f32 %v9671_v34, %v4079_v40  ;;  %v4080_v23 = vadd.f32 %v4064_v43, %v4032_v41  ;;  %v4112_v28 = vmul.f32 %v9803_v59, %v10454_v58  ;;  %v4113_v36 = vmul.f32 %v9811_v29, %v10454_v58  ;;  %v11166_v41 = vld [vmem:[#allocation154_spill] sm:$0xff]  ;;  %v11167_v43 = vld [vmem:[#allocation147_spill] sm:$0xff]  ;;  %v11168_v63 = vld [vmem:[#allocation133_spill] sm:$0xff] }
 0x431   : > { %v4081_v42 = vadd.f32 %v4065_v11, %v4033_v26  ;;  %v4035_v57 = vadd.f32 %v11158_v32, %v3987_v50  ;;  %v4082_v48 = vadd.f32 %v11159_v18, %v4034_v21  ;;  %v4159_v47 = vmul.f32 %v9768_v8, %v11000_v45  ;;  %v11164_v8 = vld [vmem:[#allocation145_spill] sm:$0xff]  ;;  %v11169_v21 = vld [vmem:[#allocation155_spill] sm:$0xff] }
 0x432   : > { %v4160_v62 = vmul.f32 %v9784_v16, %v11000_v45  ;;  %v9907_v34 = vadd.f32 %v11160_v56, %v3748_v19  ;;  %v4128_v40 = vadd.f32 %v4112_v28, %v4080_v23  ;;  %v4207_v5 = vmul.f32 %v9770_v44, %v11003_v31 }
 0x433   : > { %v4129_v1 = vadd.f32 %v4113_v36, %v4081_v42  ;;  %v4083_v38 = vadd.f32 %v11161_v60, %v4035_v57  ;;  %v4130_v3 = vadd.f32 %v11162_v33, %v4082_v48  ;;  %v4175_v10 = vadd.f32 %v4159_v47, %v4126_v0  ;;  %v11171_v42 = vld [vmem:[#allocation197_spill] sm:$0xff]  ;;  %v11172_v36 = vld [vmem:[#allocation134_spill] sm:$0xff]  ;;  %v11174_v47 = vld [vmem:[#allocation148_spill] sm:$0xff] }
 0x434   : > { %v4176_v13 = vadd.f32 %v4160_v62, %v4127_v52  ;;  %v4177_v51 = vadd.f32 %v11163_v6, %v4128_v40  ;;  %v4208_v16 = vmul.f32 %v9786_v39, %v11003_v31  ;;  %v4255_v19 = vmul.f32 %v9772_v35, %v10461_v14  ;;  %v11173_v57 = vld [vmem:[#allocation137_spill] sm:$0xff]  ;;  %v5526_v40 = vld [vmem:[%s10064_s2] ss:$0 sm:$0xff]  ;;  %v11177_v60 = vld [vmem:[#allocation138_spill] sm:$0xff] }
 0x435   : > { %v4178_v22 = vadd.f32 %v11164_v8, %v4129_v1  ;;  %v4131_v4 = vadd.f32 %v11165_v17, %v4083_v38  ;;  %v4179_v44 = vadd.f32 %v9688_v53, %v4130_v3  ;;  %v4223_v61 = vadd.f32 %v4207_v5, %v4175_v10  ;;  %v11178_v3 = vld [vmem:[#allocation139_spill] sm:$0xff]  ;;  %v11182_v17 = vld [vmem:[#allocation198_spill] sm:$0xff] }
 0x436   : > { %v4256_v55 = vmul.f32 %v9788_v46, %v10461_v14  ;;  %v4224_v0 = vadd.f32 %v4208_v16, %v4176_v13  ;;  %v4225_v26 = vadd.f32 %v11166_v41, %v4177_v51  ;;  %v4303_v15 = vmul.f32 %v9799_v25, %v10367_v7  ;;  %v11170_v46 = vld [vmem:[#allocation35_spill] sm:$0xff]  ;;  %v11179_v13 = vld [vmem:[#allocation189_spill] sm:$0xff]  ;;  %v11180_v51 = vld [vmem:[#allocation190_spill] sm:$0xff] }
 0x437   : > { %v4226_v11 = vadd.f32 %v11167_v43, %v4178_v22  ;;  %v4180_v39 = vadd.f32 %v9699_v9, %v4131_v4  ;;  %v4227_v35 = vadd.f32 %v11168_v63, %v4179_v44  ;;  %v4271_v50 = vadd.f32 %v4255_v19, %v4223_v61  ;;  %v11181_v16 = vld [vmem:[#allocation157_spill] sm:$0xff]  ;;  %v11184_v43 = vld [vmem:[#allocation183_spill] sm:$0xff] }
 0x438   : > { %v4304_v53 = vmul.f32 %v9801_v37, %v10367_v7  ;;  %v4272_v27 = vadd.f32 %v4256_v55, %v4224_v0  ;;  %v4273_v52 = vadd.f32 %v11169_v21, %v4225_v26  ;;  %v4351_v28 = vmul.f32 %v11171_v42, %v9803_v59  ;;  %v11175_v37 = vld [vmem:[#allocation188_spill] sm:$0xff]  ;;  %v11183_v4 = vld [vmem:[#allocation69_spill] sm:$0xff] }
 0x439   : > { %v4274_v23 = vadd.f32 %v11170_v46, %v4226_v11  ;;  %v4228_v32 = vadd.f32 %v11172_v36, %v4180_v39  ;;  %v4275_v25 = vadd.f32 %v11173_v57, %v4227_v35  ;;  %v4319_v18 = vadd.f32 %v4303_v15, %v4271_v50  ;;  %v11176_v59 = vld [vmem:[#allocation116_spill] sm:$0xff]  ;;  %v11185_v46 = vld [vmem:[#allocation171_spill] sm:$0xff]  ;;  %v11186_v57 = vld [vmem:[#allocation173_spill] sm:$0xff] }
 0x43a   : > { %v4352_v9 = vmul.f32 %v11171_v42, %v9811_v29  ;;  %v4320_v48 = vadd.f32 %v4304_v53, %v4272_v27  ;;  %v4321_v62 = vadd.f32 %v11174_v47, %v4273_v52  ;;  %v9944_v1 = vadd.f32 %v5526_v40, %v1338_v54 }
 0x43b   : > { %v4322_v56 = vadd.f32 %v11175_v37, %v4274_v23  ;;  %v4276_v5 = vadd.f32 %v11176_v59, %v4228_v32  ;;  %v4323_v38 = vadd.f32 %v11177_v60, %v4275_v25  ;;  %v4367_v33 = vadd.f32 %v4351_v28, %v4319_v18  ;;  %v11188_v60 = vld [vmem:[#allocation130_spill] sm:$0xff] }
 0x43c   : > { %v9949_v10 = vadd.f32 %v5526_v40, %v11178_v3  ;;  %v4368_v29 = vadd.f32 %v4352_v9, %v4320_v48  ;;  %v4369_v6 = vadd.f32 %v11179_v13, %v4321_v62  ;;  %v1422_v22 = vsub.f32 0.0, %v9944_v1  ;;  %v5527_v48 = vld [vmem:[#allocation2 + $0x19c] sm:$0xff]  ;;  %v5528_v62 = vld [vmem:[#allocation2 + $0x1a4] sm:$0xff]  ;;  %v11187_v40 = vld [vmem:[#allocation129_spill] sm:$0xff] }
 0x43d   : > { %v4370_v8 = vadd.f32 %v11180_v51, %v4322_v56  ;;  %v4324_v19 = vadd.f32 %v11181_v16, %v4276_v5  ;;  %v4371_v54 = vadd.f32 %v11182_v17, %v4323_v38  ;;  %v9957_v44 = vadd.f32 %v11183_v4, %v4367_v33 }
 0x43e   : > { %v1423_v61 = vsub.f32 0.0, %v9949_v10  ;;  %v9961_v55 = vadd.f32 %v11183_v4, %v4368_v29  ;;  %v9964_v0 = vadd.f32 %v11183_v4, %v4369_v6  ;;  %v1500_v26 = vmul.f32 1.442695, %v1422_v22  ;;  %v11189_v6 = vld [vmem:[#allocation131_spill] sm:$0xff] }
 0x43f   : > { %v9967_v41 = vadd.f32 %v11183_v4, %v4370_v8  ;;  %v4372_v11 = vadd.f32 %v11184_v43, %v4324_v19  ;;  %v9971_v15 = vadd.f32 %v11183_v4, %v4371_v54  ;;  %v4399_v39 = vsub.f32 0.0, %v9957_v44  ;;  %v11190_v19 = vld [vmem:[#allocation203_spill] sm:$0xff] }
 0x440   : > { %v1502_v63 = vmul.f32 1.442695, %v1423_v61  ;;  %v4400_v35 = vsub.f32 0.0, %v9961_v55  ;;  %v4401_v50 = vsub.f32 0.0, %v9964_v0  ;;  %5444 = vpow2.f32 %v1500_v26 }
 0x441   : > { %v4402_v53 = vsub.f32 0.0, %v9967_v41  ;;  %v9978_v27 = vadd.f32 %v11183_v4, %v4372_v11  ;;  %v4403_v21 = vsub.f32 0.0, %v9971_v15  ;;  %v4423_v52 = vmul.f32 1.442695, %v4399_v39  ;;  %v11191_v39 = vld [vmem:[#allocation193_spill] sm:$0xff] }
 0x442   : > { %5446 = vpow2.f32 %v1502_v63  ;;  %v3843_v23 = vadd.f32 %v11185_v46, %v9891_v30  ;;  %v4425_v28 = vmul.f32 1.442695, %v4400_v35  ;;  %v4427_v36 = vmul.f32 1.442695, %v4401_v50 }
 0x443   : > { %v4429_v32 = vmul.f32 1.442695, %v4402_v53  ;;  %v3844_v25 = vadd.f32 %v11186_v57, %v9907_v34  ;;  %v4404_v18 = vsub.f32 0.0, %v9978_v27  ;;  %5448 = vpow2.f32 %v4423_v52  ;;  %v11193_v57 = vld [vmem:[#allocation167_spill] sm:$0xff] }
 0x444   : > { %v4431_v9 = vmul.f32 1.442695, %v4403_v21  ;;  %v3875_v47 = vmul.f32 %v5527_v48, %v6649_v24  ;;  %5450 = vpow2.f32 %v4425_v28  ;;  %v3876_v37 = vmul.f32 %v5528_v62, %v6649_v24  ;;  %v11192_v21 = vld [vmem:[#allocation10_spill] sm:$0xff] }
 0x445   : > { %5452 = vpow2.f32 %v4427_v36  ;;  %v4433_v56 = vmul.f32 1.442695, %v4404_v18  ;;  %v3924_v59 = vmul.f32 %v11187_v40, %v10987_v20  ;;  %v3925_v38 = vmul.f32 %v11188_v60, %v10987_v20  ;;  %v11197_v60 = vld [vmem:[#allocation86_spill] sm:$0xff] }
 0x446   : > { %v5445_v30 = vpop.eup %5444  ;;  %v3891_v5 = vadd.f32 %v3875_v47, %v3843_v23  ;;  %5454 = vpow2.f32 %v4429_v32  ;;  %v3892_v33 = vadd.f32 %v3876_v37, %v3844_v25  ;;  %v3972_v51 = vmul.f32 %v11189_v6, %v10989_v12 }
 0x447   : > { %5456 = vpow2.f32 %v4431_v9  ;;  %v1542_v3 = vadd.f32 1.0, %v5445_v30  ;;  %v3973_v17 = vmul.f32 %v11190_v19, %v10989_v12  ;;  %v4020_v63 = vmul.f32 %v11191_v39, %v6656_v2 }
 0x448   : > { %v5447_v34 = vpop.eup %5446  ;;  %5458 = vpow2.f32 %v4433_v56  ;;  %v3940_v8 = vadd.f32 %v3924_v59, %v3891_v5  ;;  %v3941_v54 = vadd.f32 %v3925_v38, %v3892_v33  ;;  %v4021_v52 = vmul.f32 %v11192_v21, %v6656_v2  ;;  %v11194_v2 = vld [vmem:[#allocation132_spill] sm:$0xff] }
 0x449   : > { %v1543_v29 = vadd.f32 1.0, %v5447_v34  ;;  %v5449_v13 = vpop.eup %5448  ;;  %5460 = vrcp.f32 %v1542_v3  ;;  %v4068_v25 = vmul.f32 %v11193_v57, %v10453_v49  ;;  %v4069_v48 = vmul.f32 %v11194_v2, %v10453_v49 }
 0x44a   : > { %v5451_v24 = vpop.eup %5450  ;;  %v4447_v22 = vadd.f32 1.0, %v5449_v13  ;;  %v3988_v50 = vadd.f32 %v3972_v51, %v3940_v8  ;;  %v3989_v46 = vadd.f32 %v3973_v17, %v3941_v54  ;;  %v4117_v38 = vmul.f32 %v11197_v60, %v10454_v58 }
 0x44b   : > { %5462 = vrcp.f32 %v1543_v29  ;;  %v5453_v16 = vpop.eup %5452  ;;  %v4448_v20 = vadd.f32 1.0, %v5451_v24 }
 0x44c   : > { %v5455_v4 = vpop.eup %5454  ;;  %v4449_v61 = vadd.f32 1.0, %v5453_v16  ;;  %5464 = vrcp.f32 %v4447_v22  ;;  %v4036_v18 = vadd.f32 %v4020_v63, %v3988_v50  ;;  %v4037_v62 = vadd.f32 %v4021_v52, %v3989_v46 }
 0x44d   : > { %v5457_v26 = vpop.eup %5456  ;;  %v4450_v43 = vadd.f32 1.0, %v5455_v4  ;;  %5466 = vrcp.f32 %v4448_v20 }
 0x44e   : > { %v5459_v11 = vpop.eup %5458  ;;  %v4451_v35 = vadd.f32 1.0, %v5457_v26  ;;  %5468 = vrcp.f32 %v4449_v61  ;;  %v4084_v34 = vadd.f32 %v4068_v25, %v4036_v18  ;;  %v4085_v29 = vadd.f32 %v4069_v48, %v4037_v62 }
 0x44f   : > { %v5461_v53 = vpop.eup %5460  ;;  %v4452_v12 = vadd.f32 1.0, %v5459_v11  ;;  %5470 = vrcp.f32 %v4450_v43 }
 0x450   : > { %5472 = vrcp.f32 %v4451_v35  ;;  %v1622_v28 = vmul.f32 %v5461_v53, %v9944_v1 }
 0x451   : > { %v5463_v23 = vpop.eup %5462  ;;  %5474 = vrcp.f32 %v4452_v12 }
 0x452   : > { %v1623_v36 = vmul.f32 %v5463_v23, %v9949_v10  ;;  %v5465_v32 = vpop.eup %5464  ;;  %1704 = vst.msk [vmem:[#allocation2 + $0x1ca] sm:$0xff] %vm1665_vm1, %v1622_v28  ;;  %v11195_v10 = vmov 0.0  }
 0x453   : > { %v5467_v9 = vpop.eup %5466  ;;  %v4479_v47 = vmul.f32 %v5465_v32, %v9957_v44  ;;  %1720 = vst.msk [vmem:[#allocation2 + $0x1c8] sm:$0xff] %vm1665_vm1, %v11195_v10  ;;  %v11196_v44 = vld [vmem:[#allocation3_spill] sm:$0xff] }
 0x454   : > { %1705 = vst.msk [vmem:[#allocation2 + $0x1d2] sm:$0xff] %vm1665_vm1, %v1623_v36  ;;  %v5469_v1 = vpop.eup %5468  ;;  %v4480_v37 = vmul.f32 %v5467_v9, %v9961_v55  ;;  %v4116_v59 = vmul.f32 %v11196_v44, %v10454_v58  ;;  %v4133_v58 = vadd.f32 %v4117_v38, %v4085_v29 }
 0x455   : > { %v5471_v56 = vpop.eup %5470  ;;  %v4481_v30 = vmul.f32 %v5469_v1, %v9964_v0  ;;  %v4495_v40 = vpack.c.bf16 %v4479_v47, %v4479_v47  ;;  %1721 = vst.msk [vmem:[#allocation2 + $0x1d0] sm:$0xff] %vm1665_vm1, %v11195_v10 }
 0x456   : > { %v5473_v49 = vpop.eup %5472  ;;  %v4482_v5 = vmul.f32 %v5471_v56, %v9967_v41  ;;  %v4496_v55 = vpack.c.bf16 %v4480_v37, %v4480_v37  ;;  %1722 = vst.msk [vmem:[#allocation2 + $0x1d8] sm:$0xff] %vm1665_vm1, %v11195_v10  ;;  %v4132_v51 = vadd.f32 %v4116_v59, %v4084_v34 }
 0x457   : > { %v5475_v0 = vpop.eup %5474  ;;  %v4483_v33 = vmul.f32 %v5473_v49, %v9971_v15  ;;  %v4497_v3 = vpack.c.bf16 %v4481_v30, %v4481_v30  ;;  %4641 = vst.msk [vmem:[%s6299_s8 + $0xe0] sm:$0xf] %vm1755_vm2, %v4495_v40 }
 0x458   : > { %v4484_v41 = vmul.f32 %v5475_v0, %v9978_v27  ;;  %v4498_v13 = vpack.c.bf16 %v4482_v5, %v4482_v5  ;;  %4642 = vst.msk [vmem:[%s6299_s8 + $0xe4] sm:$0xf] %vm1755_vm2, %v4496_v55 }
 0x459   : > { %v4499_v24 = vpack.c.bf16 %v4483_v33, %v4483_v33  ;;  %4643 = vst.msk [vmem:[%s6299_s8 + $0xe8] sm:$0xf] %vm1755_vm2, %v4497_v3 }
 0x45a   : > { %v4500_v6 = vpack.c.bf16 %v4484_v41, %v4484_v41  ;;  %4644 = vst.msk [vmem:[%s6299_s8 + $0xec] sm:$0xf] %vm1755_vm2, %v4498_v13  ;;  %v4149_v15 = vld [vmem:[#allocation2 + $0x1c8] sm:$0xff] }
 0x45b   : > { %4645 = vst.msk [vmem:[%s6299_s8 + $0xf0] sm:$0xf] %vm1755_vm2, %v4499_v24  ;;  %v4165_v22 = vmul.f32 %v4149_v15, %v11000_v45 }
 0x45c   : > { %4646 = vst.msk [vmem:[%s6299_s8 + $0xf4] sm:$0xf] %vm1755_vm2, %v4500_v6  ;;  %v4150_v8 = vld [vmem:[#allocation2 + $0x1d0] sm:$0xff] }
 0x45d   : > { %v4197_v27 = vld [vmem:[#allocation2 + $0x1c9] sm:$0xff]  ;;  %v4166_v19 = vmul.f32 %v4150_v8, %v11000_v45  ;;  %v4198_v17 = vld [vmem:[#allocation2 + $0x1d1] sm:$0xff]  ;;  %v4181_v61 = vadd.f32 %v4165_v22, %v4132_v51 }
 0x45e   : > { %v4245_v16 = vld [vmem:[#allocation2 + $0x1ca] sm:$0xff]  ;;  %v4213_v54 = vmul.f32 %v4197_v27, %v11003_v31  ;;  %v4246_v20 = vld [vmem:[#allocation2 + $0x1d2] sm:$0xff]  ;;  %v4214_v26 = vmul.f32 %v4198_v17, %v11003_v31 }
 0x45f   : > { %v4293_v4 = vld [vmem:[#allocation2 + $0x1cb] sm:$0xff]  ;;  %v4261_v43 = vmul.f32 %v4245_v16, %v10461_v14  ;;  %v4294_v11 = vld [vmem:[#allocation2 + $0x1d3] sm:$0xff]  ;;  %v4182_v39 = vadd.f32 %v4166_v19, %v4133_v58  ;;  %v4262_v63 = vmul.f32 %v4246_v20, %v10461_v14  ;;  %v5529_v14 = vld [vmem:[%s10066_s4] ss:$0 sm:$0xff] }
 0x460   : > { %v4341_v35 = vld [vmem:[#allocation2 + $0x1cc] sm:$0xff]  ;;  %v4229_v50 = vadd.f32 %v4213_v54, %v4181_v61  ;;  %v4309_v53 = vmul.f32 %v4293_v4, %v10367_v7  ;;  %v4342_v21 = vld [vmem:[#allocation2 + $0x1d4] sm:$0xff]  ;;  %v4310_v52 = vmul.f32 %v4294_v11, %v10367_v7 }
 0x461   : > { %v4230_v45 = vadd.f32 %v4214_v26, %v4182_v39  ;;  %v4357_v46 = vmul.f32 %v11171_v42, %v4341_v35  ;;  %v4358_v31 = vmul.f32 %v11171_v42, %v4342_v21 }
 0x462   : > { %v4277_v12 = vadd.f32 %v4261_v43, %v4229_v50 }
 0x463   : > { %v4278_v23 = vadd.f32 %v4262_v63, %v4230_v45 }
 0x464   : > { %v4325_v28 = vadd.f32 %v4309_v53, %v4277_v12 }
 0x465   : > { %v4326_v36 = vadd.f32 %v4310_v52, %v4278_v23 }
 0x466   : > { %v4373_v32 = vadd.f32 %v4357_v46, %v4325_v28 }
 0x467   : > { %v4374_v57 = vadd.f32 %v4358_v31, %v4326_v36 }
 0x468   : > { %v4389_v25 = vadd.f32 %v5529_v14, %v4373_v32 }
 0x469   : > { %v4390_v18 = vadd.f32 %v5529_v14, %v4374_v57 }
 0x46a   : > { %v4405_v9 = vsub.f32 0.0, %v4389_v25 }
 0x46b   : > { %v4406_v2 = vsub.f32 0.0, %v4390_v18 }
 0x46c   : > { %v4435_v48 = vmul.f32 1.442695, %v4405_v9 }
 0x46d   : > { %v4437_v7 = vmul.f32 1.442695, %v4406_v2 }
 0x46e   : > { %5476 = vpow2.f32 %v4435_v48 }
 0x46f   : > { %5478 = vpow2.f32 %v4437_v7 }
 0x474   : > { %v5477_v47 = vpop.eup %5476 }
 0x475   : > { %v5479_v42 = vpop.eup %5478  ;;  %v4453_v62 = vadd.f32 1.0, %v5477_v47 }
 0x476   : > { %v4454_v1 = vadd.f32 1.0, %v5479_v42 }
 0x477   : > { %5480 = vrcp.f32 %v4453_v62 }
 0x478   : > { %5482 = vrcp.f32 %v4454_v1 }
 0x47d   : > { %v5481_v37 = vpop.eup %5480 }
 0x47e   : > { %v5483_v10 = vpop.eup %5482  ;;  %v4485_v56 = vmul.f32 %v5481_v37, %v4389_v25 }
 0x47f   : > { %v4486_v30 = vmul.f32 %v5483_v10, %v4390_v18 }
 0x480   : > { %v4501_v40 = vpack.c.bf16 %v4485_v56, %v4485_v56 }
 0x481   : > { %v4502_v49 = vpack.c.bf16 %v4486_v30, %v4486_v30 }
 0x482   : > { %4647 = vst.msk [vmem:[%s6299_s8 + $0xf8] sm:$0xf] %vm1755_vm2, %v4501_v40 }
 0x483   : > { %4648 = vst.msk [vmem:[%s6299_s8 + $0xfc] sm:$0xf] %vm1755_vm2, %v4502_v49 }
 0x484 PF: > { %s15_s20 = sadd.s32 1, %s5552_s20   ;;  %s11198_s18 = smov %s5548_s19 }
 0x485   : > { %p12_p5 = scmp.ge.s32.totalorder %s15_s20, 4   ;;  %s11199_s19 = smov %s11201_s21 }
 0x487   :  { %14 = sbr.rel (!%p12_p5) target bundleno = 2 (0x2), region = 87 }

</bundles_post_ra>
